<compile_context>
chip_gen: v5e
topology: v5e:2x2
jax: 0.10.0
libtpu: 0.0.40
codegen_flags: <defaults>
</compile_context>

<pallas_src>
import jax
import jax.numpy as jnp
from jax.experimental import pallas as pl
from jax.experimental.pallas import tpu as pltpu

BN_EPS = 1e-5
_VMEM_LIMIT = 48 * 1024 * 1024   # fits v5e/v6e (128 MiB) and v7x (64 MiB) physical VMEM


# ----------------------------------------------------------------------------
# Pallas kernels
# ----------------------------------------------------------------------------
def idwt_haar_kernel(ll_ref, lh_ref, hl_ref, hh_ref, o_ref):
    """Inverse orthonormal Haar DWT with the 2x2 interleave fused into the store.

    in blocks : (1, H, W, C) float32
    out block : (H, 2, W, 2*C) bfloat16 -- row-major identical to the (2H, 2W, C)
                up-sampled image of this batch element (wrapper reshape is free).
    """
    ll = ll_ref[0]
    lh = lh_ref[0]
    hl = hl_ref[0]
    hh = hh_ref[0]
    # CSE'd sub-band combinations (12 VALU ops instead of 16).
    s1 = ll + hh
    s2 = ll - hh
    t1 = lh + hl
    t2 = lh - hl
    a = 0.5 * (s1 - t1)   # out[2i  , 2j  ]
    b = 0.5 * (s2 + t2)   # out[2i  , 2j+1]
    c = 0.5 * (s2 - t2)   # out[2i+1, 2j  ]
    d = 0.5 * (s1 + t1)   # out[2i+1, 2j+1]
    o_ref[:, 0, :, :] = jnp.concatenate([a, b], axis=-1).astype(o_ref.dtype)
    o_ref[:, 1, :, :] = jnp.concatenate([c, d], axis=-1).astype(o_ref.dtype)


def _conv3x3_from_padded_scratch(xpad_ref, w_ref, y_ref, stat_ref):
    """3x3 conv (stride 1) of a zero-bordered VMEM scratch as one bf16 matmul.

    xpad_ref: (OH+2, OW+2, Cin) bf16 scratch, border zero, interior filled.
    w_ref   : (9*Cin, Cout) bf16, rows ordered (dy, dx, ci).
    y_ref   : (1, Cout, OH*OW)    pre-BN conv output, channel-major (lane-dense).
    stat_ref: (1, 2, Cout) f32    per-image [sum, sum_of_squares] for global BN.
    """
    hp, wp, cin = xpad_ref.shape
    oh, ow = hp - 2, wp - 2
    slabs = []
    for dy in range(3):
        for dx in range(3):
            slabs.append(
                xpad_ref[pl.ds(dy, oh), pl.ds(dx, ow), :].reshape(oh * ow, cin))
    patches = jnp.concatenate(slabs, axis=-1)                    # (OH*OW, 9*Cin) bf16
    acc = jnp.dot(patches, w_ref[...], preferred_element_type=jnp.float32)
    stat_ref[0] = jnp.concatenate(
        [jnp.sum(acc, axis=0, keepdims=True),
         jnp.sum(acc * acc, axis=0, keepdims=True)], axis=0)
    y_ref[0] = acc.T.astype(y_ref.dtype)                         # (Cout, OH*OW)


def conv3x3_cat_kernel(pool_ref, cat_ref, w_ref, y_ref, stat_ref, xpad_ref):
    """dec1: Conv2d(3x3, pad=1) over concat(pool_x, cat) + BN statistics.

    The channel concat never touches HBM: both inputs are written into the same
    zero-bordered scratch.  (Conv bias is omitted: cancelled by train-mode BN.)
    """
    hp, wp, cin = xpad_ref.shape
    oh, ow = hp - 2, wp - 2
    cw = pool_ref.shape[-1]
    # Re-zero each step (border == conv zero padding); safe under megacore sharding.
    xpad_ref[...] = jnp.zeros(xpad_ref.shape, xpad_ref.dtype)
    xpad_ref[pl.ds(1, oh), pl.ds(1, ow), pl.ds(0, cw)] = pool_ref[0]
    xpad_ref[pl.ds(1, oh), pl.ds(1, ow), pl.ds(cw, cin - cw)] = cat_ref[0]
    _conv3x3_from_padded_scratch(xpad_ref, w_ref, y_ref, stat_ref)


def conv3x3_bnrelu_in_kernel(x_ref, scale_ref, shift_ref, w_ref, y_ref, stat_ref,
                             xpad_ref):
    """dec2: fused BN(scale,shift)+ReLU of the previous conv output, then
    Conv2d(3x3, pad=1) + BN statistics.

    x_ref: (1, Cin, OH*OW) bf16 pre-BN conv1 output (channel-major, lane-dense).
    """
    hp, wp, cin = xpad_ref.shape
    oh, ow = hp - 2, wp - 2
    xpad_ref[...] = jnp.zeros(xpad_ref.shape, xpad_ref.dtype)
    x = x_ref[0].astype(jnp.float32)                             # (Cin, R)
    z = jnp.maximum(x * scale_ref[...] + shift_ref[...], 0.0)    # BN + ReLU in f32
    xpad_ref[pl.ds(1, oh), pl.ds(1, ow), :] = (
        z.T.reshape(oh, ow, cin).astype(xpad_ref.dtype))
    _conv3x3_from_padded_scratch(xpad_ref, w_ref, y_ref, stat_ref)


def conv1x1_bnrelu_in_kernel(x_ref, scale_ref, shift_ref, w_ref, b_ref, o_ref):
    """final conv: fused BN+ReLU on the conv2 output, then 1x1 conv (+bias).

    Channel-major throughout -> the (Cout, R_tile) store is lane-dense and the
    result is already NCHW after a layout-trivial wrapper reshape.
    """
    x = x_ref[0].astype(jnp.float32)                             # (Cin, TR)
    z = jnp.maximum(x * scale_ref[...] + shift_ref[...], 0.0).astype(jnp.bfloat16)
    acc = jnp.dot(w_ref[...], z, preferred_element_type=jnp.float32)  # (Cout, TR)
    o_ref[0] = acc + b_ref[...]


# ----------------------------------------------------------------------------
# Wrappers
# ----------------------------------------------------------------------------
def _compiler_params(semantics):
    return pltpu.CompilerParams(dimension_semantics=semantics,
                                vmem_limit_bytes=_VMEM_LIMIT)


def idwt_haar(ll, lh, hl, hh):
    """(N, H, W, C) f32 sub-bands -> (N, 2H, 2W, C) bf16 up-sampled image."""
    N, H, W, C = ll.shape
    spec_in = pl.BlockSpec((1, H, W, C), lambda n: (n, 0, 0, 0))
    out = pl.pallas_call(
        idwt_haar_kernel,
        grid_spec=pltpu.PrefetchScalarGridSpec(
            num_scalar_prefetch=0,
            grid=(N,),
            in_specs=[spec_in, spec_in, spec_in, spec_in],
            out_specs=pl.BlockSpec((H, 2, W, 2 * C), lambda n: (n, 0, 0, 0)),
        ),
        out_shape=jax.ShapeDtypeStruct((N * H, 2, W, 2 * C), jnp.bfloat16),
        compiler_params=_compiler_params(("parallel",)),
    )(ll, lh, hl, hh)
    # Row-major identical to the interleaved image -> reshape is layout-trivial.
    return out.reshape(N, 2 * H, 2 * W, C)


def conv3x3_dec1(pool, cat_n, w_mat, c_out):
    """Conv2d(3x3, pad=1) over concat(pool, cat): pre-BN output + BN stats."""
    N, OH, OW, Cw = pool.shape
    Cc = cat_n.shape[-1]
    cin = Cw + Cc
    R = OH * OW
    return pl.pallas_call(
        conv3x3_cat_kernel,
        grid_spec=pltpu.PrefetchScalarGridSpec(
            num_scalar_prefetch=0,
            grid=(N,),
            in_specs=[
                pl.BlockSpec((1, OH, OW, Cw), lambda n: (n, 0, 0, 0)),
                pl.BlockSpec((1, OH, OW, Cc), lambda n: (n, 0, 0, 0)),
                pl.BlockSpec((9 * cin, c_out), lambda n: (0, 0)),
            ],
            out_specs=[
                pl.BlockSpec((1, c_out, R), lambda n: (n, 0, 0)),
                pl.BlockSpec((1, 2, c_out), lambda n: (n, 0, 0)),
            ],
            scratch_shapes=[pltpu.VMEM((OH + 2, OW + 2, cin), jnp.bfloat16)],
        ),
        out_shape=(
            jax.ShapeDtypeStruct((N, c_out, R), jnp.bfloat16),
            jax.ShapeDtypeStruct((N, 2, c_out), jnp.float32),
        ),
        compiler_params=_compiler_params(("parallel",)),
    )(pool, cat_n, w_mat)


def conv3x3_dec2(y_prev, scale, shift, w_mat, c_out, oh, ow):
    """BN1+ReLU (fused on input) then Conv2d(3x3, pad=1): output + BN stats."""
    N, cin, R = y_prev.shape
    return pl.pallas_call(
        conv3x3_bnrelu_in_kernel,
        grid_spec=pltpu.PrefetchScalarGridSpec(
            num_scalar_prefetch=0,
            grid=(N,),
            in_specs=[
                pl.BlockSpec((1, cin, R), lambda n: (n, 0, 0)),
                pl.BlockSpec((cin, 1), lambda n: (0, 0)),
                pl.BlockSpec((cin, 1), lambda n: (0, 0)),
                pl.BlockSpec((9 * cin, c_out), lambda n: (0, 0)),
            ],
            out_specs=[
                pl.BlockSpec((1, c_out, R), lambda n: (n, 0, 0)),
                pl.BlockSpec((1, 2, c_out), lambda n: (n, 0, 0)),
            ],
            scratch_shapes=[pltpu.VMEM((oh + 2, ow + 2, cin), jnp.bfloat16)],
        ),
        out_shape=(
            jax.ShapeDtypeStruct((N, c_out, R), jnp.bfloat16),
            jax.ShapeDtypeStruct((N, 2, c_out), jnp.float32),
        ),
        compiler_params=_compiler_params(("parallel",)),
    )(y_prev, scale, shift, w_mat)


def _pick_row_block(r):
    """Whole image if small, else the largest 128-multiple divisor <= 2048."""
    if r <= 2048:
        return r
    for tr in (2048, 1024, 512, 256, 128):
        if r % tr == 0:
            return tr
    return r


def conv1x1_final(y_prev, scale, shift, w_mat, bias, c_out):
    """BN2+ReLU (fused) then 1x1 conv; channel-major (== NCHW) lane-dense output."""
    N, cin, R = y_prev.shape
    TR = _pick_row_block(R)
    nb = R // TR
    return pl.pallas_call(
        conv1x1_bnrelu_in_kernel,
        grid_spec=pltpu.PrefetchScalarGridSpec(
            num_scalar_prefetch=0,
            grid=(N, nb),
            in_specs=[
                pl.BlockSpec((1, cin, TR), lambda n, i: (n, 0, i)),
                pl.BlockSpec((cin, 1), lambda n, i: (0, 0)),
                pl.BlockSpec((cin, 1), lambda n, i: (0, 0)),
                pl.BlockSpec((c_out, cin), lambda n, i: (0, 0)),
                pl.BlockSpec((c_out, 1), lambda n, i: (0, 0)),
            ],
            out_specs=pl.BlockSpec((1, c_out, TR), lambda n, i: (n, 0, i)),
        ),
        out_shape=jax.ShapeDtypeStruct((N, c_out, R), jnp.float32),
        compiler_params=_compiler_params(("parallel", "parallel")),
    )(y_prev, scale, shift, w_mat, bias)


def _bn_scale_shift(stats, gamma, beta, count):
    """Fold global train-mode batch stats + (gamma, beta) into one scale/shift."""
    s = jnp.sum(stats[:, 0, :], axis=0)
    ss = jnp.sum(stats[:, 1, :], axis=0)
    mean = s / count
    var = jnp.maximum(ss / count - mean * mean, 0.0)     # biased var (BN training)
    scale = gamma * jax.lax.rsqrt(var + BN_EPS)
    shift = beta - mean * scale
    return (scale.reshape(-1, 1).astype(jnp.float32),
            shift.reshape(-1, 1).astype(jnp.float32))


def decoder_block_forward(params, x, LH, HL, HH, cat):
    """All I/O is NCHW float32 (PyTorch convention)."""
    to_nhwc = lambda t: jnp.transpose(t, (0, 2, 3, 1)).astype(jnp.float32)
    ll, lh, hl, hh = map(to_nhwc, (x, LH, HL, HH))
    cat_n = to_nhwc(cat).astype(jnp.bfloat16)

    N, H, W, _ = ll.shape
    OH, OW = 2 * H, 2 * W
    R = OH * OW

    # HFM outputs are unused by the forward pass -> omitted (see TODO at top).
    pool = idwt_haar(ll, lh, hl, hh)                               # (N, OH, OW, Cw) bf16

    # dec1: Conv3x3(concat(pool, cat)) -> BN -> ReLU  (conv bias cancelled by BN)
    c1, cin1 = params["w1"].shape[0], params["w1"].shape[1]
    w1m = jnp.transpose(params["w1"], (2, 3, 1, 0)).reshape(9 * cin1, c1)
    y1, stats1 = conv3x3_dec1(pool, cat_n, w1m.astype(jnp.bfloat16), c1)
    scale1, shift1 = _bn_scale_shift(stats1, params["g1"], params["be1"], N * R)

    # dec2: Conv3x3(relu(bn1(y1))) -> BN -> ReLU  (BN1+ReLU fused into this kernel)
    c2 = params["w2"].shape[0]
    w2m = jnp.transpose(params["w2"], (2, 3, 1, 0)).reshape(9 * c1, c2)
    y2, stats2 = conv3x3_dec2(y1, scale1, shift1, w2m.astype(jnp.bfloat16), c2, OH, OW)
    scale2, shift2 = _bn_scale_shift(stats2, params["g2"], params["be2"], N * R)

    # final 1x1 conv on relu(bn2(y2)); kernel writes channel-major == NCHW directly.
    c3 = params["w3"].shape[0]
    w3m = params["w3"].reshape(c3, c2).astype(jnp.bfloat16)
    b3 = params["b3"].reshape(c3, 1).astype(jnp.float32)
    out = conv1x1_final(y2, scale2, shift2, w3m, b3, c3)           # (N, c3, R) f32
    return out.reshape(N, c3, OH, OW)


def init_params(key, in_channels, out_channels):
    """Deterministic synthetic parameters (shapes follow Decoder_block.__init__)."""
    c_in0, c_in1 = in_channels
    c_out0, c_out1 = out_channels
    ks = jax.random.split(key, 6)
    p = {
        # dec1: CBR2d(in_channels[0] -> out_channels[0])
        "w1": 0.1 * jax.random.normal(ks[0], (c_out0, c_in0, 3, 3), jnp.float32),
        # b1/b2 are created for module parity but intentionally unused: a conv
        # bias before train-mode BatchNorm is cancelled by the mean subtraction.
        "b1": 0.05 * jax.random.normal(ks[1], (c_out0,), jnp.float32),
        "g1": jnp.ones((c_out0,), jnp.float32),
        "be1": jnp.zeros((c_out0,), jnp.float32),
        # dec2: CBR2d(in_channels[1] -> out_channels[1])
        "w2": 0.1 * jax.random.normal(ks[2], (c_out1, c_in1, 3, 3), jnp.float32),
        "b2": 0.05 * jax.random.normal(ks[3], (c_out1,), jnp.float32),
        "g2": jnp.ones((c_out1,), jnp.float32),
        "be2": jnp.zeros((c_out1,), jnp.float32),
        # conv: Conv2d(out_channels[1] -> out_channels[1]//2, kernel 1)
        "w3": 0.1 * jax.random.normal(ks[4], (c_out1 // 2, c_out1, 1, 1), jnp.float32),
        "b3": 0.05 * jax.random.normal(ks[5], (c_out1 // 2,), jnp.float32),
    }
    return p


if __name__ == "__main__":
    key = jax.random.PRNGKey(0)
    k_x, k_lh, k_hl, k_hh, k_cat, k_p = jax.random.split(key, 6)

    # Small shapes consistent with the module:
    #   wavelet bands: (N, C_wav, H, W); skip connection `cat`: (N, C_cat, 2H, 2W)
    #   in_channels = (C_wav + C_cat, 8), out_channels = (8, 8)
    N, C_wav, H, W = 2, 4, 8, 8
    C_cat = 4
    in_channels = (C_wav + C_cat, 8)
    out_channels = (8, 8)

    x = jax.random.normal(k_x, (N, C_wav, H, W), jnp.float32)        # LL band
    LH = jax.random.normal(k_lh, (N, C_wav, H, W), jnp.float32)
    HL = jax.random.normal(k_hl, (N, C_wav, H, W), jnp.float32)
    HH = jax.random.normal(k_hh, (N, C_wav, H, W), jnp.float32)
    cat = jax.random.normal(k_cat, (N, C_cat, 2 * H, 2 * W), jnp.float32)

    params = init_params(k_p, in_channels, out_channels)

    out = jax.jit(decoder_block_forward)(params, x, LH, HL, HH, cat)
    out = jax.block_until_ready(out)

    expected_shape = (N, out_channels[1] // 2, 2 * H, 2 * W)
    assert out.shape == expected_shape, (out.shape, expected_shape)
    assert bool(jnp.all(jnp.isfinite(out)))
    print("KERNEL_OK")
</pallas_src>

<mosaic_0001>
module attributes {stable_mosaic.version = 11 : i64} {
  func.func @idwt_haar_kernel(%arg0: i32, %arg1: memref<1x8x8x4xf32, #tpu.memory_space<vmem>>, %arg2: memref<1x8x8x4xf32, #tpu.memory_space<vmem>>, %arg3: memref<1x8x8x4xf32, #tpu.memory_space<vmem>>, %arg4: memref<1x8x8x4xf32, #tpu.memory_space<vmem>>, %arg5: memref<8x2x8x8xbf16, #tpu.memory_space<vmem>>) attributes {dimension_semantics = [#tpu.dimension_semantics<parallel>], iteration_bounds = array<i64: 2>, scalar_prefetch = 0 : i64, scratch_operands = 0 : i64, tpu.core_type = #tpu.core_type<tc>, window_params = [{transform_indices = @transform_0, window_bounds = array<i64: 1, 8, 8, 4>}, {transform_indices = @transform_1, window_bounds = array<i64: 1, 8, 8, 4>}, {transform_indices = @transform_2, window_bounds = array<i64: 1, 8, 8, 4>}, {transform_indices = @transform_3, window_bounds = array<i64: 1, 8, 8, 4>}, {transform_indices = @transform_4, window_bounds = array<i64: 8, 2, 8, 8>}]} {
    %c0 = arith.constant 0 : index
    %c0_0 = arith.constant 0 : index
    %c0_1 = arith.constant 0 : index
    %c0_2 = arith.constant 0 : index
    %0 = vector.load %arg1[%c0, %c0_0, %c0_1, %c0_2] : memref<1x8x8x4xf32, #tpu.memory_space<vmem>>, vector<1x8x8x4xf32>
    %1 = vector.shape_cast %0 : vector<1x8x8x4xf32> to vector<8x8x4xf32>
    %c0_3 = arith.constant 0 : index
    %c0_4 = arith.constant 0 : index
    %c0_5 = arith.constant 0 : index
    %c0_6 = arith.constant 0 : index
    %2 = vector.load %arg2[%c0_3, %c0_4, %c0_5, %c0_6] : memref<1x8x8x4xf32, #tpu.memory_space<vmem>>, vector<1x8x8x4xf32>
    %3 = vector.shape_cast %2 : vector<1x8x8x4xf32> to vector<8x8x4xf32>
    %c0_7 = arith.constant 0 : index
    %c0_8 = arith.constant 0 : index
    %c0_9 = arith.constant 0 : index
    %c0_10 = arith.constant 0 : index
    %4 = vector.load %arg3[%c0_7, %c0_8, %c0_9, %c0_10] : memref<1x8x8x4xf32, #tpu.memory_space<vmem>>, vector<1x8x8x4xf32>
    %5 = vector.shape_cast %4 : vector<1x8x8x4xf32> to vector<8x8x4xf32>
    %c0_11 = arith.constant 0 : index
    %c0_12 = arith.constant 0 : index
    %c0_13 = arith.constant 0 : index
    %c0_14 = arith.constant 0 : index
    %6 = vector.load %arg4[%c0_11, %c0_12, %c0_13, %c0_14] : memref<1x8x8x4xf32, #tpu.memory_space<vmem>>, vector<1x8x8x4xf32>
    %7 = vector.shape_cast %6 : vector<1x8x8x4xf32> to vector<8x8x4xf32>
    %8 = arith.addf %1, %7 : vector<8x8x4xf32>
    %9 = arith.subf %1, %7 : vector<8x8x4xf32>
    %10 = arith.addf %3, %5 : vector<8x8x4xf32>
    %11 = arith.subf %3, %5 : vector<8x8x4xf32>
    %12 = arith.subf %8, %10 : vector<8x8x4xf32>
    %cst = arith.constant 5.000000e-01 : f32
    %13 = vector.broadcast %cst : f32 to vector<8x8x4xf32>
    %14 = arith.mulf %13, %12 : vector<8x8x4xf32>
    %15 = arith.addf %9, %11 : vector<8x8x4xf32>
    %cst_15 = arith.constant 5.000000e-01 : f32
    %16 = vector.broadcast %cst_15 : f32 to vector<8x8x4xf32>
    %17 = arith.mulf %16, %15 : vector<8x8x4xf32>
    %18 = arith.subf %9, %11 : vector<8x8x4xf32>
    %cst_16 = arith.constant 5.000000e-01 : f32
    %19 = vector.broadcast %cst_16 : f32 to vector<8x8x4xf32>
    %20 = arith.mulf %19, %18 : vector<8x8x4xf32>
    %21 = arith.addf %8, %10 : vector<8x8x4xf32>
    %cst_17 = arith.constant 5.000000e-01 : f32
    %22 = vector.broadcast %cst_17 : f32 to vector<8x8x4xf32>
    %23 = arith.mulf %22, %21 : vector<8x8x4xf32>
    %24 = tpu.concatenate %14, %17 in 2 : vector<8x8x4xf32>, vector<8x8x4xf32> -> vector<8x8x8xf32>
    %25 = arith.truncf %24 : vector<8x8x8xf32> to vector<8x8x8xbf16>
    %c0_18 = arith.constant 0 : index
    %c0_19 = arith.constant 0 : index
    %c0_20 = arith.constant 0 : index
    %c0_21 = arith.constant 0 : index
    %26 = vector.load %arg5[%c0_18, %c0_19, %c0_20, %c0_21] : memref<8x2x8x8xbf16, #tpu.memory_space<vmem>>, vector<8x1x8x8xbf16>
    %27 = vector.shape_cast %26 : vector<8x1x8x8xbf16> to vector<8x8x8xbf16>
    %28 = vector.shape_cast %25 : vector<8x8x8xbf16> to vector<8x1x8x8xbf16>
    tpu.vector_store %arg5[%c0_18, %c0_19, %c0_20, %c0_21], %28 {strides = array<i32>} : memref<8x2x8x8xbf16, #tpu.memory_space<vmem>>, vector<8x1x8x8xbf16>,
    %29 = tpu.concatenate %20, %23 in 2 : vector<8x8x4xf32>, vector<8x8x4xf32> -> vector<8x8x8xf32>
    %30 = arith.truncf %29 : vector<8x8x8xf32> to vector<8x8x8xbf16>
    %c0_22 = arith.constant 0 : index
    %c1 = arith.constant 1 : index
    %c0_23 = arith.constant 0 : index
    %c0_24 = arith.constant 0 : index
    %31 = vector.load %arg5[%c0_22, %c1, %c0_23, %c0_24] : memref<8x2x8x8xbf16, #tpu.memory_space<vmem>>, vector<8x1x8x8xbf16>
    %32 = vector.shape_cast %31 : vector<8x1x8x8xbf16> to vector<8x8x8xbf16>
    %33 = vector.shape_cast %30 : vector<8x8x8xbf16> to vector<8x1x8x8xbf16>
    tpu.vector_store %arg5[%c0_22, %c1, %c0_23, %c0_24], %33 {strides = array<i32>} : memref<8x2x8x8xbf16, #tpu.memory_space<vmem>>, vector<8x1x8x8xbf16>,
    return
  }
  func.func @transform_0(%arg0: i32) -> (i32, i32, i32, i32) {
    %c0_i32 = arith.constant 0 : i32
    %c0_i32_0 = arith.constant 0 : i32
    %c0_i32_1 = arith.constant 0 : i32
    %c0_i32_2 = arith.constant 0 : i32
    return %arg0, %c0_i32, %c0_i32_0, %c0_i32_1 : i32, i32, i32, i32
  }
  func.func @transform_1(%arg0: i32) -> (i32, i32, i32, i32) {
    %c0_i32 = arith.constant 0 : i32
    %c0_i32_0 = arith.constant 0 : i32
    %c0_i32_1 = arith.constant 0 : i32
    %c0_i32_2 = arith.constant 0 : i32
    return %arg0, %c0_i32, %c0_i32_0, %c0_i32_1 : i32, i32, i32, i32
  }
  func.func @transform_2(%arg0: i32) -> (i32, i32, i32, i32) {
    %c0_i32 = arith.constant 0 : i32
    %c0_i32_0 = arith.constant 0 : i32
    %c0_i32_1 = arith.constant 0 : i32
    %c0_i32_2 = arith.constant 0 : i32
    return %arg0, %c0_i32, %c0_i32_0, %c0_i32_1 : i32, i32, i32, i32
  }
  func.func @transform_3(%arg0: i32) -> (i32, i32, i32, i32) {
    %c0_i32 = arith.constant 0 : i32
    %c0_i32_0 = arith.constant 0 : i32
    %c0_i32_1 = arith.constant 0 : i32
    %c0_i32_2 = arith.constant 0 : i32
    return %arg0, %c0_i32, %c0_i32_0, %c0_i32_1 : i32, i32, i32, i32
  }
  func.func @transform_4(%arg0: i32) -> (i32, i32, i32, i32) {
    %c0_i32 = arith.constant 0 : i32
    %c0_i32_0 = arith.constant 0 : i32
    %c0_i32_1 = arith.constant 0 : i32
    %c0_i32_2 = arith.constant 0 : i32
    return %arg0, %c0_i32, %c0_i32_0, %c0_i32_1 : i32, i32, i32, i32
  }
}

module attributes {stable_mosaic.version = 11 : i64} {
  func.func @conv3x3_cat_kernel(%arg0: i32, %arg1: memref<1x16x16x4xbf16, #tpu.memory_space<vmem>>, %arg2: memref<1x16x16x4xbf16, #tpu.memory_space<vmem>>, %arg3: memref<72x8xbf16, #tpu.memory_space<vmem>>, %arg4: memref<1x8x256xbf16, #tpu.memory_space<vmem>>, %arg5: memref<1x2x8xf32, #tpu.memory_space<vmem>>, %arg6: memref<18x18x8xbf16, #tpu.memory_space<vmem>>) attributes {dimension_semantics = [#tpu.dimension_semantics<parallel>], iteration_bounds = array<i64: 2>, scalar_prefetch = 0 : i64, scratch_operands = 1 : i64, tpu.core_type = #tpu.core_type<tc>, window_params = [{transform_indices = @transform_0, window_bounds = array<i64: 1, 16, 16, 4>}, {transform_indices = @transform_1, window_bounds = array<i64: 1, 16, 16, 4>}, {pipeline_mode = #tpu.pipeline_mode<synchronous>, transform_indices = @transform_2, window_bounds = array<i64: 72, 8>}, {transform_indices = @transform_3, window_bounds = array<i64: 1, 8, 256>}, {transform_indices = @transform_4, window_bounds = array<i64: 1, 2, 8>}]} {
    %cst = arith.constant 0.000000e+00 : bf16
    %0 = vector.broadcast %cst : bf16 to vector<18x18x8xbf16>
    %c0 = arith.constant 0 : index
    %c0_0 = arith.constant 0 : index
    %c0_1 = arith.constant 0 : index
    %1 = vector.load %arg6[%c0, %c0_0, %c0_1] : memref<18x18x8xbf16, #tpu.memory_space<vmem>>, vector<18x18x8xbf16>
    tpu.vector_store %arg6[%c0, %c0_0, %c0_1], %0 {strides = array<i32>} : memref<18x18x8xbf16, #tpu.memory_space<vmem>>, vector<18x18x8xbf16>,
    %c0_2 = arith.constant 0 : index
    %c0_3 = arith.constant 0 : index
    %c0_4 = arith.constant 0 : index
    %c0_5 = arith.constant 0 : index
    %2 = vector.load %arg1[%c0_2, %c0_3, %c0_4, %c0_5] : memref<1x16x16x4xbf16, #tpu.memory_space<vmem>>, vector<1x16x16x4xbf16>
    %3 = vector.shape_cast %2 : vector<1x16x16x4xbf16> to vector<16x16x4xbf16>
    %c1 = arith.constant 1 : index
    %c1_6 = arith.constant 1 : index
    %c0_7 = arith.constant 0 : index
    %4 = vector.load %arg6[%c1, %c1_6, %c0_7] : memref<18x18x8xbf16, #tpu.memory_space<vmem>>, vector<16x16x4xbf16>
    tpu.vector_store %arg6[%c1, %c1_6, %c0_7], %3 {strides = array<i32>} : memref<18x18x8xbf16, #tpu.memory_space<vmem>>, vector<16x16x4xbf16>,
    %c0_8 = arith.constant 0 : index
    %c0_9 = arith.constant 0 : index
    %c0_10 = arith.constant 0 : index
    %c0_11 = arith.constant 0 : index
    %5 = vector.load %arg2[%c0_8, %c0_9, %c0_10, %c0_11] : memref<1x16x16x4xbf16, #tpu.memory_space<vmem>>, vector<1x16x16x4xbf16>
    %6 = vector.shape_cast %5 : vector<1x16x16x4xbf16> to vector<16x16x4xbf16>
    %c1_12 = arith.constant 1 : index
    %c1_13 = arith.constant 1 : index
    %c4 = arith.constant 4 : index
    %7 = vector.load %arg6[%c1_12, %c1_13, %c4] : memref<18x18x8xbf16, #tpu.memory_space<vmem>>, vector<16x16x4xbf16>
    tpu.vector_store %arg6[%c1_12, %c1_13, %c4], %6 {strides = array<i32>} : memref<18x18x8xbf16, #tpu.memory_space<vmem>>, vector<16x16x4xbf16>,
    %c0_14 = arith.constant 0 : index
    %c0_15 = arith.constant 0 : index
    %c0_16 = arith.constant 0 : index
    %8 = vector.load %arg6[%c0_14, %c0_15, %c0_16] : memref<18x18x8xbf16, #tpu.memory_space<vmem>>, vector<16x16x8xbf16>
    %9 = vector.shape_cast %8 : vector<16x16x8xbf16> to vector<256x8xbf16>
    %c0_17 = arith.constant 0 : index
    %c1_18 = arith.constant 1 : index
    %c0_19 = arith.constant 0 : index
    %10 = vector.load %arg6[%c0_17, %c1_18, %c0_19] : memref<18x18x8xbf16, #tpu.memory_space<vmem>>, vector<16x16x8xbf16>
    %11 = vector.shape_cast %10 : vector<16x16x8xbf16> to vector<256x8xbf16>
    %c0_20 = arith.constant 0 : index
    %c2 = arith.constant 2 : index
    %c0_21 = arith.constant 0 : index
    %12 = vector.load %arg6[%c0_20, %c2, %c0_21] : memref<18x18x8xbf16, #tpu.memory_space<vmem>>, vector<16x16x8xbf16>
    %13 = vector.shape_cast %12 : vector<16x16x8xbf16> to vector<256x8xbf16>
    %c1_22 = arith.constant 1 : index
    %c0_23 = arith.constant 0 : index
    %c0_24 = arith.constant 0 : index
    %14 = vector.load %arg6[%c1_22, %c0_23, %c0_24] : memref<18x18x8xbf16, #tpu.memory_space<vmem>>, vector<16x16x8xbf16>
    %15 = vector.shape_cast %14 : vector<16x16x8xbf16> to vector<256x8xbf16>
    %c1_25 = arith.constant 1 : index
    %c1_26 = arith.constant 1 : index
    %c0_27 = arith.constant 0 : index
    %16 = vector.load %arg6[%c1_25, %c1_26, %c0_27] : memref<18x18x8xbf16, #tpu.memory_space<vmem>>, vector<16x16x8xbf16>
    %17 = vector.shape_cast %16 : vector<16x16x8xbf16> to vector<256x8xbf16>
    %c1_28 = arith.constant 1 : index
    %c2_29 = arith.constant 2 : index
    %c0_30 = arith.constant 0 : index
    %18 = vector.load %arg6[%c1_28, %c2_29, %c0_30] : memref<18x18x8xbf16, #tpu.memory_space<vmem>>, vector<16x16x8xbf16>
    %19 = vector.shape_cast %18 : vector<16x16x8xbf16> to vector<256x8xbf16>
    %c2_31 = arith.constant 2 : index
    %c0_32 = arith.constant 0 : index
    %c0_33 = arith.constant 0 : index
    %20 = vector.load %arg6[%c2_31, %c0_32, %c0_33] : memref<18x18x8xbf16, #tpu.memory_space<vmem>>, vector<16x16x8xbf16>
    %21 = vector.shape_cast %20 : vector<16x16x8xbf16> to vector<256x8xbf16>
    %c2_34 = arith.constant 2 : index
    %c1_35 = arith.constant 1 : index
    %c0_36 = arith.constant 0 : index
    %22 = vector.load %arg6[%c2_34, %c1_35, %c0_36] : memref<18x18x8xbf16, #tpu.memory_space<vmem>>, vector<16x16x8xbf16>
    %23 = vector.shape_cast %22 : vector<16x16x8xbf16> to vector<256x8xbf16>
    %c2_37 = arith.constant 2 : index
    %c2_38 = arith.constant 2 : index
    %c0_39 = arith.constant 0 : index
    %24 = vector.load %arg6[%c2_37, %c2_38, %c0_39] : memref<18x18x8xbf16, #tpu.memory_space<vmem>>, vector<16x16x8xbf16>
    %25 = vector.shape_cast %24 : vector<16x16x8xbf16> to vector<256x8xbf16>
    %26 = tpu.concatenate %9, %11, %13, %15, %17, %19, %21, %23, %25 in 1 : vector<256x8xbf16>, vector<256x8xbf16>, vector<256x8xbf16>, vector<256x8xbf16>, vector<256x8xbf16>, vector<256x8xbf16>, vector<256x8xbf16>, vector<256x8xbf16>, vector<256x8xbf16> -> vector<256x72xbf16>
    %c0_40 = arith.constant 0 : index
    %c0_41 = arith.constant 0 : index
    %27 = vector.load %arg3[%c0_40, %c0_41] : memref<72x8xbf16, #tpu.memory_space<vmem>>, vector<72x8xbf16>
    %cst_42 = arith.constant dense<0.000000e+00> : vector<256x8xf32>
    %28 = tpu.matmul %26, %27, %cst_42 {dimension_numbers = #tpu.dot_dimension_numbers<[1], [0], [0], [1], [0, 0, 1, 1], [], []>} : vector<256x72xbf16>, vector<72x8xbf16>, vector<256x8xf32> -> vector<256x8xf32>
    %cst_43 = arith.constant dense<0.000000e+00> : vector<8xf32>
    %29 = vector.multi_reduction <add>, %28, %cst_43 [0] : vector<256x8xf32> to vector<8xf32>
    %30 = vector.shape_cast %29 : vector<8xf32> to vector<1x8xf32>
    %31 = arith.mulf %28, %28 : vector<256x8xf32>
    %cst_44 = arith.constant dense<0.000000e+00> : vector<8xf32>
    %32 = vector.multi_reduction <add>, %31, %cst_44 [0] : vector<256x8xf32> to vector<8xf32>
    %33 = vector.shape_cast %32 : vector<8xf32> to vector<1x8xf32>
    %34 = tpu.concatenate %30, %33 in 0 : vector<1x8xf32>, vector<1x8xf32> -> vector<2x8xf32>
    %c0_45 = arith.constant 0 : index
    %c0_46 = arith.constant 0 : index
    %c0_47 = arith.constant 0 : index
    %35 = vector.load %arg5[%c0_45, %c0_46, %c0_47] : memref<1x2x8xf32, #tpu.memory_space<vmem>>, vector<1x2x8xf32>
    %36 = vector.shape_cast %35 : vector<1x2x8xf32> to vector<2x8xf32>
    %37 = vector.shape_cast %34 : vector<2x8xf32> to vector<1x2x8xf32>
    tpu.vector_store %arg5[%c0_45, %c0_46, %c0_47], %37 {strides = array<i32>} : memref<1x2x8xf32, #tpu.memory_space<vmem>>, vector<1x2x8xf32>,
    %38 = tpu.transpose %28, [1, 0] : vector<256x8xf32> -> vector<8x256xf32>
    %39 = arith.truncf %38 : vector<8x256xf32> to vector<8x256xbf16>
    %c0_48 = arith.constant 0 : index
    %c0_49 = arith.constant 0 : index
    %c0_50 = arith.constant 0 : index
    %40 = vector.load %arg4[%c0_48, %c0_49, %c0_50] : memref<1x8x256xbf16, #tpu.memory_space<vmem>>, vector<1x8x256xbf16>
    %41 = vector.shape_cast %40 : vector<1x8x256xbf16> to vector<8x256xbf16>
    %42 = vector.shape_cast %39 : vector<8x256xbf16> to vector<1x8x256xbf16>
    tpu.vector_store %arg4[%c0_48, %c0_49, %c0_50], %42 {strides = array<i32>} : memref<1x8x256xbf16, #tpu.memory_space<vmem>>, vector<1x8x256xbf16>,
    return
  }
  func.func @transform_0(%arg0: i32) -> (i32, i32, i32, i32) {
    %c0_i32 = arith.constant 0 : i32
    %c0_i32_0 = arith.constant 0 : i32
    %c0_i32_1 = arith.constant 0 : i32
    %c0_i32_2 = arith.constant 0 : i32
    return %arg0, %c0_i32, %c0_i32_0, %c0_i32_1 : i32, i32, i32, i32
  }
  func.func @transform_1(%arg0: i32) -> (i32, i32, i32, i32) {
    %c0_i32 = arith.constant 0 : i32
    %c0_i32_0 = arith.constant 0 : i32
    %c0_i32_1 = arith.constant 0 : i32
    %c0_i32_2 = arith.constant 0 : i32
    return %arg0, %c0_i32, %c0_i32_0, %c0_i32_1 : i32, i32, i32, i32
  }
  func.func @transform_2(%arg0: i32) -> (i32, i32) {
    %c0_i32 = arith.constant 0 : i32
    %c0_i32_0 = arith.constant 0 : i32
    %c0_i32_1 = arith.constant 0 : i32
    return %c0_i32, %c0_i32_0 : i32, i32
  }
  func.func @transform_3(%arg0: i32) -> (i32, i32, i32) {
    %c0_i32 = arith.constant 0 : i32
    %c0_i32_0 = arith.constant 0 : i32
    %c0_i32_1 = arith.constant 0 : i32
    return %arg0, %c0_i32, %c0_i32_0 : i32, i32, i32
  }
  func.func @transform_4(%arg0: i32) -> (i32, i32, i32) {
    %c0_i32 = arith.constant 0 : i32
    %c0_i32_0 = arith.constant 0 : i32
    %c0_i32_1 = arith.constant 0 : i32
    return %arg0, %c0_i32, %c0_i32_0 : i32, i32, i32
  }
}

module attributes {stable_mosaic.version = 11 : i64} {
  func.func @conv3x3_bnrelu_in_kernel(%arg0: i32, %arg1: memref<1x8x256xbf16, #tpu.memory_space<vmem>>, %arg2: memref<8x1xf32, #tpu.memory_space<vmem>>, %arg3: memref<8x1xf32, #tpu.memory_space<vmem>>, %arg4: memref<72x8xbf16, #tpu.memory_space<vmem>>, %arg5: memref<1x8x256xbf16, #tpu.memory_space<vmem>>, %arg6: memref<1x2x8xf32, #tpu.memory_space<vmem>>, %arg7: memref<18x18x8xbf16, #tpu.memory_space<vmem>>) attributes {dimension_semantics = [#tpu.dimension_semantics<parallel>], iteration_bounds = array<i64: 2>, scalar_prefetch = 0 : i64, scratch_operands = 1 : i64, tpu.core_type = #tpu.core_type<tc>, window_params = [{transform_indices = @transform_0, window_bounds = array<i64: 1, 8, 256>}, {pipeline_mode = #tpu.pipeline_mode<synchronous>, transform_indices = @transform_1, window_bounds = array<i64: 8, 1>}, {pipeline_mode = #tpu.pipeline_mode<synchronous>, transform_indices = @transform_2, window_bounds = array<i64: 8, 1>}, {pipeline_mode = #tpu.pipeline_mode<synchronous>, transform_indices = @transform_3, window_bounds = array<i64: 72, 8>}, {transform_indices = @transform_4, window_bounds = array<i64: 1, 8, 256>}, {transform_indices = @transform_5, window_bounds = array<i64: 1, 2, 8>}]} {
    %cst = arith.constant 0.000000e+00 : bf16
    %0 = vector.broadcast %cst : bf16 to vector<18x18x8xbf16>
    %c0 = arith.constant 0 : index
    %c0_0 = arith.constant 0 : index
    %c0_1 = arith.constant 0 : index
    %1 = vector.load %arg7[%c0, %c0_0, %c0_1] : memref<18x18x8xbf16, #tpu.memory_space<vmem>>, vector<18x18x8xbf16>
    tpu.vector_store %arg7[%c0, %c0_0, %c0_1], %0 {strides = array<i32>} : memref<18x18x8xbf16, #tpu.memory_space<vmem>>, vector<18x18x8xbf16>,
    %c0_2 = arith.constant 0 : index
    %c0_3 = arith.constant 0 : index
    %c0_4 = arith.constant 0 : index
    %2 = vector.load %arg1[%c0_2, %c0_3, %c0_4] : memref<1x8x256xbf16, #tpu.memory_space<vmem>>, vector<1x8x256xbf16>
    %3 = vector.shape_cast %2 : vector<1x8x256xbf16> to vector<8x256xbf16>
    %4 = arith.extf %3 : vector<8x256xbf16> to vector<8x256xf32>
    %c0_5 = arith.constant 0 : index
    %c0_6 = arith.constant 0 : index
    %5 = vector.load %arg2[%c0_5, %c0_6] : memref<8x1xf32, #tpu.memory_space<vmem>>, vector<8x1xf32>
    %6 = vector.broadcast %5 : vector<8x1xf32> to vector<8x256xf32>
    %7 = arith.mulf %4, %6 : vector<8x256xf32>
    %c0_7 = arith.constant 0 : index
    %c0_8 = arith.constant 0 : index
    %8 = vector.load %arg3[%c0_7, %c0_8] : memref<8x1xf32, #tpu.memory_space<vmem>>, vector<8x1xf32>
    %9 = vector.broadcast %8 : vector<8x1xf32> to vector<8x256xf32>
    %10 = arith.addf %7, %9 : vector<8x256xf32>
    %cst_9 = arith.constant 0.000000e+00 : f32
    %11 = vector.broadcast %cst_9 : f32 to vector<8x256xf32>
    %12 = arith.maximumf %10, %11 : vector<8x256xf32>
    %13 = tpu.transpose %12, [1, 0] : vector<8x256xf32> -> vector<256x8xf32>
    %14 = vector.shape_cast %13 : vector<256x8xf32> to vector<16x16x8xf32>
    %15 = arith.truncf %14 : vector<16x16x8xf32> to vector<16x16x8xbf16>
    %c1 = arith.constant 1 : index
    %c1_10 = arith.constant 1 : index
    %c0_11 = arith.constant 0 : index
    %16 = vector.load %arg7[%c1, %c1_10, %c0_11] : memref<18x18x8xbf16, #tpu.memory_space<vmem>>, vector<16x16x8xbf16>
    tpu.vector_store %arg7[%c1, %c1_10, %c0_11], %15 {strides = array<i32>} : memref<18x18x8xbf16, #tpu.memory_space<vmem>>, vector<16x16x8xbf16>,
    %c0_12 = arith.constant 0 : index
    %c0_13 = arith.constant 0 : index
    %c0_14 = arith.constant 0 : index
    %17 = vector.load %arg7[%c0_12, %c0_13, %c0_14] : memref<18x18x8xbf16, #tpu.memory_space<vmem>>, vector<16x16x8xbf16>
    %18 = vector.shape_cast %17 : vector<16x16x8xbf16> to vector<256x8xbf16>
    %c0_15 = arith.constant 0 : index
    %c1_16 = arith.constant 1 : index
    %c0_17 = arith.constant 0 : index
    %19 = vector.load %arg7[%c0_15, %c1_16, %c0_17] : memref<18x18x8xbf16, #tpu.memory_space<vmem>>, vector<16x16x8xbf16>
    %20 = vector.shape_cast %19 : vector<16x16x8xbf16> to vector<256x8xbf16>
    %c0_18 = arith.constant 0 : index
    %c2 = arith.constant 2 : index
    %c0_19 = arith.constant 0 : index
    %21 = vector.load %arg7[%c0_18, %c2, %c0_19] : memref<18x18x8xbf16, #tpu.memory_space<vmem>>, vector<16x16x8xbf16>
    %22 = vector.shape_cast %21 : vector<16x16x8xbf16> to vector<256x8xbf16>
    %c1_20 = arith.constant 1 : index
    %c0_21 = arith.constant 0 : index
    %c0_22 = arith.constant 0 : index
    %23 = vector.load %arg7[%c1_20, %c0_21, %c0_22] : memref<18x18x8xbf16, #tpu.memory_space<vmem>>, vector<16x16x8xbf16>
    %24 = vector.shape_cast %23 : vector<16x16x8xbf16> to vector<256x8xbf16>
    %c1_23 = arith.constant 1 : index
    %c1_24 = arith.constant 1 : index
    %c0_25 = arith.constant 0 : index
    %25 = vector.load %arg7[%c1_23, %c1_24, %c0_25] : memref<18x18x8xbf16, #tpu.memory_space<vmem>>, vector<16x16x8xbf16>
    %26 = vector.shape_cast %25 : vector<16x16x8xbf16> to vector<256x8xbf16>
    %c1_26 = arith.constant 1 : index
    %c2_27 = arith.constant 2 : index
    %c0_28 = arith.constant 0 : index
    %27 = vector.load %arg7[%c1_26, %c2_27, %c0_28] : memref<18x18x8xbf16, #tpu.memory_space<vmem>>, vector<16x16x8xbf16>
    %28 = vector.shape_cast %27 : vector<16x16x8xbf16> to vector<256x8xbf16>
    %c2_29 = arith.constant 2 : index
    %c0_30 = arith.constant 0 : index
    %c0_31 = arith.constant 0 : index
    %29 = vector.load %arg7[%c2_29, %c0_30, %c0_31] : memref<18x18x8xbf16, #tpu.memory_space<vmem>>, vector<16x16x8xbf16>
    %30 = vector.shape_cast %29 : vector<16x16x8xbf16> to vector<256x8xbf16>
    %c2_32 = arith.constant 2 : index
    %c1_33 = arith.constant 1 : index
    %c0_34 = arith.constant 0 : index
    %31 = vector.load %arg7[%c2_32, %c1_33, %c0_34] : memref<18x18x8xbf16, #tpu.memory_space<vmem>>, vector<16x16x8xbf16>
    %32 = vector.shape_cast %31 : vector<16x16x8xbf16> to vector<256x8xbf16>
    %c2_35 = arith.constant 2 : index
    %c2_36 = arith.constant 2 : index
    %c0_37 = arith.constant 0 : index
    %33 = vector.load %arg7[%c2_35, %c2_36, %c0_37] : memref<18x18x8xbf16, #tpu.memory_space<vmem>>, vector<16x16x8xbf16>
    %34 = vector.shape_cast %33 : vector<16x16x8xbf16> to vector<256x8xbf16>
    %35 = tpu.concatenate %18, %20, %22, %24, %26, %28, %30, %32, %34 in 1 : vector<256x8xbf16>, vector<256x8xbf16>, vector<256x8xbf16>, vector<256x8xbf16>, vector<256x8xbf16>, vector<256x8xbf16>, vector<256x8xbf16>, vector<256x8xbf16>, vector<256x8xbf16> -> vector<256x72xbf16>
    %c0_38 = arith.constant 0 : index
    %c0_39 = arith.constant 0 : index
    %36 = vector.load %arg4[%c0_38, %c0_39] : memref<72x8xbf16, #tpu.memory_space<vmem>>, vector<72x8xbf16>
    %cst_40 = arith.constant dense<0.000000e+00> : vector<256x8xf32>
    %37 = tpu.matmul %35, %36, %cst_40 {dimension_numbers = #tpu.dot_dimension_numbers<[1], [0], [0], [1], [0, 0, 1, 1], [], []>} : vector<256x72xbf16>, vector<72x8xbf16>, vector<256x8xf32> -> vector<256x8xf32>
    %cst_41 = arith.constant dense<0.000000e+00> : vector<8xf32>
    %38 = vector.multi_reduction <add>, %37, %cst_41 [0] : vector<256x8xf32> to vector<8xf32>
    %39 = vector.shape_cast %38 : vector<8xf32> to vector<1x8xf32>
    %40 = arith.mulf %37, %37 : vector<256x8xf32>
    %cst_42 = arith.constant dense<0.000000e+00> : vector<8xf32>
    %41 = vector.multi_reduction <add>, %40, %cst_42 [0] : vector<256x8xf32> to vector<8xf32>
    %42 = vector.shape_cast %41 : vector<8xf32> to vector<1x8xf32>
    %43 = tpu.concatenate %39, %42 in 0 : vector<1x8xf32>, vector<1x8xf32> -> vector<2x8xf32>
    %c0_43 = arith.constant 0 : index
    %c0_44 = arith.constant 0 : index
    %c0_45 = arith.constant 0 : index
    %44 = vector.load %arg6[%c0_43, %c0_44, %c0_45] : memref<1x2x8xf32, #tpu.memory_space<vmem>>, vector<1x2x8xf32>
    %45 = vector.shape_cast %44 : vector<1x2x8xf32> to vector<2x8xf32>
    %46 = vector.shape_cast %43 : vector<2x8xf32> to vector<1x2x8xf32>
    tpu.vector_store %arg6[%c0_43, %c0_44, %c0_45], %46 {strides = array<i32>} : memref<1x2x8xf32, #tpu.memory_space<vmem>>, vector<1x2x8xf32>,
    %47 = tpu.transpose %37, [1, 0] : vector<256x8xf32> -> vector<8x256xf32>
    %48 = arith.truncf %47 : vector<8x256xf32> to vector<8x256xbf16>
    %c0_46 = arith.constant 0 : index
    %c0_47 = arith.constant 0 : index
    %c0_48 = arith.constant 0 : index
    %49 = vector.load %arg5[%c0_46, %c0_47, %c0_48] : memref<1x8x256xbf16, #tpu.memory_space<vmem>>, vector<1x8x256xbf16>
    %50 = vector.shape_cast %49 : vector<1x8x256xbf16> to vector<8x256xbf16>
    %51 = vector.shape_cast %48 : vector<8x256xbf16> to vector<1x8x256xbf16>
    tpu.vector_store %arg5[%c0_46, %c0_47, %c0_48], %51 {strides = array<i32>} : memref<1x8x256xbf16, #tpu.memory_space<vmem>>, vector<1x8x256xbf16>,
    return
  }
  func.func @transform_0(%arg0: i32) -> (i32, i32, i32) {
    %c0_i32 = arith.constant 0 : i32
    %c0_i32_0 = arith.constant 0 : i32
    %c0_i32_1 = arith.constant 0 : i32
    return %arg0, %c0_i32, %c0_i32_0 : i32, i32, i32
  }
  func.func @transform_1(%arg0: i32) -> (i32, i32) {
    %c0_i32 = arith.constant 0 : i32
    %c0_i32_0 = arith.constant 0 : i32
    %c0_i32_1 = arith.constant 0 : i32
    return %c0_i32, %c0_i32_0 : i32, i32
  }
  func.func @transform_2(%arg0: i32) -> (i32, i32) {
    %c0_i32 = arith.constant 0 : i32
    %c0_i32_0 = arith.constant 0 : i32
    %c0_i32_1 = arith.constant 0 : i32
    return %c0_i32, %c0_i32_0 : i32, i32
  }
  func.func @transform_3(%arg0: i32) -> (i32, i32) {
    %c0_i32 = arith.constant 0 : i32
    %c0_i32_0 = arith.constant 0 : i32
    %c0_i32_1 = arith.constant 0 : i32
    return %c0_i32, %c0_i32_0 : i32, i32
  }
  func.func @transform_4(%arg0: i32) -> (i32, i32, i32) {
    %c0_i32 = arith.constant 0 : i32
    %c0_i32_0 = arith.constant 0 : i32
    %c0_i32_1 = arith.constant 0 : i32
    return %arg0, %c0_i32, %c0_i32_0 : i32, i32, i32
  }
  func.func @transform_5(%arg0: i32) -> (i32, i32, i32) {
    %c0_i32 = arith.constant 0 : i32
    %c0_i32_0 = arith.constant 0 : i32
    %c0_i32_1 = arith.constant 0 : i32
    return %arg0, %c0_i32, %c0_i32_0 : i32, i32, i32
  }
}

module attributes {stable_mosaic.version = 11 : i64} {
  func.func @conv1x1_bnrelu_in_kernel(%arg0: i32, %arg1: i32, %arg2: memref<1x8x256xbf16, #tpu.memory_space<vmem>>, %arg3: memref<8x1xf32, #tpu.memory_space<vmem>>, %arg4: memref<8x1xf32, #tpu.memory_space<vmem>>, %arg5: memref<4x8xbf16, #tpu.memory_space<vmem>>, %arg6: memref<4x1xf32, #tpu.memory_space<vmem>>, %arg7: memref<1x4x256xf32, #tpu.memory_space<vmem>>) attributes {dimension_semantics = [#tpu.dimension_semantics<parallel>, #tpu.dimension_semantics<parallel>], iteration_bounds = array<i64: 2, 1>, scalar_prefetch = 0 : i64, scratch_operands = 0 : i64, tpu.core_type = #tpu.core_type<tc>, window_params = [{transform_indices = @transform_0, window_bounds = array<i64: 1, 8, 256>}, {pipeline_mode = #tpu.pipeline_mode<synchronous>, transform_indices = @transform_1, window_bounds = array<i64: 8, 1>}, {pipeline_mode = #tpu.pipeline_mode<synchronous>, transform_indices = @transform_2, window_bounds = array<i64: 8, 1>}, {pipeline_mode = #tpu.pipeline_mode<synchronous>, transform_indices = @transform_3, window_bounds = array<i64: 4, 8>}, {pipeline_mode = #tpu.pipeline_mode<synchronous>, transform_indices = @transform_4, window_bounds = array<i64: 4, 1>}, {transform_indices = @transform_5, window_bounds = array<i64: 1, 4, 256>}]} {
    %c0 = arith.constant 0 : index
    %c0_0 = arith.constant 0 : index
    %c0_1 = arith.constant 0 : index
    %0 = vector.load %arg2[%c0, %c0_0, %c0_1] : memref<1x8x256xbf16, #tpu.memory_space<vmem>>, vector<1x8x256xbf16>
    %1 = vector.shape_cast %0 : vector<1x8x256xbf16> to vector<8x256xbf16>
    %2 = arith.extf %1 : vector<8x256xbf16> to vector<8x256xf32>
    %c0_2 = arith.constant 0 : index
    %c0_3 = arith.constant 0 : index
    %3 = vector.load %arg3[%c0_2, %c0_3] : memref<8x1xf32, #tpu.memory_space<vmem>>, vector<8x1xf32>
    %4 = vector.broadcast %3 : vector<8x1xf32> to vector<8x256xf32>
    %5 = arith.mulf %2, %4 : vector<8x256xf32>
    %c0_4 = arith.constant 0 : index
    %c0_5 = arith.constant 0 : index
    %6 = vector.load %arg4[%c0_4, %c0_5] : memref<8x1xf32, #tpu.memory_space<vmem>>, vector<8x1xf32>
    %7 = vector.broadcast %6 : vector<8x1xf32> to vector<8x256xf32>
    %8 = arith.addf %5, %7 : vector<8x256xf32>
    %cst = arith.constant 0.000000e+00 : f32
    %9 = vector.broadcast %cst : f32 to vector<8x256xf32>
    %10 = arith.maximumf %8, %9 : vector<8x256xf32>
    %11 = arith.truncf %10 : vector<8x256xf32> to vector<8x256xbf16>
    %c0_6 = arith.constant 0 : index
    %c0_7 = arith.constant 0 : index
    %12 = vector.load %arg5[%c0_6, %c0_7] : memref<4x8xbf16, #tpu.memory_space<vmem>>, vector<4x8xbf16>
    %cst_8 = arith.constant dense<0.000000e+00> : vector<4x256xf32>
    %13 = tpu.matmul %12, %11, %cst_8 {dimension_numbers = #tpu.dot_dimension_numbers<[1], [0], [0], [1], [0, 0, 1, 1], [], []>} : vector<4x8xbf16>, vector<8x256xbf16>, vector<4x256xf32> -> vector<4x256xf32>
    %c0_9 = arith.constant 0 : index
    %c0_10 = arith.constant 0 : index
    %14 = vector.load %arg6[%c0_9, %c0_10] : memref<4x1xf32, #tpu.memory_space<vmem>>, vector<4x1xf32>
    %15 = vector.broadcast %14 : vector<4x1xf32> to vector<4x256xf32>
    %16 = arith.addf %13, %15 : vector<4x256xf32>
    %c0_11 = arith.constant 0 : index
    %c0_12 = arith.constant 0 : index
    %c0_13 = arith.constant 0 : index
    %17 = vector.load %arg7[%c0_11, %c0_12, %c0_13] : memref<1x4x256xf32, #tpu.memory_space<vmem>>, vector<1x4x256xf32>
    %18 = vector.shape_cast %17 : vector<1x4x256xf32> to vector<4x256xf32>
    %19 = vector.shape_cast %16 : vector<4x256xf32> to vector<1x4x256xf32>
    tpu.vector_store %arg7[%c0_11, %c0_12, %c0_13], %19 {strides = array<i32>} : memref<1x4x256xf32, #tpu.memory_space<vmem>>, vector<1x4x256xf32>,
    return
  }
  func.func @transform_0(%arg0: i32, %arg1: i32) -> (i32, i32, i32) {
    %c0_i32 = arith.constant 0 : i32
    %c0_i32_0 = arith.constant 0 : i32
    return %arg0, %c0_i32, %arg1 : i32, i32, i32
  }
  func.func @transform_1(%arg0: i32, %arg1: i32) -> (i32, i32) {
    %c0_i32 = arith.constant 0 : i32
    %c0_i32_0 = arith.constant 0 : i32
    %c0_i32_1 = arith.constant 0 : i32
    return %c0_i32, %c0_i32_0 : i32, i32
  }
  func.func @transform_2(%arg0: i32, %arg1: i32) -> (i32, i32) {
    %c0_i32 = arith.constant 0 : i32
    %c0_i32_0 = arith.constant 0 : i32
    %c0_i32_1 = arith.constant 0 : i32
    return %c0_i32, %c0_i32_0 : i32, i32
  }
  func.func @transform_3(%arg0: i32, %arg1: i32) -> (i32, i32) {
    %c0_i32 = arith.constant 0 : i32
    %c0_i32_0 = arith.constant 0 : i32
    %c0_i32_1 = arith.constant 0 : i32
    return %c0_i32, %c0_i32_0 : i32, i32
  }
  func.func @transform_4(%arg0: i32, %arg1: i32) -> (i32, i32) {
    %c0_i32 = arith.constant 0 : i32
    %c0_i32_0 = arith.constant 0 : i32
    %c0_i32_1 = arith.constant 0 : i32
    return %c0_i32, %c0_i32_0 : i32, i32
  }
  func.func @transform_5(%arg0: i32, %arg1: i32) -> (i32, i32, i32) {
    %c0_i32 = arith.constant 0 : i32
    %c0_i32_0 = arith.constant 0 : i32
    return %arg0, %c0_i32, %arg1 : i32, i32, i32
  }
}

</mosaic_0001>

<bundles_post_ra>
// kernel: decoder_block_forward.4
= control target key start
LH: loop header
LB: loop body
LE: loop exit
PB: predicated region body
PF: predicated region fallthrough
CT: control target
= control target key end

     0   :  { %s712_s15 = smov 0   ;;  %s1019_s0 = inlined_call_operand.vmem [shape: f32[2,8,8,4], index: 0, kind: input, shape index: {}]   ;;  %s1020_s1 = inlined_call_operand.vmem [shape: f32[2,8,8,4], index: 1, kind: input, shape index: {}]   ;;  %s1021_s2 = inlined_call_operand.vmem [shape: f32[2,8,8,4], index: 2, kind: input, shape index: {}]   ;;  %s1022_s3 = inlined_call_operand.vmem [shape: f32[2,8,8,4], index: 3, kind: input, shape index: {}]   ;;  %s1023_s4 = inlined_call_operand.vmem [shape: bf16[16,2,8,8], index: 4, kind: output, shape index: {}]  }
   0x1 LB: > { %s718_s16 = sadd.s32 4294967295, %s684_s15   ;;  %p602_p0 = scmp.ge.s32.totalorder %s684_s15, 1  ;;  %s684_s15 = sphi %s712_s15, %s14_s15  }
   0x2   : > { %p192_p1 = scmp.lt.s32.totalorder %s684_s15, 3 }
   0x4   : > { %p193_p2 = pnand %p602_p0, %p192_p1 }
   0x5   : > { %p234_p3 = scmp.lt.s32.totalorder (!%p193_p2), %s718_s16, 1  ;;  %s686_s5 = smov (!%p193_p2), 4  }
   0x6   : > { %196 = sbr.rel (%p193_p2) target bundleno = 169 (0xa9), region = 36  ;;  %s611_s6 = sshll.u32 (!%p193_p2), %s718_s16, 3 }
   0x7   : > { %p255_p4 = scmp.lt.s32.totalorder (!%p193_p2), %s611_s6, 15 }
   0xb   : > { %s235_s17 = scalar_select %p234_p3, %s718_s16, 1  ;;  %vm421_vm0 = vcmask 31744   ;;  %vm438_vm1 = vcmask 60416  }
   0xc   : > { %s1026_s6 = smov (!%p255_p4, %s611_s6), 15 }
   0xd   : > { %s624_s18 = sshll.u32 %s235_s17, 6  ;;  %s628_s7 = sshll.u32 %s1026_s6, 3 }
   0xe   : > { %s727_s21 = scalar_lea.vmem %s1019_s0, %s624_s18  ;;  %s732_s24 = scalar_lea.vmem %s1020_s1, %s624_s18 }
   0xf   : > { %s737_s27 = scalar_lea.vmem %s1021_s2, %s624_s18  ;;  %s742_s30 = scalar_lea.vmem %s1022_s3, %s624_s18  ;;  %v265_v0 = vld [vmem:[%s727_s21 + $0x20] sm:$0xff]  ;;  %v266_v1 = vld [vmem:[%s727_s21 + $0x28] sm:$0xff]  ;;  %v267_v28 = vld [vmem:[%s727_s21 + $0x30] sm:$0xff] }
  0x10   : > { %v273_v2 = vld [vmem:[%s732_s24 + $0x20] sm:$0xff]  ;;  %v274_v3 = vld [vmem:[%s732_s24 + $0x28] sm:$0xff]  ;;  %v268_v33 = vld [vmem:[%s727_s21 + $0x38] sm:$0xff]  ;;  %s940_s10 = scalar_lea.vmem %s1023_s4, %s628_s7 }
  0x11   : > { %v281_v4 = vld [vmem:[%s737_s27 + $0x20] sm:$0xff]  ;;  %v282_v5 = vld [vmem:[%s737_s27 + $0x28] sm:$0xff]  ;;  %v275_v34 = vld [vmem:[%s732_s24 + $0x30] sm:$0xff] }
  0x12   : > { %v289_v6 = vld [vmem:[%s742_s30 + $0x20] sm:$0xff]  ;;  %v290_v7 = vld [vmem:[%s742_s30 + $0x28] sm:$0xff]  ;;  %v752_v8 = vsub.f32 %v273_v2, %v281_v4  ;;  %v754_v9 = vsub.f32 %v274_v3, %v282_v5  ;;  %v762_v13 = vadd.f32 %v282_v5, %v274_v3  ;;  %v773_v17 = vadd.f32 %v281_v4, %v273_v2  ;;  %v283_v35 = vld [vmem:[%s737_s27 + $0x30] sm:$0xff] }
  0x13   : > { %v756_v10 = vadd.f32 %v290_v7, %v266_v1  ;;  %v758_v11 = vsub.f32 %v265_v0, %v289_v6  ;;  %v760_v12 = vsub.f32 %v266_v1, %v290_v7  ;;  %v765_v14 = vld [vmem:[%s727_s21] sm:$0xff]  ;;  %v768_v15 = vld [vmem:[%s727_s21 + $0x8] sm:$0xff]  ;;  %v775_v18 = vadd.f32 %v289_v6, %v265_v0  ;;  %v276_v38 = vld [vmem:[%s732_s24 + $0x38] sm:$0xff] }
  0x14   : > { %v771_v16 = vld [vmem:[%s732_s24] sm:$0xff]  ;;  %v778_v19 = vld [vmem:[%s732_s24 + $0x8] sm:$0xff]  ;;  %v284_v39 = vld [vmem:[%s737_s27 + $0x38] sm:$0xff]  ;;  %v834_v49 = vsub.f32 %v275_v34, %v283_v35 }
  0x15   : > { %v781_v20 = vld [vmem:[%s737_s27] sm:$0xff]  ;;  %v330_v22 = vsub.f32 %v756_v10, %v762_v13  ;;  %v345_v23 = vadd.f32 %v752_v8, %v758_v11  ;;  %v346_v24 = vadd.f32 %v754_v9, %v760_v12  ;;  %v361_v25 = vsub.f32 %v758_v11, %v752_v8  ;;  %v795_v26 = vld [vmem:[%s737_s27 + $0x8] sm:$0xff]  ;;  %v291_v40 = vld [vmem:[%s742_s30 + $0x30] sm:$0xff] }
  0x16   : > { %v784_v21 = vld [vmem:[%s742_s30] sm:$0xff]  ;;  %v798_v27 = vld [vmem:[%s742_s30 + $0x8] sm:$0xff]  ;;  %v329_v30 = vsub.f32 %v775_v18, %v773_v17  ;;  %v821_v41 = vsub.f32 %v771_v16, %v781_v20  ;;  %v825_v42 = vsub.f32 %v778_v19, %v795_v26  ;;  %v292_v43 = vld [vmem:[%s742_s30 + $0x38] sm:$0xff]  ;;  %v830_v47 = vsub.f32 %v267_v28, %v291_v40 }
  0x17   : > { %v807_v31 = vsub.f32 %v765_v14, %v784_v21  ;;  %v811_v32 = vsub.f32 %v768_v15, %v798_v27  ;;  %v353_v36 = vmul.f32 0.5, %v345_v23  ;;  %v354_v37 = vmul.f32 0.5, %v346_v24  ;;  %v263_v44 = vld [vmem:[%s727_s21 + $0x10] sm:$0xff]  ;;  %v264_v45 = vld [vmem:[%s727_s21 + $0x18] sm:$0xff] }
  0x18   : > { %v832_v48 = vsub.f32 %v268_v33, %v292_v43  ;;  %v271_v50 = vld [vmem:[%s732_s24 + $0x10] sm:$0xff]  ;;  %v272_v51 = vld [vmem:[%s732_s24 + $0x18] sm:$0xff]  ;;  %v851_v60 = vsub.f32 %v276_v38, %v284_v39  ;;  %v347_v61 = vadd.f32 %v834_v49, %v830_v47  ;;  %v865_v7 = vadd.f32 %v291_v40, %v267_v28 }
  0x19   : > { %v648_v46 = vpack.i.bf16 %v354_v37, %v353_v36  ;;  %v279_v52 = vld [vmem:[%s737_s27 + $0x10] sm:$0xff]  ;;  %v341_v53 = vadd.f32 %v821_v41, %v807_v31  ;;  %v342_v54 = vadd.f32 %v825_v42, %v811_v32  ;;  %v357_v55 = vsub.f32 %v807_v31, %v821_v41  ;;  %v280_v57 = vld [vmem:[%s737_s27 + $0x18] sm:$0xff] }
  0x1a   : > { %v358_v56 = vsub.f32 %v811_v32, %v825_v42  ;;  %v287_v58 = vld [vmem:[%s742_s30 + $0x10] sm:$0xff]  ;;  %v288_v59 = vld [vmem:[%s742_s30 + $0x18] sm:$0xff]  ;;  %v348_v2 = vadd.f32 %v851_v60, %v832_v48  ;;  %v355_v3 = vmul.f32 0.5, %v347_v61  ;;  %v861_v4 = vsub.f32 %v271_v50, %v279_v52 }
  0x1b   : > { %649 = vrot.lane.b32.xlu1 %v648_v46, %s686_s5  ;;  %v855_v62 = vsub.f32 %v263_v44, %v287_v58  ;;  %v857_v63 = vsub.f32 %v264_v45, %v288_v59  ;;  %v349_v0 = vmul.f32 0.5, %v341_v53  ;;  %v350_v1 = vmul.f32 0.5, %v342_v54 }
  0x1c   : > { %v863_v5 = vsub.f32 %v272_v51, %v280_v57  ;;  %v867_v23 = vadd.f32 %v292_v43, %v268_v33  ;;  %v869_v24 = vadd.f32 %v283_v35, %v275_v34  ;;  %v356_v36 = vmul.f32 0.5, %v348_v2 }
  0x1d   : > { %v638_v6 = vpack.i.bf16 %v350_v1, %v349_v0  ;;  %v343_v37 = vadd.f32 %v861_v4, %v855_v62  ;;  %v875_v53 = vadd.f32 %v284_v39, %v276_v38  ;;  %v377_v38 = vadd.f32 %v773_v17, %v775_v18 }
  0x1e   : > { %v344_v46 = vadd.f32 %v863_v5, %v857_v63  ;;  %v379_v54 = vadd.f32 %v869_v24, %v865_v7  ;;  %v331_v28 = vsub.f32 %v865_v7, %v869_v24  ;;  %v653_v33 = vpack.i.bf16 %v356_v36, %v355_v3 }
  0x1f   : > { %639 = vrot.lane.b32.xlu0 %v638_v6, %s686_s5  ;;  %v351_v34 = vmul.f32 0.5, %v343_v37  ;;  %v332_v40 = vsub.f32 %v867_v23, %v875_v53  ;;  %v380_v43 = vadd.f32 %v875_v53, %v867_v23  ;;  %v378_v39 = vadd.f32 %v762_v13, %v756_v10 }
  0x20   : > { %v352_v35 = vmul.f32 0.5, %v344_v46  ;;  %v387_v61 = vmul.f32 0.5, %v379_v54  ;;  %v893_v0 = vadd.f32 %v784_v21, %v765_v14  ;;  %v294_v1 = vadd.f32 %v798_v27, %v768_v15 }
  0x21   : > { %v309_v2 = vadd.f32 %v781_v20, %v771_v16  ;;  %v388_v6 = vmul.f32 0.5, %v380_v43  ;;  %v310_v36 = vadd.f32 %v795_v26, %v778_v19  ;;  %v901_v37 = vadd.f32 %v287_v58, %v263_v44 }
  0x22   : > { %v643_v3 = vpack.i.bf16 %v352_v35, %v351_v34  ;;  %v907_v14 = vadd.f32 %v279_v52, %v271_v50  ;;  %v385_v21 = vmul.f32 0.5, %v377_v38  ;;  %v909_v29 = vadd.f32 %v280_v57, %v272_v51 }
  0x23   : > { %654 = vrot.lane.b32.xlu1 %v653_v33, %s686_s5  ;;  %v373_v46 = vadd.f32 %v309_v2, %v893_v0  ;;  %v325_v54 = vsub.f32 %v893_v0, %v309_v2  ;;  %v905_v33 = vadd.f32 %v288_v59, %v264_v45  ;;  %v326_v15 = vsub.f32 %v294_v1, %v310_v36 }
  0x24   : > { %v374_v27 = vadd.f32 %v310_v36, %v294_v1  ;;  %v673_v16 = vpack.i.bf16 %v388_v6, %v387_v61  ;;  %v386_v20 = vmul.f32 0.5, %v378_v39  ;;  %v327_v19 = vsub.f32 %v901_v37, %v907_v14 }
  0x25   : > { %v381_v34 = vmul.f32 0.5, %v373_v46  ;;  %v328_v44 = vsub.f32 %v905_v33, %v909_v29  ;;  %v375_v45 = vadd.f32 %v907_v14, %v901_v37  ;;  %v376_v50 = vadd.f32 %v909_v29, %v905_v33 }
  0x26   : > { %v382_v26 = vmul.f32 0.5, %v374_v27  ;;  %v668_v52 = vpack.i.bf16 %v386_v20, %v385_v21  ;;  %v365_v35 = vmul.f32 0.5, %v357_v55  ;;  %v366_v43 = vmul.f32 0.5, %v358_v56 }
  0x27   : > { %644 = vrot.lane.b32.xlu0 %v643_v3, %s686_s5  ;;  %v383_v57 = vmul.f32 0.5, %v375_v45  ;;  %v384_v58 = vmul.f32 0.5, %v376_v50  ;;  %v359_v2 = vsub.f32 %v855_v62, %v861_v4  ;;  %v360_v31 = vsub.f32 %v857_v63, %v863_v5 }
  0x28   : > { %v658_v51 = vpack.i.bf16 %v382_v26, %v381_v34  ;;  %v338_v32 = vmul.f32 0.5, %v330_v22  ;;  %v337_v42 = vmul.f32 0.5, %v329_v30  ;;  %v334_v10 = vmul.f32 0.5, %v326_v15 }
  0x29   : > { %v663_v59 = vpack.i.bf16 %v384_v58, %v383_v57  ;;  %v367_v62 = vmul.f32 0.5, %v359_v2  ;;  %v368_v63 = vmul.f32 0.5, %v360_v31  ;;  %v333_v13 = vmul.f32 0.5, %v325_v54 }
  0x2a   : > { %659 = vrot.lane.b32.xlu2 %v658_v51, %s686_s5  ;;  %v339_v34 = vmul.f32 0.5, %v331_v28  ;;  %v340_v26 = vmul.f32 0.5, %v332_v40  ;;  %v363_v24 = vsub.f32 %v830_v47, %v834_v49  ;;  %v364_v53 = vsub.f32 %v832_v48, %v851_v60 }
  0x2b   : > { %674 = vrot.lane.b32.xlu1 %v673_v16, %s686_s5  ;;  %v1024_v2 = vsub.f32 %v760_v12, %v754_v9 }
  0x2c   : > { %v371_v48 = vmul.f32 0.5, %v363_v24  ;;  %v372_v60 = vmul.f32 0.5, %v364_v53 }
  0x2d   : > { %v370_v31 = vmul.f32 0.5, %v1024_v2 }
  0x2f   : > { %669 = vrot.lane.b32.xlu0 %v668_v52, %s686_s5 }
  0x32   : > { %664 = vrot.lane.b32.xlu2 %v663_v59, %s686_s5 }
  0x84   : > { %v660_v38 = vpop.permute.xlu2 %659 }
  0x85   : > { %v662_v39 = vunpack.i.h.bf16 %v660_v38  ;;  %v661_v61 = vunpack.i.l.bf16 %v660_v38 }
  0x87   : > { %v480_v0 = vsel %vm421_vm0, %v366_v43, %v662_v39  ;;  %v479_v1 = vsel %vm421_vm0, %v365_v35, %v661_v61  ;;  %v335_v35 = vmul.f32 0.5, %v327_v19  ;;  %v336_v43 = vmul.f32 0.5, %v328_v44 }
  0x88   : > { %v488_v41 = vpack.c.bf16 %v480_v0, %v480_v0  ;;  %v487_v55 = vpack.c.bf16 %v479_v1, %v479_v1  ;;  %v369_v1 = vmul.f32 0.5, %v361_v25 }
  0x8a   : > { %615 = vst.msk [vmem:[%s940_s10 + $0xc] sm:$0xf] %vm438_vm1, %v488_v41 }
  0x8b   : > { %614 = vst.msk [vmem:[%s940_s10 + $0x4] sm:$0xf] %vm438_vm1, %v487_v55 }
  0x8c   : > { %v665_v3 = vpop.permute.xlu2 %664 }
  0x8d   : > { %v650_v56 = vpop.permute.xlu1 %649  ;;  %v667_v6 = vunpack.i.h.bf16 %v665_v3  ;;  %v666_v36 = vunpack.i.l.bf16 %v665_v3 }
  0x8e   : > { %v652_v4 = vunpack.i.h.bf16 %v650_v56  ;;  %v651_v5 = vunpack.i.l.bf16 %v650_v56 }
  0x8f   : > { %v482_v46 = vsel %vm421_vm0, %v368_v63, %v667_v6  ;;  %v481_v21 = vsel %vm421_vm0, %v367_v62, %v666_v36 }
  0x90   : > { %v427_v22 = vsel %vm421_vm0, %v338_v32, %v652_v4  ;;  %v426_v17 = vsel %vm421_vm0, %v337_v42, %v651_v5  ;;  %v490_v16 = vpack.c.bf16 %v482_v46, %v482_v46  ;;  %v489_v20 = vpack.c.bf16 %v481_v21, %v481_v21 }
  0x91   : > { %v435_v18 = vpack.c.bf16 %v427_v22, %v427_v22  ;;  %v434_v30 = vpack.c.bf16 %v426_v17, %v426_v17  ;;  %v640_v27 = vpop.permute.xlu0 %639 }
  0x92   : > { %v642_v15 = vunpack.i.h.bf16 %v640_v27  ;;  %v641_v54 = vunpack.i.l.bf16 %v640_v27  ;;  %617 = vst.msk [vmem:[%s940_s10 + $0x1c] sm:$0xf] %vm438_vm1, %v490_v16 }
  0x93   : > { %444 = vst.msk [vmem:[%s940_s10 + $0x28] sm:$0xf] %vm438_vm1, %v435_v18 }
  0x94   : > { %443 = vst.msk [vmem:[%s940_s10 + $0x20] sm:$0xf] %vm438_vm1, %v434_v30  ;;  %v423_v45 = vsel %vm421_vm0, %v334_v10, %v642_v15  ;;  %v422_v50 = vsel %vm421_vm0, %v333_v13, %v641_v54 }
  0x95   : > { %v655_v51 = vpop.permute.xlu1 %654  ;;  %v431_v52 = vpack.c.bf16 %v423_v45, %v423_v45  ;;  %v430_v57 = vpack.c.bf16 %v422_v50, %v422_v50  ;;  %616 = vst.msk [vmem:[%s940_s10 + $0x14] sm:$0xf] %vm438_vm1, %v489_v20 }
  0x96   : > { %v657_v58 = vunpack.i.h.bf16 %v655_v51  ;;  %v656_v59 = vunpack.i.l.bf16 %v655_v51 }
  0x97   : > { %440 = vst.msk [vmem:[%s940_s10 + $0x8] sm:$0xf] %vm438_vm1, %v431_v52 }
  0x98   : > { %v429_v7 = vsel %vm421_vm0, %v340_v26, %v657_v58  ;;  %v428_v23 = vsel %vm421_vm0, %v339_v34, %v656_v59  ;;  %439 = vst.msk [vmem:[%s940_s10] sm:$0xf] %vm438_vm1, %v430_v57 }
  0x99   : > { %v437_v28 = vpack.c.bf16 %v429_v7, %v429_v7  ;;  %v436_v40 = vpack.c.bf16 %v428_v23, %v428_v23  ;;  %v645_v38 = vpop.permute.xlu0 %644 }
  0x9a   : > { %v647_v47 = vunpack.i.h.bf16 %v645_v38  ;;  %v646_v49 = vunpack.i.l.bf16 %v645_v38 }
  0x9b   : > { %446 = vst.msk [vmem:[%s940_s10 + $0x38] sm:$0xf] %vm438_vm1, %v437_v28 }
  0x9c   : > { %445 = vst.msk [vmem:[%s940_s10 + $0x30] sm:$0xf] %vm438_vm1, %v436_v40  ;;  %v425_v39 = vsel %vm421_vm0, %v336_v43, %v647_v47  ;;  %v424_v37 = vsel %vm421_vm0, %v335_v35, %v646_v49 }
  0x9d   : > { %v675_v14 = vpop.permute.xlu1 %674  ;;  %v433_v19 = vpack.c.bf16 %v425_v39, %v425_v39  ;;  %v432_v29 = vpack.c.bf16 %v424_v37, %v424_v37 }
  0x9e   : > { %v677_v33 = vunpack.i.h.bf16 %v675_v14  ;;  %v676_v44 = vunpack.i.l.bf16 %v675_v14 }
  0x9f   : > { %442 = vst.msk [vmem:[%s940_s10 + $0x18] sm:$0xf] %vm438_vm1, %v433_v19 }
  0xa0   : > { %v486_v61 = vsel %vm421_vm0, %v372_v60, %v677_v33  ;;  %v485_v0 = vsel %vm421_vm0, %v371_v48, %v676_v44  ;;  %441 = vst.msk [vmem:[%s940_s10 + $0x10] sm:$0xf] %vm438_vm1, %v432_v29 }
  0xa1   : > { %v494_v41 = vpack.c.bf16 %v486_v61, %v486_v61  ;;  %v493_v55 = vpack.c.bf16 %v485_v0, %v485_v0  ;;  %v670_v32 = vpop.permute.xlu0 %669 }
  0xa2   : > { %v672_v42 = vunpack.i.h.bf16 %v670_v32  ;;  %v671_v56 = vunpack.i.l.bf16 %v670_v32 }
  0xa3   : > { %621 = vst.msk [vmem:[%s940_s10 + $0x3c] sm:$0xf] %vm438_vm1, %v494_v41 }
  0xa4   : > { %620 = vst.msk [vmem:[%s940_s10 + $0x34] sm:$0xf] %vm438_vm1, %v493_v55  ;;  %v484_v62 = vsel %vm421_vm0, %v370_v31, %v672_v42  ;;  %v483_v8 = vsel %vm421_vm0, %v369_v1, %v671_v56 }
  0xa5   : > { %v492_v11 = vpack.c.bf16 %v484_v62, %v484_v62  ;;  %v491_v25 = vpack.c.bf16 %v483_v8, %v483_v8 }
  0xa7   : > { %619 = vst.msk [vmem:[%s940_s10 + $0x2c] sm:$0xf] %vm438_vm1, %v492_v11 }
  0xa8   : > { %618 = vst.msk [vmem:[%s940_s10 + $0x24] sm:$0xf] %vm438_vm1, %v491_v25 }
  0xa9 PF: > { %s14_s15 = sadd.s32 1, %s684_s15  }
  0xaa   : > { %p11_p5 = scmp.ge.s32.totalorder %s14_s15, 4  }
  0xac   :  { %13 = sbr.rel (!%p11_p5) target bundleno = 1 (0x1), region = 76 }

// kernel: decoder_block_forward.7
= control target key start
LH: loop header
LB: loop body
LE: loop exit
PB: predicated region body
PF: predicated region fallthrough
CT: control target
= control target key end

     0   :  { %s522_s18 = smov 0   ;;  %s524_s19 = smov 0   ;;  %s573_s0 = inlined_call_operand.vmem [shape: bf16[2,8,256], index: 0, kind: input, shape index: {}]   ;;  %s574_s1 = inlined_call_operand.vmem [shape: f32[8,1], index: 1, kind: input, shape index: {}]   ;;  %s575_s2 = inlined_call_operand.vmem [shape: f32[8,1], index: 2, kind: input, shape index: {}]   ;;  %s576_s3 = inlined_call_operand.vmem [shape: bf16[4,8], index: 3, kind: input, shape index: {}]   ;;  %s577_s4 = inlined_call_operand.vmem [shape: f32[4,1], index: 4, kind: input, shape index: {}]   ;;  %s578_s5 = inlined_call_operand.vmem [shape: f32[2,4,256], index: 5, kind: output, shape index: {}]  }
   0x1   :  { %s526_s20 = smov 0  }
   0x2 LB: > { %s27_s21 = sadd.s32 1, %s485_s19  ;;  %p429_p0 = scmp.ge.s32.totalorder %s489_s20, 1  ;;  %s489_s20 = sphi %s526_s20, %s15_s20   ;;  %s485_s19 = sphi %s524_s19, %s580_s19   ;;  %s481_s18 = sphi %s522_s18, %s579_s18  }
   0x3   : > { %p29_p1 = scmp.ge.s32.totalorder %s27_s21, 2  ;;  %p208_p2 = scmp.lt.s32.totalorder %s489_s20, 3 }
   0x5   : > { %s582_s21 = smov (%p29_p1, %s27_s21), 0  ;;  %p209_p3 = pnand %p429_p0, %p208_p2 }
   0x6   : > { %p245_p4 = scmp.lt.s32.totalorder (!%p209_p3), %s481_s18, 1 }
   0x7   : > { %212 = sbr.rel (%p209_p3) target bundleno = 281 (0x119), region = 40 }
   0xc   : > { %v268_v0 = vld [vmem:[%s574_s1] sm:$0xff]  ;;  %v491_v1 = vmov 0   ;;  %s584_s18 = smov (!%p245_p4, %s481_s18), 1  ;;  %vm299_vm0 = vcmask 1043456   ;;  %vm295_vm1 = vcmask 64512  }
   0xd   : > { %465 = vset.pattern.permute.xlu0 %v491_v1  ;;  %466 = vset.pattern.permute.xlu1 %v491_v1  ;;  %v276_v2 = vld [vmem:[%s575_s2] sm:$0xff]  ;;  %s438_s28 = sshll.u32 %s584_s18, 3 }
   0xe   : > { %271 = vperm.xlu0 %465, %v268_v0   ;;  %v289_v3 = vld [vmem:[%s577_s4] sm:$0xf]  ;;  %s252_s6 = scalar_lea.vmem %s573_s0, %s438_s28  ;;  %s262_s11 = scalar_lea.vmem %s578_s5, %s438_s28 }
   0xf   : > { %292 = vperm.xlu1 %466, %v289_v3   ;;  %v265_v5 = vld [vmem:[%s252_s6] sm:$0xff] }
  0x10   : > { %v266_v6 = vunpack.c.l.bf16 %v265_v5  ;;  %v267_v7 = vunpack.c.h.bf16 %v265_v5  ;;  %v288_v19 = vld [vmem:[%s576_s3] sm:$0x3] }
  0x16   : > { %279 = vperm.xlu0 %465, %v276_v2  }
  0x80   : > { %v272_v4 = vpop.permute.xlu0 %271 }
  0x81   : > { %v274_v8 = vmul.f32 %v272_v4, %v266_v6  ;;  %v275_v9 = vmul.f32 %v272_v4, %v267_v7  ;;  %v293_v20 = vpop.permute.xlu1 %292 }
  0x88   : > { %v280_v10 = vpop.permute.xlu0 %279 }
  0x89   : > { %v282_v11 = vadd.f32 %v280_v10, %v274_v8  ;;  %v283_v12 = vadd.f32 %v280_v10, %v275_v9 }
  0x8b   : > { %v284_v13 = vmax.f32 %v282_v11, 0.0  ;;  %v285_v14 = vmax.f32 %v283_v12, 0.0 }
  0x8d   : > { %v286_v15 = vpack.c.bf16 %v284_v13, %v284_v13  ;;  %v287_v16 = vpack.c.bf16 %v285_v14, %v285_v14 }
  0x8f   : > { %v301_v17 = vsel %vm299_vm0, %v286_v15, 0  ;;  %v304_v18 = vsel %vm299_vm0, %v287_v16, 0 }
  0x90   : > { %313 = vmatpush.bf16.msra.mxu0 %v301_v17  ;;  %326 = vmatpush.bf16.msra.mxu1 %v304_v18 }
  0x93   : > { %434 = vmatmul.msk.bf16.vlgmr.msra.gmra.mxu0 %vm295_vm1, %v288_v19  ;;  %435 = vmatmul.msk.bf16.vlgmr.msra.gmra.mxu1 %vm295_vm1, %v288_v19 }
 0x110   : > { %v315_v21 = vpop.f32.mrf.mxu0  ;;  %v328_v22 = vpop.f32.mrf.mxu1 }
 0x111   : > { %v329_v23 = vadd.f32 %v328_v22, %v293_v20  ;;  %v316_v24 = vadd.f32 %v315_v21, %v293_v20 }
 0x113   : > { %v334_v25 = vrot.slane %v329_v23, 4 }
 0x115   : > { %v335_v26 = vsel %vm299_vm0, %v316_v24, %v334_v25 }
 0x116   : > { %337 = vst [vmem:[%s262_s11] sm:$0xff] %v335_v26 }
 0x118   : > { %v317_v27 = vpop.f32.mrf.mxu0  ;;  %v330_v28 = vpop.f32.mrf.mxu1 }
 0x119 PF: > { %s15_s20 = sadd.s32 1, %s489_s20   ;;  %s579_s18 = smov %s485_s19 }
 0x11a   : > { %p12_p5 = scmp.ge.s32.totalorder %s15_s20, 4   ;;  %s580_s19 = smov %s582_s21 }
 0x11c   :  { %14 = sbr.rel (!%p12_p5) target bundleno = 2 (0x2), region = 70 }

// kernel: decoder_block_forward.6
= control target key start
LH: loop header
LB: loop body
LE: loop exit
PB: predicated region body
PF: predicated region fallthrough
CT: control target
= control target key end

     0   :  { %s4746_s18 = smov 0   ;;  %s6510_s0 = inlined_call_operand.vmem [shape: bf16[2,8,256], index: 0, kind: input, shape index: {}]   ;;  %s6511_s1 = inlined_call_operand.vmem [shape: f32[8,1], index: 1, kind: input, shape index: {}]   ;;  %s6512_s2 = inlined_call_operand.vmem [shape: f32[8,1], index: 2, kind: input, shape index: {}]   ;;  %s6513_s3 = inlined_call_operand.vmem [shape: bf16[72,8], index: 3, kind: input, shape index: {}]   ;;  %s6514_s4 = inlined_call_operand.vmem [shape: bf16[2,8,256], index: 4, kind: output, shape index: {0}]   ;;  %s6515_s5 = inlined_call_operand.vmem [shape: f32[2,2,8], index: 5, kind: output, shape index: {1}]  }
   0x1 LB: > { %s4186_s19 = sadd.s32 4294967295, %s4705_s18   ;;  %p4190_p0 = scmp.ge.s32.totalorder %s4705_s18, 1  ;;  %s4705_s18 = sphi %s4746_s18, %s16_s18  }
   0x2   : > { %p190_p1 = scmp.lt.s32.totalorder %s4705_s18, 3 }
   0x4   : > { %p191_p2 = pnand %p4190_p0, %p190_p1 }
   0x5   : > { %p222_p3 = scmp.lt.s32.totalorder (!%p191_p2), %s4186_s19, 1  ;;  %s4708_s28 = smov (!%p191_p2), 16  }
   0x6   : > { %194 = sbr.rel (%p191_p2) target bundleno = 1143 (0x477), region = 36  ;;  %s4709_s29 = smov (!%p191_p2), 24  }
   0x7   : > { %s4710_s30 = smov (!%p191_p2), 8   ;;  %s4711_s6 = smov (!%p191_p2), 40  }
   0x8   : > { %s4712_s7 = smov (!%p191_p2), 32   ;;  %s4713_s8 = smov (!%p191_p2), 48  }
   0x9   : > { %s4714_s9 = smov (!%p191_p2), 64   ;;  %s4715_s10 = smov (!%p191_p2), 56  }
   0xb   : > { %v296_v0 = vld [vmem:[%s6511_s1] sm:$0xff]  ;;  %v4707_v1 = vmov 0   ;;  %vm237_vm0 = vcmask 60416   ;;  %s6527_s19 = smov (!%p222_p3, %s4186_s19), 1  ;;  %vm240_vm1 = vcmask 57344   ;;  %vm1350_vm2 = vcmask 1042432  }
   0xc   : > { %4557 = vset.pattern.permute.xlu0 %v4707_v1  ;;  %v304_v2 = vld [vmem:[%s6512_s2] sm:$0xff]  ;;  %242 = vst.msk [vmem:[#allocation2 + $0xc] sm:$0xf] %vm237_vm0, %v4707_v1  ;;  %s4470_s24 = sshll.u32 %s6527_s19, 3  ;;  %vm1351_vm3 = vcmask 1046532   ;;  %vm3418_vm14 = vcmask 64512  }
   0xd   : > { %299 = vperm.xlu0 %4557, %v296_v0   ;;  %266 = vst.msk [vmem:[#allocation2 + $0x6c] sm:$0xf] %vm237_vm0, %v4707_v1  ;;  %s226_s27 = scalar_lea.vmem %s6510_s0, %s4470_s24  ;;  %vm4872_vm4 = vmor %vm1350_vm2, %vm1351_vm3  ;;  %vm735_vm5 = vsmask.f32 7938  ;;  %vm410_vm7 = vsmask.f32 256 }
   0xe   : > { %238 = vst.msk [vmem:[#allocation2] sm:$0xf] %vm237_vm0, %v4707_v1  ;;  %v293_v4 = vld [vmem:[%s226_s27] sm:$0xff]  ;;  %vm4893_vm6 = vmand %vm237_vm0, %vm735_vm5  ;;  %vm411_vm8 = vsmask.f32 4368  ;;  %vm3467_vm15 = vcmask 130048  }
   0xf   : > { %239 = vst.msk [vmem:[#allocation2 + $0x4] sm:$0xf] %vm237_vm0, %v4707_v1  ;;  %v294_v5 = vunpack.c.l.bf16 %v293_v4  ;;  %v295_v6 = vunpack.c.h.bf16 %v293_v4  ;;  %vm899_vm9 = vsmask.f32 3328  ;;  %vm900_vm10 = vsmask.f32 7440  ;;  %vm4906_vm11 = vmor %vm410_vm7, %vm411_vm8 }
  0x10   : > { %243 = vst.msk [vmem:[#allocation2 + $0x10] sm:$0xf] %vm237_vm0, %v4707_v1  ;;  %vm4912_vm12 = vmand %vm240_vm1, %vm410_vm7  ;;  %vm3566_vm2 = vcmask 326656   ;;  %vm3599_vm3 = vcmask 392192   ;;  %vm3767_vm5 = vcmask 1043456   ;;  %vm3665_vm7 = vcmask 523264  }
  0x11   : > { %245 = vst.msk [vmem:[#allocation2 + $0x18] sm:$0xf] %vm237_vm0, %v4707_v1  ;;  %vm4937_vm13 = vmor %vm899_vm9, %vm900_vm10  ;;  %vm3734_vm8 = vcmask 588800   ;;  %s4195_s23 = sshll.u32 %s6527_s19, 1  ;;  %vm4032_vm9 = vcmask 58368  }
  0x12   : > { %246 = vst.msk [vmem:[#allocation2 + $0x1c] sm:$0xf] %vm237_vm0, %v4707_v1  ;;  %s235_s27 = scalar_lea.vmem %s6515_s5, %s4195_s23 }
  0x13   : > { %248 = vst.msk [vmem:[#allocation2 + $0x24] sm:$0xf] %vm237_vm0, %v4707_v1  ;;  %v737_v40 = vld [vmem:[#allocation2 + $0xc] sm:$0xf] }
  0x14   : > { %249 = vst.msk [vmem:[#allocation2 + $0x28] sm:$0xf] %vm237_vm0, %v4707_v1  ;;  %v795_v41 = vld [vmem:[#allocation2 + $0x6c] sm:$0xf] }
  0x15   : > { %307 = vperm.xlu0 %4557, %v304_v2   ;;  %251 = vst.msk [vmem:[#allocation2 + $0x30] sm:$0xf] %vm237_vm0, %v4707_v1  ;;  %v1286_v18 = vld [vmem:[#allocation2] sm:$0xe] }
  0x16   : > { %252 = vst.msk [vmem:[#allocation2 + $0x34] sm:$0xf] %vm237_vm0, %v4707_v1  ;;  %v4859_v15 = vld [vmem:[#allocation2 + $0x4] sm:$0xf]  ;;  %v4196_v19 = vrot.slane %v1286_v18, 9 }
  0x17   : > { %254 = vst.msk [vmem:[#allocation2 + $0x3c] sm:$0xf] %vm237_vm0, %v4707_v1  ;;  %v1355_v16 = vrot.slane %v4859_v15, 5  ;;  %v851_v47 = vld [vmem:[#allocation2] sm:$0xf]  ;;  %v916_v50 = vshrl.u32 %v4859_v15, 16 }
  0x18   : > { %255 = vst.msk [vmem:[#allocation2 + $0x40] sm:$0xf] %vm237_vm0, %v4707_v1  ;;  %v903_v51 = vshrl.u32 %v851_v47, 16  ;;  %v906_v54 = vshll.u32 %v851_v47, 16  ;;  %v912_v55 = vshll.u32 %v4859_v15, 16 }
  0x19   : > { %257 = vst.msk [vmem:[#allocation2 + $0x48] sm:$0xf] %vm237_vm0, %v4707_v1  ;;  %v1357_v20 = vrot.slane %v1355_v16, 4  ;;  %v1356_v23 = vsel %vm4872_vm4, %v4196_v19, %v1355_v16  ;;  %v918_v0 = vrot.slane %v916_v50, 4 }
  0x1a   : > { %258 = vst.msk [vmem:[#allocation2 + $0x4c] sm:$0xf] %vm237_vm0, %v4707_v1  ;;  %v2826_v25 = vunpack.c.l.b16 %v1356_v23  ;;  %v905_v61 = vrot.slane %v903_v51, 4  ;;  %v908_v62 = vrot.slane %v906_v54, 5  ;;  %v914_v63 = vrot.slane %v912_v55, 5 }
  0x1b   : > { %260 = vst.msk [vmem:[#allocation2 + $0x54] sm:$0xf] %vm237_vm0, %v4707_v1 }
  0x1c   : > { %261 = vst.msk [vmem:[#allocation2 + $0x58] sm:$0xf] %vm237_vm0, %v4707_v1  ;;  %v909_v19 = vor.u32 %v908_v62, %v905_v61 }
  0x1d   : > { %263 = vst.msk [vmem:[#allocation2 + $0x60] sm:$0xf] %vm237_vm0, %v4707_v1 }
  0x1e   : > { %264 = vst.msk [vmem:[#allocation2 + $0x64] sm:$0xf] %vm237_vm0, %v4707_v1 }
  0x1f   : > { %267 = vst.msk [vmem:[#allocation2 + $0x70] sm:$0xf] %vm237_vm0, %v4707_v1 }
  0x20   : > { %269 = vst.msk [vmem:[#allocation2 + $0x78] sm:$0xf] %vm237_vm0, %v4707_v1 }
  0x21   : > { %270 = vst.msk [vmem:[#allocation2 + $0x7c] sm:$0xf] %vm237_vm0, %v4707_v1 }
  0x22   : > { %272 = vst.msk [vmem:[#allocation2 + $0x84] sm:$0xf] %vm237_vm0, %v4707_v1 }
  0x23   : > { %273 = vst.msk [vmem:[#allocation2 + $0x88] sm:$0xf] %vm237_vm0, %v4707_v1 }
  0x24   : > { %275 = vst.msk [vmem:[#allocation2 + $0x90] sm:$0xf] %vm237_vm0, %v4707_v1 }
  0x25   : > { %276 = vst.msk [vmem:[#allocation2 + $0x94] sm:$0xf] %vm237_vm0, %v4707_v1 }
  0x26   : > { %278 = vst.msk [vmem:[#allocation2 + $0x9c] sm:$0xf] %vm237_vm0, %v4707_v1 }
  0x27   : > { %279 = vst.msk [vmem:[#allocation2 + $0xa0] sm:$0xf] %vm237_vm0, %v4707_v1 }
  0x28   : > { %281 = vst.msk [vmem:[#allocation2 + $0xa8] sm:$0xf] %vm237_vm0, %v4707_v1 }
  0x29   : > { %282 = vst.msk [vmem:[#allocation2 + $0xac] sm:$0xf] %vm237_vm0, %v4707_v1 }
  0x2a   : > { %284 = vst.msk [vmem:[#allocation2 + $0xb4] sm:$0xf] %vm237_vm0, %v4707_v1 }
  0x2b   : > { %285 = vst.msk [vmem:[#allocation2 + $0xb8] sm:$0xf] %vm237_vm0, %v4707_v1 }
  0x2c   : > { %287 = vst.msk [vmem:[#allocation2 + $0xc0] sm:$0xf] %vm237_vm0, %v4707_v1 }
  0x2d   : > { %288 = vst.msk [vmem:[#allocation2 + $0xc4] sm:$0xf] %vm237_vm0, %v4707_v1 }
  0x2e   : > { %290 = vst.msk [vmem:[#allocation2 + $0xcc] sm:$0xf] %vm237_vm0, %v4707_v1 }
  0x2f   : > { %291 = vst.msk [vmem:[#allocation2 + $0xd0] sm:$0xf] %vm237_vm0, %v4707_v1 }
  0x30   : > { %244 = vst.msk [vmem:[#allocation2 + $0x14] sm:$0x1] %vm240_vm1, %v4707_v1 }
  0x31   : > { %268 = vst.msk [vmem:[#allocation2 + $0x74] sm:$0x1] %vm240_vm1, %v4707_v1 }
  0x32   : > { %241 = vst.msk [vmem:[#allocation2 + $0x8] sm:$0x1] %vm240_vm1, %v4707_v1 }
  0x33   : > { %247 = vst.msk [vmem:[#allocation2 + $0x20] sm:$0x1] %vm240_vm1, %v4707_v1 }
  0x34   : > { %250 = vst.msk [vmem:[#allocation2 + $0x2c] sm:$0x1] %vm240_vm1, %v4707_v1 }
  0x35   : > { %253 = vst.msk [vmem:[#allocation2 + $0x38] sm:$0x1] %vm240_vm1, %v4707_v1 }
  0x36   : > { %256 = vst.msk [vmem:[#allocation2 + $0x44] sm:$0x1] %vm240_vm1, %v4707_v1 }
  0x37   : > { %259 = vst.msk [vmem:[#allocation2 + $0x50] sm:$0x1] %vm240_vm1, %v4707_v1 }
  0x38   : > { %262 = vst.msk [vmem:[#allocation2 + $0x5c] sm:$0x1] %vm240_vm1, %v4707_v1 }
  0x39   : > { %265 = vst.msk [vmem:[#allocation2 + $0x68] sm:$0x1] %vm240_vm1, %v4707_v1  ;;  %v4866_v17 = vld [vmem:[#allocation2 + $0x8] sm:$0x1] }
  0x3a   : > { %271 = vst.msk [vmem:[#allocation2 + $0x80] sm:$0x1] %vm240_vm1, %v4707_v1  ;;  %v1358_v22 = vrot.slane %v4866_v17, 5  ;;  %v922_v57 = vshll.u32 %v4866_v17, 16 }
  0x3b   : > { %274 = vst.msk [vmem:[#allocation2 + $0x8c] sm:$0x1] %vm240_vm1, %v4707_v1 }
  0x3c   : > { %277 = vst.msk [vmem:[#allocation2 + $0x98] sm:$0x1] %vm240_vm1, %v4707_v1  ;;  %v1359_v24 = vsel %vm4872_vm4, %v1357_v20, %v1358_v22  ;;  %v919_v20 = vor.u32 %v918_v0, %v914_v63 }
  0x3d   : > { %280 = vst.msk [vmem:[#allocation2 + $0xa4] sm:$0x1] %vm240_vm1, %v4707_v1  ;;  %v2827_v26 = vunpack.c.l.b16 %v1359_v24 }
  0x3e   : > { %283 = vst.msk [vmem:[#allocation2 + $0xb0] sm:$0x1] %vm240_vm1, %v4707_v1 }
  0x3f   : > { %286 = vst.msk [vmem:[#allocation2 + $0xbc] sm:$0x1] %vm240_vm1, %v4707_v1  ;;  %v2858_v27 = vpack.c.b16 %v2827_v26, %v2826_v25 }
  0x40   : > { %289 = vst.msk [vmem:[#allocation2 + $0xc8] sm:$0x1] %vm240_vm1, %v4707_v1 }
  0x41   : > { %292 = vst.msk [vmem:[#allocation2 + $0xd4] sm:$0x1] %vm240_vm1, %v4707_v1  ;;  %2874 = vrot.lane.b32.xlu2 %v2858_v27, %s4708_s28  ;;  %vm3533_vm1 = vcmask 261120  }
  0x7f   : > { %v300_v3 = vpop.permute.xlu0 %299 }
  0x80   : > { %v302_v7 = vmul.f32 %v300_v3, %v294_v5  ;;  %v303_v8 = vmul.f32 %v300_v3, %v295_v6 }
  0x87   : > { %v308_v9 = vpop.permute.xlu0 %307 }
  0x88   : > { %v310_v10 = vadd.f32 %v308_v9, %v302_v7  ;;  %v311_v11 = vadd.f32 %v308_v9, %v303_v8  ;;  %v743_v8 = vld [vmem:[#allocation2 + $0x14] sm:$0x1] }
  0x89   : > { %v799_v9 = vld [vmem:[#allocation2 + $0x74] sm:$0x1] }
  0x8a   : > { %v312_v12 = vmax.f32 %v310_v10, 0.0  ;;  %v313_v13 = vmax.f32 %v311_v11, 0.0 }
  0x8c   : > { %v4558_v14 = vpack.i.bf16 %v313_v13, %v312_v12 }
  0x8e   : > { %4559 = vxpose.xlu1.b32.start.end [1/1] (short) %v4558_v14, 128 }
 0x132   : > { %v4560_v28 = vpop.trf.xlu1 }
 0x133   : > { %v4564_v29 = vunpack.i.h.bf16 %v4560_v28  ;;  %v4561_v30 = vunpack.i.l.bf16 %v4560_v28 }
 0x135   : > { %v394_v31 = vpack.c.bf16 %v4564_v29, %v4564_v29  ;;  %v378_v32 = vpack.c.bf16 %v4561_v30, %v4561_v30 }
 0x137   : > { %v550_v33 = vshrl.u32 %v394_v31, 16  ;;  %v414_v34 = vshrl.u32 %v378_v32, 16  ;;  %v553_v36 = vshll.u32 %v394_v31, 16  ;;  %v417_v38 = vshll.u32 %v378_v32, 16 }
 0x139   : > { %v552_v35 = vrot.slane %v550_v33, 7  ;;  %v416_v37 = vrot.slane %v414_v34, 7  ;;  %v746_v33 = vld [vmem:[#allocation2 + $0x18] sm:$0xf] }
 0x13a   : > { %v4565_v42 = vpop.trf.xlu1  ;;  %v802_v34 = vld [vmem:[#allocation2 + $0x78] sm:$0xf] }
 0x13b   : > { %v555_v43 = vor.u32 %v553_v36, %v552_v35  ;;  %v419_v44 = vor.u32 %v417_v38, %v416_v37  ;;  %v4569_v45 = vunpack.i.h.bf16 %v4565_v42  ;;  %v4566_v46 = vunpack.i.l.bf16 %v4565_v42 }
 0x13c   : > { %v556_v56 = vrot.slane %v552_v35, 4  ;;  %v420_v58 = vrot.slane %v416_v37, 4  ;;  %v910_v37 = vrot.slane %v909_v19, 4  ;;  %v920_v42 = vrot.slane %v919_v20, 4 }
 0x13d   : > { %v796_v48 = vsel %vm4893_vm6, %v555_v43, %v795_v41  ;;  %v738_v49 = vsel %vm4893_vm6, %v419_v44, %v737_v40  ;;  %v395_v52 = vpack.c.bf16 %v4569_v45, %v4569_v45  ;;  %v379_v53 = vpack.c.bf16 %v4566_v46, %v4566_v46 }
 0x13e   : > { %797 = vst [vmem:[#allocation2 + $0x6c] sm:$0xf] %v796_v48  ;;  %v924_v43 = vrot.slane %v922_v57, 5  ;;  %v915_v45 = vsel %vm4937_vm13, %v910_v37, %v914_v63 }
 0x13f   : > { %739 = vst [vmem:[#allocation2 + $0xc] sm:$0xf] %v738_v49  ;;  %v558_v59 = vshrl.u32 %v395_v52, 16  ;;  %v422_v60 = vshrl.u32 %v379_v53, 16  ;;  %v561_v3 = vshll.u32 %v395_v52, 16  ;;  %v425_v5 = vshll.u32 %v379_v53, 16 }
 0x140   : > { %v925_v57 = vsel %vm4937_vm13, %v920_v42, %v924_v43 }
 0x141   : > { %v560_v2 = vrot.slane %v558_v59, 7  ;;  %v424_v4 = vrot.slane %v422_v60, 7  ;;  %v4957_v62 = vunpack.c.l.b16 %v925_v57  ;;  %v809_v57 = vld [vmem:[#allocation2 + $0x84] sm:$0xf] }
 0x142   : > { %v4570_v6 = vpop.trf.xlu1 }
 0x143   : > { %v4574_v10 = vunpack.i.h.bf16 %v4570_v6  ;;  %v4571_v11 = vunpack.i.l.bf16 %v4570_v6  ;;  %v563_v12 = vor.u32 %v561_v3, %v560_v2  ;;  %v565_v13 = vrot.slane %v560_v2, 4 }
 0x144   : > { %v427_v14 = vor.u32 %v425_v5, %v424_v4  ;;  %v429_v15 = vrot.slane %v424_v4, 4 }
 0x145   : > { %v396_v16 = vpack.c.bf16 %v4574_v10, %v4574_v10  ;;  %v380_v17 = vpack.c.bf16 %v4571_v11, %v4571_v11  ;;  %v4916_v18 = vld [vmem:[#allocation2 + $0x6c] sm:$0xe]  ;;  %v800_v22 = vsel %vm4912_vm12, %v565_v13, %v799_v9  ;;  %v564_v24 = vsel %vm4906_vm11, %v556_v56, %v563_v12 }
 0x146   : > { %v428_v23 = vsel %vm4906_vm11, %v420_v58, %v427_v14  ;;  %v744_v25 = vsel %vm4912_vm12, %v429_v15, %v743_v8  ;;  %v4926_v26 = vld [vmem:[#allocation2 + $0xc] sm:$0xe]  ;;  %801 = vst [vmem:[#allocation2 + $0x74] sm:$0x1] %v800_v22  ;;  %v4205_v36 = vrot.slane %v4916_v18, 9  ;;  %v4953_v58 = vunpack.c.l.b16 %v915_v45 }
 0x147   : > { %v853_v27 = vld [vmem:[#allocation2 + $0xc] sm:$0xf]  ;;  %v567_v29 = vshrl.u32 %v396_v16, 16  ;;  %v570_v30 = vshll.u32 %v396_v16, 16  ;;  %v431_v31 = vshrl.u32 %v380_v17, 16  ;;  %v434_v32 = vshll.u32 %v380_v17, 16 }
 0x148   : > { %v4928_v28 = vld [vmem:[#allocation2 + $0x6c] sm:$0xf]  ;;  %740 = vst.msk [vmem:[#allocation2 + $0x10] sm:$0xf] %vm237_vm0, %v428_v23  ;;  %v4197_v35 = vrot.slane %v4926_v26, 9  ;;  %v927_v46 = vshrl.u32 %v853_v27, 16  ;;  %v2778_v13 = vpack.c.b16 %v4957_v62, %v4953_v58 }
 0x149   : > { %745 = vst [vmem:[#allocation2 + $0x14] sm:$0x1] %v744_v25  ;;  %v4933_v38 = vrot.slane %v567_v29, 7  ;;  %v433_v40 = vrot.slane %v431_v31, 7  ;;  %v930_v47 = vshll.u32 %v853_v27, 16  ;;  %v1119_v48 = vshrl.u32 %v4928_v28, 16 }
 0x14a   : > { %798 = vst.msk [vmem:[#allocation2 + $0x70] sm:$0xf] %vm237_vm0, %v564_v24  ;;  %v4575_v44 = vpop.trf.xlu1  ;;  %v4959_v63 = vrot.slane %v927_v46, 4  ;;  %v750_v22 = vld [vmem:[#allocation2 + $0x20] sm:$0x1] }
 0x14b   : > { %v572_v49 = vor.u32 %v570_v30, %v4933_v38  ;;  %v573_v50 = vrot.slane %v4933_v38, 4  ;;  %v436_v51 = vor.u32 %v434_v32, %v433_v40  ;;  %v437_v52 = vrot.slane %v433_v40, 4  ;;  %v806_v23 = vld [vmem:[#allocation2 + $0x80] sm:$0x1] }
 0x14c   : > { %v4579_v53 = vunpack.i.h.bf16 %v4575_v44  ;;  %v4576_v54 = vunpack.i.l.bf16 %v4575_v44  ;;  %v932_v14 = vrot.slane %v930_v47, 5 }
 0x14d   : > { %v803_v55 = vsel %vm4893_vm6, %v572_v49, %v802_v34  ;;  %v747_v56 = vsel %vm4893_vm6, %v436_v51, %v746_v33  ;;  %v4955_v61 = vld [vmem:[#allocation2 + $0x74] sm:$0x1] }
 0x14e   : > { %804 = vst [vmem:[#allocation2 + $0x78] sm:$0xf] %v803_v55  ;;  %v397_v59 = vpack.c.bf16 %v4579_v53, %v4579_v53  ;;  %v381_v60 = vpack.c.bf16 %v4576_v54, %v4576_v54  ;;  %v1421_v3 = vrot.slane %v4955_v61, 5 }
 0x14f   : > { %748 = vst [vmem:[#allocation2 + $0x18] sm:$0xf] %v747_v56  ;;  %v4488_v0 = vld [vmem:[#allocation2 + $0xc] sm:$0xff] }
 0x150   : > { %v4961_v2 = vld [vmem:[#allocation2 + $0x10] sm:$0xf]  ;;  %v575_v4 = vshrl.u32 %v397_v59, 16  ;;  %v578_v5 = vshll.u32 %v397_v59, 16  ;;  %v439_v6 = vshrl.u32 %v381_v60, 16  ;;  %v442_v8 = vshll.u32 %v381_v60, 16  ;;  %2970 = vrot.lane.b32.xlu2 %v4488_v0, %s4709_s29 }
 0x151   : > { %v4964_v9 = vld [vmem:[#allocation2 + $0x14] sm:$0x1]  ;;  %v1362_v10 = vrot.slane %v4961_v2, 5  ;;  %v4969_v12 = vld [vmem:[#allocation2 + $0x70] sm:$0xf]  ;;  %v936_v20 = vshll.u32 %v4961_v2, 16 }
 0x152   : > { %v1365_v11 = vrot.slane %v4964_v9, 5  ;;  %v577_v15 = vrot.slane %v575_v4, 7  ;;  %v441_v16 = vrot.slane %v439_v6, 7  ;;  %v4580_v17 = vpop.trf.xlu1  ;;  %v1418_v19 = vrot.slane %v4969_v12, 5  ;;  %v4496_v44 = vld [vmem:[#allocation2 + $0x6c] sm:$0xff] }
 0x153   : > { %v4584_v24 = vunpack.i.h.bf16 %v4580_v17  ;;  %v4581_v25 = vunpack.i.l.bf16 %v4580_v17  ;;  %v1363_v34 = vsel %vm4872_vm4, %v4197_v35, %v1362_v10  ;;  %v1364_v37 = vrot.slane %v1362_v10, 4 }
 0x154   : > { %v580_v27 = vor.u32 %v578_v5, %v577_v15  ;;  %v582_v29 = vrot.slane %v577_v15, 4  ;;  %v444_v30 = vor.u32 %v442_v8, %v441_v16  ;;  %v446_v31 = vrot.slane %v441_v16, 4 }
 0x155   : > { %v398_v32 = vpack.c.bf16 %v4584_v24, %v4584_v24  ;;  %v382_v33 = vpack.c.bf16 %v4581_v25, %v4581_v25  ;;  %v1366_v35 = vsel %vm4872_vm4, %v1364_v37, %v1365_v11  ;;  %v2828_v49 = vunpack.c.l.b16 %v1363_v34 }
 0x156   : > { %v807_v38 = vsel %vm4912_vm12, %v582_v29, %v806_v23  ;;  %v445_v40 = vsel %vm4906_vm11, %v437_v52, %v444_v30  ;;  %v581_v42 = vsel %vm4906_vm11, %v573_v50, %v580_v27  ;;  %v751_v43 = vsel %vm4912_vm12, %v446_v31, %v750_v22  ;;  %v753_v52 = vld [vmem:[#allocation2 + $0x24] sm:$0xf] }
 0x157   : > { %808 = vst [vmem:[#allocation2 + $0x80] sm:$0x1] %v807_v38  ;;  %v584_v45 = vshrl.u32 %v398_v32, 16  ;;  %v587_v26 = vshll.u32 %v398_v32, 16  ;;  %v448_v46 = vshrl.u32 %v382_v33, 16  ;;  %v451_v47 = vshll.u32 %v382_v33, 16 }
 0x158   : > { %749 = vst.msk [vmem:[#allocation2 + $0x1c] sm:$0xf] %vm237_vm0, %v445_v40  ;;  %v1419_v50 = vsel %vm4872_vm4, %v4205_v36, %v1418_v19  ;;  %v1420_v51 = vrot.slane %v1418_v19, 4  ;;  %v2829_v55 = vunpack.c.l.b16 %v1366_v35  ;;  %2986 = vrot.lane.b32.xlu2 %v4496_v44, %s4709_s29  ;;  %v933_v36 = vor.u32 %v932_v14, %v4959_v63  ;;  %v813_v40 = vld [vmem:[#allocation2 + $0x8c] sm:$0x1] }
 0x159   : > { %752 = vst [vmem:[#allocation2 + $0x20] sm:$0x1] %v751_v43  ;;  %v4994_v53 = vrot.slane %v584_v45, 7  ;;  %v4996_v54 = vrot.slane %v448_v46, 7  ;;  %v2844_v56 = vunpack.c.l.b16 %v1419_v50  ;;  %v938_v60 = vrot.slane %v936_v20, 5 }
 0x15a   : > { %805 = vst.msk [vmem:[#allocation2 + $0x7c] sm:$0xf] %vm237_vm0, %v581_v42  ;;  %v4585_v59 = vpop.trf.xlu1  ;;  %v1422_v18 = vsel %vm4872_vm4, %v1420_v51, %v1421_v3  ;;  %v940_v0 = vshrl.u32 %v4961_v2, 16  ;;  %v2859_v10 = vpack.c.b16 %v2829_v55, %v2828_v49  ;;  %v934_v16 = vrot.slane %v933_v36, 4  ;;  %v757_v44 = vld [vmem:[#allocation2 + $0x2c] sm:$0x1] }
 0x15b   : > { %v589_v4 = vor.u32 %v587_v26, %v4994_v53  ;;  %v590_v5 = vrot.slane %v4994_v53, 4  ;;  %v453_v6 = vor.u32 %v451_v47, %v4996_v54  ;;  %v454_v8 = vrot.slane %v4996_v54, 4  ;;  %v1466_v53 = vld [vmem:[#allocation2 + $0x10] sm:$0xf]  ;;  %v1897_v54 = vld [vmem:[#allocation2 + $0xc] sm:$0xe] }
 0x15c   : > { %v4589_v11 = vunpack.i.h.bf16 %v4585_v59  ;;  %v4586_v63 = vunpack.i.l.bf16 %v4585_v59  ;;  %v2845_v14 = vunpack.c.l.b16 %v1422_v18  ;;  %2876 = vrot.lane.b32.xlu0 %v2859_v10, %s4708_s28  ;;  %v942_v17 = vrot.slane %v940_v0, 4  ;;  %v1497_v18 = vld [vmem:[#allocation2 + $0x14] sm:$0x1]  ;;  %v816_v36 = vld [vmem:[#allocation2 + $0x90] sm:$0xf] }
 0x15d   : > { %v810_v15 = vsel %vm4893_vm6, %v589_v4, %v809_v57  ;;  %v754_v3 = vsel %vm4893_vm6, %v453_v6, %v753_v52  ;;  %v946_v19 = vshll.u32 %v4964_v9, 16  ;;  %v1121_v23 = vrot.slane %v1119_v48, 4 }
 0x15e   : > { %811 = vst [vmem:[#allocation2 + $0x84] sm:$0xf] %v810_v15  ;;  %v399_v2 = vpack.c.bf16 %v4589_v11, %v4589_v11  ;;  %v383_v20 = vpack.c.bf16 %v4586_v63, %v4586_v63  ;;  %v2867_v22 = vpack.c.b16 %v2845_v14, %v2844_v56  ;;  %v1122_v24 = vshll.u32 %v4928_v28, 16 }
 0x15f   : > { %755 = vst [vmem:[#allocation2 + $0x24] sm:$0xf] %v754_v3  ;;  %v939_v29 = vsel %vm4937_vm13, %v934_v16, %v938_v60  ;;  %v943_v9 = vor.u32 %v942_v17, %v938_v60  ;;  %v948_v32 = vrot.slane %v946_v19, 5  ;;  %v1128_v38 = vshll.u32 %v4969_v12, 16 }
 0x160   : > { %v592_v25 = vshrl.u32 %v399_v2, 16  ;;  %v595_v27 = vshll.u32 %v399_v2, 16  ;;  %2794 = vrot.lane.b32.xlu1 %v2778_v13, %s4710_s30  ;;  %v456_v30 = vshrl.u32 %v383_v20, 16  ;;  %v459_v31 = vshll.u32 %v383_v20, 16  ;;  %v760_v2 = vld [vmem:[#allocation2 + $0x30] sm:$0xf] }
 0x161   : > { %v2748_v33 = vunpack.c.l.b16 %v939_v29  ;;  %v944_v48 = vrot.slane %v943_v9, 4  ;;  %v1124_v28 = vrot.slane %v1122_v24, 5  ;;  %v1130_v10 = vrot.slane %v1128_v38, 5 }
 0x162   : > { %v594_v34 = vrot.slane %v592_v25, 7  ;;  %v4590_v37 = vpop.trf.xlu1  ;;  %v458_v42 = vrot.slane %v456_v30, 7  ;;  %v1138_v11 = vshll.u32 %v4955_v61, 16  ;;  %v4212_v3 = vrot.slane %v1897_v54, 9 }
 0x163   : > { %v4594_v43 = vunpack.i.h.bf16 %v4590_v37  ;;  %v949_v13 = vsel %vm4937_vm13, %v944_v48, %v948_v32  ;;  %v4591_v45 = vunpack.i.l.bf16 %v4590_v37  ;;  %v1125_v52 = vor.u32 %v1124_v28, %v1121_v23 }
 0x164   : > { %v597_v58 = vor.u32 %v595_v27, %v594_v34  ;;  %v599_v62 = vrot.slane %v594_v34, 4  ;;  %v461_v26 = vor.u32 %v459_v31, %v458_v42  ;;  %v463_v46 = vrot.slane %v458_v42, 4  ;;  %2892 = vrot.lane.b32.xlu0 %v2867_v22, %s4708_s28  ;;  %v1465_v22 = vld [vmem:[#allocation2 + $0xc] sm:$0xf] }
 0x165   : > { %v2749_v47 = vunpack.c.l.b16 %v949_v13  ;;  %v400_v35 = vpack.c.bf16 %v4594_v43, %v4594_v43  ;;  %v384_v51 = vpack.c.bf16 %v4591_v45, %v4591_v45  ;;  %v1963_v63 = vrot.slane %v1466_v53, 5 }
 0x166   : > { %v814_v49 = vsel %vm4912_vm12, %v599_v62, %v813_v40  ;;  %v598_v50 = vsel %vm4906_vm11, %v590_v5, %v597_v58  ;;  %v462_v55 = vsel %vm4906_vm11, %v454_v8, %v461_v26  ;;  %v758_v56 = vsel %vm4912_vm12, %v463_v46, %v757_v44  ;;  %v1481_v26 = vld [vmem:[#allocation2 + $0x6c] sm:$0xf] }
 0x167   : > { %815 = vst [vmem:[#allocation2 + $0x8c] sm:$0x1] %v814_v49  ;;  %v2779_v57 = vpack.c.b16 %v2749_v47, %v2748_v33  ;;  %v601_v59 = vshrl.u32 %v400_v35, 16  ;;  %v604_v60 = vshll.u32 %v400_v35, 16  ;;  %v465_v0 = vshrl.u32 %v384_v51, 16 }
 0x168   : > { %756 = vst.msk [vmem:[#allocation2 + $0x28] sm:$0xf] %vm237_vm0, %v462_v55  ;;  %v468_v4 = vshll.u32 %v384_v51, 16  ;;  %v1126_v5 = vrot.slane %v1125_v52, 4  ;;  %v1132_v8 = vshrl.u32 %v4969_v12, 16  ;;  %v1966_v14 = vrot.slane %v1497_v18, 5 }
 0x169   : > { %759 = vst [vmem:[#allocation2 + $0x2c] sm:$0x1] %v758_v56  ;;  %2796 = vrot.lane.b32.xlu2 %v2779_v57, %s4710_s30  ;;  %v5037_v6 = vrot.slane %v601_v59, 7  ;;  %v5042_v15 = vrot.slane %v465_v0, 7  ;;  %v1140_v24 = vrot.slane %v1138_v11, 5  ;;  %v1964_v9 = vsel %vm4872_vm4, %v4212_v3, %v1963_v63 }
 0x16a   : > { %812 = vst.msk [vmem:[#allocation2 + $0x88] sm:$0xf] %vm237_vm0, %v598_v50  ;;  %v1131_v19 = vsel %vm4937_vm13, %v1126_v5, %v1130_v10  ;;  %v1134_v20 = vrot.slane %v1132_v8, 4  ;;  %v4595_v12 = vpop.trf.xlu1  ;;  %v1965_v30 = vrot.slane %v1963_v63, 4  ;;  %v3082_v32 = vunpack.c.l.b16 %v1964_v9  ;;  %v5060_v52 = vld [vmem:[#allocation2 + $0x70] sm:$0xf] }
 0x16b   : > { %v606_v16 = vor.u32 %v604_v60, %v5037_v6  ;;  %v607_v17 = vrot.slane %v5037_v6, 4  ;;  %v470_v61 = vor.u32 %v468_v4, %v5042_v15  ;;  %v471_v23 = vrot.slane %v5042_v15, 4  ;;  %v5071_v63 = vld [vmem:[#allocation2 + $0x74] sm:$0x1] }
 0x16c   : > { %v2764_v25 = vunpack.c.l.b16 %v1131_v19  ;;  %v1135_v29 = vor.u32 %v1134_v20, %v1130_v10  ;;  %v1514_v33 = vshrl.u32 %v1465_v22, 16  ;;  %v1517_v34 = vshll.u32 %v1465_v22, 16  ;;  %v820_v19 = vld [vmem:[#allocation2 + $0x98] sm:$0x1] }
 0x16d   : > { %v817_v27 = vsel %vm4893_vm6, %v606_v16, %v816_v36  ;;  %v761_v31 = vsel %vm4893_vm6, %v470_v61, %v760_v2  ;;  %v1967_v37 = vsel %vm4872_vm4, %v1965_v30, %v1966_v14  ;;  %v1523_v28 = vshll.u32 %v1466_v53, 16  ;;  %v1288_v2 = vld [vmem:[#allocation2 + $0x18] sm:$0xe] }
 0x16e   : > { %818 = vst [vmem:[#allocation2 + $0x90] sm:$0xf] %v817_v27  ;;  %v1136_v48 = vrot.slane %v1135_v29, 4  ;;  %v1527_v38 = vshrl.u32 %v1466_v53, 16  ;;  %v3083_v40 = vunpack.c.l.b16 %v1967_v37  ;;  %v1516_v42 = vrot.slane %v1514_v33, 4 }
 0x16f   : > { %762 = vst [vmem:[#allocation2 + $0x30] sm:$0xf] %v761_v31  ;;  %v1519_v43 = vrot.slane %v1517_v34, 5  ;;  %v1533_v44 = vshll.u32 %v1497_v18, 16  ;;  %v1525_v62 = vrot.slane %v1523_v28, 5  ;;  %v4599_v45 = vunpack.i.h.bf16 %v4595_v12 }
 0x170   : > { %v1141_v58 = vsel %vm4937_vm13, %v1136_v48, %v1140_v24  ;;  %v1529_v13 = vrot.slane %v1527_v38, 4  ;;  %v3114_v47 = vpack.c.b16 %v3083_v40, %v3082_v32  ;;  %v4596_v55 = vunpack.i.l.bf16 %v4595_v12  ;;  %v5074_v29 = vld [vmem:[#allocation2 + $0x1c] sm:$0xf]  ;;  %v5077_v33 = vld [vmem:[#allocation2 + $0x20] sm:$0x1] }
 0x171   : > { %v2765_v46 = vunpack.c.l.b16 %v1141_v58  ;;  %v1520_v35 = vor.u32 %v1519_v43, %v1516_v42  ;;  %v1535_v49 = vrot.slane %v1533_v44, 5  ;;  %v401_v51 = vpack.c.bf16 %v4599_v45, %v4599_v45  ;;  %v4504_v32 = vld [vmem:[#allocation2 + $0x18] sm:$0xff] }
 0x172   : > { %v1530_v50 = vor.u32 %v1529_v13, %v1525_v62  ;;  %3130 = vrot.lane.b32.xlu1 %v3114_v47, %s4711_s6  ;;  %v1706_v56 = vshrl.u32 %v1481_v26, 16  ;;  %v1709_v36 = vshll.u32 %v1481_v26, 16  ;;  %v5063_v60 = vpop.trf.xlu1  ;;  %v385_v4 = vpack.c.bf16 %v4596_v55, %v4596_v55  ;;  %v764_v48 = vld [vmem:[#allocation2 + $0x38] sm:$0x1]  ;;  %v1296_v45 = vld [vmem:[#allocation2 + $0x78] sm:$0xe] }
 0x173   : > { %v2787_v53 = vpack.c.b16 %v2765_v46, %v2764_v25  ;;  %v1521_v54 = vrot.slane %v1520_v35, 4  ;;  %v609_v59 = vshrl.u32 %v401_v51, 16  ;;  %v612_v18 = vshll.u32 %v401_v51, 16 }
 0x174   : > { %v1531_v57 = vrot.slane %v1530_v50, 4  ;;  %v1708_v5 = vrot.slane %v1706_v56, 4  ;;  %v1715_v10 = vshll.u32 %v5060_v52, 16  ;;  %v1711_v14 = vrot.slane %v1709_v36, 5 }
 0x175   : > { %2812 = vrot.lane.b32.xlu0 %v2787_v53, %s4710_s30  ;;  %v1526_v0 = vsel %vm4937_vm13, %v1521_v54, %v1525_v62  ;;  %v611_v3 = vrot.slane %v609_v59, 7  ;;  %v473_v20 = vshrl.u32 %v385_v4, 16  ;;  %v476_v22 = vshll.u32 %v385_v4, 16  ;;  %v5102_v54 = vld [vmem:[#allocation2 + $0x7c] sm:$0xf] }
 0x176   : > { %v1536_v8 = vsel %vm4937_vm13, %v1531_v57, %v1535_v49  ;;  %v3002_v11 = vunpack.c.l.b16 %v1526_v0  ;;  %v1717_v12 = vrot.slane %v1715_v10, 5  ;;  %v1712_v25 = vor.u32 %v1711_v14, %v1708_v5 }
 0x177   : > { %v3003_v16 = vunpack.c.l.b16 %v1536_v8  ;;  %v614_v61 = vor.u32 %v612_v18, %v611_v3  ;;  %v616_v24 = vrot.slane %v611_v3, 4  ;;  %v1719_v27 = vshrl.u32 %v5060_v52, 16 }
 0x178   : > { %v475_v30 = vrot.slane %v473_v20, 7  ;;  %v1725_v31 = vshll.u32 %v5071_v63, 16  ;;  %v4198_v34 = vrot.slane %v1288_v2, 9  ;;  %v1713_v38 = vrot.slane %v1712_v25, 4  ;;  %v823_v2 = vld [vmem:[#allocation2 + $0x9c] sm:$0xf] }
 0x179   : > { %v3034_v9 = vpack.c.b16 %v3003_v16, %v3002_v11  ;;  %v821_v37 = vsel %vm4912_vm12, %v616_v24, %v820_v19  ;;  %v615_v28 = vsel %vm4906_vm11, %v607_v17, %v614_v61  ;;  %v1721_v40 = vrot.slane %v1719_v27, 4  ;;  %v2506_v20 = vld [vmem:[#allocation2 + $0x18] sm:$0xe] }
 0x17a   : > { %822 = vst [vmem:[#allocation2 + $0x98] sm:$0x1] %v821_v37  ;;  %v478_v42 = vor.u32 %v476_v22, %v475_v30  ;;  %v480_v43 = vrot.slane %v475_v30, 4  ;;  %v1727_v44 = vrot.slane %v1725_v31, 5  ;;  %3226 = vrot.lane.b32.xlu1 %v4504_v32, %s4713_s8  ;;  %v1369_v58 = vrot.slane %v5074_v29, 5  ;;  %v4605_v55 = vpop.trf.xlu1 }
 0x17b   : > { %3050 = vrot.lane.b32.xlu2 %v3034_v9, %s4712_s7  ;;  %819 = vst.msk [vmem:[#allocation2 + $0x94] sm:$0xf] %vm237_vm0, %v615_v28  ;;  %v1718_v6 = vsel %vm4937_vm13, %v1713_v38, %v1717_v12  ;;  %v1722_v17 = vor.u32 %v1721_v40, %v1717_v12  ;;  %v1372_v62 = vrot.slane %v5077_v33, 5  ;;  %v4604_v13 = vunpack.i.h.bf16 %v5063_v60  ;;  %v5117_v30 = vld [vmem:[#allocation2 + $0x1c] sm:$0xf] }
 0x17c   : > { %v479_v26 = vsel %vm4906_vm11, %v471_v23, %v478_v42  ;;  %v765_v46 = vsel %vm4912_vm12, %v480_v43, %v764_v48  ;;  %v3018_v47 = vunpack.c.l.b16 %v1718_v6  ;;  %v1370_v35 = vsel %vm4872_vm4, %v4198_v34, %v1369_v58  ;;  %v5105_v23 = vld [vmem:[#allocation2 + $0x80] sm:$0x1]  ;;  %v767_v32 = vld [vmem:[#allocation2 + $0x3c] sm:$0xf] }
 0x17d   : > { %763 = vst.msk [vmem:[#allocation2 + $0x34] sm:$0xf] %vm237_vm0, %v479_v26  ;;  %v1723_v49 = vrot.slane %v1722_v17, 4  ;;  %v1371_v50 = vrot.slane %v1369_v58, 4  ;;  %v2830_v51 = vunpack.c.l.b16 %v1370_v35  ;;  %v402_v53 = vpack.c.bf16 %v4604_v13, %v4604_v13  ;;  %v5119_v31 = vld [vmem:[#allocation2 + $0x20] sm:$0x1] }
 0x17e   : > { %766 = vst [vmem:[#allocation2 + $0x38] sm:$0x1] %v765_v46  ;;  %v4601_v15 = vunpack.i.l.bf16 %v5063_v60  ;;  %v4206_v56 = vrot.slane %v1296_v45, 9  ;;  %v1425_v10 = vrot.slane %v5102_v54, 5  ;;  %v1428_v11 = vrot.slane %v5105_v23, 5 }
 0x17f   : > { %v1728_v57 = vsel %vm4937_vm13, %v1723_v49, %v1727_v44  ;;  %v1373_v59 = vsel %vm4872_vm4, %v1371_v50, %v1372_v62  ;;  %v618_v18 = vshrl.u32 %v402_v53, 16  ;;  %v621_v36 = vshll.u32 %v402_v53, 16  ;;  %v827_v26 = vld [vmem:[#allocation2 + $0xa4] sm:$0x1]  ;;  %v4489_v53 = vld [vmem:[#allocation2 + $0x18] sm:$0xff] }
 0x180   : > { %v3019_v0 = vunpack.c.l.b16 %v1728_v57  ;;  %v2831_v4 = vunpack.c.l.b16 %v1373_v59  ;;  %v386_v5 = vpack.c.bf16 %v4601_v15, %v4601_v15  ;;  %v4609_v60 = vunpack.i.h.bf16 %v4605_v55 }
 0x181   : > { %v620_v8 = vrot.slane %v618_v18, 7  ;;  %v1426_v61 = vsel %vm4872_vm4, %v4206_v56, %v1425_v10  ;;  %v1427_v24 = vrot.slane %v1425_v10, 4  ;;  %v4606_v37 = vunpack.i.l.bf16 %v4605_v55 }
 0x182   : > { %v3042_v3 = vpack.c.b16 %v3019_v0, %v3018_v47  ;;  %v2860_v14 = vpack.c.b16 %v2831_v4, %v2830_v51  ;;  %v482_v16 = vshrl.u32 %v386_v5, 16  ;;  %v485_v19 = vshll.u32 %v386_v5, 16  ;;  %v4610_v62 = vpop.trf.xlu1  ;;  %v771_v0 = vld [vmem:[#allocation2 + $0x44] sm:$0x1] }
 0x183   : > { %v623_v22 = vor.u32 %v621_v36, %v620_v8  ;;  %v624_v12 = vrot.slane %v620_v8, 4  ;;  %v2846_v27 = vunpack.c.l.b16 %v1426_v61  ;;  %v403_v9 = vpack.c.bf16 %v4609_v60, %v4609_v60  ;;  %v1905_v36 = vld [vmem:[#allocation2 + $0x6c] sm:$0xe] }
 0x184   : > { %3066 = vrot.lane.b32.xlu0 %v3042_v3, %s4712_s7  ;;  %2878 = vrot.lane.b32.xlu2 %v2860_v14, %s4708_s28  ;;  %v484_v25 = vrot.slane %v482_v16, 7  ;;  %v1429_v48 = vsel %vm4872_vm4, %v1427_v24, %v1428_v11  ;;  %v4228_v28 = vrot.slane %v2506_v20, 9  ;;  %v387_v58 = vpack.c.bf16 %v4606_v37, %v4606_v37  ;;  %v830_v3 = vld [vmem:[#allocation2 + $0xa8] sm:$0xf]  ;;  %v2514_v16 = vld [vmem:[#allocation2 + $0x78] sm:$0xe] }
 0x185   : > { %v824_v34 = vsel %vm4893_vm6, %v623_v22, %v823_v2  ;;  %v2847_v42 = vunpack.c.l.b16 %v1429_v48  ;;  %v626_v43 = vshrl.u32 %v403_v9, 16  ;;  %v629_v44 = vshll.u32 %v403_v9, 16  ;;  %v5148_v9 = vld [vmem:[#allocation2 + $0x7c] sm:$0xf] }
 0x186   : > { %825 = vst [vmem:[#allocation2 + $0x9c] sm:$0xf] %v824_v34  ;;  %v487_v38 = vor.u32 %v485_v19, %v484_v25  ;;  %v488_v40 = vrot.slane %v484_v25, 4  ;;  %v2572_v6 = vrot.slane %v5117_v30, 5  ;;  %v2575_v17 = vrot.slane %v5119_v31, 5 }
 0x187   : > { %v2868_v45 = vpack.c.b16 %v2847_v42, %v2846_v27  ;;  %v628_v46 = vrot.slane %v626_v43, 7  ;;  %v4614_v47 = vunpack.i.h.bf16 %v4610_v62  ;;  %v490_v35 = vshrl.u32 %v387_v58, 16  ;;  %v4497_v43 = vld [vmem:[#allocation2 + $0x78] sm:$0xff] }
 0x188   : > { %v768_v13 = vsel %vm4893_vm6, %v487_v38, %v767_v32  ;;  %v493_v49 = vshll.u32 %v387_v58, 16  ;;  %v2573_v50 = vsel %vm4872_vm4, %v4228_v28, %v2572_v6  ;;  %v2574_v51 = vrot.slane %v2572_v6, 4  ;;  %v5150_v32 = vld [vmem:[#allocation2 + $0x80] sm:$0x1] }
 0x189   : > { %769 = vst [vmem:[#allocation2 + $0x3c] sm:$0xf] %v768_v13  ;;  %v631_v55 = vor.u32 %v629_v44, %v628_v46  ;;  %v633_v15 = vrot.slane %v628_v46, 4  ;;  %v3338_v56 = vunpack.c.l.b16 %v2573_v50  ;;  %v404_v57 = vpack.c.bf16 %v4614_v47, %v4614_v47  ;;  %v774_v46 = vld [vmem:[#allocation2 + $0x48] sm:$0xf] }
 0x18a   : > { %v492_v59 = vrot.slane %v490_v35, 7  ;;  %v2576_v18 = vsel %vm4872_vm4, %v2574_v51, %v2575_v17  ;;  %v4611_v2 = vunpack.i.l.bf16 %v4610_v62  ;;  %v4220_v22 = vrot.slane %v1905_v36, 9  ;;  %v1486_v50 = vld [vmem:[#allocation2 + $0x88] sm:$0xf] }
 0x18b   : > { %v828_v4 = vsel %vm4912_vm12, %v633_v15, %v827_v26  ;;  %v632_v5 = vsel %vm4906_vm11, %v624_v12, %v631_v55  ;;  %v3339_v10 = vunpack.c.l.b16 %v2576_v18  ;;  %v635_v8 = vshrl.u32 %v404_v57, 16  ;;  %v1485_v26 = vld [vmem:[#allocation2 + $0x84] sm:$0xf] }
 0x18c   : > { %2972 = vrot.lane.b32.xlu0 %v4489_v53, %s4709_s29  ;;  %2894 = vrot.lane.b32.xlu2 %v2868_v45, %s4708_s28  ;;  %829 = vst [vmem:[#allocation2 + $0xa4] sm:$0x1] %v828_v4  ;;  %v495_v11 = vor.u32 %v493_v49, %v492_v59  ;;  %v497_v60 = vrot.slane %v492_v59, 4  ;;  %v638_v14 = vshll.u32 %v404_v57, 16  ;;  %v2019_v61 = vrot.slane %v5060_v52, 5 }
 0x18d   : > { %826 = vst.msk [vmem:[#allocation2 + $0xa0] sm:$0xf] %vm237_vm0, %v632_v5  ;;  %v3370_v19 = vpack.c.b16 %v3339_v10, %v3338_v56  ;;  %v5140_v20 = vrot.slane %v635_v8, 7  ;;  %v388_v25 = vpack.c.bf16 %v4611_v2, %v4611_v2  ;;  %v2022_v27 = vrot.slane %v5071_v63, 5  ;;  %v4615_v63 = vpop.trf.xlu1  ;;  %v1507_v4 = vld [vmem:[#allocation2 + $0x8c] sm:$0x1] }
 0x18e   : > { %v496_v12 = vsel %vm4906_vm11, %v488_v40, %v495_v11  ;;  %v772_v24 = vsel %vm4912_vm12, %v497_v60, %v771_v0  ;;  %v2020_v52 = vsel %vm4872_vm4, %v4220_v22, %v2019_v61  ;;  %v2021_v37 = vrot.slane %v2019_v61, 4  ;;  %v855_v8 = vld [vmem:[#allocation2 + $0x18] sm:$0xf]  ;;  %v778_v61 = vld [vmem:[#allocation2 + $0x50] sm:$0x1] }
 0x18f   : > { %770 = vst.msk [vmem:[#allocation2 + $0x40] sm:$0xf] %vm237_vm0, %v496_v12  ;;  %v640_v34 = vor.u32 %v638_v14, %v5140_v20  ;;  %v641_v48 = vrot.slane %v5140_v20, 4  ;;  %v499_v28 = vshrl.u32 %v388_v25, 16  ;;  %v502_v38 = vshll.u32 %v388_v25, 16 }
 0x190   : > { %773 = vst [vmem:[#allocation2 + $0x44] sm:$0x1] %v772_v24  ;;  %v3098_v40 = vunpack.c.l.b16 %v2020_v52  ;;  %v4236_v42 = vrot.slane %v2514_v16, 9  ;;  %v2023_v58 = vsel %vm4872_vm4, %v2021_v37, %v2022_v27  ;;  %v2628_v6 = vrot.slane %v5148_v9, 5 }
 0x191   : > { %v831_v44 = vsel %vm4893_vm6, %v640_v34, %v830_v3  ;;  %v2631_v17 = vrot.slane %v5150_v32, 5  ;;  %v501_v62 = vrot.slane %v499_v28, 7  ;;  %v3099_v13 = vunpack.c.l.b16 %v2023_v58  ;;  %v834_v34 = vld [vmem:[#allocation2 + $0xb0] sm:$0x1] }
 0x192   : > { %832 = vst [vmem:[#allocation2 + $0xa8] sm:$0xf] %v831_v44  ;;  %v4619_v45 = vunpack.i.h.bf16 %v4615_v63  ;;  %v2629_v47 = vsel %vm4872_vm4, %v4236_v42, %v2628_v6  ;;  %v2630_v35 = vrot.slane %v2628_v6, 4  ;;  %v4616_v49 = vunpack.i.l.bf16 %v4615_v63 }
 0x193   : > { %v504_v51 = vor.u32 %v502_v38, %v501_v62  ;;  %v505_v53 = vrot.slane %v501_v62, 4  ;;  %v3122_v55 = vpack.c.b16 %v3099_v13, %v3098_v40  ;;  %v3354_v15 = vunpack.c.l.b16 %v2629_v47  ;;  %v1898_v62 = vld [vmem:[#allocation2 + $0x18] sm:$0xe]  ;;  %v5184_v47 = vld [vmem:[#allocation2 + $0x1c] sm:$0xf] }
 0x194   : > { %2988 = vrot.lane.b32.xlu0 %v4497_v43, %s4709_s29  ;;  %3386 = vrot.lane.b32.xlu2 %v3370_v19, %s4714_s9  ;;  %v2632_v56 = vsel %vm4872_vm4, %v2630_v35, %v2631_v17  ;;  %v405_v57 = vpack.c.bf16 %v4619_v45, %v4619_v45  ;;  %v389_v59 = vpack.c.bf16 %v4616_v49, %v4616_v49  ;;  %v1754_v18 = vshrl.u32 %v1485_v26, 16  ;;  %v5186_v35 = vld [vmem:[#allocation2 + $0x20] sm:$0x1]  ;;  %v1472_v49 = vld [vmem:[#allocation2 + $0x34] sm:$0xf] }
 0x195   : > { %v775_v36 = vsel %vm4893_vm6, %v504_v51, %v774_v46  ;;  %v3355_v0 = vunpack.c.l.b16 %v2632_v56  ;;  %v1757_v5 = vshll.u32 %v1485_v26, 16  ;;  %v1763_v10 = vshll.u32 %v1486_v50, 16 }
 0x196   : > { %776 = vst [vmem:[#allocation2 + $0x48] sm:$0xf] %v775_v36  ;;  %v643_v11 = vshrl.u32 %v405_v57, 16  ;;  %v646_v60 = vshll.u32 %v405_v57, 16  ;;  %v507_v3 = vshrl.u32 %v389_v59, 16  ;;  %v510_v14 = vshll.u32 %v389_v59, 16 }
 0x197   : > { %v3378_v2 = vpack.c.b16 %v3355_v0, %v3354_v15  ;;  %v1756_v16 = vrot.slane %v1754_v18, 4  ;;  %v1759_v19 = vrot.slane %v1757_v5, 5  ;;  %v1765_v22 = vrot.slane %v1763_v10, 5  ;;  %v1900_v15 = vld [vmem:[#allocation2 + $0x30] sm:$0xe]  ;;  %v4512_v18 = vld [vmem:[#allocation2 + $0x78] sm:$0xff] }
 0x198   : > { %v645_v12 = vrot.slane %v643_v11, 7  ;;  %v509_v24 = vrot.slane %v507_v3, 7  ;;  %v1767_v25 = vshrl.u32 %v1486_v50, 16  ;;  %v1773_v27 = vshll.u32 %v1507_v4, 16  ;;  %v1500_v59 = vld [vmem:[#allocation2 + $0x38] sm:$0x1] }
 0x199   : > { %v1760_v52 = vor.u32 %v1759_v19, %v1756_v16  ;;  %v951_v37 = vshrl.u32 %v855_v8, 16  ;;  %v954_v28 = vshll.u32 %v855_v8, 16  ;;  %v960_v38 = vshll.u32 %v5074_v29, 16 }
 0x19a   : > { %v648_v40 = vor.u32 %v646_v60, %v645_v12  ;;  %v650_v42 = vrot.slane %v645_v12, 4  ;;  %v512_v63 = vor.u32 %v510_v14, %v509_v24  ;;  %v514_v43 = vrot.slane %v509_v24, 4 }
 0x19b   : > { %v1761_v44 = vrot.slane %v1760_v52, 4  ;;  %v1769_v58 = vrot.slane %v1767_v25, 4  ;;  %v1775_v6 = vrot.slane %v1773_v27, 5  ;;  %v953_v17 = vrot.slane %v951_v37, 4 }
 0x19c   : > { %3146 = vrot.lane.b32.xlu0 %v3122_v55, %s4711_s6  ;;  %3402 = vrot.lane.b32.xlu2 %v3378_v2, %s4714_s9  ;;  %v835_v13 = vsel %vm4912_vm12, %v650_v42, %v834_v34  ;;  %v513_v45 = vsel %vm4906_vm11, %v505_v53, %v512_v63  ;;  %v649_v26 = vsel %vm4906_vm11, %v641_v48, %v648_v40  ;;  %v956_v55 = vrot.slane %v954_v28, 5 }
 0x19d   : > { %v779_v46 = vsel %vm4912_vm12, %v514_v43, %v778_v61  ;;  %836 = vst [vmem:[#allocation2 + $0xb0] sm:$0x1] %v835_v13  ;;  %v1766_v50 = vsel %vm4937_vm13, %v1761_v44, %v1765_v22  ;;  %v1770_v51 = vor.u32 %v1769_v58, %v1765_v22  ;;  %v962_v53 = vrot.slane %v960_v38, 5  ;;  %v871_v61 = vld [vmem:[#allocation2 + $0x78] sm:$0xf] }
 0x19e   : > { %777 = vst.msk [vmem:[#allocation2 + $0x4c] sm:$0xf] %vm237_vm0, %v513_v45  ;;  %v3022_v20 = vunpack.c.l.b16 %v1766_v50  ;;  %v964_v48 = vshrl.u32 %v5074_v29, 16  ;;  %v970_v56 = vshll.u32 %v5077_v33, 16  ;;  %v4213_v57 = vrot.slane %v1898_v62, 9 }
 0x19f   : > { %780 = vst [vmem:[#allocation2 + $0x50] sm:$0x1] %v779_v46  ;;  %v1771_v36 = vrot.slane %v1770_v51, 4  ;;  %v957_v0 = vor.u32 %v956_v55, %v953_v17  ;;  %v1970_v4 = vrot.slane %v5184_v47, 5  ;;  %v1973_v5 = vrot.slane %v5186_v35, 5 }
 0x1a0   : > { %833 = vst.msk [vmem:[#allocation2 + $0xac] sm:$0xf] %vm237_vm0, %v649_v26  ;;  %v966_v10 = vrot.slane %v964_v48, 4  ;;  %v972_v8 = vrot.slane %v970_v56, 5  ;;  %v4215_v11 = vrot.slane %v1900_v15, 9  ;;  %v1984_v60 = vrot.slane %v1472_v49, 5 }
 0x1a1   : > { %v1776_v29 = vsel %vm4937_vm13, %v1771_v36, %v1775_v6  ;;  %v958_v33 = vrot.slane %v957_v0, 4  ;;  %v1971_v3 = vsel %vm4872_vm4, %v4213_v57, %v1970_v4  ;;  %v1972_v14 = vrot.slane %v1970_v4, 4  ;;  %v1467_v43 = vld [vmem:[#allocation2 + $0x18] sm:$0xf] }
 0x1a2   : > { %v3023_v2 = vunpack.c.l.b16 %v1776_v29  ;;  %v967_v16 = vor.u32 %v966_v10, %v962_v53  ;;  %v3084_v19 = vunpack.c.l.b16 %v1971_v3  ;;  %v1985_v22 = vsel %vm4872_vm4, %v4215_v11, %v1984_v60  ;;  %v1483_v48 = vld [vmem:[#allocation2 + $0x78] sm:$0xf]  ;;  %v5220_v10 = vld [vmem:[#allocation2 + $0x7c] sm:$0xf] }
 0x1a3   : > { %v963_v12 = vsel %vm4937_vm13, %v958_v33, %v962_v53  ;;  %v1974_v24 = vsel %vm4872_vm4, %v1972_v14, %v1973_v5  ;;  %v1986_v25 = vrot.slane %v1984_v60, 4  ;;  %v1987_v27 = vrot.slane %v1500_v59, 5 }
 0x1a4   : > { %3242 = vrot.lane.b32.xlu0 %v4512_v18, %s4713_s8  ;;  %v3044_v34 = vpack.c.b16 %v3023_v2, %v3022_v20  ;;  %v968_v52 = vrot.slane %v967_v16, 4  ;;  %v2750_v37 = vunpack.c.l.b16 %v963_v12  ;;  %v3085_v28 = vunpack.c.l.b16 %v1974_v24 }
 0x1a5   : > { %v1988_v38 = vsel %vm4872_vm4, %v1986_v25, %v1987_v27  ;;  %v3088_v40 = vunpack.c.l.b16 %v1985_v22  ;;  %v1143_v42 = vshrl.u32 %v871_v61, 16  ;;  %v1146_v63 = vshll.u32 %v871_v61, 16  ;;  %v5229_v61 = vld [vmem:[#allocation2 + $0x80] sm:$0x1] }
 0x1a6   : > { %3070 = vrot.lane.b32.xlu1 %v3044_v34, %s4712_s7  ;;  %v973_v44 = vsel %vm4937_vm13, %v968_v52, %v972_v8  ;;  %v3115_v58 = vpack.c.b16 %v3085_v28, %v3084_v19  ;;  %v3089_v6 = vunpack.c.l.b16 %v1988_v38  ;;  %v1152_v17 = vshll.u32 %v5102_v54, 16 }
 0x1a7   : > { %v2751_v62 = vunpack.c.l.b16 %v973_v44  ;;  %v1145_v13 = vrot.slane %v1143_v42, 4  ;;  %v1148_v45 = vrot.slane %v1146_v63, 5  ;;  %v1156_v26 = vshrl.u32 %v5102_v54, 16 }
 0x1a8   : > { %v3117_v46 = vpack.c.b16 %v3089_v6, %v3088_v40  ;;  %v1154_v49 = vrot.slane %v1152_v17, 5  ;;  %v1162_v50 = vshll.u32 %v5105_v23, 16  ;;  %v1538_v51 = vshrl.u32 %v1467_v43, 16 }
 0x1a9   : > { %v2780_v55 = vpack.c.b16 %v2751_v62, %v2750_v37  ;;  %v1149_v53 = vor.u32 %v1148_v45, %v1145_v13  ;;  %v1158_v15 = vrot.slane %v1156_v26, 4  ;;  %v1541_v20 = vshll.u32 %v1467_v43, 16  ;;  %v4620_v37 = vpop.trf.xlu1  ;;  %v2074_v26 = vld [vmem:[#allocation2 + $0x18] sm:$0xf] }
 0x1aa   : > { %v1164_v56 = vrot.slane %v1162_v50, 5  ;;  %v1540_v57 = vrot.slane %v1538_v51, 4  ;;  %v1547_v59 = vshll.u32 %v5184_v47, 16  ;;  %v1551_v18 = vshrl.u32 %v5184_v47, 16  ;;  %v5224_v47 = vpop.permute.xlu2 %2874 }
 0x1ab   : > { %2798 = vrot.lane.b32.xlu2 %v2780_v55, %s4710_s30  ;;  %v1150_v54 = vrot.slane %v1149_v53, 4  ;;  %v1159_v36 = vor.u32 %v1158_v15, %v1154_v49  ;;  %v1543_v0 = vrot.slane %v1541_v20, 5  ;;  %v1557_v23 = vshll.u32 %v5186_v35, 16  ;;  %v837_v15 = vld [vmem:[#allocation2 + $0xb4] sm:$0xf] }
 0x1ac   : > { %3132 = vrot.lane.b32.xlu0 %v3115_v58, %s4711_s6  ;;  %v1549_v4 = vrot.slane %v1547_v59, 5  ;;  %v1553_v5 = vrot.slane %v1551_v18, 4  ;;  %v1730_v8 = vshrl.u32 %v1483_v48, 16  ;;  %v1733_v11 = vshll.u32 %v1483_v48, 16  ;;  %v4508_v58 = vld [vmem:[#allocation2 + $0x48] sm:$0xff] }
 0x1ad   : > { %v1155_v60 = vsel %vm4937_vm13, %v1150_v54, %v1154_v49  ;;  %v1160_v29 = vrot.slane %v1159_v36, 4  ;;  %v1544_v33 = vor.u32 %v1543_v0, %v1540_v57  ;;  %v1559_v3 = vrot.slane %v1557_v23, 5  ;;  %v5249_v0 = vld [vmem:[#allocation2 + $0x4c] sm:$0xf] }
 0x1ae   : > { %3136 = vrot.lane.b32.xlu1 %v3117_v46, %s4711_s6  ;;  %v2766_v14 = vunpack.c.l.b16 %v1155_v60  ;;  %v1554_v2 = vor.u32 %v1553_v5, %v1549_v4  ;;  %v1732_v16 = vrot.slane %v1730_v8, 4  ;;  %v1735_v35 = vrot.slane %v1733_v11, 5  ;;  %v2510_v60 = vld [vmem:[#allocation2 + $0x48] sm:$0xe] }
 0x1af   : > { %v1165_v19 = vsel %vm4937_vm13, %v1160_v29, %v1164_v56  ;;  %v1545_v22 = vrot.slane %v1544_v33, 4  ;;  %v1739_v12 = vshll.u32 %v5220_v10, 16  ;;  %v1743_v24 = vshrl.u32 %v5220_v10, 16 }
 0x1b0   : > { %v2767_v25 = vunpack.c.l.b16 %v1165_v19  ;;  %v1555_v27 = vrot.slane %v1554_v2, 4  ;;  %v1736_v34 = vor.u32 %v1735_v35, %v1732_v16  ;;  %v1749_v52 = vshll.u32 %v5229_v61, 16  ;;  %v5258_v19 = vld [vmem:[#allocation2 + $0x50] sm:$0x1] }
 0x1b1   : > { %v1550_v28 = vsel %vm4937_vm13, %v1545_v22, %v1549_v4  ;;  %v1741_v38 = vrot.slane %v1739_v12, 5  ;;  %v1745_v40 = vrot.slane %v1743_v24, 4  ;;  %v4624_v42 = vunpack.i.h.bf16 %v4620_v37  ;;  %v781_v22 = vld [vmem:[#allocation2 + $0x54] sm:$0xf] }
 0x1b2   : > { %v2788_v63 = vpack.c.b16 %v2767_v25, %v2766_v14  ;;  %v1560_v43 = vsel %vm4937_vm13, %v1555_v27, %v1559_v3  ;;  %v3004_v44 = vunpack.c.l.b16 %v1550_v28  ;;  %v1737_v6 = vrot.slane %v1736_v34, 4  ;;  %v5251_v23 = vpop.permute.xlu2 %2970 }
 0x1b3   : > { %v3005_v17 = vunpack.c.l.b16 %v1560_v43  ;;  %v1746_v62 = vor.u32 %v1745_v40, %v1741_v38  ;;  %v1751_v13 = vrot.slane %v1749_v52, 5  ;;  %v406_v45 = vpack.c.bf16 %v4624_v42, %v4624_v42 }
 0x1b4   : > { %2814 = vrot.lane.b32.xlu2 %v2788_v63, %s4710_s30  ;;  %v1742_v46 = vsel %vm4937_vm13, %v1737_v6, %v1741_v38  ;;  %v4621_v49 = vunpack.i.l.bf16 %v4620_v37  ;;  %v2123_v56 = vshrl.u32 %v2074_v26, 16  ;;  %v2126_v57 = vshll.u32 %v2074_v26, 16  ;;  %v4625_v63 = vpop.trf.xlu1 }
 0x1b5   : > { %v3035_v50 = vpack.c.b16 %v3005_v17, %v3004_v44  ;;  %v1747_v51 = vrot.slane %v1746_v62, 4  ;;  %v3020_v55 = vunpack.c.l.b16 %v1742_v46  ;;  %v652_v53 = vshrl.u32 %v406_v45, 16  ;;  %v2090_v17 = vld [vmem:[#allocation2 + $0x78] sm:$0xf] }
 0x1b6   : > { %3234 = vrot.lane.b32.xlu1 %v4508_v58, %s4713_s8  ;;  %v655_v20 = vshll.u32 %v406_v45, 16  ;;  %v390_v48 = vpack.c.bf16 %v4621_v49, %v4621_v49  ;;  %v2132_v54 = vshll.u32 %v5117_v30, 16  ;;  %v2136_v36 = vshrl.u32 %v5117_v30, 16 }
 0x1b7   : > { %3052 = vrot.lane.b32.xlu0 %v3035_v50, %s4712_s7  ;;  %v1752_v59 = vsel %vm4937_vm13, %v1747_v51, %v1751_v13  ;;  %v5245_v18 = vrot.slane %v652_v53, 7  ;;  %v2125_v11 = vrot.slane %v2123_v56, 4  ;;  %v2128_v3 = vrot.slane %v2126_v57, 5 }
 0x1b8   : > { %v3021_v4 = vunpack.c.l.b16 %v1752_v59  ;;  %v516_v5 = vshrl.u32 %v390_v48, 16  ;;  %v519_v8 = vshll.u32 %v390_v48, 16  ;;  %v2134_v14 = vrot.slane %v2132_v54, 5  ;;  %v4490_v48 = vld [vmem:[#allocation2 + $0x24] sm:$0xff] }
 0x1b9   : > { %v657_v29 = vor.u32 %v655_v20, %v5245_v18  ;;  %v658_v33 = vrot.slane %v5245_v18, 4  ;;  %v2138_v35 = vrot.slane %v2136_v36, 4  ;;  %v2142_v30 = vshll.u32 %v5119_v31, 16  ;;  %v1902_v54 = vld [vmem:[#allocation2 + $0x48] sm:$0xe] }
 0x1ba   : > { %v3043_v2 = vpack.c.b16 %v3021_v4, %v3020_v55  ;;  %v5255_v16 = vrot.slane %v516_v5, 7  ;;  %v2129_v24 = vor.u32 %v2128_v3, %v2125_v11  ;;  %v4232_v25 = vrot.slane %v2510_v60, 9  ;;  %v1476_v11 = vld [vmem:[#allocation2 + $0x4c] sm:$0xf] }
 0x1bb   : > { %v838_v12 = vsel %vm4893_vm6, %v657_v29, %v837_v15  ;;  %v2600_v27 = vrot.slane %v5249_v0, 5  ;;  %v2139_v37 = vor.u32 %v2138_v35, %v2134_v14  ;;  %v2144_v28 = vrot.slane %v2142_v30, 5  ;;  %v5277_v15 = vpop.permute.xlu2 %2986  ;;  %v841_v35 = vld [vmem:[#allocation2 + $0xbc] sm:$0x1] }
 0x1bc   : > { %3068 = vrot.lane.b32.xlu2 %v3043_v2, %s4712_s7  ;;  %839 = vst [vmem:[#allocation2 + $0xb4] sm:$0xf] %v838_v12  ;;  %v521_v34 = vor.u32 %v519_v8, %v5255_v16  ;;  %v522_v52 = vrot.slane %v5255_v16, 4  ;;  %v2130_v31 = vrot.slane %v2129_v24, 4  ;;  %v2603_v42 = vrot.slane %v5258_v19, 5 }
 0x1bd   : > { %v2601_v38 = vsel %vm4872_vm4, %v4232_v25, %v2600_v27  ;;  %v2602_v40 = vrot.slane %v2600_v27, 4  ;;  %v2140_v44 = vrot.slane %v2139_v37, 4  ;;  %v4629_v6 = vunpack.i.h.bf16 %v4625_v63  ;;  %v1502_v2 = vld [vmem:[#allocation2 + $0x50] sm:$0x1] }
 0x1be   : > { %v782_v43 = vsel %vm4893_vm6, %v521_v34, %v781_v22  ;;  %v3346_v58 = vunpack.c.l.b16 %v2601_v38  ;;  %v2135_v62 = vsel %vm4937_vm13, %v2130_v31, %v2134_v14  ;;  %v4626_v51 = vunpack.i.l.bf16 %v4625_v63 }
 0x1bf   : > { %783 = vst [vmem:[#allocation2 + $0x54] sm:$0xf] %v782_v43  ;;  %v2604_v13 = vsel %vm4872_vm4, %v2602_v40, %v2603_v42  ;;  %v2145_v45 = vsel %vm4937_vm13, %v2140_v44, %v2144_v28  ;;  %v3258_v26 = vunpack.c.l.b16 %v2135_v62  ;;  %v407_v49 = vpack.c.bf16 %v4629_v6, %v4629_v6  ;;  %v785_v42 = vld [vmem:[#allocation2 + $0x5c] sm:$0x1] }
 0x1c0   : > { %v3347_v46 = vunpack.c.l.b16 %v2604_v13  ;;  %v3259_v50 = vunpack.c.l.b16 %v2145_v45  ;;  %v2315_v55 = vshrl.u32 %v2090_v17, 16  ;;  %v2318_v53 = vshll.u32 %v2090_v17, 16 }
 0x1c1   : > { %v660_v56 = vshrl.u32 %v407_v49, 16  ;;  %v663_v57 = vshll.u32 %v407_v49, 16  ;;  %v2324_v59 = vshll.u32 %v5148_v9, 16  ;;  %v391_v4 = vpack.c.bf16 %v4626_v51, %v4626_v51  ;;  %v5302_v51 = vld [vmem:[#allocation2 + $0x28] sm:$0xf] }
 0x1c2   : > { %v3374_v20 = vpack.c.b16 %v3347_v46, %v3346_v58  ;;  %v3290_v36 = vpack.c.b16 %v3259_v50, %v3258_v26  ;;  %v2317_v5 = vrot.slane %v2315_v55, 4  ;;  %v2320_v8 = vrot.slane %v2318_v53, 5  ;;  %v4498_v46 = vld [vmem:[#allocation2 + $0x84] sm:$0xff]  ;;  %v5304_v55 = vld [vmem:[#allocation2 + $0x2c] sm:$0x1] }
 0x1c3   : > { %v662_v60 = vrot.slane %v660_v56, 7  ;;  %v2326_v29 = vrot.slane %v2324_v59, 5  ;;  %v2328_v3 = vshrl.u32 %v5148_v9, 16  ;;  %v2334_v14 = vshll.u32 %v5150_v32, 16  ;;  %v4630_v9 = vpop.trf.xlu1  ;;  %v1289_v53 = vld [vmem:[#allocation2 + $0x24] sm:$0xe] }
 0x1c4   : > { %3394 = vrot.lane.b32.xlu1 %v3374_v20, %s4714_s9  ;;  %2974 = vrot.lane.b32.xlu2 %v4490_v48, %s4709_s29  ;;  %v524_v30 = vshrl.u32 %v391_v4, 16  ;;  %v527_v22 = vshll.u32 %v391_v4, 16  ;;  %v2321_v12 = vor.u32 %v2320_v8, %v2317_v5  ;;  %v4217_v24 = vrot.slane %v1902_v54, 9  ;;  %v5306_v20 = vpop.permute.xlu2 %2796  ;;  %v1491_v56 = vld [vmem:[#allocation2 + $0xa8] sm:$0xf] }
 0x1c5   : > { %3306 = vrot.lane.b32.xlu0 %v3290_v36, %s4715_s10  ;;  %v665_v25 = vor.u32 %v663_v57, %v662_v60  ;;  %v667_v27 = vrot.slane %v662_v60, 4  ;;  %v2330_v34 = vrot.slane %v2328_v3, 4  ;;  %v2336_v37 = vrot.slane %v2334_v14, 5  ;;  %v844_v3 = vld [vmem:[#allocation2 + $0xc0] sm:$0xf] }
 0x1c6   : > { %v526_v28 = vrot.slane %v524_v30, 7  ;;  %v2322_v31 = vrot.slane %v2321_v12, 4  ;;  %v1998_v38 = vrot.slane %v1476_v11, 5  ;;  %v2001_v40 = vrot.slane %v1502_v2, 5  ;;  %v1492_v2 = vld [vmem:[#allocation2 + $0xac] sm:$0xf] }
 0x1c7   : > { %v842_v32 = vsel %vm4912_vm12, %v667_v27, %v841_v35  ;;  %v666_v63 = vsel %vm4906_vm11, %v658_v33, %v665_v25  ;;  %v2331_v43 = vor.u32 %v2330_v34, %v2326_v29  ;;  %v4634_v44 = vunpack.i.h.bf16 %v4630_v9  ;;  %v1510_v25 = vld [vmem:[#allocation2 + $0xb0] sm:$0x1] }
 0x1c8   : > { %843 = vst [vmem:[#allocation2 + $0xbc] sm:$0x1] %v842_v32  ;;  %v529_v58 = vor.u32 %v527_v22, %v526_v28  ;;  %v531_v6 = vrot.slane %v526_v28, 4  ;;  %v2327_v17 = vsel %vm4937_vm13, %v2322_v31, %v2326_v29  ;;  %v1999_v62 = vsel %vm4872_vm4, %v4217_v24, %v1998_v38 }
 0x1c9   : > { %840 = vst.msk [vmem:[#allocation2 + $0xb8] sm:$0xf] %vm237_vm0, %v666_v63  ;;  %v2332_v13 = vrot.slane %v2331_v43, 4  ;;  %v3274_v45 = vunpack.c.l.b16 %v2327_v17  ;;  %v2000_v26 = vrot.slane %v1998_v38, 4  ;;  %v3092_v18 = vunpack.c.l.b16 %v1999_v62 }
 0x1ca   : > { %v530_v33 = vsel %vm4906_vm11, %v522_v52, %v529_v58  ;;  %v786_v49 = vsel %vm4912_vm12, %v531_v6, %v785_v42  ;;  %v408_v50 = vpack.c.bf16 %v4634_v44, %v4634_v44  ;;  %v4631_v52 = vunpack.i.l.bf16 %v4630_v9  ;;  %v4505_v9 = vld [vmem:[#allocation2 + $0x24] sm:$0xff]  ;;  %v788_v42 = vld [vmem:[#allocation2 + $0x60] sm:$0xf] }
 0x1cb   : > { %784 = vst.msk [vmem:[#allocation2 + $0x58] sm:$0xf] %vm237_vm0, %v530_v33  ;;  %v2337_v48 = vsel %vm4937_vm13, %v2332_v13, %v2336_v37  ;;  %v2002_v16 = vsel %vm4872_vm4, %v2000_v26, %v2001_v40  ;;  %v4199_v5 = vrot.slane %v1289_v53, 9  ;;  %v1376_v8 = vrot.slane %v5302_v51, 5  ;;  %v4635_v62 = vpop.trf.xlu1  ;;  %v5331_v13 = vld [vmem:[#allocation2 + $0x88] sm:$0xf] }
 0x1cc   : > { %2990 = vrot.lane.b32.xlu2 %v4498_v46, %s4709_s29  ;;  %787 = vst [vmem:[#allocation2 + $0x5c] sm:$0x1] %v786_v49  ;;  %v3275_v57 = vunpack.c.l.b16 %v2337_v48  ;;  %v3093_v59 = vunpack.c.l.b16 %v2002_v16  ;;  %v669_v54 = vshrl.u32 %v408_v50, 16  ;;  %v672_v36 = vshll.u32 %v408_v50, 16  ;;  %v1297_v33 = vld [vmem:[#allocation2 + $0x84] sm:$0xe] }
 0x1cd   : > { %v392_v4 = vpack.c.bf16 %v4631_v52, %v4631_v52  ;;  %v1379_v11 = vrot.slane %v5304_v55, 5  ;;  %v1826_v35 = vshrl.u32 %v1491_v56, 16  ;;  %v1377_v12 = vsel %vm4872_vm4, %v4199_v5, %v1376_v8  ;;  %v5339_v52 = vld [vmem:[#allocation2 + $0x8c] sm:$0x1] }
 0x1ce   : > { %v3298_v60 = vpack.c.b16 %v3275_v57, %v3274_v45  ;;  %v3119_v29 = vpack.c.b16 %v3093_v59, %v3092_v18  ;;  %v5316_v14 = vrot.slane %v669_v54, 7  ;;  %v1378_v24 = vrot.slane %v1376_v8, 4 }
 0x1cf   : > { %v533_v30 = vshrl.u32 %v392_v4, 16  ;;  %v536_v22 = vshll.u32 %v392_v4, 16  ;;  %v2832_v34 = vunpack.c.l.b16 %v1377_v12  ;;  %v1828_v37 = vrot.slane %v1826_v35, 4  ;;  %v5348_v35 = vpop.permute.xlu0 %2876 }
 0x1d0   : > { %3322 = vrot.lane.b32.xlu0 %v3298_v60, %s4715_s10  ;;  %3140 = vrot.lane.b32.xlu1 %v3119_v29, %s4711_s6  ;;  %v674_v27 = vor.u32 %v672_v36, %v5316_v14  ;;  %v1380_v31 = vsel %vm4872_vm4, %v1378_v24, %v1379_v11  ;;  %v1829_v38 = vshll.u32 %v1491_v56, 16  ;;  %v1835_v40 = vshll.u32 %v1492_v2, 16  ;;  %v2082_v56 = vld [vmem:[#allocation2 + $0x48] sm:$0xf] }
 0x1d1   : > { %v5323_v28 = vrot.slane %v533_v30, 7  ;;  %v2833_v63 = vunpack.c.l.b16 %v1380_v31  ;;  %v1839_v43 = vshrl.u32 %v1492_v2, 16  ;;  %v1845_v44 = vshll.u32 %v1510_v25, 16 }
 0x1d2   : > { %v845_v32 = vsel %vm4893_vm6, %v674_v27, %v844_v3  ;;  %v1831_v6 = vrot.slane %v1829_v38, 5  ;;  %v1837_v17 = vrot.slane %v1835_v40, 5  ;;  %v675_v45 = vrot.slane %v5316_v14, 4 }
 0x1d3   : > { %846 = vst [vmem:[#allocation2 + $0xc0] sm:$0xf] %v845_v32  ;;  %v538_v58 = vor.u32 %v536_v22, %v5323_v28  ;;  %v539_v26 = vrot.slane %v5323_v28, 4  ;;  %v2861_v18 = vpack.c.b16 %v2833_v63, %v2832_v34  ;;  %v1841_v46 = vrot.slane %v1839_v43, 4  ;;  %v848_v28 = vld [vmem:[#allocation2 + $0xc8] sm:$0x1] }
 0x1d4   : > { %3228 = vrot.lane.b32.xlu2 %v4505_v9, %s4713_s8  ;;  %v1832_v53 = vor.u32 %v1831_v6, %v1828_v37  ;;  %v1847_v48 = vrot.slane %v1845_v44, 5  ;;  %v4639_v16 = vunpack.i.h.bf16 %v4635_v62  ;;  %v4636_v59 = vunpack.i.l.bf16 %v4635_v62  ;;  %v792_v32 = vld [vmem:[#allocation2 + $0x68] sm:$0x1] }
 0x1d5   : > { %v5335_v49 = vpop.permute.xlu2 %3050  ;;  %v789_v50 = vsel %vm4893_vm6, %v538_v58, %v788_v42  ;;  %v1842_v57 = vor.u32 %v1841_v46, %v1837_v17  ;;  %v4207_v4 = vrot.slane %v1297_v33, 9  ;;  %v1432_v5 = vrot.slane %v5331_v13, 5  ;;  %v1899_v46 = vld [vmem:[#allocation2 + $0x24] sm:$0xe] }
 0x1d6   : > { %790 = vst [vmem:[#allocation2 + $0x60] sm:$0xf] %v789_v50  ;;  %v1833_v54 = vrot.slane %v1832_v53, 4  ;;  %v409_v36 = vpack.c.bf16 %v4639_v16, %v4639_v16  ;;  %v393_v11 = vpack.c.bf16 %v4636_v59, %v4636_v59  ;;  %v1435_v39 = vrot.slane %v5339_v52, 5 }
 0x1d7   : > { %v1843_v8 = vrot.slane %v1842_v57, 4  ;;  %v2219_v60 = vshrl.u32 %v2082_v56, 16  ;;  %v1433_v2 = vsel %vm4872_vm4, %v4207_v4, %v1432_v5  ;;  %v1434_v34 = vrot.slane %v1432_v5, 4  ;;  %v857_v57 = vld [vmem:[#allocation2 + $0x24] sm:$0xf] }
 0x1d8   : > { %2880 = vrot.lane.b32.xlu0 %v2861_v18, %s4708_s28  ;;  %v1838_v29 = vsel %vm4937_vm13, %v1833_v54, %v1837_v17  ;;  %v677_v3 = vshrl.u32 %v409_v36, 16  ;;  %v680_v14 = vshll.u32 %v409_v36, 16  ;;  %v541_v12 = vshrl.u32 %v393_v11, 16  ;;  %v5355_v18 = vld [vmem:[#allocation2 + $0x28] sm:$0xf] }
 0x1d9   : > { %v1848_v30 = vsel %vm4937_vm13, %v1843_v8, %v1847_v48  ;;  %v3028_v22 = vunpack.c.l.b16 %v1838_v29  ;;  %v544_v24 = vshll.u32 %v393_v11, 16  ;;  %v2848_v37 = vunpack.c.l.b16 %v1433_v2 }
 0x1da   : > { %v3029_v25 = vunpack.c.l.b16 %v1848_v30  ;;  %v679_v27 = vrot.slane %v677_v3, 7  ;;  %v543_v31 = vrot.slane %v541_v12, 7  ;;  %v2221_v38 = vrot.slane %v2219_v60, 4  ;;  %v1906_v12 = vld [vmem:[#allocation2 + $0x78] sm:$0xe] }
 0x1db   : > { %v2222_v40 = vshll.u32 %v2082_v56, 16  ;;  %v2228_v9 = vshll.u32 %v5249_v0, 16  ;;  %v1436_v44 = vsel %vm4872_vm4, %v1434_v34, %v1435_v39  ;;  %v2232_v16 = vshrl.u32 %v5249_v0, 16  ;;  %v5365_v56 = vld [vmem:[#allocation2 + $0x2c] sm:$0x1] }
 0x1dc   : > { %v3047_v42 = vpack.c.b16 %v3029_v25, %v3028_v22  ;;  %v682_v63 = vor.u32 %v680_v14, %v679_v27  ;;  %v684_v43 = vrot.slane %v679_v27, 4  ;;  %v546_v58 = vor.u32 %v544_v24, %v543_v31 }
 0x1dd   : > { %v548_v6 = vrot.slane %v543_v31, 4  ;;  %v2849_v17 = vunpack.c.l.b16 %v1436_v44  ;;  %v2224_v62 = vrot.slane %v2222_v40, 5  ;;  %v2230_v48 = vrot.slane %v2228_v9, 5 }
 0x1de   : > { %v5357_v33 = vpop.permute.xlu2 %2878  ;;  %3076 = vrot.lane.b32.xlu1 %v3047_v42, %s4712_s7  ;;  %v849_v50 = vsel %vm4912_vm12, %v684_v43, %v848_v28  ;;  %v683_v53 = vsel %vm4906_vm11, %v675_v45, %v682_v63  ;;  %v547_v59 = vsel %vm4906_vm11, %v539_v26, %v546_v58  ;;  %v2234_v5 = vrot.slane %v2232_v16, 4 }
 0x1df   : > { %850 = vst [vmem:[#allocation2 + $0xc8] sm:$0x1] %v849_v50  ;;  %v793_v54 = vsel %vm4912_vm12, %v548_v6, %v792_v32  ;;  %v2869_v36 = vpack.c.b16 %v2849_v17, %v2848_v37  ;;  %v2225_v4 = vor.u32 %v2224_v62, %v2221_v38  ;;  %v2238_v45 = vshll.u32 %v5258_v19, 16  ;;  %v5379_v19 = vpop.permute.xlu0 %2892  ;;  %v5391_v6 = vld [vmem:[#allocation2 + $0x28] sm:$0xf] }
 0x1e0   : > { %791 = vst.msk [vmem:[#allocation2 + $0x64] sm:$0xf] %vm237_vm0, %v547_v59  ;;  %v4214_v8 = vrot.slane %v1899_v46, 9  ;;  %v1977_v0 = vrot.slane %v5355_v18, 5  ;;  %v1980_v1 = vrot.slane %v5365_v56, 5  ;;  %v975_v26 = vshrl.u32 %v857_v57, 16 }
 0x1e1   : > { %794 = vst [vmem:[#allocation2 + $0x68] sm:$0x1] %v793_v54  ;;  %2896 = vrot.lane.b32.xlu0 %v2869_v36, %s4708_s28  ;;  %v2226_v11 = vrot.slane %v2225_v4, 4  ;;  %v978_v39 = vshll.u32 %v857_v57, 16  ;;  %v2235_v7 = vor.u32 %v2234_v5, %v2230_v48  ;;  %v2240_v60 = vrot.slane %v2238_v45, 5 }
 0x1e2   : > { %847 = vst.msk [vmem:[#allocation2 + $0xc4] sm:$0xf] %vm237_vm0, %v683_v53  ;;  %v1978_v29 = vsel %vm4872_vm4, %v4214_v8, %v1977_v0  ;;  %v1979_v3 = vrot.slane %v1977_v0, 4  ;;  %v977_v30 = vrot.slane %v975_v26, 4  ;;  %v984_v34 = vshll.u32 %v5302_v51, 16  ;;  %v4473_v53 = vld [vmem:[#allocation2 + $0xc] sm:$0xff] }
 0x1e3   : > { %v2231_v14 = vsel %vm4937_vm13, %v2226_v11, %v2230_v48  ;;  %v3086_v2 = vunpack.c.l.b16 %v1978_v29  ;;  %v980_v22 = vrot.slane %v978_v39, 5  ;;  %v2236_v24 = vrot.slane %v2235_v7, 4  ;;  %v2507_v17 = vld [vmem:[#allocation2 + $0x24] sm:$0xe]  ;;  %v5398_v50 = vld [vmem:[#allocation2 + $0x2c] sm:$0x1] }
 0x1e4   : > { %v3266_v25 = vunpack.c.l.b16 %v2231_v14  ;;  %v1981_v27 = vsel %vm4872_vm4, %v1979_v3, %v1980_v1  ;;  %v988_v31 = vshrl.u32 %v5302_v51, 16  ;;  %v994_v38 = vshll.u32 %v5304_v55, 16  ;;  %v873_v59 = vld [vmem:[#allocation2 + $0x84] sm:$0xf] }
 0x1e5   : > { %v3087_v37 = vunpack.c.l.b16 %v1981_v27  ;;  %v981_v28 = vor.u32 %v980_v22, %v977_v30  ;;  %v2241_v40 = vsel %vm4937_vm13, %v2236_v24, %v2240_v60  ;;  %v986_v9 = vrot.slane %v984_v34, 5  ;;  %v1469_v3 = vld [vmem:[#allocation2 + $0x24] sm:$0xf] }
 0x1e6   : > { %v4221_v42 = vrot.slane %v1906_v12, 9  ;;  %v2026_v32 = vrot.slane %v5220_v10, 5  ;;  %v3267_v63 = vunpack.c.l.b16 %v2241_v40  ;;  %v990_v58 = vrot.slane %v988_v31, 4  ;;  %v5393_v62 = vpop.permute.xlu2 %2894 }
 0x1e7   : > { %v3116_v43 = vpack.c.b16 %v3087_v37, %v3086_v2  ;;  %v982_v44 = vrot.slane %v981_v28, 4  ;;  %v2029_v46 = vrot.slane %v5229_v61, 5  ;;  %v996_v57 = vrot.slane %v994_v38, 5  ;;  %v5414_v39 = vpop.permute.xlu0 %2812  ;;  %v4472_v38 = vld [vmem:[#allocation2] sm:$0xff] }
 0x1e8   : > { %v2027_v51 = vsel %vm4872_vm4, %v4221_v42, %v2026_v32  ;;  %v2028_v55 = vrot.slane %v2026_v32, 4  ;;  %v3294_v10 = vpack.c.b16 %v3267_v63, %v3266_v25  ;;  %v991_v16 = vor.u32 %v990_v58, %v986_v9  ;;  %v2795_v63 = vpop.permute.xlu1 %2794 }
 0x1e9   : > { %3134 = vrot.lane.b32.xlu2 %v3116_v43, %s4711_s6  ;;  %v987_v48 = vsel %vm4937_vm13, %v982_v44, %v986_v9  ;;  %v4229_v36 = vrot.slane %v2507_v17, 9  ;;  %v2579_v4 = vrot.slane %v5391_v6, 5  ;;  %v5408_v61 = vsel %vm3418_vm14, %v4473_v53, %v5306_v20  ;;  %v2092_v17 = vld [vmem:[#allocation2 + $0x84] sm:$0xf] }
 0x1ea   : > { %v2030_v54 = vsel %vm4872_vm4, %v2028_v55, %v2029_v46  ;;  %3314 = vrot.lane.b32.xlu1 %v3294_v10, %s4715_s10  ;;  %v992_v5 = vrot.slane %v991_v16, 4  ;;  %v3100_v45 = vunpack.c.l.b16 %v2027_v51  ;;  %v2582_v8 = vrot.slane %v5398_v50, 5 }
 0x1eb   : > { %v2752_v0 = vunpack.c.l.b16 %v987_v48  ;;  %v2580_v11 = vsel %vm4872_vm4, %v4229_v36, %v2579_v4  ;;  %v2581_v1 = vrot.slane %v2579_v4, 4  ;;  %v1167_v26 = vshrl.u32 %v873_v59, 16 }
 0x1ec   : > { %v997_v7 = vsel %vm4937_vm13, %v992_v5, %v996_v57  ;;  %v3101_v60 = vunpack.c.l.b16 %v2030_v54  ;;  %v3340_v20 = vunpack.c.l.b16 %v2580_v11  ;;  %v1170_v29 = vshll.u32 %v873_v59, 16  ;;  %v2093_v59 = vld [vmem:[#allocation2 + $0x88] sm:$0xf] }
 0x1ed   : > { %v2753_v14 = vunpack.c.l.b16 %v997_v7  ;;  %v2583_v2 = vsel %vm4872_vm4, %v2581_v1, %v2582_v8  ;;  %v1169_v30 = vrot.slane %v1167_v26, 4  ;;  %v1176_v22 = vshll.u32 %v5331_v13, 16 }
 0x1ee   : > { %v3341_v12 = vunpack.c.l.b16 %v2583_v2  ;;  %v1172_v24 = vrot.slane %v1170_v29, 5  ;;  %v1180_v25 = vshrl.u32 %v5331_v13, 16  ;;  %v1186_v27 = vshll.u32 %v5339_v52, 16  ;;  %v5423_v43 = vpop.permute.xlu2 %3386 }
 0x1ef   : > { %v2781_v34 = vpack.c.b16 %v2753_v14, %v2752_v0  ;;  %v1178_v37 = vrot.slane %v1176_v22, 5  ;;  %v1562_v28 = vshrl.u32 %v1469_v3, 16  ;;  %v1565_v31 = vshll.u32 %v1469_v3, 16  ;;  %v2115_v14 = vld [vmem:[#allocation2 + $0x8c] sm:$0x1] }
 0x1f0   : > { %v3123_v40 = vpack.c.b16 %v3101_v60, %v3100_v45  ;;  %v3371_v9 = vpack.c.b16 %v3341_v12, %v3340_v20  ;;  %v1173_v42 = vor.u32 %v1172_v24, %v1169_v30  ;;  %v1182_v32 = vrot.slane %v1180_v25, 4  ;;  %v2076_v60 = vld [vmem:[#allocation2 + $0x24] sm:$0xf] }
 0x1f1   : > { %2800 = vrot.lane.b32.xlu0 %v2781_v34, %s4710_s30  ;;  %v1564_v44 = vrot.slane %v1562_v28, 4  ;;  %v1567_v58 = vrot.slane %v1565_v31, 5  ;;  %v1571_v13 = vshll.u32 %v5355_v18, 16  ;;  %v1575_v52 = vshrl.u32 %v5355_v18, 16  ;;  %v4513_v30 = vld [vmem:[#allocation2 + $0x84] sm:$0xff] }
 0x1f2   : > { %3148 = vrot.lane.b32.xlu1 %v3123_v40, %s4711_s6  ;;  %3388 = vrot.lane.b32.xlu2 %v3371_v9, %s4714_s9  ;;  %v1174_v51 = vrot.slane %v1173_v42, 4  ;;  %v1183_v55 = vor.u32 %v1182_v32, %v1178_v37  ;;  %v1188_v46 = vrot.slane %v1186_v27, 5  ;;  %v1581_v53 = vshll.u32 %v5365_v56, 16 }
 0x1f3   : > { %v1568_v10 = vor.u32 %v1567_v58, %v1564_v44  ;;  %v1573_v48 = vrot.slane %v1571_v13, 5  ;;  %v1577_v16 = vrot.slane %v1575_v52, 4  ;;  %v3421_v57 = vsel %vm3418_vm14, %v4472_v38, %v2795_v63 }
 0x1f4   : > { %v1179_v18 = vsel %vm4937_vm13, %v1174_v51, %v1178_v37  ;;  %v1184_v54 = vrot.slane %v1183_v55, 4  ;;  %v1583_v36 = vrot.slane %v1581_v53, 5  ;;  %v2339_v4 = vshrl.u32 %v2092_v17, 16 }
 0x1f5   : > { %v2768_v5 = vunpack.c.l.b16 %v1179_v18  ;;  %v1569_v45 = vrot.slane %v1568_v10, 4  ;;  %v1578_v8 = vor.u32 %v1577_v16, %v1573_v48  ;;  %v2342_v0 = vshll.u32 %v2092_v17, 16  ;;  %v4481_v18 = vld [vmem:[#allocation2 + $0x6c] sm:$0xff] }
 0x1f6   : > { %v5434_v11 = vpop.permute.xlu0 %3066  ;;  %v1189_v56 = vsel %vm4937_vm13, %v1184_v54, %v1188_v46  ;;  %v2341_v1 = vrot.slane %v2339_v4, 4  ;;  %v2348_v26 = vshll.u32 %v2093_v59, 16  ;;  %v2352_v7 = vshrl.u32 %v2093_v59, 16  ;;  %v5443_v42 = vpop.permute.xlu2 %3402 }
 0x1f7   : > { %v2769_v20 = vunpack.c.l.b16 %v1189_v56  ;;  %v1574_v29 = vsel %vm4937_vm13, %v1569_v45, %v1573_v48  ;;  %v1579_v3 = vrot.slane %v1578_v8, 4  ;;  %v2344_v2 = vrot.slane %v2342_v0, 5  ;;  %v1479_v48 = vld [vmem:[#allocation2 + $0x60] sm:$0xf]  ;;  %v4491_v8 = vld [vmem:[#allocation2 + $0x30] sm:$0xff] }
 0x1f8   : > { %v3006_v22 = vunpack.c.l.b16 %v1574_v29  ;;  %v2350_v12 = vrot.slane %v2348_v26, 5  ;;  %v2354_v24 = vrot.slane %v2352_v7, 4  ;;  %v2358_v25 = vshll.u32 %v2115_v14, 16  ;;  %v1290_v26 = vld [vmem:[#allocation2 + $0x30] sm:$0xe] }
 0x1f9   : > { %v2789_v27 = vpack.c.b16 %v2769_v20, %v2768_v5  ;;  %v1584_v34 = vsel %vm4937_vm13, %v1579_v3, %v1583_v36  ;;  %v2345_v37 = vor.u32 %v2344_v2, %v2341_v1  ;;  %v2147_v28 = vshrl.u32 %v2076_v60, 16  ;;  %v5461_v36 = vld [vmem:[#allocation2 + $0x64] sm:$0xf]  ;;  %v5474_v29 = vld [vmem:[#allocation2 + $0x34] sm:$0xf] }
 0x1fa   : > { %3244 = vrot.lane.b32.xlu1 %v4513_v30, %s4713_s8  ;;  %v3007_v31 = vunpack.c.l.b16 %v1584_v34  ;;  %v2355_v38 = vor.u32 %v2354_v24, %v2350_v12  ;;  %v2360_v40 = vrot.slane %v2358_v25, 5  ;;  %v2150_v9 = vshll.u32 %v2076_v60, 16  ;;  %v5476_v3 = vld [vmem:[#allocation2 + $0x38] sm:$0x1]  ;;  %v5484_v34 = vld [vmem:[#allocation2 + $0x94] sm:$0xf] }
 0x1fb   : > { %2816 = vrot.lane.b32.xlu0 %v2789_v27, %s4710_s30  ;;  %v2346_v32 = vrot.slane %v2345_v37, 4  ;;  %v2149_v63 = vrot.slane %v2147_v28, 4  ;;  %v2156_v44 = vshll.u32 %v5391_v6, 16  ;;  %v2160_v58 = vshrl.u32 %v5391_v6, 16  ;;  %v3131_v28 = vpop.permute.xlu1 %3130 }
 0x1fc   : > { %v3036_v13 = vpack.c.b16 %v3007_v31, %v3006_v22  ;;  %v2356_v52 = vrot.slane %v2355_v38, 4  ;;  %v2152_v17 = vrot.slane %v2150_v9, 5  ;;  %v2166_v51 = vshll.u32 %v5398_v50, 16 }
 0x1fd   : > { %v5452_v55 = vsel %vm3467_vm15, %v5408_v61, %v5348_v35  ;;  %v2351_v46 = vsel %vm4937_vm13, %v2346_v32, %v2350_v12  ;;  %v2158_v53 = vrot.slane %v2156_v44, 5  ;;  %v2162_v10 = vrot.slane %v2160_v58, 4  ;;  %v1298_v12 = vld [vmem:[#allocation2 + $0x90] sm:$0xe]  ;;  %v5488_v32 = vld [vmem:[#allocation2 + $0x98] sm:$0x1] }
 0x1fe   : > { %3054 = vrot.lane.b32.xlu2 %v3036_v13, %s4712_s7  ;;  %v3469_v6 = vsel %vm3467_vm15, %v3421_v57, %v5224_v47  ;;  %v2361_v16 = vsel %vm4937_vm13, %v2356_v52, %v2360_v40  ;;  %v3276_v50 = vunpack.c.l.b16 %v2351_v46  ;;  %v2153_v59 = vor.u32 %v2152_v17, %v2149_v63  ;;  %v2973_v4 = vpop.permute.xlu0 %2972  ;;  %v5467_v47 = vld [vmem:[#allocation2 + $0x68] sm:$0x1] }
 0x1ff   : > { %v3277_v54 = vunpack.c.l.b16 %v2361_v16  ;;  %v2163_v35 = vor.u32 %v2162_v10, %v2158_v53  ;;  %v2168_v61 = vrot.slane %v2166_v51, 5  ;;  %vm3500_vm0 = vcmask 195584   ;;  %v1471_v16 = vld [vmem:[#allocation2 + $0x30] sm:$0xf] }
 0x200   : > { %v2154_v5 = vrot.slane %v2153_v59, 4  ;;  %v5465_v45 = vsel %vm3418_vm14, %v4481_v18, %v5414_v39  ;;  %v1682_v57 = vshrl.u32 %v1479_v48, 16  ;;  %v1685_v1 = vshll.u32 %v1479_v48, 16 }
 0x201   : > { %v3299_v0 = vpack.c.b16 %v3277_v54, %v3276_v50  ;;  %v2164_v56 = vrot.slane %v2163_v35, 4  ;;  %v3502_v60 = vsel %vm3500_vm0, %v3469_v6, %v5251_v23  ;;  %v1691_v39 = vshll.u32 %v5461_v36, 16  ;;  %v4474_v35 = vld [vmem:[#allocation2 + $0x18] sm:$0xff] }
 0x202   : > { %v2159_v7 = vsel %vm4937_vm13, %v2154_v5, %v2158_v53  ;;  %v1684_v20 = vrot.slane %v1682_v57, 4  ;;  %v1687_v30 = vrot.slane %v1685_v1, 5  ;;  %v1695_v22 = vshrl.u32 %v5461_v36, 16 }
 0x203   : > { %2976 = vrot.lane.b32.xlu0 %v4491_v8, %s4709_s29  ;;  %3324 = vrot.lane.b32.xlu1 %v3299_v0, %s4715_s10  ;;  %v2169_v14 = vsel %vm4937_vm13, %v2164_v56, %v2168_v61  ;;  %v3260_v2 = vunpack.c.l.b16 %v2159_v7  ;;  %v1693_v24 = vrot.slane %v1691_v39, 5  ;;  %v1701_v25 = vshll.u32 %v5467_v47, 16 }
 0x204   : > { %v3261_v23 = vunpack.c.l.b16 %v2169_v14  ;;  %v4200_v27 = vrot.slane %v1290_v26, 9  ;;  %v1688_v31 = vor.u32 %v1687_v30, %v1684_v20  ;;  %v1697_v38 = vrot.slane %v1695_v22, 4  ;;  %v1478_v14 = vld [vmem:[#allocation2 + $0x58] sm:$0xf] }
 0x205   : > { %v2799_v37 = vpop.permute.xlu2 %2798  ;;  %v1383_v40 = vrot.slane %v5474_v29, 5  ;;  %v1386_v9 = vrot.slane %v5476_v3, 5  ;;  %v3535_v44 = vsel %vm3533_vm1, %v3502_v60, %v5335_v49  ;;  %v1703_v58 = vrot.slane %v1701_v25, 5  ;;  %v4499_v49 = vld [vmem:[#allocation2 + $0x90] sm:$0xff] }
 0x206   : > { %v3291_v63 = vpack.c.b16 %v3261_v23, %v3260_v2  ;;  %v4208_v13 = vrot.slane %v1298_v12, 9  ;;  %v1689_v52 = vrot.slane %v1688_v31, 4  ;;  %v1698_v17 = vor.u32 %v1697_v38, %v1693_v24  ;;  %v5508_v61 = vpop.permute.xlu0 %2988  ;;  %v1503_v2 = vld [vmem:[#allocation2 + $0x5c] sm:$0x1]  ;;  %v4677_v12 = vld [vmem:[#allocation2 + $0x34] sm:$0xf] }
 0x207   : > { %v1384_v51 = vsel %vm4872_vm4, %v4200_v27, %v1383_v40  ;;  %v1385_v46 = vrot.slane %v1383_v40, 4  ;;  %v5496_v53 = vsel %vm3566_vm2, %v3535_v44, %v3131_v28  ;;  %v1439_v48 = vrot.slane %v5484_v34, 5  ;;  %v859_v25 = vld [vmem:[#allocation2 + $0x30] sm:$0xf] }
 0x208   : > { %3308 = vrot.lane.b32.xlu2 %v3291_v63, %s4715_s10  ;;  %v2834_v10 = vunpack.c.l.b16 %v1384_v51  ;;  %v1442_v6 = vrot.slane %v5488_v32, 5  ;;  %v1694_v50 = vsel %vm4937_vm13, %v1689_v52, %v1693_v24  ;;  %v1699_v59 = vrot.slane %v1698_v17, 4 }
 0x209   : > { %v1387_v18 = vsel %vm4872_vm4, %v1385_v46, %v1386_v9  ;;  %v5506_v54 = vsel %vm3500_vm0, %v5452_v55, %v2973_v4  ;;  %v3016_v5 = vunpack.c.l.b16 %v1694_v50  ;;  %v1440_v8 = vsel %vm4872_vm4, %v4208_v13, %v1439_v48  ;;  %v1903_v4 = vld [vmem:[#allocation2 + $0x54] sm:$0xe] }
 0x20a   : > { %v2835_v57 = vunpack.c.l.b16 %v1387_v18  ;;  %v1441_v0 = vrot.slane %v1439_v48, 4  ;;  %v1704_v56 = vsel %vm4937_vm13, %v1699_v59, %v1703_v58  ;;  %v2850_v1 = vunpack.c.l.b16 %v1440_v8  ;;  %v4506_v46 = vld [vmem:[#allocation2 + $0x30] sm:$0xff] }
 0x20b   : > { %2992 = vrot.lane.b32.xlu0 %v4499_v49, %s4709_s29  ;;  %v5516_v26 = vsel %vm3418_vm14, %v4474_v35, %v2799_v37  ;;  %v1586_v55 = vshrl.u32 %v1471_v16, 16  ;;  %v3017_v7 = vunpack.c.l.b16 %v1704_v56  ;;  %v1589_v39 = vshll.u32 %v1471_v16, 16  ;;  %v4678_v37 = vld [vmem:[#allocation2 + $0x38] sm:$0x1]  ;;  %v4516_v56 = vld [vmem:[#allocation2 + $0xa8] sm:$0xff] }
 0x20c   : > { %v2862_v60 = vpack.c.b16 %v2835_v57, %v2834_v10  ;;  %v1443_v20 = vsel %vm4872_vm4, %v1441_v0, %v1442_v6  ;;  %v1595_v23 = vshll.u32 %v4677_v12, 16  ;;  %v1599_v24 = vshrl.u32 %v4677_v12, 16 }
 0x20d   : > { %v2851_v30 = vunpack.c.l.b16 %v1443_v20  ;;  %v1588_v22 = vrot.slane %v1586_v55, 4  ;;  %v3041_v27 = vpack.c.b16 %v3017_v7, %v3016_v5  ;;  %v1591_v28 = vrot.slane %v1589_v39, 5 }
 0x20e   : > { %v1605_v31 = vshll.u32 %v4678_v37, 16  ;;  %v4218_v38 = vrot.slane %v1903_v4, 9  ;;  %v2815_v40 = vpop.permute.xlu2 %2814  ;;  %v1597_v63 = vrot.slane %v1595_v23, 5  ;;  %v1601_v44 = vrot.slane %v1599_v24, 4  ;;  %v5529_v0 = vpop.permute.xlu0 %3146  ;;  %v1907_v37 = vld [vmem:[#allocation2 + $0x84] sm:$0xe] }
 0x20f   : > { %v2870_v9 = vpack.c.b16 %v2851_v30, %v2850_v1  ;;  %v2005_v58 = vrot.slane %v1478_v14, 5  ;;  %3064 = vrot.lane.b32.xlu1 %v3041_v27, %s4712_s7  ;;  %v1592_v13 = vor.u32 %v1591_v28, %v1588_v22  ;;  %v2008_v17 = vrot.slane %v1503_v2, 5  ;;  %v4482_v2 = vld [vmem:[#allocation2 + $0x78] sm:$0xff]  ;;  %v1487_v30 = vld [vmem:[#allocation2 + $0x90] sm:$0xf] }
 0x210   : > { %2882 = vrot.lane.b32.xlu2 %v2862_v60, %s4708_s28  ;;  %v1607_v52 = vrot.slane %v1605_v31, 5  ;;  %v999_v51 = vshrl.u32 %v859_v25, 16  ;;  %v1602_v10 = vor.u32 %v1601_v44, %v1597_v63  ;;  %v1002_v16 = vshll.u32 %v859_v25, 16  ;;  %v1488_v22 = vld [vmem:[#allocation2 + $0x94] sm:$0xf] }
 0x211   : > { %v2006_v48 = vsel %vm4872_vm4, %v4218_v38, %v2005_v58  ;;  %v2007_v6 = vrot.slane %v2005_v58, 4  ;;  %v1593_v49 = vrot.slane %v1592_v13, 4  ;;  %v1008_v18 = vshll.u32 %v5474_v29, 16  ;;  %v1508_v38 = vld [vmem:[#allocation2 + $0x98] sm:$0x1] }
 0x212   : > { %v3094_v50 = vunpack.c.l.b16 %v2006_v48  ;;  %v1001_v59 = vrot.slane %v999_v51, 4  ;;  %v1603_v35 = vrot.slane %v1602_v10, 4  ;;  %v1004_v57 = vrot.slane %v1002_v16, 5  ;;  %v875_v10 = vld [vmem:[#allocation2 + $0x90] sm:$0xf] }
 0x213   : > { %3230 = vrot.lane.b32.xlu0 %v4506_v46, %s4713_s8  ;;  %v2009_v5 = vsel %vm4872_vm4, %v2007_v6, %v2008_v17  ;;  %v1012_v8 = vshrl.u32 %v5474_v29, 16  ;;  %v1598_v1 = vsel %vm4937_vm13, %v1593_v49, %v1597_v63  ;;  %v1010_v4 = vrot.slane %v1008_v18, 5 }
 0x214   : > { %v3095_v55 = vunpack.c.l.b16 %v2009_v5  ;;  %v1018_v7 = vshll.u32 %v5476_v3, 16  ;;  %v1608_v60 = vsel %vm4937_vm13, %v1603_v35, %v1607_v52  ;;  %v3008_v20 = vunpack.c.l.b16 %v1598_v1  ;;  %v4680_v35 = vld [vmem:[#allocation2 + $0x8c] sm:$0x1] }
 0x215   : > { %v1005_v39 = vor.u32 %v1004_v57, %v1001_v59  ;;  %v1014_v14 = vrot.slane %v1012_v8, 4  ;;  %v3009_v29 = vunpack.c.l.b16 %v1608_v60  ;;  %v3487_v24 = vsel %vm3467_vm15, %v5465_v45, %v5379_v19  ;;  %v4679_v59 = vld [vmem:[#allocation2 + $0x88] sm:$0xf] }
 0x216   : > { %v3120_v12 = vpack.c.b16 %v3095_v55, %v3094_v50  ;;  %v1020_v23 = vrot.slane %v1018_v7, 5  ;;  %v3520_v3 = vsel %vm3500_vm0, %v3487_v24, %v5508_v61  ;;  %v5542_v28 = vsel %vm3418_vm14, %v4482_v2, %v2815_v40  ;;  %v3069_v13 = vpop.permute.xlu2 %3068  ;;  %v5552_v55 = vpop.permute.xlu0 %3242 }
 0x217   : > { %v1006_v25 = vrot.slane %v1005_v39, 4  ;;  %v1015_v27 = vor.u32 %v1014_v14, %v1010_v4  ;;  %3250 = vrot.lane.b32.xlu1 %v4516_v56, %s4713_s8  ;;  %v3037_v31 = vpack.c.b16 %v3009_v29, %v3008_v20  ;;  %v1778_v63 = vshrl.u32 %v1487_v30, 16 }
 0x218   : > { %2898 = vrot.lane.b32.xlu2 %v2870_v9, %s4708_s28  ;;  %v1781_v44 = vshll.u32 %v1487_v30, 16  ;;  %v1787_v58 = vshll.u32 %v1488_v22, 16  ;;  %v1791_v52 = vshrl.u32 %v1488_v22, 16  ;;  %v1797_v61 = vshll.u32 %v1508_v38, 16 }
 0x219   : > { %v1011_v19 = vsel %vm4937_vm13, %v1006_v25, %v1010_v4  ;;  %v1016_v45 = vrot.slane %v1015_v27, 4  ;;  %v1780_v40 = vrot.slane %v1778_v63, 4  ;;  %v4222_v16 = vrot.slane %v1907_v37, 9  ;;  %v5563_v25 = vld [vmem:[#allocation2 + $0x40] sm:$0xf] }
 0x21a   : > { %v2754_v17 = vunpack.c.l.b16 %v1011_v19  ;;  %v1783_v51 = vrot.slane %v1781_v44, 5  ;;  %v1789_v46 = vrot.slane %v1787_v58, 5  ;;  %v1793_v48 = vrot.slane %v1791_v52, 4  ;;  %v1291_v27 = vld [vmem:[#allocation2 + $0x3c] sm:$0xe] }
 0x21b   : > { %3056 = vrot.lane.b32.xlu0 %v3037_v31, %s4712_s7  ;;  %v1021_v9 = vsel %vm4937_vm13, %v1016_v45, %v1020_v23  ;;  %v1799_v6 = vrot.slane %v1797_v61, 5  ;;  %v2033_v18 = vrot.slane %v4679_v59, 5  ;;  %v2036_v5 = vrot.slane %v4680_v35, 5  ;;  %v5567_v63 = vld [vmem:[#allocation2 + $0x44] sm:$0x1] }
 0x21c   : > { %v2755_v49 = vunpack.c.l.b16 %v1021_v9  ;;  %v1784_v50 = vor.u32 %v1783_v51, %v1780_v40  ;;  %v1794_v57 = vor.u32 %v1793_v48, %v1789_v46  ;;  %v1191_v8 = vshrl.u32 %v875_v10, 16  ;;  %v5574_v51 = vld [vmem:[#allocation2 + $0xa0] sm:$0xf] }
 0x21d   : > { %v1194_v56 = vshll.u32 %v875_v10, 16  ;;  %v1200_v1 = vshll.u32 %v5484_v34, 16  ;;  %v2034_v60 = vsel %vm4872_vm4, %v4222_v16, %v2033_v18  ;;  %v2035_v20 = vrot.slane %v2033_v18, 4  ;;  %v1299_v16 = vld [vmem:[#allocation2 + $0x9c] sm:$0xe] }
 0x21e   : > { %v2782_v4 = vpack.c.b16 %v2755_v49, %v2754_v17  ;;  %v1785_v7 = vrot.slane %v1784_v50, 4  ;;  %v1795_v39 = vrot.slane %v1794_v57, 4  ;;  %v3102_v14 = vunpack.c.l.b16 %v2034_v60  ;;  %v2975_v52 = vpop.permute.xlu2 %2974  ;;  %v2094_v50 = vld [vmem:[#allocation2 + $0x90] sm:$0xf]  ;;  %v2095_v57 = vld [vmem:[#allocation2 + $0x94] sm:$0xf] }
 0x21f   : > { %v1193_v2 = vrot.slane %v1191_v8, 4  ;;  %v1196_v30 = vrot.slane %v1194_v56, 5  ;;  %3142 = vrot.lane.b32.xlu1 %v3120_v12, %s4711_s6  ;;  %v2037_v29 = vsel %vm4872_vm4, %v2035_v20, %v2036_v5  ;;  %v1202_v23 = vrot.slane %v1200_v1, 5 }
 0x220   : > { %2802 = vrot.lane.b32.xlu2 %v2782_v4, %s4710_s30  ;;  %v1790_v22 = vsel %vm4937_vm13, %v1785_v7, %v1789_v46  ;;  %v1204_v24 = vshrl.u32 %v5484_v34, 16  ;;  %v1800_v37 = vsel %vm4937_vm13, %v1795_v39, %v1799_v6  ;;  %v3103_v38 = vunpack.c.l.b16 %v2037_v29  ;;  %v5577_v6 = vld [vmem:[#allocation2 + $0xa4] sm:$0x1]  ;;  %v5594_v7 = vpop.permute.xlu0 %3132 }
 0x221   : > { %v3024_v31 = vunpack.c.l.b16 %v1790_v22  ;;  %v1197_v12 = vor.u32 %v1196_v30, %v1193_v2  ;;  %v3025_v44 = vunpack.c.l.b16 %v1800_v37  ;;  %v1210_v19 = vshll.u32 %v5488_v32, 16  ;;  %v3706_v22 = vld [vmem:[%s6513_s3 + $0x20] sm:$0xf]  ;;  %v1901_v37 = vld [vmem:[#allocation2 + $0x3c] sm:$0xe] }
 0x222   : > { %v1206_v58 = vrot.slane %v1204_v24, 4  ;;  %v5571_v45 = vsel %vm3533_vm1, %v3520_v3, %v3069_v13  ;;  %v3124_v34 = vpack.c.b16 %v3103_v38, %v3102_v14  ;;  %v4201_v17 = vrot.slane %v1291_v27, 9 }
 0x223   : > { %v1198_v61 = vrot.slane %v1197_v12, 4  ;;  %v1390_v40 = vrot.slane %v5563_v25, 5  ;;  %v3045_v46 = vpack.c.b16 %v3025_v44, %v3024_v31  ;;  %v1212_v9 = vrot.slane %v1210_v19, 5  ;;  %v2116_v12 = vld [vmem:[#allocation2 + $0x98] sm:$0x1] }
 0x224   : > { %v1207_v10 = vor.u32 %v1206_v58, %v1202_v23  ;;  %v1393_v48 = vrot.slane %v5567_v63, 5  ;;  %v3473_v49 = vsel %vm3467_vm15, %v5516_v26, %v5357_v33  ;;  %v4209_v56 = vrot.slane %v1299_v16, 9  ;;  %v1473_v16 = vld [vmem:[#allocation2 + $0x3c] sm:$0xf] }
 0x225   : > { %v1203_v32 = vsel %vm4937_vm13, %v1198_v61, %v1202_v23  ;;  %v1391_v3 = vsel %vm4872_vm4, %v4201_v17, %v1390_v40  ;;  %v1392_v13 = vrot.slane %v1390_v40, 4  ;;  %3072 = vrot.lane.b32.xlu0 %v3045_v46, %s4712_s7  ;;  %v5588_v5 = vsel %vm3500_vm0, %v3473_v49, %v2975_v52  ;;  %v1474_v40 = vld [vmem:[#allocation2 + $0x40] sm:$0xf]  ;;  %v1501_v46 = vld [vmem:[#allocation2 + $0x44] sm:$0x1] }
 0x226   : > { %v1208_v59 = vrot.slane %v1207_v10, 4  ;;  %v2770_v18 = vunpack.c.l.b16 %v1203_v32  ;;  %v2836_v35 = vunpack.c.l.b16 %v1391_v3  ;;  %v1446_v1 = vrot.slane %v5574_v51, 5  ;;  %v2991_v17 = vpop.permute.xlu2 %2990  ;;  %v4514_v32 = vld [vmem:[#allocation2 + $0x90] sm:$0xff] }
 0x227   : > { %v1394_v8 = vsel %vm4872_vm4, %v1392_v13, %v1393_v48  ;;  %v1449_v4 = vrot.slane %v5577_v6, 5  ;;  %3150 = vrot.lane.b32.xlu1 %v3124_v34, %s4711_s6  ;;  %v2363_v60 = vshrl.u32 %v2094_v50, 16  ;;  %v2366_v20 = vshll.u32 %v2094_v50, 16 }
 0x228   : > { %v1213_v33 = vsel %vm4937_vm13, %v1208_v59, %v1212_v9  ;;  %v2837_v26 = vunpack.c.l.b16 %v1394_v8  ;;  %v1447_v14 = vsel %vm4872_vm4, %v4209_v56, %v1446_v1  ;;  %v1448_v2 = vrot.slane %v1446_v1, 4 }
 0x229   : > { %v2771_v39 = vunpack.c.l.b16 %v1213_v33  ;;  %v2372_v30 = vshll.u32 %v2095_v57, 16  ;;  %v2852_v23 = vunpack.c.l.b16 %v1447_v14  ;;  %v2365_v24 = vrot.slane %v2363_v60, 4  ;;  %v4523_v33 = vld [vmem:[%s6513_s3 + $0x18] sm:$0xff] }
 0x22a   : > { %v2863_v29 = vpack.c.b16 %v2837_v26, %v2836_v35  ;;  %v2368_v27 = vrot.slane %v2366_v20, 5  ;;  %v1450_v38 = vsel %vm4872_vm4, %v1448_v2, %v1449_v4  ;;  %v2376_v58 = vshrl.u32 %v2095_v57, 16  ;;  %v3053_v20 = vpop.permute.xlu0 %3052 }
 0x22b   : > { %v2790_v31 = vpack.c.b16 %v2771_v39, %v2770_v18  ;;  %v2374_v44 = vrot.slane %v2372_v30, 5  ;;  %v2853_v19 = vunpack.c.l.b16 %v1450_v38  ;;  %v2382_v34 = vshll.u32 %v2116_v12, 16  ;;  %v3227_v39 = vpop.permute.xlu1 %3226 }
 0x22c   : > { %v2369_v52 = vor.u32 %v2368_v27, %v2365_v24  ;;  %v3724_v61 = vunpack.c.l.b16 %v3706_v22  ;;  %v2378_v10 = vrot.slane %v2376_v58, 4  ;;  %v3489_v9 = vsel %vm3467_vm15, %v5542_v28, %v5393_v62 }
 0x22d   : > { %2818 = vrot.lane.b32.xlu2 %v2790_v31, %s4710_s30  ;;  %v4216_v48 = vrot.slane %v1901_v37, 9  ;;  %2884 = vrot.lane.b32.xlu0 %v2863_v29, %s4708_s28  ;;  %v2871_v3 = vpack.c.b16 %v2853_v19, %v2852_v23  ;;  %v2384_v49 = vrot.slane %v2382_v34, 5  ;;  %v5612_v18 = vsel %vm3500_vm0, %v3489_v9, %v2991_v17  ;;  %v861_v29 = vld [vmem:[#allocation2 + $0x3c] sm:$0xf]  ;;  %v4522_v34 = vld [vmem:[%s6513_s3 + $0x10] sm:$0xff] }
 0x22e   : > { %v2370_v13 = vrot.slane %v2369_v52, 4  ;;  %v3729_v50 = vpack.c.b16 %v3724_v61, %v3724_v61  ;;  %v2379_v59 = vor.u32 %v2378_v10, %v2374_v44  ;;  %v1991_v35 = vrot.slane %v1474_v40, 5  ;;  %v4492_v23 = vld [vmem:[#allocation2 + $0x3c] sm:$0xff] }
 0x22f   : > { %v1994_v57 = vrot.slane %v1501_v46, 5  ;;  %3246 = vrot.lane.b32.xlu1 %v4514_v32, %s4713_s8  ;;  %v1610_v8 = vshrl.u32 %v1473_v16, 16  ;;  %v1613_v56 = vshll.u32 %v1473_v16, 16  ;;  %v1619_v22 = vshll.u32 %v1474_v40, 16 }
 0x230   : > { %v2375_v62 = vsel %vm4937_vm13, %v2370_v13, %v2374_v44  ;;  %v3769_v28 = vsel %vm3767_vm5, %v3729_v50, 0  ;;  %v2380_v1 = vrot.slane %v2379_v59, 4  ;;  %v1992_v26 = vsel %vm4872_vm4, %v4216_v48, %v1991_v35  ;;  %v1489_v59 = vld [vmem:[#allocation2 + $0x9c] sm:$0xf] }
 0x231   : > { %v3278_v4 = vunpack.c.l.b16 %v2375_v62  ;;  %3774 = vmatpush.bf16.msra.mxu0 %v3769_v28  ;;  %v1993_v60 = vrot.slane %v1991_v35, 4  ;;  %4524 = vmatpush.bf16.msra.mxu1 %v3769_v28  ;;  %v3090_v14 = vunpack.c.l.b16 %v1992_v26  ;;  %v1612_v2 = vrot.slane %v1610_v8, 4  ;;  %v5653_v8 = vpop.permute.xlu2 %3228 }
 0x232   : > { %v1615_v30 = vrot.slane %v1613_v56, 5  ;;  %4525 = vmatpush.bf16.msra.mxu2 %v3769_v28  ;;  %4526 = vmatpush.bf16.msra.mxu3 %v3769_v28  ;;  %v2385_v24 = vsel %vm4937_vm13, %v2380_v1, %v2384_v49  ;;  %v1623_v37 = vshrl.u32 %v1474_v40, 16  ;;  %v1629_v31 = vshll.u32 %v1501_v46, 16 }
 0x233   : > { %v1995_v27 = vsel %vm4872_vm4, %v1993_v60, %v1994_v57  ;;  %v3279_v38 = vunpack.c.l.b16 %v2385_v24  ;;  %v1621_v58 = vrot.slane %v1619_v22, 5  ;;  %v5629_v19 = vsel %vm3599_vm3, %v5496_v53, %v3227_v39  ;;  %v1904_v53 = vld [vmem:[#allocation2 + $0x60] sm:$0xe] }
 0x234   : > { %v3091_v12 = vunpack.c.l.b16 %v1995_v27  ;;  %v1616_v44 = vor.u32 %v1615_v30, %v1612_v2  ;;  %v1625_v52 = vrot.slane %v1623_v37, 4  ;;  %v3537_v61 = vsel %vm3533_vm1, %v5506_v54, %v3053_v20  ;;  %v1490_v20 = vld [vmem:[#allocation2 + $0xa0] sm:$0xf]  ;;  %v4517_v2 = vld [vmem:[#allocation2 + $0xb4] sm:$0xff] }
 0x235   : > { %2978 = vrot.lane.b32.xlu2 %v4492_v23, %s4709_s29  ;;  %3775 = vmatpush.bf16.msra.mxu0 %v4523_v33  ;;  %v1023_v17 = vshrl.u32 %v861_v29, 16  ;;  %v3300_v40 = vpack.c.b16 %v3279_v38, %v3278_v4  ;;  %v1631_v9 = vrot.slane %v1629_v31, 5  ;;  %v5640_v16 = vsel %vm3566_vm2, %v3537_v61, %v5594_v7  ;;  %v4521_v7 = vld [vmem:[%s6513_s3 + $0x8] sm:$0xff] }
 0x236   : > { %2900 = vrot.lane.b32.xlu0 %v2871_v3, %s4708_s28  ;;  %v3118_v46 = vpack.c.b16 %v3091_v12, %v3090_v14  ;;  %v1617_v10 = vrot.slane %v1616_v44, 4  ;;  %4527 = vmatpush.bf16.msra.mxu1 %v4523_v33  ;;  %v1626_v48 = vor.u32 %v1625_v52, %v1621_v58  ;;  %v1026_v13 = vshll.u32 %v861_v29, 16 }
 0x237   : > { %v1025_v32 = vrot.slane %v1023_v17, 4  ;;  %4528 = vmatpush.bf16.msra.mxu2 %v4523_v33  ;;  %4529 = vmatpush.bf16.msra.mxu3 %v4523_v33  ;;  %v1032_v3 = vshll.u32 %v5563_v25, 16  ;;  %v1036_v49 = vshrl.u32 %v5563_v25, 16  ;;  %v1042_v50 = vshll.u32 %v5567_v63, 16  ;;  %v4500_v63 = vld [vmem:[#allocation2 + $0x9c] sm:$0xff]  ;;  %v3307_v14 = vpop.permute.xlu0 %3306 }
 0x238   : > { %3326 = vrot.lane.b32.xlu1 %v3300_v40, %s4715_s10  ;;  %v1622_v54 = vsel %vm4937_vm13, %v1617_v10, %v1621_v58  ;;  %v1627_v35 = vrot.slane %v1626_v48, 4  ;;  %v1028_v62 = vrot.slane %v1026_v13, 5  ;;  %v4219_v28 = vrot.slane %v1904_v53, 9 }
 0x239   : > { %v5648_v57 = vunpack.c.l.b16 %v1622_v54  ;;  %3776 = vmatpush.bf16.msra.mxu0 %v4522_v34  ;;  %v1034_v56 = vrot.slane %v1032_v3, 5  ;;  %v1038_v1 = vrot.slane %v1036_v49, 4  ;;  %v1044_v4 = vrot.slane %v1042_v50, 5  ;;  %v877_v54 = vld [vmem:[#allocation2 + $0x9c] sm:$0xf] }
 0x23a   : > { %v2012_v25 = vrot.slane %v5461_v36, 5  ;;  %4530 = vmatpush.bf16.msra.mxu1 %v4522_v34  ;;  %v1632_v33 = vsel %vm4937_vm13, %v1627_v35, %v1631_v9  ;;  %v1029_v26 = vor.u32 %v1028_v62, %v1025_v32  ;;  %v2015_v60 = vrot.slane %v5467_v47, 5  ;;  %v4520_v47 = vld [vmem:[%s6513_s3] sm:$0xff] }
 0x23b   : > { %v1802_v39 = vshrl.u32 %v1489_v59, 16  ;;  %4531 = vmatpush.bf16.msra.mxu2 %v4522_v34  ;;  %4532 = vmatpush.bf16.msra.mxu3 %v4522_v34  ;;  %v3011_v30 = vunpack.c.l.b16 %v1632_v33  ;;  %v1039_v22 = vor.u32 %v1038_v1, %v1034_v56  ;;  %v1805_v37 = vshll.u32 %v1489_v59, 16  ;;  %v1509_v34 = vld [vmem:[#allocation2 + $0xa4] sm:$0x1]  ;;  %v2088_v1 = vld [vmem:[#allocation2 + $0x6c] sm:$0xf] }
 0x23c   : > { %v2013_v29 = vsel %vm4872_vm4, %v4219_v28, %v2012_v25  ;;  %v2014_v36 = vrot.slane %v2012_v25, 4  ;;  %v1030_v23 = vrot.slane %v1029_v26, 4  ;;  %v1811_v44 = vshll.u32 %v1490_v20, 16  ;;  %v2089_v33 = vld [vmem:[#allocation2 + $0x70] sm:$0xf] }
 0x23d   : > { %2994 = vrot.lane.b32.xlu2 %v4500_v63, %s4709_s29  ;;  %3777 = vmatpush.bf16.msra.mxu0 %v4521_v7  ;;  %v3096_v24 = vunpack.c.l.b16 %v2013_v29  ;;  %v1804_v27 = vrot.slane %v1802_v39, 4  ;;  %v3038_v31 = vpack.c.b16 %v3011_v30, %v5648_v57  ;;  %v1040_v38 = vrot.slane %v1039_v22, 4 }
 0x23e   : > { %3138 = vrot.lane.b32.xlu0 %v3118_v46, %s4711_s6  ;;  %v2016_v12 = vsel %vm4872_vm4, %v2014_v36, %v2015_v60  ;;  %4533 = vmatpush.bf16.msra.mxu1 %v4521_v7  ;;  %v1035_v58 = vsel %vm4937_vm13, %v1030_v23, %v1034_v56  ;;  %v1807_v61 = vrot.slane %v1805_v37, 5  ;;  %v1815_v17 = vshrl.u32 %v1490_v20, 16 }
 0x23f   : > { %v3097_v52 = vunpack.c.l.b16 %v2016_v12  ;;  %4534 = vmatpush.bf16.msra.mxu2 %v4521_v7  ;;  %4535 = vmatpush.bf16.msra.mxu3 %v4521_v7  ;;  %v1045_v40 = vsel %vm4937_vm13, %v1040_v38, %v1044_v4  ;;  %v2756_v46 = vunpack.c.l.b16 %v1035_v58  ;;  %v1813_v10 = vrot.slane %v1811_v44, 5  ;;  %v5695_v12 = vld [vmem:[#allocation2 + $0x50] sm:$0x1] }
 0x240   : > { %3252 = vrot.lane.b32.xlu1 %v4517_v2, %s4713_s8  ;;  %v1821_v9 = vshll.u32 %v1509_v34, 16  ;;  %v2757_v53 = vunpack.c.l.b16 %v1045_v40  ;;  %v1808_v32 = vor.u32 %v1807_v61, %v1804_v27  ;;  %v1817_v13 = vrot.slane %v1815_v17, 4  ;;  %v1292_v27 = vld [vmem:[#allocation2 + $0x48] sm:$0xe]  ;;  %v2096_v61 = vld [vmem:[#allocation2 + $0x9c] sm:$0xf] }
 0x241   : > { %v3121_v48 = vpack.c.b16 %v3097_v52, %v3096_v24  ;;  %3778 = vmatpush.bf16.msra.mxu0 %v4520_v47  ;;  %vm3632_vm6 = vcmask 457728   ;;  %v1215_v62 = vshrl.u32 %v877_v54, 16  ;;  %v1218_v28 = vshll.u32 %v877_v54, 16  ;;  %v5693_v24 = vld [vmem:[#allocation2 + $0x4c] sm:$0xf] }
 0x242   : > { %v1823_v3 = vrot.slane %v1821_v9, 5  ;;  %4536 = vmatpush.bf16.msra.mxu1 %v4520_v47  ;;  %v2783_v49 = vpack.c.b16 %v2757_v53, %v2756_v46  ;;  %v1809_v50 = vrot.slane %v1808_v32, 4  ;;  %v1818_v59 = vor.u32 %v1817_v13, %v1813_v10  ;;  %v5687_v26 = vpop.permute.xlu0 %3322 }
 0x243   : > { %v3634_v35 = vsel %vm3632_vm6, %v5629_v19, %v3307_v14  ;;  %4537 = vmatpush.bf16.msra.mxu2 %v4520_v47  ;;  %4538 = vmatpush.bf16.msra.mxu3 %v4520_v47  ;;  %v5676_v57 = vpop.permute.xlu2 %3134  ;;  %v1224_v56 = vshll.u32 %v5574_v51, 16  ;;  %v1228_v19 = vshrl.u32 %v5574_v51, 16  ;;  %v1234_v63 = vshll.u32 %v5577_v6, 16  ;;  %v2113_v14 = vld [vmem:[#allocation2 + $0x74] sm:$0x1] }
 0x244   : > { %v3667_v7 = vsel %vm3665_vm7, %v3634_v35, %v5423_v43  ;;  %v1814_v4 = vsel %vm4937_vm13, %v1809_v50, %v1813_v10  ;;  %v1819_v25 = vrot.slane %v1818_v59, 4  ;;  %v1217_v60 = vrot.slane %v1215_v62, 4 }
 0x245   : > { %3058 = vrot.lane.b32.xlu2 %v3038_v31, %s4712_s7  ;;  %4452 = vmatmul.msk.bf16.vlgmr.msra.gmra.mxu0 %vm3734_vm8, %v3667_v7  ;;  %v3026_v43 = vunpack.c.l.b16 %v1814_v4  ;;  %v1220_v20 = vrot.slane %v1218_v28, 5  ;;  %v1226_v39 = vrot.slane %v1224_v56, 5  ;;  %v1230_v30 = vrot.slane %v1228_v19, 4 }
 0x246   : > { %2804 = vrot.lane.b32.xlu0 %v2783_v49, %s4710_s30  ;;  %v1824_v2 = vsel %vm4937_vm13, %v1819_v25, %v1823_v3  ;;  %v1236_v22 = vrot.slane %v1234_v63, 5  ;;  %v2291_v29 = vshrl.u32 %v2088_v1, 16  ;;  %v2294_v36 = vshll.u32 %v2088_v1, 16  ;;  %v2097_v49 = vld [vmem:[#allocation2 + $0xa0] sm:$0xf] }
 0x247   : > { %v3027_v51 = vunpack.c.l.b16 %v1824_v2  ;;  %v1221_v6 = vor.u32 %v1220_v20, %v1217_v60  ;;  %v2300_v23 = vshll.u32 %v2089_v33, 16  ;;  %v1231_v37 = vor.u32 %v1230_v30, %v1226_v39  ;;  %v2117_v60 = vld [vmem:[#allocation2 + $0xa4] sm:$0x1] }
 0x248   : > { %3144 = vrot.lane.b32.xlu1 %v3121_v48, %s4711_s6  ;;  %v2293_v47 = vrot.slane %v2291_v29, 4  ;;  %v2304_v31 = vshrl.u32 %v2089_v33, 16  ;;  %v2310_v38 = vshll.u32 %v2113_v14, 16  ;;  %v2296_v52 = vrot.slane %v2294_v36, 5  ;;  %v5716_v29 = vld [vmem:[#allocation2 + $0xac] sm:$0xf] }
 0x249   : > { %v3046_v44 = vpack.c.b16 %v3027_v51, %v3026_v43  ;;  %v1222_v58 = vrot.slane %v1221_v6, 4  ;;  %v2302_v34 = vrot.slane %v2300_v23, 5  ;;  %v1232_v17 = vrot.slane %v1231_v37, 4  ;;  %v5718_v51 = vld [vmem:[#allocation2 + $0xb0] sm:$0x1] }
 0x24a   : > { %v2306_v40 = vrot.slane %v2304_v31, 4  ;;  %v2312_v46 = vrot.slane %v2310_v38, 5  ;;  %v4202_v10 = vrot.slane %v1292_v27, 9  ;;  %v2297_v53 = vor.u32 %v2296_v52, %v2293_v47  ;;  %v5708_v19 = vpop.permute.xlu0 %2880  ;;  %v863_v37 = vld [vmem:[#allocation2 + $0x48] sm:$0xf] }
 0x24b   : > { %v1227_v9 = vsel %vm4937_vm13, %v1222_v58, %v1226_v39  ;;  %v1397_v48 = vrot.slane %v5693_v24, 5  ;;  %v1400_v32 = vrot.slane %v5695_v12, 5  ;;  %v1237_v13 = vsel %vm4937_vm13, %v1232_v17, %v1236_v22  ;;  %v1300_v39 = vld [vmem:[#allocation2 + $0xa8] sm:$0xe] }
 0x24c   : > { %v2772_v54 = vunpack.c.l.b16 %v1227_v9  ;;  %v2307_v3 = vor.u32 %v2306_v40, %v2302_v34  ;;  %v2387_v50 = vshrl.u32 %v2096_v61, 16  ;;  %v2773_v59 = vunpack.c.l.b16 %v1237_v13  ;;  %v5706_v28 = vpop.permute.xlu2 %3388 }
 0x24d   : > { %3074 = vrot.lane.b32.xlu2 %v3046_v44, %s4712_s7  ;;  %v2298_v35 = vrot.slane %v2297_v53, 4  ;;  %v1398_v7 = vsel %vm4872_vm4, %v4202_v10, %v1397_v48  ;;  %v1399_v62 = vrot.slane %v1397_v48, 4  ;;  %v2390_v25 = vshll.u32 %v2096_v61, 16 }
 0x24e   : > { %v2308_v56 = vrot.slane %v2307_v3, 4  ;;  %v2838_v1 = vunpack.c.l.b16 %v1398_v7  ;;  %v2389_v4 = vrot.slane %v2387_v50, 4  ;;  %v2791_v63 = vpack.c.b16 %v2773_v59, %v2772_v54  ;;  %v1475_v3 = vld [vmem:[#allocation2 + $0x48] sm:$0xf] }
 0x24f   : > { %v2303_v33 = vsel %vm4937_vm13, %v2298_v35, %v2302_v34  ;;  %v1401_v43 = vsel %vm4872_vm4, %v1399_v62, %v1400_v32  ;;  %v2396_v20 = vshll.u32 %v2097_v49, 16  ;;  %v2392_v22 = vrot.slane %v2390_v25, 5 }
 0x250   : > { %v2313_v14 = vsel %vm4937_vm13, %v2308_v56, %v2312_v46  ;;  %v3272_v2 = vunpack.c.l.b16 %v2303_v33  ;;  %v2839_v30 = vunpack.c.l.b16 %v1401_v43  ;;  %2820 = vrot.lane.b32.xlu0 %v2791_v63, %s4710_s30  ;;  %v2400_v23 = vshrl.u32 %v2097_v49, 16  ;;  %v4493_v49 = vld [vmem:[#allocation2 + $0x48] sm:$0xff] }
 0x251   : > { %v3273_v6 = vunpack.c.l.b16 %v2313_v14  ;;  %v2398_v36 = vrot.slane %v2396_v20, 5  ;;  %v2406_v27 = vshll.u32 %v2117_v60, 16  ;;  %v5724_v47 = vsel %vm3599_vm3, %v5640_v16, %v5653_v8 }
 0x252   : > { %v2864_v31 = vpack.c.b16 %v2839_v30, %v2838_v1  ;;  %v2393_v38 = vor.u32 %v2392_v22, %v2389_v4  ;;  %v4210_v44 = vrot.slane %v1300_v39, 9  ;;  %v2402_v52 = vrot.slane %v2400_v23, 4  ;;  %v879_v23 = vld [vmem:[#allocation2 + $0xa8] sm:$0xf] }
 0x253   : > { %v3297_v58 = vpack.c.b16 %v3273_v6, %v3272_v2  ;;  %v2408_v34 = vrot.slane %v2406_v27, 5  ;;  %v1453_v61 = vrot.slane %v5716_v29, 5  ;;  %v1456_v40 = vrot.slane %v5718_v51, 5  ;;  %v5742_v63 = vpop.permute.xlu0 %2896 }
 0x254   : > { %v2394_v17 = vrot.slane %v2393_v38, 4  ;;  %v1047_v46 = vshrl.u32 %v863_v37, 16  ;;  %v1050_v10 = vshll.u32 %v863_v37, 16  ;;  %v2403_v9 = vor.u32 %v2402_v52, %v2398_v36  ;;  %v4682_v52 = vld [vmem:[#allocation2 + $0x50] sm:$0x1] }
 0x255   : > { %2886 = vrot.lane.b32.xlu2 %v2864_v31, %s4708_s28  ;;  %3320 = vrot.lane.b32.xlu1 %v3297_v58, %s4715_s10  ;;  %v1454_v16 = vsel %vm4872_vm4, %v4210_v44, %v1453_v61  ;;  %v1455_v8 = vrot.slane %v1453_v61, 4  ;;  %v1056_v53 = vshll.u32 %v5693_v24, 16  ;;  %v1060_v25 = vshrl.u32 %v5693_v24, 16 }
 0x256   : > { %v2399_v48 = vsel %vm4937_vm13, %v2394_v17, %v2398_v36  ;;  %v2854_v32 = vunpack.c.l.b16 %v1454_v16  ;;  %v1049_v13 = vrot.slane %v1047_v46, 4  ;;  %v1052_v54 = vrot.slane %v1050_v10, 5  ;;  %v4681_v36 = vld [vmem:[#allocation2 + $0x4c] sm:$0xf] }
 0x257   : > { %v2404_v50 = vrot.slane %v2403_v9, 4  ;;  %v3280_v59 = vunpack.c.l.b16 %v2399_v48  ;;  %v1457_v35 = vsel %vm4872_vm4, %v1455_v8, %v1456_v40  ;;  %v1058_v62 = vrot.slane %v1056_v53, 5  ;;  %v4501_v10 = vld [vmem:[#allocation2 + $0xa8] sm:$0xff] }
 0x258   : > { %v3055_v7 = vpop.permute.xlu2 %3054  ;;  %v2855_v56 = vunpack.c.l.b16 %v1457_v35  ;;  %v1053_v4 = vor.u32 %v1052_v54, %v1049_v13  ;;  %2980 = vrot.lane.b32.xlu0 %v4493_v49, %s4709_s29  ;;  %v1066_v43 = vshll.u32 %v5695_v12, 16  ;;  %v1634_v60 = vshrl.u32 %v1475_v3, 16 }
 0x259   : > { %v5739_v1 = vsel %vm3533_vm1, %v5588_v5, %v3055_v7  ;;  %v2409_v33 = vsel %vm4937_vm13, %v2404_v50, %v2408_v34  ;;  %v1637_v20 = vshll.u32 %v1475_v3, 16  ;;  %v1062_v30 = vrot.slane %v1060_v25, 4 }
 0x25a   : > { %v3281_v39 = vunpack.c.l.b16 %v2409_v33  ;;  %v2872_v14 = vpack.c.b16 %v2855_v56, %v2854_v32  ;;  %v1054_v2 = vrot.slane %v1053_v4, 4  ;;  %v1068_v5 = vrot.slane %v1066_v43, 5  ;;  %v4475_v4 = vld [vmem:[#allocation2 + $0x24] sm:$0xff]  ;;  %v2078_v33 = vld [vmem:[#allocation2 + $0x30] sm:$0xf] }
 0x25b   : > { %v1636_v22 = vrot.slane %v1634_v60, 4  ;;  %v1639_v6 = vrot.slane %v1637_v20, 5  ;;  %v1643_v24 = vshll.u32 %v4681_v36, 16  ;;  %v1063_v31 = vor.u32 %v1062_v30, %v1058_v62 }
 0x25c   : > { %v3301_v27 = vpack.c.b16 %v3281_v39, %v3280_v59  ;;  %v1059_v37 = vsel %vm4937_vm13, %v1054_v2, %v1058_v62  ;;  %v1647_v12 = vshrl.u32 %v4681_v36, 16  ;;  %v1653_v34 = vshll.u32 %v4682_v52, 16 }
 0x25d   : > { %2902 = vrot.lane.b32.xlu2 %v2872_v14, %s4708_s28  ;;  %v2758_v38 = vunpack.c.l.b16 %v1059_v37  ;;  %v1640_v44 = vor.u32 %v1639_v6, %v1636_v22  ;;  %v1645_v58 = vrot.slane %v1643_v24, 5  ;;  %v1064_v61 = vrot.slane %v1063_v31, 4  ;;  %v5764_v14 = vld [vmem:[#allocation2 + $0x34] sm:$0xf] }
 0x25e   : > { %3328 = vrot.lane.b32.xlu1 %v3301_v27, %s4715_s10  ;;  %v1649_v17 = vrot.slane %v1647_v12, 4  ;;  %v1239_v40 = vshrl.u32 %v879_v23, 16  ;;  %v1242_v46 = vshll.u32 %v879_v23, 16  ;;  %v1655_v16 = vrot.slane %v1653_v34, 5  ;;  %v866_v27 = vld [vmem:[#allocation2 + $0x58] sm:$0xf] }
 0x25f   : > { %v1641_v9 = vrot.slane %v1640_v44, 4  ;;  %v1248_v8 = vshll.u32 %v5716_v29, 16  ;;  %v1252_v53 = vshrl.u32 %v5716_v29, 16  ;;  %v1069_v48 = vsel %vm4937_vm13, %v1064_v61, %v1068_v5 }
 0x260   : > { %v1650_v32 = vor.u32 %v1649_v17, %v1645_v58  ;;  %v1241_v13 = vrot.slane %v1239_v40, 4  ;;  %v1244_v54 = vrot.slane %v1242_v46, 5  ;;  %2996 = vrot.lane.b32.xlu0 %v4501_v10, %s4709_s29  ;;  %v2759_v3 = vunpack.c.l.b16 %v1069_v48  ;;  %v1293_v17 = vld [vmem:[#allocation2 + $0x54] sm:$0xe]  ;;  %v5783_v10 = vld [vmem:[#allocation2 + $0x5c] sm:$0x1] }
 0x261   : > { %v1646_v50 = vsel %vm4937_vm13, %v1641_v9, %v1645_v58  ;;  %v1250_v59 = vrot.slane %v1248_v8, 5  ;;  %v1254_v35 = vrot.slane %v1252_v53, 4  ;;  %v1258_v39 = vshll.u32 %v5718_v51, 16 }
 0x262   : > { %v3309_v49 = vpop.permute.xlu2 %3308  ;;  %v1651_v62 = vrot.slane %v1650_v32, 4  ;;  %v3012_v29 = vunpack.c.l.b16 %v1646_v50  ;;  %v1245_v56 = vor.u32 %v1244_v54, %v1241_v13  ;;  %v2784_v43 = vpack.c.b16 %v2759_v3, %v2758_v38  ;;  %v5777_v38 = vld [vmem:[#allocation2 + $0x38] sm:$0x1]  ;;  %v4483_v13 = vld [vmem:[#allocation2 + $0x84] sm:$0xff] }
 0x263   : > { %v3636_v7 = vsel %vm3632_vm6, %v5724_v47, %v3309_v49  ;;  %v2801_v25 = vpop.permute.xlu0 %2800  ;;  %v1255_v20 = vor.u32 %v1254_v35, %v1250_v59  ;;  %v1260_v6 = vrot.slane %v1258_v39, 5  ;;  %v2171_v36 = vshrl.u32 %v2078_v33, 16  ;;  %v5787_v3 = vld [vmem:[#allocation2 + $0xb8] sm:$0xf] }
 0x264   : > { %v3669_v60 = vsel %vm3665_vm7, %v3636_v7, %v5706_v28  ;;  %v1656_v47 = vsel %vm4937_vm13, %v1651_v62, %v1655_v16  ;;  %v1246_v2 = vrot.slane %v1245_v56, 4  ;;  %v3430_v30 = vsel %vm3418_vm14, %v4475_v4, %v2801_v25  ;;  %v865_v56 = vld [vmem:[#allocation2 + $0x54] sm:$0xf]  ;;  %v5796_v25 = vld [vmem:[#allocation2 + $0xbc] sm:$0x1] }
 0x265   : > { %4453 = vmatmul.msk.bf16.gmra.mxu0 %vm3734_vm8, %v3669_v60  ;;  %2806 = vrot.lane.b32.xlu2 %v2784_v43, %s4710_s30  ;;  %v3013_v5 = vunpack.c.l.b16 %v1656_v47  ;;  %v1256_v22 = vrot.slane %v1255_v20, 4  ;;  %v2174_v51 = vshll.u32 %v2078_v33, 16  ;;  %v2180_v24 = vshll.u32 %v5764_v14, 16 }
 0x266   : > { %v1251_v28 = vsel %vm4937_vm13, %v1246_v2, %v1250_v59  ;;  %v2184_v23 = vshrl.u32 %v5764_v14, 16  ;;  %v2173_v44 = vrot.slane %v2171_v36, 4  ;;  %v2190_v46 = vshll.u32 %v5777_v38, 16 }
 0x267   : > { %v3039_v37 = vpack.c.b16 %v3013_v5, %v3012_v29  ;;  %v1261_v31 = vsel %vm4937_vm13, %v1256_v22, %v1260_v6  ;;  %v2774_v12 = vunpack.c.l.b16 %v1251_v28  ;;  %v2176_v52 = vrot.slane %v2174_v51, 5  ;;  %v1301_v29 = vld [vmem:[#allocation2 + $0xb4] sm:$0xe] }
 0x268   : > { %v2775_v58 = vunpack.c.l.b16 %v1261_v31  ;;  %v2182_v34 = vrot.slane %v2180_v24, 5  ;;  %v2186_v61 = vrot.slane %v2184_v23, 4  ;;  %v1404_v9 = vrot.slane %v866_v27, 5  ;;  %v1477_v22 = vld [vmem:[#allocation2 + $0x54] sm:$0xf] }
 0x269   : > { %3060 = vrot.lane.b32.xlu0 %v3039_v37, %s4712_s7  ;;  %v2177_v16 = vor.u32 %v2176_v52, %v2173_v44  ;;  %v3475_v53 = vsel %vm3467_vm15, %v3430_v30, %v5708_v19  ;;  %v2192_v32 = vrot.slane %v2190_v46, 5  ;;  %v4203_v54 = vrot.slane %v1293_v17, 9 }
 0x26a   : > { %v5780_v40 = vpop.permute.xlu2 %2882  ;;  %v2187_v8 = vor.u32 %v2186_v61, %v2182_v34  ;;  %v2792_v48 = vpack.c.b16 %v2775_v58, %v2774_v12  ;;  %v1406_v35 = vrot.slane %v1404_v9, 4  ;;  %v1407_v7 = vrot.slane %v5783_v10, 5  ;;  %v4494_v12 = vld [vmem:[#allocation2 + $0x54] sm:$0xff] }
 0x26b   : > { %v2178_v49 = vrot.slane %v2177_v16, 4  ;;  %v1460_v33 = vrot.slane %v5787_v3, 5  ;;  %v1405_v39 = vsel %vm4872_vm4, %v4203_v54, %v1404_v9  ;;  %v4211_v2 = vrot.slane %v1301_v29, 9  ;;  %v4683_v9 = vld [vmem:[#allocation2 + $0x58] sm:$0xf]  ;;  %v4518_v54 = vld [vmem:[#allocation2 + $0xc0] sm:$0xff] }
 0x26c   : > { %v2188_v50 = vrot.slane %v2187_v8, 4  ;;  %v1408_v47 = vsel %vm4872_vm4, %v1406_v35, %v1407_v7  ;;  %v1071_v30 = vshrl.u32 %v865_v56, 16  ;;  %v1074_v5 = vshll.u32 %v865_v56, 16  ;;  %v5812_v8 = vpop.permute.xlu1 %3070  ;;  %3254 = vrot.lane.b32.xlu1 %v4518_v54, %s4713_s8 }
 0x26d   : > { %v2817_v59 = vpop.permute.xlu0 %2816  ;;  %2822 = vrot.lane.b32.xlu2 %v2792_v48, %s4710_s30  ;;  %v2183_v19 = vsel %vm4937_vm13, %v2178_v49, %v2182_v34  ;;  %v1463_v36 = vrot.slane %v5796_v25, 5  ;;  %v1080_v28 = vshll.u32 %v866_v27, 16  ;;  %v1084_v51 = vshrl.u32 %v866_v27, 16  ;;  %v881_v27 = vld [vmem:[#allocation2 + $0xb4] sm:$0xf] }
 0x26e   : > { %v3454_v62 = vsel %vm3418_vm14, %v4483_v13, %v2817_v59  ;;  %v2193_v4 = vsel %vm4937_vm13, %v2188_v50, %v2192_v32  ;;  %v3262_v60 = vunpack.c.l.b16 %v2183_v19  ;;  %v1073_v23 = vrot.slane %v1071_v30, 4 }
 0x26f   : > { %v5801_v43 = vsel %vm3467_vm15, %v3454_v62, %v5742_v63  ;;  %v3263_v20 = vunpack.c.l.b16 %v2193_v4  ;;  %v1462_v63 = vrot.slane %v1460_v33, 4  ;;  %v1076_v37 = vrot.slane %v1074_v5, 5 }
 0x270   : > { %v1090_v31 = vshll.u32 %v5783_v10, 16  ;;  %v1082_v44 = vrot.slane %v1080_v28, 5  ;;  %v1086_v58 = vrot.slane %v1084_v51, 4  ;;  %v1658_v52 = vshrl.u32 %v1477_v22, 16  ;;  %v2084_v28 = vld [vmem:[#allocation2 + $0x54] sm:$0xf] }
 0x271   : > { %v3292_v6 = vpack.c.b16 %v3263_v20, %v3262_v60  ;;  %v1661_v34 = vshll.u32 %v1477_v22, 16  ;;  %v2840_v61 = vunpack.c.l.b16 %v1405_v39  ;;  %v1077_v46 = vor.u32 %v1076_v37, %v1073_v23  ;;  %v4684_v39 = vld [vmem:[#allocation2 + $0x5c] sm:$0x1]  ;;  %v4502_v22 = vld [vmem:[#allocation2 + $0xb4] sm:$0xff] }
 0x272   : > { %v5808_v24 = vpop.permute.xlu2 %2898  ;;  %v1667_v16 = vshll.u32 %v4683_v9, 16  ;;  %v2841_v48 = vunpack.c.l.b16 %v1408_v47  ;;  %v1087_v32 = vor.u32 %v1086_v58, %v1082_v44  ;;  %v1660_v13 = vrot.slane %v1658_v52, 4 }
 0x273   : > { %3310 = vrot.lane.b32.xlu0 %v3292_v6, %s4715_s10  ;;  %v1461_v49 = vsel %vm4872_vm4, %v4211_v2, %v1460_v33  ;;  %v1663_v50 = vrot.slane %v1661_v34, 5  ;;  %v1671_v35 = vshrl.u32 %v4683_v9, 16  ;;  %v1464_v7 = vsel %vm4872_vm4, %v1462_v63, %v1463_v36 }
 0x274   : > { %v5820_v59 = vrot.slane %v1667_v16, 5  ;;  %v1092_v62 = vrot.slane %v1090_v31, 5  ;;  %v5827_v29 = vsel %vm3566_vm2, %v5739_v1, %v5676_v57  ;;  %v1078_v56 = vrot.slane %v1077_v46, 4  ;;  %v5840_v31 = vld [vmem:[#allocation2 + $0x58] sm:$0xf] }
 0x275   : > { %v2977_v17 = vpop.permute.xlu0 %2976  ;;  %2982 = vrot.lane.b32.xlu2 %v4494_v12, %s4709_s29  ;;  %v1088_v19 = vrot.slane %v1087_v32, 4  ;;  %v1673_v4 = vrot.slane %v1671_v35, 4  ;;  %v1266_v33 = vshll.u32 %v881_v27, 16  ;;  %v2865_v60 = vpack.c.b16 %v2841_v48, %v2840_v61  ;;  %v1493_v32 = vld [vmem:[#allocation2 + $0xb4] sm:$0xf] }
 0x276   : > { %v5816_v10 = vsel %vm3500_vm0, %v3475_v53, %v2977_v17  ;;  %v1263_v53 = vshrl.u32 %v881_v27, 16  ;;  %v1664_v20 = vor.u32 %v1663_v50, %v1660_v13  ;;  %v1677_v47 = vshll.u32 %v4684_v39, 16  ;;  %v5855_v50 = vld [vmem:[#allocation2 + $0xb8] sm:$0xf] }
 0x277   : > { %v2856_v2 = vunpack.c.l.b16 %v1461_v49  ;;  %v1674_v30 = vor.u32 %v1673_v4, %v5820_v59  ;;  %v2857_v57 = vunpack.c.l.b16 %v1464_v7  ;;  %v1268_v1 = vrot.slane %v1266_v33, 5 }
 0x278   : > { %v1265_v5 = vrot.slane %v1263_v53, 4  ;;  %v1272_v6 = vshll.u32 %v5787_v3, 16  ;;  %v1276_v36 = vshrl.u32 %v5787_v3, 16  ;;  %v1083_v23 = vsel %vm4937_vm13, %v1078_v56, %v1082_v44  ;;  %v5849_v44 = vpop.permute.xlu1 %3136 }
 0x279   : > { %v1093_v37 = vsel %vm4937_vm13, %v1088_v19, %v1092_v62  ;;  %v1665_v58 = vrot.slane %v1664_v20, 4  ;;  %v1679_v3 = vrot.slane %v1677_v47, 5  ;;  %v1675_v34 = vrot.slane %v1674_v30, 4  ;;  %v5860_v62 = vld [vmem:[#allocation2 + $0x5c] sm:$0x1] }
 0x27a   : > { %v5834_v51 = vpop.permute.xlu2 %2802  ;;  %v5847_v52 = vrot.slane %v1272_v6, 5  ;;  %v1269_v61 = vor.u32 %v1268_v1, %v1265_v5  ;;  %v1278_v17 = vrot.slane %v1276_v36, 4  ;;  %v2243_v46 = vshrl.u32 %v2084_v28, 16  ;;  %v4484_v1 = vld [vmem:[#allocation2 + $0x90] sm:$0xff] }
 0x27b   : > { %2888 = vrot.lane.b32.xlu0 %v2865_v60, %s4708_s28  ;;  %v2873_v9 = vpack.c.b16 %v2857_v57, %v2856_v2  ;;  %v2760_v16 = vunpack.c.l.b16 %v1083_v23  ;;  %v2246_v27 = vshll.u32 %v2084_v28, 16  ;;  %v2252_v48 = vshll.u32 %v5840_v31, 16  ;;  %v4509_v60 = vld [vmem:[#allocation2 + $0x54] sm:$0xff] }
 0x27c   : > { %v1279_v13 = vor.u32 %v1278_v17, %v5847_v52  ;;  %v2245_v54 = vrot.slane %v2243_v46, 4  ;;  %v2256_v49 = vshrl.u32 %v5840_v31, 16  ;;  %v2761_v35 = vunpack.c.l.b16 %v1093_v37 }
 0x27d   : > { %v2993_v63 = vpop.permute.xlu0 %2992  ;;  %2998 = vrot.lane.b32.xlu2 %v4502_v22, %s4709_s29  ;;  %v1670_v7 = vsel %vm4937_vm13, %v1665_v58, %v5820_v59  ;;  %v2248_v53 = vrot.slane %v2246_v27, 5  ;;  %v5862_v56 = vrot.slane %v2252_v48, 5  ;;  %v1680_v19 = vsel %vm4937_vm13, %v1675_v34, %v1679_v3  ;;  %v5879_v58 = vld [vmem:[#allocation2 + $0xbc] sm:$0x1] }
 0x27e   : > { %v5845_v12 = vsel %vm3500_vm0, %v5801_v43, %v2993_v63  ;;  %v1282_v43 = vshll.u32 %v5796_v25, 16  ;;  %v1270_v4 = vrot.slane %v1269_v61, 4  ;;  %v2258_v25 = vrot.slane %v2256_v49, 4 }
 0x27f   : > { %v2262_v33 = vshll.u32 %v5860_v62, 16  ;;  %v2249_v20 = vor.u32 %v2248_v53, %v2245_v54  ;;  %v1850_v39 = vshrl.u32 %v1493_v32, 16  ;;  %v1853_v47 = vshll.u32 %v1493_v32, 16  ;;  %v2511_v53 = vld [vmem:[#allocation2 + $0x54] sm:$0xe] }
 0x280   : > { %v1859_v59 = vshll.u32 %v5855_v50, 16  ;;  %v1280_v30 = vrot.slane %v1279_v13, 4  ;;  %v1284_v5 = vrot.slane %v1282_v43, 5  ;;  %v2259_v22 = vor.u32 %v2258_v25, %v5862_v56  ;;  %v5891_v43 = vld [vmem:[#allocation2 + $0xc4] sm:$0xf]  ;;  %v5893_v54 = vpop.permute.xlu1 %3234 }
 0x281   : > { %v1863_v57 = vshrl.u32 %v5855_v50, 16  ;;  %v3014_v6 = vunpack.c.l.b16 %v1670_v7  ;;  %v3015_v36 = vunpack.c.l.b16 %v1680_v19  ;;  %v1852_v63 = vrot.slane %v1850_v39, 4  ;;  %v5896_v19 = vld [vmem:[#allocation2 + $0xc8] sm:$0x1] }
 0x282   : > { %v1275_v37 = vsel %vm4937_vm13, %v1270_v4, %v5847_v52  ;;  %v1855_v3 = vrot.slane %v1853_v47, 5  ;;  %v5881_v34 = vrot.slane %v1859_v59, 5  ;;  %v2250_v46 = vrot.slane %v2249_v20, 4 }
 0x283   : > { %2904 = vrot.lane.b32.xlu0 %v2873_v9, %s4708_s28  ;;  %v1865_v61 = vrot.slane %v1863_v57, 4  ;;  %v2264_v9 = vrot.slane %v2262_v33, 5  ;;  %v1869_v27 = vshll.u32 %v5879_v58, 16  ;;  %v1285_v48 = vsel %vm4937_vm13, %v1280_v30, %v1284_v5 }
 0x284   : > { %v2260_v32 = vrot.slane %v2259_v22, 4  ;;  %v1856_v13 = vor.u32 %v1855_v3, %v1852_v63  ;;  %v2785_v49 = vpack.c.b16 %v2761_v35, %v2760_v16  ;;  %v3040_v4 = vpack.c.b16 %v3015_v36, %v3014_v6  ;;  %v867_v3 = vld [vmem:[#allocation2 + $0x60] sm:$0xf] }
 0x285   : > { %v3231_v2 = vpop.permute.xlu0 %3230  ;;  %3236 = vrot.lane.b32.xlu2 %v4509_v60, %s4713_s8  ;;  %v1866_v7 = vor.u32 %v1865_v61, %v5881_v34  ;;  %v2776_v25 = vunpack.c.l.b16 %v1275_v37  ;;  %v2607_v33 = vrot.slane %v5840_v31, 5  ;;  %v2255_v20 = vsel %vm4937_vm13, %v2250_v46, %v5862_v56  ;;  %v868_v37 = vld [vmem:[#allocation2 + $0x64] sm:$0xf] }
 0x286   : > { %v5874_v28 = vsel %vm3599_vm3, %v5827_v29, %v3231_v2  ;;  %v1912_v29 = vld [vmem:[#allocation2 + $0xc0] sm:$0xe]  ;;  %v1871_v39 = vrot.slane %v1869_v27, 5  ;;  %v2068_v16 = vrot.slane %v5891_v43, 5  ;;  %v2265_v35 = vsel %vm4937_vm13, %v2260_v32, %v2264_v9 }
 0x287   : > { %v2819_v23 = vpop.permute.xlu2 %2818  ;;  %v4227_v60 = vrot.slane %v1912_v29, 9  ;;  %v1857_v59 = vrot.slane %v1856_v13, 4  ;;  %v4233_v2 = vrot.slane %v2511_v53, 9  ;;  %v2071_v30 = vrot.slane %v5896_v19, 5  ;;  %v891_v29 = vld [vmem:[#allocation2 + $0x68] sm:$0x1] }
 0x288   : > { %v3457_v17 = vsel %vm3418_vm14, %v4484_v1, %v2819_v23  ;;  %v1867_v5 = vrot.slane %v1866_v7, 4  ;;  %v2609_v22 = vrot.slane %v2607_v33, 4  ;;  %v2610_v56 = vrot.slane %v5860_v62, 5  ;;  %v2508_v7 = vld [vmem:[#allocation2 + $0x30] sm:$0xe] }
 0x289   : > { %v5889_v52 = vsel %vm3467_vm15, %v3457_v17, %v5808_v24  ;;  %v2777_v24 = vunpack.c.l.b16 %v1285_v48  ;;  %v2069_v1 = vsel %vm4872_vm4, %v4227_v60, %v2068_v16  ;;  %v2070_v6 = vrot.slane %v2068_v16, 4  ;;  %v1294_v48 = vld [vmem:[#allocation2 + $0x60] sm:$0xe] }
 0x28a   : > { %v3268_v36 = vunpack.c.l.b16 %v2255_v20  ;;  %v3269_v63 = vunpack.c.l.b16 %v2265_v35  ;;  %v3112_v23 = vunpack.c.l.b16 %v2069_v1  ;;  %v1872_v62 = vsel %vm4937_vm13, %v1867_v5, %v1871_v39 }
 0x28b   : > { %2808 = vrot.lane.b32.xlu0 %v2785_v49, %s4710_s30  ;;  %v2793_v61 = vpack.c.b16 %v2777_v24, %v2776_v25  ;;  %v2072_v17 = vsel %vm4872_vm4, %v2070_v6, %v2071_v30  ;;  %v2608_v46 = vsel %vm4872_vm4, %v4233_v2, %v2607_v33  ;;  %v2611_v9 = vsel %vm4872_vm4, %v2609_v22, %v2610_v56 }
 0x28c   : > { %v3113_v27 = vunpack.c.l.b16 %v2072_v17  ;;  %v1411_v32 = vrot.slane %v868_v37, 5  ;;  %v1095_v13 = vshrl.u32 %v867_v3, 16  ;;  %v1098_v49 = vshll.u32 %v867_v3, 16 }
 0x28d   : > { %v3057_v47 = vpop.permute.xlu0 %3056  ;;  %3062 = vrot.lane.b32.xlu2 %v3040_v4, %s4712_s7  ;;  %v3295_v53 = vpack.c.b16 %v3269_v63, %v3268_v36  ;;  %v1104_v25 = vshll.u32 %v868_v37, 16  ;;  %v1108_v60 = vshrl.u32 %v868_v37, 16  ;;  %v3031_v33 = vunpack.c.l.b16 %v1872_v62 }
 0x28e   : > { %v5910_v31 = vsel %vm3533_vm1, %v5816_v10, %v3057_v47  ;;  %v1862_v10 = vsel %vm4937_vm13, %v1857_v59, %v5881_v34  ;;  %v5928_v34 = vpop.permute.xlu1 %3394  ;;  %v3129_v4 = vpack.c.b16 %v3113_v27, %v3112_v23  ;;  %v3348_v20 = vunpack.c.l.b16 %v2608_v46 }
 0x28f   : > { %v5913_v57 = vpop.permute.xlu2 %2978  ;;  %v3030_v24 = vunpack.c.l.b16 %v1862_v10  ;;  %v3349_v39 = vunpack.c.l.b16 %v2611_v9  ;;  %v4204_v16 = vrot.slane %v1294_v48, 9  ;;  %v1414_v35 = vrot.slane %v891_v29, 5  ;;  %v1495_v10 = vld [vmem:[#allocation2 + $0xc0] sm:$0xf] }
 0x290   : > { %3160 = vrot.lane.b32.xlu1 %v3129_v4, %s4711_s6  ;;  %v4230_v47 = vrot.slane %v2508_v7, 9  ;;  %v2586_v59 = vrot.slane %v5764_v14, 5  ;;  %v1413_v30 = vrot.slane %v1411_v32, 4  ;;  %v1097_v5 = vrot.slane %v1095_v13, 4 }
 0x291   : > { %v1100_v22 = vrot.slane %v1098_v49, 5  ;;  %v2589_v56 = vrot.slane %v5777_v38, 5  ;;  %v1106_v36 = vrot.slane %v1104_v25, 5  ;;  %v1110_v63 = vrot.slane %v1108_v60, 4 }
 0x292   : > { %v2587_v23 = vsel %vm4872_vm4, %v4230_v47, %v2586_v59  ;;  %v2588_v14 = vrot.slane %v2586_v59, 4  ;;  %v3048_v3 = vpack.c.b16 %v3031_v33, %v3030_v24  ;;  %v3375_v17 = vpack.c.b16 %v3349_v39, %v3348_v20  ;;  %v4495_v59 = vld [vmem:[#allocation2 + $0x60] sm:$0xff] }
 0x293   : > { %2824 = vrot.lane.b32.xlu0 %v2793_v61, %s4710_s30  ;;  %v3342_v61 = vunpack.c.l.b16 %v2587_v23  ;;  %v1412_v38 = vsel %vm4872_vm4, %v4204_v16, %v1411_v32  ;;  %v1101_v46 = vor.u32 %v1100_v22, %v1097_v5  ;;  %v1111_v9 = vor.u32 %v1110_v63, %v1106_v36  ;;  %v2098_v23 = vld [vmem:[#allocation2 + $0xa8] sm:$0xf] }
 0x294   : > { %v2590_v62 = vsel %vm4872_vm4, %v2588_v14, %v2589_v56  ;;  %v1874_v48 = vshrl.u32 %v1495_v10, 16  ;;  %v1877_v13 = vshll.u32 %v1495_v10, 16  ;;  %v1883_v49 = vshll.u32 %v5891_v43, 16  ;;  %v5966_v14 = vld [vmem:[#allocation2 + $0xac] sm:$0xf] }
 0x295   : > { %3316 = vrot.lane.b32.xlu2 %v3295_v53, %s4715_s10  ;;  %v3343_v27 = vunpack.c.l.b16 %v2590_v62  ;;  %v1887_v7 = vshrl.u32 %v5891_v43, 16  ;;  %v2842_v25 = vunpack.c.l.b16 %v1412_v38  ;;  %v1102_v33 = vrot.slane %v1101_v46, 4  ;;  %v2515_v46 = vld [vmem:[#allocation2 + $0x84] sm:$0xe] }
 0x296   : > { %v5952_v53 = vpop.permute.xlu1 %3140  ;;  %v1876_v39 = vrot.slane %v1874_v48, 4  ;;  %v1879_v16 = vrot.slane %v1877_v13, 5  ;;  %v1893_v56 = vshll.u32 %v5896_v19, 16  ;;  %v2420_v48 = vshll.u32 %v5966_v14, 16 }
 0x297   : > { %v2995_v2 = vpop.permute.xlu2 %2994  ;;  %v3073_v6 = vpop.permute.xlu0 %3072  ;;  %v5955_v32 = vpack.c.b16 %v3343_v27, %v3342_v61  ;;  %v1889_v47 = vrot.slane %v1887_v7, 4  ;;  %v2414_v27 = vshll.u32 %v2098_v23, 16  ;;  %v2424_v13 = vshrl.u32 %v5966_v14, 16 }
 0x298   : > { %v3526_v1 = vsel %vm3500_vm0, %v5889_v52, %v2995_v2  ;;  %v5941_v37 = vsel %vm3533_vm1, %v5845_v12, %v3073_v6  ;;  %v1415_v52 = vsel %vm4872_vm4, %v1413_v30, %v1414_v35  ;;  %v1114_v12 = vshll.u32 %v891_v29, 16  ;;  %v4476_v6 = vld [vmem:[#allocation2 + $0x30] sm:$0xff] }
 0x299   : > { %v2843_v60 = vunpack.c.l.b16 %v1415_v52  ;;  %v1112_v29 = vrot.slane %v1111_v9, 4  ;;  %v1885_v35 = vrot.slane %v1883_v49, 5  ;;  %v1107_v2 = vsel %vm4937_vm13, %v1102_v33, %v1106_v36  ;;  %v4503_v9 = vld [vmem:[#allocation2 + $0xc0] sm:$0xff] }
 0x29a   : > { %v1116_v20 = vrot.slane %v1114_v12, 5  ;;  %v1880_v5 = vor.u32 %v1879_v16, %v1876_v39  ;;  %v2762_v36 = vunpack.c.l.b16 %v1107_v2  ;;  %v3433_v38 = vsel %vm3418_vm14, %v4476_v6, %v5834_v51  ;;  %v1909_v39 = vld [vmem:[#allocation2 + $0x9c] sm:$0xe] }
 0x29b   : > { %3078 = vrot.lane.b32.xlu0 %v3048_v3, %s4712_s7  ;;  %v2866_v43 = vpack.c.b16 %v2843_v60, %v2842_v25  ;;  %v1890_v22 = vor.u32 %v1889_v47, %v1885_v35  ;;  %v1895_v62 = vrot.slane %v1893_v56, 5  ;;  %v2411_v12 = vshrl.u32 %v2098_v23, 16 }
 0x29c   : > { %v1117_v30 = vsel %vm4937_vm13, %v1112_v29, %v1116_v20  ;;  %v1881_v19 = vrot.slane %v1880_v5, 4  ;;  %v4237_v25 = vrot.slane %v2515_v46, 9  ;;  %v3477_v51 = vsel %vm3467_vm15, %v3433_v38, %v5780_v40  ;;  %v4686_v29 = vld [vmem:[#allocation2 + $0xa0] sm:$0xf] }
 0x29d   : > { %3396 = vrot.lane.b32.xlu2 %v3375_v17, %s4714_s9  ;;  %v2763_v10 = vunpack.c.l.b16 %v1117_v30  ;;  %v1891_v52 = vrot.slane %v1890_v22, 4  ;;  %v2047_v20 = vrot.slane %v4686_v29, 5  ;;  %v2413_v16 = vrot.slane %v2411_v12, 4 }
 0x29e   : > { %v5968_v3 = vpop.permute.xlu1 %3076  ;;  %v1886_v60 = vsel %vm4937_vm13, %v1881_v19, %v1885_v35  ;;  %v2416_v47 = vrot.slane %v2414_v27, 5  ;;  %v3510_v2 = vsel %vm3500_vm0, %v3477_v51, %v5913_v57  ;;  %v4687_v35 = vld [vmem:[#allocation2 + $0x8c] sm:$0x1]  ;;  %v4688_v19 = vld [vmem:[#allocation2 + $0xa4] sm:$0x1]  ;;  %v2656_v51 = vrot.slane %v5966_v14, 5 }
 0x29f   : > { %v3059_v4 = vpop.permute.xlu2 %3058  ;;  %v5957_v24 = vpop.permute.xlu0 %2884  ;;  %v2786_v7 = vpack.c.b16 %v2763_v10, %v2762_v36  ;;  %v1896_v33 = vsel %vm4937_vm13, %v1891_v52, %v1895_v62  ;;  %v2638_v5 = vrot.slane %v4687_v35, 5  ;;  %v3032_v56 = vunpack.c.l.b16 %v1886_v60  ;;  %v2118_v57 = vld [vmem:[#allocation2 + $0xb0] sm:$0x1]  ;;  %v2086_v35 = vld [vmem:[#allocation2 + $0x60] sm:$0xf] }
 0x2a0   : > { %v3543_v22 = vsel %vm3533_vm1, %v3510_v2, %v3059_v4  ;;  %v3033_v6 = vunpack.c.l.b16 %v1896_v33  ;;  %v4224_v10 = vrot.slane %v1909_v39, 9  ;;  %v2049_v38 = vrot.slane %v2047_v20, 4  ;;  %v6016_v2 = vld [vmem:[#allocation2 + $0x40] sm:$0xf] }
 0x2a1   : > { %v2050_v52 = vrot.slane %v4688_v19, 5  ;;  %v2430_v12 = vshll.u32 %v2118_v57, 16 }
 0x2a3   : > { %2984 = vrot.lane.b32.xlu0 %v4495_v59, %s4709_s29  ;;  %v5987_v59 = vrot.slane %v2420_v48, 5  ;;  %v2432_v29 = vrot.slane %v2430_v12, 5  ;;  %v4478_v12 = vld [vmem:[#allocation2 + $0x48] sm:$0xff] }
 0x2a5   : > { %2890 = vrot.lane.b32.xlu2 %v2866_v43, %s4708_s28  ;;  %v2426_v43 = vrot.slane %v2424_v13, 4  ;;  %v3049_v13 = vpack.c.b16 %v3033_v6, %v3032_v56  ;;  %v6025_v6 = vld [vmem:[#allocation2 + $0x64] sm:$0xf] }
 0x2a6   : > { %v3315_v62 = vpop.permute.xlu1 %3314 }
 0x2a7   : > { %v3075_v63 = vpop.permute.xlu2 %3074  ;;  %v2427_v4 = vor.u32 %v2426_v43, %v5987_v59  ;;  %v2080_v43 = vld [vmem:[#allocation2 + $0x3c] sm:$0xf] }
 0x2a8   : > { %v5971_v61 = vsel %vm3533_vm1, %v3526_v1, %v3075_v63  ;;  %v5973_v17 = vpop.permute.xlu0 %2900  ;;  %v4685_v1 = vld [vmem:[#allocation2 + $0x88] sm:$0xf] }
 0x2a9   : > { %v2635_v49 = vrot.slane %v4685_v1, 5  ;;  %v2428_v33 = vrot.slane %v2427_v4, 4 }
 0x2ab   : > { %3000 = vrot.lane.b32.xlu0 %v4503_v9, %s4709_s29  ;;  %v2637_v30 = vrot.slane %v2635_v49, 4  ;;  %v2636_v23 = vsel %vm4872_vm4, %v4237_v25, %v2635_v49  ;;  %v2417_v9 = vor.u32 %v2416_v47, %v2413_v16  ;;  %v2518_v25 = vld [vmem:[#allocation2 + $0xa8] sm:$0xe]  ;;  %v2433_v56 = vsel %vm4937_vm13, %v2428_v33, %v2432_v29 }
 0x2ac   : > { %v3356_v49 = vunpack.c.l.b16 %v2636_v23  ;;  %v4240_v47 = vrot.slane %v2518_v25, 9  ;;  %v2198_v23 = vshll.u32 %v2080_v43, 16  ;;  %v3283_v4 = vunpack.c.l.b16 %v2433_v56 }
 0x2ad   : > { %2810 = vrot.lane.b32.xlu2 %v2786_v7, %s4710_s30  ;;  %v2639_v48 = vsel %vm4872_vm4, %v2637_v30, %v2638_v5  ;;  %v2051_v7 = vsel %vm4872_vm4, %v2049_v38, %v2050_v52  ;;  %v2659_v30 = vrot.slane %v2118_v57, 5  ;;  %v2267_v52 = vshrl.u32 %v2086_v35, 16  ;;  %s231_s30 = scalar_lea.vmem %s6514_s4, %s4470_s24 }
 0x2ae   : > { %v3357_v60 = vunpack.c.l.b16 %v2639_v48  ;;  %v3107_v16 = vunpack.c.l.b16 %v2051_v7  ;;  %v2657_v19 = vsel %vm4872_vm4, %v4240_v47, %v2656_v51  ;;  %v2270_v57 = vshll.u32 %v2086_v35, 16  ;;  %v4485_v47 = vld [vmem:[#allocation2 + $0x9c] sm:$0xff] }
 0x2af   : > { %v5991_v40 = vpop.permute.xlu2 %2886  ;;  %v2200_v48 = vrot.slane %v2198_v23, 5  ;;  %v2269_v25 = vrot.slane %v2267_v52, 4 }
 0x2b0   : > { %v3139_v63 = vpop.permute.xlu0 %3138  ;;  %v3379_v5 = vpack.c.b16 %v3357_v60, %v3356_v49  ;;  %v2272_v60 = vrot.slane %v2270_v57, 5 }
 0x2b1   : > { %v3576_v36 = vsel %vm3566_vm2, %v3543_v22, %v3139_v63  ;;  %v2195_v63 = vshrl.u32 %v2080_v43, 16 }
 0x2b2   : > { %v3609_v46 = vsel %vm3599_vm3, %v3576_v36, %v5893_v54  ;;  %v2048_v54 = vsel %vm4872_vm4, %v4224_v10, %v2047_v20  ;;  %v2658_v20 = vrot.slane %v2656_v51, 4  ;;  %v2204_v36 = vshll.u32 %v6016_v2, 16 }
 0x2b3   : > { %v3642_v27 = vsel %vm3632_vm6, %v3609_v46, %v3315_v62  ;;  %3390 = vrot.lane.b32.xlu0 %v5955_v32, %s4714_s9  ;;  %v2418_v32 = vrot.slane %v2417_v9, 4  ;;  %v2208_v10 = vshrl.u32 %v6016_v2, 16  ;;  %v2276_v62 = vshll.u32 %v6025_v6, 16 }
 0x2b4   : > { %v3675_v1 = vsel %vm3665_vm7, %v3642_v27, %v5928_v34  ;;  %v3106_v34 = vunpack.c.l.b16 %v2048_v54  ;;  %v2280_v46 = vshrl.u32 %v6025_v6, 16  ;;  %v2197_v27 = vrot.slane %v2195_v63, 4 }
 0x2b5   : > { %4456 = vmatmul.msk.bf16.vlgmr.msra.gmra.mxu1 %vm3734_vm8, %v3675_v1  ;;  %3080 = vrot.lane.b32.xlu2 %v3049_v13, %s4712_s7  ;;  %v2423_v14 = vsel %vm4937_vm13, %v2418_v32, %v5987_v59  ;;  %v2660_v59 = vsel %vm4872_vm4, %v2658_v20, %v2659_v30  ;;  %v2206_v13 = vrot.slane %v2204_v36, 5  ;;  %v2210_v1 = vrot.slane %v2208_v10, 4  ;;  %v4486_v10 = vld [vmem:[#allocation2 + $0xa8] sm:$0xff] }
 0x2b6   : > { %v3126_v38 = vpack.c.b16 %v3107_v16, %v3106_v34  ;;  %v3282_v9 = vunpack.c.l.b16 %v2423_v14  ;;  %v3362_v54 = vunpack.c.l.b16 %v2657_v19  ;;  %v3363_v7 = vunpack.c.l.b16 %v2660_v59  ;;  %v2109_v16 = vld [vmem:[#allocation2 + $0x44] sm:$0x1]  ;;  %v2112_v14 = vld [vmem:[#allocation2 + $0x68] sm:$0x1] }
 0x2b7   : > { %v6014_v39 = vpop.permute.xlu2 %2902  ;;  %v2278_v32 = vrot.slane %v2276_v62, 5  ;;  %v2282_v33 = vrot.slane %v2280_v46, 4  ;;  %v2201_v43 = vor.u32 %v2200_v48, %v2197_v27  ;;  %v2211_v20 = vor.u32 %v2210_v1, %v2206_v13  ;;  %v2509_v27 = vld [vmem:[#allocation2 + $0x3c] sm:$0xe] }
 0x2b8   : > { %v6018_v22 = vpop.permute.xlu0 %2804  ;;  %v3302_v29 = vpack.c.b16 %v3283_v4, %v3282_v9  ;;  %v2214_v30 = vshll.u32 %v2109_v16, 16  ;;  %v3382_v35 = vpack.c.b16 %v3363_v7, %v3362_v54  ;;  %v2273_v63 = vor.u32 %v2272_v60, %v2269_v25  ;;  %v4507_v4 = vld [vmem:[#allocation2 + $0x3c] sm:$0xff] }
 0x2b9   : > { %v2283_v23 = vor.u32 %v2282_v33, %v2278_v32  ;;  %v2286_v36 = vshll.u32 %v2112_v14, 16  ;;  %v2212_v19 = vrot.slane %v2211_v20, 4  ;;  %v2593_v48 = vrot.slane %v6016_v2, 5 }
 0x2ba   : > { %v2216_v52 = vrot.slane %v2214_v30, 5  ;;  %v2274_v62 = vrot.slane %v2273_v63, 4  ;;  %v4231_v25 = vrot.slane %v2509_v27, 9  ;;  %v2614_v2 = vrot.slane %v6025_v6, 5  ;;  %v2100_v30 = vld [vmem:[#allocation2 + $0xb4] sm:$0xf] }
 0x2bb   : > { %3404 = vrot.lane.b32.xlu0 %v3379_v5, %s4714_s9  ;;  %v2284_v46 = vrot.slane %v2283_v23, 4  ;;  %v2288_v9 = vrot.slane %v2286_v36, 5  ;;  %v2595_v60 = vrot.slane %v2593_v48, 4  ;;  %v2596_v33 = vrot.slane %v2109_v16, 5  ;;  %v2516_v6 = vld [vmem:[#allocation2 + $0x90] sm:$0xe] }
 0x2bc   : > { %v2217_v1 = vsel %vm4937_vm13, %v2212_v19, %v2216_v52  ;;  %v2279_v7 = vsel %vm4937_vm13, %v2274_v62, %v2278_v32  ;;  %v2617_v63 = vrot.slane %v2112_v14, 5  ;;  %v2594_v36 = vsel %vm4872_vm4, %v4231_v25, %v2593_v48  ;;  %v4690_v27 = vld [vmem:[#allocation2 + $0xac] sm:$0xf]  ;;  %v1910_v25 = vld [vmem:[#allocation2 + $0xa8] sm:$0xe] }
 0x2bd   : > { %3154 = vrot.lane.b32.xlu2 %v3126_v38, %s4711_s6  ;;  %v2202_v38 = vrot.slane %v2201_v43, 4  ;;  %v3270_v43 = vunpack.c.l.b16 %v2279_v7  ;;  %v2597_v16 = vsel %vm4872_vm4, %v2595_v60, %v2596_v33  ;;  %v2435_v19 = vshrl.u32 %v2100_v30, 16  ;;  %v4691_v7 = vld [vmem:[#allocation2 + $0x98] sm:$0x1] }
 0x2be   : > { %v2438_v52 = vshll.u32 %v2100_v30, 16  ;;  %v4238_v62 = vrot.slane %v2516_v6, 9  ;;  %v2054_v48 = vrot.slane %v4690_v27, 5  ;;  %v4692_v30 = vld [vmem:[#allocation2 + $0xb0] sm:$0x1] }
 0x2bf   : > { %v2807_v49 = vpop.permute.xlu2 %2806  ;;  %v2119_v6 = vld [vmem:[#allocation2 + $0xbc] sm:$0x1] }
 0x2c0   : > { %v3439_v51 = vsel %vm3418_vm14, %v4478_v12, %v2807_v49  ;;  %v4510_v49 = vld [vmem:[#allocation2 + $0x60] sm:$0xff] }
 0x2c1   : > { %v3481_v34 = vsel %vm3467_vm15, %v3439_v51, %v5991_v40  ;;  %v3265_v51 = vunpack.c.l.b16 %v2217_v1  ;;  %v3345_v1 = vunpack.c.l.b16 %v2597_v16 }
 0x2c2   : > { %v2821_v5 = vpop.permute.xlu0 %2820 }
 0x2c3   : > { %3330 = vrot.lane.b32.xlu0 %v3302_v29, %s4715_s10  ;;  %v3460_v56 = vsel %vm3418_vm14, %v4485_v47, %v2821_v5  ;;  %v2512_v29 = vld [vmem:[#allocation2 + $0x60] sm:$0xe] }
 0x2c4   : > { %v3495_v40 = vsel %vm3467_vm15, %v3460_v56, %v5973_v17  ;;  %v2207_v17 = vsel %vm4937_vm13, %v2202_v38, %v2206_v13  ;;  %v4234_v5 = vrot.slane %v2512_v29, 9  ;;  %v2616_v56 = vrot.slane %v2614_v2, 4 }
 0x2c5   : > { %3410 = vrot.lane.b32.xlu2 %v3382_v35, %s4714_s9  ;;  %v3264_v13 = vunpack.c.l.b16 %v2207_v17  ;;  %v6062_v35 = vld [vmem:[#allocation2 + $0xb8] sm:$0xf]  ;;  %v3344_v17 = vunpack.c.l.b16 %v2594_v36 }
 0x2c7   : > { %v2823_v59 = vpop.permute.xlu2 %2822  ;;  %v3293_v23 = vpack.c.b16 %v3265_v51, %v3264_v13  ;;  %v2437_v13 = vrot.slane %v2435_v19, 4  ;;  %v2440_v51 = vrot.slane %v2438_v52, 5 }
 0x2c8   : > { %v3463_v57 = vsel %vm3418_vm14, %v4486_v10, %v2823_v59  ;;  %v4689_v10 = vld [vmem:[#allocation2 + $0x94] sm:$0xf]  ;;  %v2444_v59 = vshll.u32 %v6062_v35, 16 }
 0x2c9   : > { %v3497_v12 = vsel %vm3467_vm15, %v3463_v57, %v6014_v39  ;;  %v2289_v39 = vsel %vm4937_vm13, %v2284_v46, %v2288_v9  ;;  %v2642_v38 = vrot.slane %v4689_v10, 5  ;;  %v2615_v9 = vsel %vm4872_vm4, %v4234_v5, %v2614_v2 }
 0x2ca   : > { %v6054_v54 = vpop.permute.xlu0 %2980  ;;  %v3271_v20 = vunpack.c.l.b16 %v2289_v39  ;;  %v2645_v39 = vrot.slane %v4691_v7, 5  ;;  %v3350_v29 = vunpack.c.l.b16 %v2615_v9  ;;  %v2057_v5 = vrot.slane %v4692_v30, 5  ;;  %v4477_v30 = vld [vmem:[#allocation2 + $0x3c] sm:$0xff] }
 0x2cb   : > { %3232 = vrot.lane.b32.xlu0 %v4507_v4, %s4713_s8  ;;  %v2618_v4 = vsel %vm4872_vm4, %v2616_v56, %v2617_v63  ;;  %v3373_v56 = vpack.c.b16 %v3345_v1, %v3344_v17  ;;  %v2643_v63 = vsel %vm4872_vm4, %v4238_v62, %v2642_v38  ;;  %v2441_v36 = vor.u32 %v2440_v51, %v2437_v13 }
 0x2cc   : > { %v3296_v57 = vpack.c.b16 %v3271_v20, %v3270_v43  ;;  %v3351_v2 = vunpack.c.l.b16 %v2618_v4  ;;  %v4225_v43 = vrot.slane %v1910_v25, 9  ;;  %v2056_v20 = vrot.slane %v2054_v48, 4 }
 0x2cd   : > { %3238 = vrot.lane.b32.xlu2 %v4510_v49, %s4713_s8  ;;  %v2644_v49 = vrot.slane %v2642_v38, 4  ;;  %v2454_v10 = vshll.u32 %v2119_v6, 16  ;;  %v3358_v38 = vunpack.c.l.b16 %v2643_v63  ;;  %v2442_v62 = vrot.slane %v2441_v36, 4 }
 0x2ce   : > { %v3376_v19 = vpack.c.b16 %v3351_v2, %v3350_v29  ;;  %v2055_v52 = vsel %vm4872_vm4, %v4225_v43, %v2054_v48  ;;  %v2666_v48 = vrot.slane %v2119_v6, 5 }
 0x2cf   : > { %v2983_v47 = vpop.permute.xlu2 %2982  ;;  %v2456_v4 = vrot.slane %v2454_v10, 5  ;;  %v3108_v17 = vunpack.c.l.b16 %v2055_v52 }
 0x2d0   : > { %v6065_v32 = vsel %vm3500_vm0, %v3481_v34, %v2983_v47  ;;  %v2448_v34 = vshrl.u32 %v6062_v35, 16 }
 0x2d2   : > { %v2997_v14 = vpop.permute.xlu0 %2996  ;;  %v2450_v60 = vrot.slane %v2448_v34, 4  ;;  %v2663_v34 = vrot.slane %v6062_v35, 5 }
 0x2d3   : > { %3312 = vrot.lane.b32.xlu0 %v3293_v23, %s4715_s10  ;;  %v6075_v46 = vsel %vm3500_vm0, %v3495_v40, %v2997_v14  ;;  %v2446_v40 = vrot.slane %v2444_v59, 5  ;;  %v2646_v23 = vsel %vm4872_vm4, %v2644_v49, %v2645_v39  ;;  %v2058_v59 = vsel %vm4872_vm4, %v2056_v20, %v2057_v5  ;;  %v2519_v14 = vld [vmem:[#allocation2 + $0xb4] sm:$0xe]  ;;  %v1908_v20 = vld [vmem:[#allocation2 + $0x90] sm:$0xe] }
 0x2d4   : > { %v3109_v1 = vunpack.c.l.b16 %v2058_v59  ;;  %v4241_v49 = vrot.slane %v2519_v14, 9  ;;  %v2665_v7 = vrot.slane %v2663_v34, 4 }
 0x2d5   : > { %3318 = vrot.lane.b32.xlu2 %v3296_v57, %s4715_s10  ;;  %v2451_v16 = vor.u32 %v2450_v60, %v2446_v40  ;;  %v3359_v57 = vunpack.c.l.b16 %v2646_v23  ;;  %v2447_v25 = vsel %vm4937_vm13, %v2442_v62, %v2446_v40  ;;  %v4223_v23 = vrot.slane %v1908_v20, 9  ;;  %v4698_v20 = vld [vmem:[#allocation2 + $0xa4] sm:$0x1] }
 0x2d6   : > { %v3127_v13 = vpack.c.b16 %v3109_v1, %v3108_v17  ;;  %v2664_v51 = vsel %vm4872_vm4, %v4241_v49, %v2663_v34  ;;  %v2667_v60 = vsel %vm4872_vm4, %v2665_v7, %v2666_v48  ;;  %v3284_v43 = vunpack.c.l.b16 %v2447_v25  ;;  %v2102_v17 = vld [vmem:[#allocation2 + $0xc0] sm:$0xf]  ;;  %v6129_v7 = vld [vmem:[#allocation2 + $0xc4] sm:$0xf]  ;;  %v4511_v25 = vld [vmem:[#allocation2 + $0x6c] sm:$0xff] }
 0x2d7   : > { %v2999_v33 = vpop.permute.xlu2 %2998  ;;  %v2452_v9 = vrot.slane %v2451_v16, 4  ;;  %v3380_v39 = vpack.c.b16 %v3359_v57, %v3358_v38  ;;  %v3365_v63 = vunpack.c.l.b16 %v2667_v60  ;;  %v4694_v16 = vld [vmem:[#allocation2 + $0x98] sm:$0x1]  ;;  %v4695_v57 = vld [vmem:[#allocation2 + $0x70] sm:$0xf] }
 0x2d8   : > { %v6083_v47 = vsel %vm3500_vm0, %v3497_v12, %v2999_v33  ;;  %v4693_v33 = vld [vmem:[#allocation2 + $0x94] sm:$0xf]  ;;  %v2043_v10 = vrot.slane %v4694_v16, 5  ;;  %v2621_v14 = vrot.slane %v4695_v57, 5  ;;  %v2061_v16 = vrot.slane %v5855_v50, 5 }
 0x2d9   : > { %v2457_v35 = vsel %vm4937_vm13, %v2452_v9, %v2456_v4  ;;  %v2040_v29 = vrot.slane %v4693_v33, 5  ;;  %v2513_v4 = vld [vmem:[#allocation2 + $0x6c] sm:$0xe]  ;;  %v4697_v60 = vld [vmem:[#allocation2 + $0x74] sm:$0x1] }
 0x2da   : > { %v3285_v40 = vunpack.c.l.b16 %v2457_v35  ;;  %v2623_v48 = vrot.slane %v2621_v14, 4  ;;  %v4235_v35 = vrot.slane %v2513_v4, 9  ;;  %v2624_v33 = vrot.slane %v4697_v60, 5 }
 0x2db   : > { %3392 = vrot.lane.b32.xlu0 %v3373_v56, %s4714_s9  ;;  %v3061_v12 = vpop.permute.xlu0 %3060  ;;  %v3364_v56 = vunpack.c.l.b16 %v2664_v51  ;;  %v2042_v36 = vrot.slane %v2040_v29, 4  ;;  %v2041_v38 = vsel %vm4872_vm4, %v4223_v23, %v2040_v29  ;;  %v2459_v51 = vshrl.u32 %v2102_v17, 16  ;;  %v2517_v29 = vld [vmem:[#allocation2 + $0x9c] sm:$0xe] }
 0x2dc   : > { %v3303_v52 = vpack.c.b16 %v3285_v40, %v3284_v43  ;;  %v3104_v1 = vunpack.c.l.b16 %v2041_v38  ;;  %v2468_v43 = vshll.u32 %v6129_v7, 16  ;;  %v2472_v40 = vshrl.u32 %v6129_v7, 16  ;;  %v1911_v38 = vld [vmem:[#allocation2 + $0xb4] sm:$0xe] }
 0x2dd   : > { %3398 = vrot.lane.b32.xlu2 %v3376_v19, %s4714_s9  ;;  %v3436_v19 = vsel %vm3418_vm14, %v4477_v30, %v6018_v22  ;;  %v3383_v59 = vpack.c.b16 %v3365_v63, %v3364_v56  ;;  %v2652_v30 = vrot.slane %v4698_v20, 5  ;;  %v2622_v56 = vsel %vm4872_vm4, %v4235_v35, %v2621_v14  ;;  %v6139_v63 = vld [vmem:[#allocation2 + $0xd0] sm:$0xf] }
 0x2de   : > { %v3479_v34 = vsel %vm3467_vm15, %v3436_v19, %v5957_v24  ;;  %v2521_v19 = vld [vmem:[#allocation2 + $0xcc] sm:$0xe]  ;;  %v2470_v14 = vrot.slane %v2468_v43, 5  ;;  %v2063_v35 = vrot.slane %v2061_v16, 4  ;;  %v3352_v60 = vunpack.c.l.b16 %v2622_v56 }
 0x2df   : > { %v6096_v27 = vpop.permute.xlu2 %3236  ;;  %v3512_v62 = vsel %vm3500_vm0, %v3479_v34, %v6054_v54  ;;  %v4696_v54 = vld [vmem:[#allocation2 + $0xa0] sm:$0xf]  ;;  %v4243_v57 = vrot.slane %v2521_v19, 9 }
 0x2e0   : > { %v3545_v9 = vsel %vm3533_vm1, %v3512_v62, %v3061_v12  ;;  %v2462_v12 = vshll.u32 %v2102_v17, 16  ;;  %v2474_v62 = vrot.slane %v2472_v40, 4 }
 0x2e2   : > { %v2475_v40 = vor.u32 %v2474_v62, %v2470_v14 }
 0x2e3   : > { %3406 = vrot.lane.b32.xlu0 %v3380_v39, %s4714_s9  ;;  %v3578_v39 = vsel %vm3566_vm2, %v3545_v9, %v5952_v53 }
 0x2e4   : > { %v3611_v23 = vsel %vm3599_vm3, %v3578_v39, %v6096_v27  ;;  %v2464_v27 = vrot.slane %v2462_v12, 5 }
 0x2e5   : > { %3156 = vrot.lane.b32.xlu2 %v3127_v13, %s4711_s6  ;;  %v6108_v2 = vpop.permute.xlu0 %3310  ;;  %v2649_v13 = vrot.slane %v4696_v54, 5 }
 0x2e7   : > { %v3063_v5 = vpop.permute.xlu2 %3062  ;;  %v2651_v34 = vrot.slane %v2649_v13, 4 }
 0x2e8   : > { %v6112_v6 = vsel %vm3533_vm1, %v6065_v32, %v3063_v5  ;;  %v2044_v32 = vsel %vm4872_vm4, %v2042_v36, %v2043_v10  ;;  %v2064_v5 = vrot.slane %v5879_v58, 5  ;;  %v2625_v36 = vsel %vm4872_vm4, %v2623_v48, %v2624_v33  ;;  %v6146_v10 = vld [vmem:[#allocation2 + $0xd4] sm:$0x1]  ;;  %v6156_v48 = vpop.permute.xlu1 %3148 }
 0x2e9   : > { %v3105_v49 = vunpack.c.l.b16 %v2044_v32  ;;  %v2677_v58 = vrot.slane %v6139_v63, 5  ;;  %v2461_v32 = vrot.slane %v2459_v51, 4  ;;  %v3353_v17 = vunpack.c.l.b16 %v2625_v36  ;;  %v4515_v51 = vld [vmem:[#allocation2 + $0x9c] sm:$0xff]  ;;  %v4479_v36 = vld [vmem:[#allocation2 + $0x54] sm:$0xff] }
 0x2ea   : > { %v2653_v33 = vsel %vm4872_vm4, %v2651_v34, %v2652_v30  ;;  %v2670_v30 = vrot.slane %v6129_v7, 5 }
 0x2eb   : > { %3332 = vrot.lane.b32.xlu0 %v3303_v52, %s4715_s10  ;;  %v3125_v53 = vpack.c.b16 %v3105_v49, %v3104_v1  ;;  %v2679_v9 = vrot.slane %v2677_v58, 4  ;;  %v2678_v1 = vsel %vm4872_vm4, %v4243_v57, %v2677_v58  ;;  %v2680_v49 = vrot.slane %v6146_v10, 5 }
 0x2ec   : > { %v3368_v54 = vunpack.c.l.b16 %v2678_v1  ;;  %v2465_v43 = vor.u32 %v2464_v27, %v2461_v32  ;;  %v3361_v34 = vunpack.c.l.b16 %v2653_v33  ;;  %v2476_v27 = vrot.slane %v2475_v40, 4 }
 0x2ed   : > { %3412 = vrot.lane.b32.xlu2 %v3383_v59, %s4714_s9  ;;  %v6126_v22 = vpop.permute.xlu0 %2888  ;;  %v4239_v59 = vrot.slane %v2517_v29, 9  ;;  %v2120_v29 = vld [vmem:[#allocation2 + $0xc8] sm:$0x1]  ;;  %v2681_v12 = vsel %vm4872_vm4, %v2679_v9, %v2680_v49 }
 0x2ee   : > { %v2478_v20 = vshll.u32 %v2120_v29, 16  ;;  %v2466_v57 = vrot.slane %v2465_v43, 4 }
 0x2ef   : > { %v3317_v24 = vpop.permute.xlu2 %3316 }
 0x2f0   : > { %v3644_v50 = vsel %vm3632_vm6, %v3611_v23, %v3317_v24  ;;  %v2650_v24 = vsel %vm4872_vm4, %v4239_v59, %v2649_v13  ;;  %v3377_v23 = vpack.c.b16 %v3353_v17, %v3352_v60  ;;  %v2065_v13 = vsel %vm4872_vm4, %v2063_v35, %v2064_v5  ;;  %v6179_v49 = vpop.permute.xlu1 %3244 }
 0x2f1   : > { %v3360_v59 = vunpack.c.l.b16 %v2650_v24  ;;  %v2480_v62 = vrot.slane %v2478_v20, 5  ;;  %v2673_v17 = vrot.slane %v2120_v29, 5  ;;  %v2496_v60 = vshrl.u32 %v6139_v63, 16 }
 0x2f3   : > { %3240 = vrot.lane.b32.xlu0 %v4511_v25, %s4713_s8  ;;  %v4226_v25 = vrot.slane %v1911_v38, 9  ;;  %v2520_v38 = vld [vmem:[#allocation2 + $0xc0] sm:$0xe]  ;;  %v3381_v1 = vpack.c.b16 %v3361_v34, %v3360_v59  ;;  %v2498_v21 = vrot.slane %v2496_v60, 4 }
 0x2f4   : > { %v4242_v5 = vrot.slane %v2520_v38, 9 }
 0x2f5   : > { %3152 = vrot.lane.b32.xlu2 %v3125_v53, %s4711_s6  ;;  %v6150_v52 = vpop.permute.xlu0 %2904  ;;  %v3369_v53 = vunpack.c.l.b16 %v2681_v12  ;;  %v2062_v56 = vsel %vm4872_vm4, %v4226_v25, %v2061_v16  ;;  %v2481_v25 = vsel %vm4937_vm13, %v2476_v27, %v2480_v62  ;;  %v4480_v12 = vld [vmem:[#allocation2 + $0x60] sm:$0xff] }
 0x2f6   : > { %v3110_v9 = vunpack.c.l.b16 %v2062_v56  ;;  %v2104_v56 = vld [vmem:[#allocation2 + $0xcc] sm:$0xf] }
 0x2f7   : > { %v3397_v4 = vpop.permute.xlu2 %3396  ;;  %v3385_v19 = vpack.c.b16 %v3369_v53, %v3368_v54  ;;  %v4487_v54 = vld [vmem:[#allocation2 + $0xb4] sm:$0xff]  ;;  %v2486_v59 = vshll.u32 %v2104_v56, 16 }
 0x2f8   : > { %v3677_v39 = vsel %vm3665_vm7, %v3644_v50, %v3397_v4  ;;  %v3111_v50 = vunpack.c.l.b16 %v2065_v13  ;;  %v2672_v4 = vrot.slane %v2670_v30, 4  ;;  %v2492_v13 = vshll.u32 %v6139_v63, 16  ;;  %v3325_v27 = vpop.permute.xlu1 %3324 }
 0x2f9   : > { %4457 = vmatmul.msk.bf16.gmra.mxu1 %vm3734_vm8, %v3677_v39  ;;  %3416 = vrot.lane.b32.xlu1 %v3385_v19, %s4714_s9  ;;  %v2471_v39 = vsel %vm4937_vm13, %v2466_v57, %v2470_v14  ;;  %v3287_v14 = vunpack.c.l.b16 %v2481_v25 }
 0x2fa   : > { %v3128_v35 = vpack.c.b16 %v3111_v50, %v3110_v9  ;;  %v3286_v33 = vunpack.c.l.b16 %v2471_v39  ;;  %v2494_v38 = vrot.slane %v2492_v13, 5 }
 0x2fb   : > { %3248 = vrot.lane.b32.xlu0 %v4515_v51, %s4713_s8  ;;  %v2674_v51 = vsel %vm4872_vm4, %v2672_v4, %v2673_v17 }
 0x2fc   : > { %v3367_v20 = vunpack.c.l.b16 %v2674_v51  ;;  %v3304_v19 = vpack.c.b16 %v3287_v14, %v3286_v33 }
 0x2fd   : > { %3400 = vrot.lane.b32.xlu2 %v3377_v23, %s4714_s9  ;;  %v2809_v58 = vpop.permute.xlu0 %2808 }
 0x2fe   : > { %v3442_v32 = vsel %vm3418_vm14, %v4479_v36, %v2809_v58  ;;  %v2502_v36 = vshll.u32 %v6146_v10, 16  ;;  %v2483_v58 = vshrl.u32 %v2104_v56, 16  ;;  %v2488_v10 = vrot.slane %v2486_v59, 5 }
 0x2ff   : > { %v2891_v16 = vpop.permute.xlu2 %2890  ;;  %v6177_v7 = vsel %vm3467_vm15, %v3442_v32, %v6126_v22  ;;  %v2671_v22 = vsel %vm4872_vm4, %v4242_v5, %v2670_v30  ;;  %vm4030_vm4 = vcmask 1040384  }
 0x300   : > { %v3366_v40 = vunpack.c.l.b16 %v2671_v22  ;;  %v2485_v57 = vrot.slane %v2483_v58, 4  ;;  %v2504_v62 = vrot.slane %v2502_v36, 5  ;;  %v6223_v22 = vpop.permute.xlu1 %3064 }
 0x302   : > { %v3384_v32 = vpack.c.b16 %v3367_v20, %v3366_v40  ;;  %v2489_v50 = vor.u32 %v2488_v10, %v2485_v57  ;;  %v3586_v20 = vsel %vm3566_vm2, %v5571_v45, %v6156_v48  ;;  %v3574_v57 = vsel %vm3566_vm2, %v5910_v31, %v5849_v44 }
 0x303   : > { %3408 = vrot.lane.b32.xlu0 %v3381_v1, %s4714_s9  ;;  %v4519_v1 = vld [vmem:[#allocation2 + $0xcc] sm:$0xff] }
 0x304   : > { %v2490_v39 = vrot.slane %v2489_v50, 4 }
 0x305   : > { %3158 = vrot.lane.b32.xlu2 %v3128_v35, %s4711_s6  ;;  %v2825_v24 = vpop.permute.xlu0 %2824 }
 0x306   : > { %v3466_v29 = vsel %vm3418_vm14, %v4487_v54, %v2825_v24  ;;  %v2495_v25 = vsel %vm4937_vm13, %v2490_v39, %v2494_v38 }
 0x307   : > { %v2811_v43 = vpop.permute.xlu2 %2810  ;;  %v3499_v53 = vsel %vm3467_vm15, %v3466_v29, %v6150_v52  ;;  %v3288_v35 = vunpack.c.l.b16 %v2495_v25  ;;  %v3638_v29 = vsel %vm3632_vm6, %v5874_v28, %v6108_v2 }
 0x308   : > { %v3445_v23 = vsel %vm3418_vm14, %v4480_v12, %v2811_v43  ;;  %v3251_v14 = vpop.permute.xlu1 %3250 }
 0x309   : > { %v3485_v30 = vsel %vm3467_vm15, %v3445_v23, %v2891_v16  ;;  %v2499_v16 = vor.u32 %v2498_v21, %v2494_v38 }
 0x30a   : > { %v3518_v34 = vsel %vm3500_vm0, %v3485_v30, %v5277_v15 }
 0x30b   : > { %v3551_v52 = vsel %vm3533_vm1, %v3518_v34, %v5434_v11  ;;  %3334 = vrot.lane.b32.xlu0 %v3304_v19, %s4715_s10  ;;  %v2500_v4 = vrot.slane %v2499_v16, 4  ;;  %v3555_v16 = vsel %vm3533_vm1, %v5612_v18, %v5812_v8 }
 0x30c   : > { %v3584_v63 = vsel %vm3566_vm2, %v3551_v52, %v5529_v0 }
 0x30d   : > { %3414 = vrot.lane.b32.xlu2 %v3384_v32, %s4714_s9  ;;  %v3079_v9 = vpop.permute.xlu0 %3078  ;;  %v3617_v15 = vsel %vm3599_vm3, %v3584_v63, %v5552_v55  ;;  %v2505_v55 = vsel %vm4937_vm13, %v2500_v4, %v2504_v62 }
 0x30e   : > { %v6211_v11 = vsel %vm3533_vm1, %v6083_v47, %v3079_v9  ;;  %v3650_v5 = vsel %vm3632_vm6, %v3617_v15, %v5687_v26  ;;  %v3289_v47 = vunpack.c.l.b16 %v2505_v55 }
 0x30f   : > { %v3081_v17 = vpop.permute.xlu2 %3080  ;;  %v3683_v0 = vsel %vm3665_vm7, %v3650_v5, %v5443_v42 }
 0x310   : > { %4460 = vmatmul.msk.bf16.vlgmr.msra.gmra.mxu2 %vm3734_vm8, %v3683_v0  ;;  %v3305_v26 = vpack.c.b16 %v3289_v47, %v3288_v35  ;;  %v3143_v40 = vpop.permute.xlu1 %3142 }
 0x311   : > { %v3580_v13 = vsel %vm3566_vm2, %v6112_v6, %v3143_v40 }
 0x313   : > { %3256 = vrot.lane.b32.xlu0 %v4519_v1, %s4713_s8 }
 0x315   : > { %v2985_v54 = vpop.permute.xlu0 %2984  ;;  %3336 = vrot.lane.b32.xlu2 %v3305_v26, %s4715_s10 }
 0x316   : > { %v6227_v42 = vsel %vm3500_vm0, %v6177_v7, %v2985_v54 }
 0x317   : > { %v3155_v51 = vpop.permute.xlu2 %3154  ;;  %v3549_v47 = vsel %vm3533_vm1, %v6227_v42, %v6223_v22 }
 0x318   : > { %v3592_v2 = vsel %vm3566_vm2, %v5971_v61, %v3155_v51  ;;  %v3151_v56 = vpop.permute.xlu1 %3150 }
 0x319   : > { %v3625_v45 = vsel %vm3599_vm3, %v3592_v2, %v3251_v14  ;;  %v3588_v15 = vsel %vm3566_vm2, %v3555_v16, %v3151_v56 }
 0x31d   : > { %v3001_v60 = vpop.permute.xlu0 %3000 }
 0x31e   : > { %v3532_v24 = vsel %vm3500_vm0, %v3499_v53, %v3001_v60  ;;  %v3619_v53 = vsel %vm3599_vm3, %v3586_v20, %v6179_v49 }
 0x31f   : > { %v6232_v41 = vsel %vm3533_vm1, %v3532_v24, %v3081_v17  ;;  %v3411_v33 = vpop.permute.xlu2 %3410  ;;  %v3652_v23 = vsel %vm3632_vm6, %v3619_v53, %v3325_v27  ;;  %v3561_v17 = vsel %vm3533_vm1, %v6075_v46, %v5968_v3 }
 0x320   : > { %v3247_v6 = vpop.permute.xlu1 %3246 }
 0x321   : > { %v3621_v5 = vsel %vm3599_vm3, %v3588_v15, %v3247_v6 }
 0x325   : > { %v3391_v12 = vpop.permute.xlu0 %3390 }
 0x326   : > { %v3671_v43 = vsel %vm3665_vm7, %v3638_v29, %v3391_v12 }
 0x327   : > { %v3239_v7 = vpop.permute.xlu2 %3238  ;;  %4454 = vmatmul.msk.bf16.gmra.mxu0 %vm3734_vm8, %v3671_v43 }
 0x328   : > { %v3613_v48 = vsel %vm3599_vm3, %v3580_v13, %v3239_v7  ;;  %v3327_v52 = vpop.permute.xlu1 %3326 }
 0x329   : > { %v3654_v44 = vsel %vm3632_vm6, %v3621_v5, %v3327_v52 }
 0x32d   : > { %v3405_v21 = vpop.permute.xlu0 %3404 }
 0x32e   : > { %v3685_v36 = vsel %vm3665_vm7, %v3652_v23, %v3405_v21 }
 0x32f   : > { %v3319_v28 = vpop.permute.xlu2 %3318  ;;  %4461 = vmatmul.msk.bf16.gmra.mxu2 %vm3734_vm8, %v3685_v36 }
 0x330   : > { %v3646_v19 = vsel %vm3632_vm6, %v3613_v48, %v3319_v28  ;;  %v3253_v9 = vpop.permute.xlu1 %3252  ;;  %v3780_v48 = vpop.f32.mrf.mxu0 }
 0x331   : > { %v3860_v5 = vsel %vm3418_vm14, %v3780_v48, 0.0 }
 0x335   : > { %v3331_v30 = vpop.permute.xlu0 %3330 }
 0x336   : > { %v3658_v49 = vsel %vm3632_vm6, %v3625_v45, %v3331_v30 }
 0x337   : > { %v3399_v58 = vpop.permute.xlu2 %3398  ;;  %v3691_v59 = vsel %vm3665_vm7, %v3658_v49, %v3411_v33 }
 0x338   : > { %v3679_v34 = vsel %vm3665_vm7, %v3646_v19, %v3399_v58  ;;  %4464 = vmatmul.msk.bf16.vlgmr.msra.gmra.mxu3 %vm3734_vm8, %v3691_v59  ;;  %v3145_v18 = vpop.permute.xlu1 %3144  ;;  %v3782_v58 = vpop.f32.mrf.mxu0 }
 0x339   : > { %4458 = vmatmul.msk.bf16.gmra.mxu1 %vm3734_vm8, %v3679_v34  ;;  %v3582_v35 = vsel %vm3566_vm2, %v3549_v47, %v3145_v18  ;;  %v3930_v16 = vmul.f32 %v3782_v58, %v3782_v58  ;;  %v3861_v15 = vsel %vm3418_vm14, %v3782_v58, 0.0 }
 0x33d   : > { %v3233_v61 = vpop.permute.xlu0 %3232 }
 0x33e   : > { %v3607_v10 = vsel %vm3599_vm3, %v3574_v57, %v3233_v61  ;;  %v6314_v61 = vpop.f32.mrf.mxu1 }
 0x33f   : > { %v3157_v32 = vpop.permute.xlu2 %3156 }
 0x340   : > { %v3594_v0 = vsel %vm3566_vm2, %v3561_v17, %v3157_v32  ;;  %v3321_v46 = vpop.permute.xlu1 %3320  ;;  %v3785_v34 = vpop.f32.mrf.mxu0  ;;  %v3862_v17 = vadd.f32 %v3861_v15, %v3860_v5 }
 0x341   : > { %v3627_v39 = vsel %vm3599_vm3, %v3594_v0, %v3253_v9  ;;  %v3929_v9 = vmul.f32 %v3780_v48, %v3780_v48 }
 0x343   : > { %v3961_v0 = vsel %vm3418_vm14, %v3929_v9, 0.0 }
 0x345   : > { %v3313_v38 = vpop.permute.xlu0 %3312 }
 0x346   : > { %v3640_v27 = vsel %vm3632_vm6, %v3607_v10, %v3313_v38  ;;  %v6319_v32 = vpop.f32.mrf.mxu1 }
 0x347   : > { %v3413_v50 = vpop.permute.xlu2 %3412 }
 0x348   : > { %v3329_v14 = vpop.permute.xlu1 %3328  ;;  %v3787_v6 = vpop.f32.mrf.mxu0 }
 0x34d   : > { %v3393_v63 = vpop.permute.xlu0 %3392 }
 0x34e   : > { %v3673_v62 = vsel %vm3665_vm7, %v3640_v27, %v3393_v63 }
 0x34f   : > { %4455 = vmatmul.msk.bf16.gmra.mxu0 %vm3734_vm8, %v3673_v62  ;;  %v3153_v8 = vpop.permute.xlu2 %3152 }
 0x350   : > { %v3590_v33 = vsel %vm3566_vm2, %v5941_v37, %v3153_v8  ;;  %v3255_v7 = vpop.permute.xlu1 %3254  ;;  %v3865_v8 = vsel %vm3418_vm14, %v3787_v6, 0.0 }
 0x355   : > { %v3407_v31 = vpop.permute.xlu0 %3406 }
 0x356   : > { %v3687_v4 = vsel %vm3665_vm7, %v3654_v44, %v3407_v31  ;;  %v3962_v44 = vsel %vm3418_vm14, %v3930_v16, 0.0  ;;  %v3863_v31 = vsel %vm3418_vm14, %v3785_v34, 0.0 }
 0x357   : > { %4462 = vmatmul.msk.bf16.gmra.mxu2 %vm3734_vm8, %v3687_v4  ;;  %v3401_v54 = vpop.permute.xlu2 %3400  ;;  %v3932_v4 = vmul.f32 %v3787_v6, %v3787_v6 }
 0x358   : > { %v3161_v36 = vpop.permute.xlu1 %3160 }
 0x359   : > { %v3598_v2 = vsel %vm3566_vm2, %v6232_v41, %v3161_v36 }
 0x35d   : > { %v3333_v1 = vpop.permute.xlu0 %3332 }
 0x35e   : > { %v3660_v55 = vsel %vm3632_vm6, %v3627_v39, %v3333_v1  ;;  %v3963_v39 = vadd.f32 %v3962_v44, %v3961_v0 }
 0x35f   : > { %v3693_v25 = vsel %vm3665_vm7, %v3660_v55, %v3413_v50  ;;  %v3159_v42 = vpop.permute.xlu2 %3158  ;;  %v3931_v50 = vmul.f32 %v3785_v34, %v3785_v34  ;;  %v3864_v55 = vadd.f32 %v3863_v31, %v3862_v17 }
 0x360   : > { %4465 = vmatmul.msk.bf16.gmra.mxu3 %vm3734_vm8, %v3693_v25  ;;  %v3596_v40 = vsel %vm3566_vm2, %v6211_v11, %v3159_v42 }
 0x361   : > { %v3629_v53 = vsel %vm3599_vm3, %v3596_v40, %v3255_v7  ;;  %v3964_v18 = vsel %vm3418_vm14, %v3931_v50, 0.0 }
 0x365   : > { %v3241_v3 = vpop.permute.xlu0 %3240 }
 0x366   : > { %v3615_v26 = vsel %vm3599_vm3, %v3582_v35, %v3241_v3  ;;  %v3966_v35 = vsel %vm3418_vm14, %v3932_v4, 0.0 }
 0x367   : > { %v3648_v51 = vsel %vm3632_vm6, %v3615_v26, %v3321_v46  ;;  %v3415_v23 = vpop.permute.xlu2 %3414  ;;  %v3965_v26 = vadd.f32 %v3964_v18, %v3963_v39 }
 0x368   : > { %v3681_v60 = vsel %vm3665_vm7, %v3648_v51, %v3401_v54  ;;  %v3866_v54 = vadd.f32 %v3865_v8, %v3864_v55 }
 0x369   : > { %4459 = vmatmul.msk.bf16.gmra.mxu1 %vm3734_vm8, %v3681_v60 }
 0x36b   : > { %v3417_v30 = vpop.permute.xlu1 %3416 }
 0x36d   : > { %v3249_v24 = vpop.permute.xlu0 %3248 }
 0x36e   : > { %v3623_v22 = vsel %vm3599_vm3, %v3590_v33, %v3249_v24  ;;  %v3967_v33 = vadd.f32 %v3966_v35, %v3965_v26 }
 0x36f   : > { %v3656_v12 = vsel %vm3632_vm6, %v3623_v22, %v3329_v14  ;;  %v3337_v13 = vpop.permute.xlu2 %3336 }
 0x375   : > { %v3409_v29 = vpop.permute.xlu0 %3408 }
 0x376   : > { %v3689_v43 = vsel %vm3665_vm7, %v3656_v12, %v3409_v29  ;;  %v6324_v63 = vpop.f32.mrf.mxu1 }
 0x377   : > { %4463 = vmatmul.msk.bf16.gmra.mxu2 %vm3734_vm8, %v3689_v43  ;;  %v3879_v9 = vsel %vm3418_vm14, %v6324_v63, 0.0 }
 0x37d   : > { %v3335_v20 = vpop.permute.xlu0 %3334 }
 0x37e   : > { %v3662_v37 = vsel %vm3632_vm6, %v3629_v53, %v3335_v20  ;;  %v6335_v25 = vpop.f32.mrf.mxu1 }
 0x37f   : > { %v3695_v21 = vsel %vm3665_vm7, %v3662_v37, %v3415_v23  ;;  %v3937_v23 = vmul.f32 %v6314_v61, %v6314_v61  ;;  %v3881_v4 = vsel %vm3418_vm14, %v6335_v25, 0.0 }
 0x380   : > { %4466 = vmatmul.msk.bf16.gmra.mxu3 %vm3734_vm8, %v3695_v21 }
 0x385   : > { %v3257_v28 = vpop.permute.xlu0 %3256 }
 0x386   : > { %v3631_v56 = vsel %vm3599_vm3, %v3598_v2, %v3257_v28  ;;  %v3875_v2 = vsel %vm3418_vm14, %v6314_v61, 0.0 }
 0x387   : > { %v3664_v11 = vsel %vm3632_vm6, %v3631_v56, %v3337_v13 }
 0x388   : > { %v3697_v45 = vsel %vm3665_vm7, %v3664_v11, %v3417_v30  ;;  %v3976_v30 = vsel %vm3418_vm14, %v3937_v23, 0.0 }
 0x390   : > { %4467 = vmatmul.msk.bf16.gmra.mxu3 %vm3734_vm8, %v3697_v45  ;;  %v3938_v45 = vmul.f32 %v6319_v32, %v6319_v32 }
 0x393   : > { %v6308_v49 = vpop.f32.mrf.mxu2 }
 0x394   : > { %v4640_v19 = vpack.i.bf16 %v6308_v49, %v3780_v48 }
 0x396   : > { %4641 = vxpose.xlu0.b32.start [1/16] (narrow) %v4640_v19, 8 }
 0x39b   : > { %v6311_v59 = vpop.f32.mrf.mxu2 }
 0x39c   : > { %v4642_v41 = vpack.i.bf16 %v6311_v59, %v3782_v58  ;;  %v3877_v58 = vsel %vm3418_vm14, %v6319_v32, 0.0 }
 0x39e   : > { %4643 = vxpose.xlu0.b32.cont [2/16] (narrow) %v4642_v41, 8 }
 0x3a4   : > { %v3790_v57 = vpop.f32.mrf.mxu0 }
 0x3a5   : > { %v3933_v1 = vmul.f32 %v3790_v57, %v3790_v57  ;;  %v3867_v3 = vsel %vm3418_vm14, %v3790_v57, 0.0 }
 0x3a6   : > { %v3868_v14 = vadd.f32 %v3867_v3, %v3866_v54 }
 0x3a7   : > { %v3968_v51 = vsel %vm3418_vm14, %v3933_v1, 0.0 }
 0x3a8   : > { %v3969_v29 = vadd.f32 %v3968_v51, %v3967_v33 }
 0x3ac   : > { %v6326_v62 = vpop.f32.mrf.mxu0 }
 0x3ad   : > { %v3934_v46 = vmul.f32 %v6326_v62, %v6326_v62  ;;  %v3869_v60 = vsel %vm3418_vm14, %v6326_v62, 0.0 }
 0x3ae   : > { %v3870_v12 = vadd.f32 %v3869_v60, %v3868_v14 }
 0x3af   : > { %v3970_v22 = vsel %vm3418_vm14, %v3934_v46, 0.0 }
 0x3b0   : > { %v3971_v7 = vadd.f32 %v3970_v22, %v3969_v29 }
 0x3b2   : > { %v6316_v38 = vpop.f32.mrf.mxu2 }
 0x3b3   : > { %v4644_v52 = vpack.i.bf16 %v6316_v38, %v3785_v34 }
 0x3b5   : > { %4645 = vxpose.xlu0.b32.cont [3/16] (narrow) %v4644_v52, 8  ;;  %v3939_v52 = vmul.f32 %v6324_v63, %v6324_v63 }
 0x3b6   : > { %v6352_v40 = vpop.f32.mrf.mxu1 }
 0x3b7   : > { %v3980_v5 = vsel %vm3418_vm14, %v3939_v52, 0.0  ;;  %v3941_v8 = vmul.f32 %v6352_v40, %v6352_v40  ;;  %v3883_v55 = vsel %vm3418_vm14, %v6352_v40, 0.0 }
 0x3b9   : > { %v3984_v3 = vsel %vm3418_vm14, %v3941_v8, 0.0 }
 0x3ba   : > { %v6321_v10 = vpop.f32.mrf.mxu2 }
 0x3bb   : > { %v4646_v27 = vpack.i.bf16 %v6321_v10, %v3787_v6  ;;  %v3978_v6 = vsel %vm3418_vm14, %v3938_v45, 0.0  ;;  %v6380_v15 = vpop.f32.mrf.mxu3 }
 0x3bd   : > { %4647 = vxpose.xlu0.b32.cont [4/16] (narrow) %v4646_v27, 8 }
 0x3be   : > { %v6376_v27 = vpop.f32.mrf.mxu1 }
 0x3bf   : > { %v3942_v46 = vmul.f32 %v6376_v27, %v6376_v27  ;;  %v3885_v51 = vsel %vm3418_vm14, %v6376_v27, 0.0 }
 0x3c1   : > { %v3986_v33 = vsel %vm3418_vm14, %v3942_v46, 0.0 }
 0x3cc   : > { %v6337_v47 = vpop.f32.mrf.mxu0 }
 0x3cd   : > { %v3935_v24 = vmul.f32 %v6337_v47, %v6337_v47  ;;  %v3871_v42 = vsel %vm3418_vm14, %v6337_v47, 0.0 }
 0x3ce   : > { %v3872_v20 = vadd.f32 %v3871_v42, %v3870_v12  ;;  %v3945_v12 = vmul.f32 %v6308_v49, %v6308_v49 }
 0x3cf   : > { %v3972_v43 = vsel %vm3418_vm14, %v3935_v24, 0.0 }
 0x3d0   : > { %v3973_v36 = vadd.f32 %v3972_v43, %v3971_v7 }
 0x3d4   : > { %v6354_v53 = vpop.f32.mrf.mxu0 }
 0x3d5   : > { %v3873_v37 = vsel %vm3418_vm14, %v6354_v53, 0.0  ;;  %v3936_v21 = vmul.f32 %v6354_v53, %v6354_v53 }
 0x3d6   : > { %v3874_v28 = vadd.f32 %v3873_v37, %v3872_v20  ;;  %v3891_v37 = vsel %vm3418_vm14, %v6308_v49, 0.0 }
 0x3d7   : > { %v3974_v56 = vsel %vm3418_vm14, %v3936_v21, 0.0  ;;  %v3946_v21 = vmul.f32 %v6311_v59, %v6311_v59 }
 0x3d8   : > { %v3876_v13 = vadd.f32 %v3875_v2, %v3874_v28  ;;  %v3975_v11 = vadd.f32 %v3974_v56, %v3973_v36 }
 0x3d9   : > { %v3994_v49 = vsel %vm3418_vm14, %v3946_v21, 0.0 }
 0x3da   : > { %v3977_v48 = vadd.f32 %v3976_v30, %v3975_v11  ;;  %v6368_v19 = vpop.f32.mrf.mxu2  ;;  %v3878_v34 = vadd.f32 %v3877_v58, %v3876_v13  ;;  %v3992_v13 = vsel %vm3418_vm14, %v3945_v12, 0.0  ;;  %v3893_v11 = vsel %vm3418_vm14, %v6311_v59, 0.0 }
 0x3db   : > { %v4648_v41 = vpack.i.bf16 %v6368_v19, %v3790_v57  ;;  %v3940_v57 = vmul.f32 %v6335_v25, %v6335_v25  ;;  %v3947_v30 = vmul.f32 %v6316_v38, %v6316_v38  ;;  %v3895_v58 = vsel %vm3418_vm14, %v6316_v38, 0.0 }
 0x3dc   : > { %v3979_v16 = vadd.f32 %v3978_v6, %v3977_v48  ;;  %v3880_v50 = vadd.f32 %v3879_v9, %v3878_v34  ;;  %v3897_v59 = vsel %vm3418_vm14, %v6321_v10, 0.0  ;;  %v3899_v38 = vsel %vm3418_vm14, %v6368_v19, 0.0 }
 0x3dd   : > { %4649 = vxpose.xlu0.b32.cont [5/16] (narrow) %v4648_v41, 8  ;;  %v3982_v18 = vsel %vm3418_vm14, %v3940_v57, 0.0  ;;  %v3948_v41 = vmul.f32 %v6321_v10, %v6321_v10  ;;  %v3996_v52 = vsel %vm3418_vm14, %v3947_v30, 0.0 }
 0x3de   : > { %v3981_v44 = vadd.f32 %v3980_v5, %v3979_v16  ;;  %v3882_v0 = vadd.f32 %v3881_v4, %v3880_v50  ;;  %v3949_v16 = vmul.f32 %v6368_v19, %v6368_v19 }
 0x3df   : > { %v3998_v5 = vsel %vm3418_vm14, %v3948_v41, 0.0 }
 0x3e0   : > { %v3983_v39 = vadd.f32 %v3982_v18, %v3981_v44  ;;  %v3884_v35 = vadd.f32 %v3883_v55, %v3882_v0 }
 0x3e2   : > { %v3832_v31 = vpop.f32.mrf.mxu2  ;;  %v3985_v54 = vadd.f32 %v3984_v3, %v3983_v39  ;;  %v3886_v24 = vadd.f32 %v3885_v51, %v3884_v35 }
 0x3e3   : > { %v4650_v17 = vpack.i.bf16 %v3832_v31, %v6326_v62  ;;  %v6398_v62 = vpop.f32.mrf.mxu3  ;;  %v3950_v0 = vmul.f32 %v3832_v31, %v3832_v31  ;;  %v3901_v39 = vsel %vm3418_vm14, %v3832_v31, 0.0 }
 0x3e4   : > { %v3987_v42 = vadd.f32 %v3986_v33, %v3985_v54 }
 0x3e5   : > { %4651 = vxpose.xlu0.b32.cont [6/16] (narrow) %v4650_v17, 8  ;;  %v4000_v17 = vsel %vm3418_vm14, %v3949_v16, 0.0  ;;  %v4002_v35 = vsel %vm3418_vm14, %v3950_v0, 0.0 }
 0x3e6   : > { %v6391_v1 = vpop.f32.mrf.mxu1 }
 0x3e7   : > { %v3943_v26 = vmul.f32 %v6391_v1, %v6391_v1  ;;  %v3887_v60 = vsel %vm3418_vm14, %v6391_v1, 0.0 }
 0x3e8   : > { %v3888_v22 = vadd.f32 %v3887_v60, %v3886_v24 }
 0x3e9   : > { %v3988_v14 = vsel %vm3418_vm14, %v3943_v26, 0.0  ;;  %v3953_v26 = vmul.f32 %v6380_v15, %v6380_v15 }
 0x3ea   : > { %v3989_v20 = vadd.f32 %v3988_v14, %v3987_v42  ;;  %v3907_v42 = vsel %vm3418_vm14, %v6380_v15, 0.0 }
 0x3eb   : > { %v6420_v36 = vpop.f32.mrf.mxu3 }
 0x3ec   : > { %v3911_v30 = vsel %vm3418_vm14, %v6420_v36, 0.0 }
 0x3ee   : > { %v6408_v29 = vpop.f32.mrf.mxu1 }
 0x3ef   : > { %v3889_v43 = vsel %vm3418_vm14, %v6408_v29, 0.0  ;;  %v3944_v7 = vmul.f32 %v6408_v29, %v6408_v29 }
 0x3f0   : > { %v3890_v23 = vadd.f32 %v3889_v43, %v3888_v22  ;;  %v3954_v43 = vmul.f32 %v6398_v62, %v6398_v62 }
 0x3f1   : > { %v3990_v28 = vsel %vm3418_vm14, %v3944_v7, 0.0 }
 0x3f2   : > { %v3892_v2 = vadd.f32 %v3891_v37, %v3890_v23  ;;  %v3991_v56 = vadd.f32 %v3990_v28, %v3989_v20  ;;  %v3909_v23 = vsel %vm3418_vm14, %v6398_v62, 0.0  ;;  %v4010_v28 = vsel %vm3418_vm14, %v3954_v43, 0.0 }
 0x3f3   : > { %v6442_v18 = vpop.f32.mrf.mxu3 }
 0x3f4   : > { %v3894_v45 = vadd.f32 %v3893_v11, %v3892_v2  ;;  %v3993_v48 = vadd.f32 %v3992_v13, %v3991_v56  ;;  %v3955_v2 = vmul.f32 %v6420_v36, %v6420_v36  ;;  %v4656_v56 = vpack.i.bf16 %v6380_v15, %v6314_v61 }
 0x3f5   : > { %v3913_v41 = vsel %vm3418_vm14, %v6442_v18, 0.0  ;;  %v4658_v15 = vpack.i.bf16 %v6398_v62, %v6319_v32  ;;  %v4660_v62 = vpack.i.bf16 %v6420_v36, %v6324_v63 }
 0x3f6   : > { %v3896_v34 = vadd.f32 %v3895_v58, %v3894_v45  ;;  %v3995_v6 = vadd.f32 %v3994_v49, %v3993_v48  ;;  %v4012_v48 = vsel %vm3418_vm14, %v3955_v2, 0.0  ;;  %v3956_v49 = vmul.f32 %v6442_v18, %v6442_v18 }
 0x3f8   : > { %v3997_v9 = vadd.f32 %v3996_v52, %v3995_v6  ;;  %v3898_v50 = vadd.f32 %v3897_v59, %v3896_v34  ;;  %v4014_v6 = vsel %vm3418_vm14, %v3956_v49, 0.0 }
 0x3fa   : > { %v3835_v57 = vpop.f32.mrf.mxu2  ;;  %v3900_v44 = vadd.f32 %v3899_v38, %v3898_v50  ;;  %v3999_v4 = vadd.f32 %v3998_v5, %v3997_v9 }
 0x3fb   : > { %v4652_v10 = vpack.i.bf16 %v3835_v57, %v6337_v47  ;;  %v3951_v3 = vmul.f32 %v3835_v57, %v3835_v57  ;;  %v3903_v19 = vsel %vm3418_vm14, %v3835_v57, 0.0 }
 0x3fc   : > { %v4001_v8 = vadd.f32 %v4000_v17, %v3999_v4  ;;  %v3902_v55 = vadd.f32 %v3901_v39, %v3900_v44 }
 0x3fd   : > { %4653 = vxpose.xlu0.b32.cont [7/16] (narrow) %v4652_v10, 8  ;;  %v4004_v60 = vsel %vm3418_vm14, %v3951_v3, 0.0 }
 0x3fe   : > { %v4003_v46 = vadd.f32 %v4002_v35, %v4001_v8  ;;  %v3904_v54 = vadd.f32 %v3903_v19, %v3902_v55 }
 0x400   : > { %v4005_v14 = vadd.f32 %v4004_v60, %v4003_v46 }
 0x402   : > { %v3837_v51 = vpop.f32.mrf.mxu2 }
 0x403   : > { %v4654_v47 = vpack.i.bf16 %v3837_v51, %v6354_v53  ;;  %v3905_v24 = vsel %vm3418_vm14, %v3837_v51, 0.0  ;;  %v3952_v31 = vmul.f32 %v3837_v51, %v3837_v51  ;;  %v6453_v33 = vpop.f32.mrf.mxu3  ;;  %v4008_v53 = vsel %vm3418_vm14, %v3953_v26, 0.0 }
 0x404   : > { %v3906_v22 = vadd.f32 %v3905_v24, %v3904_v54  ;;  %v3957_v61 = vmul.f32 %v6453_v33, %v6453_v33  ;;  %v3915_v16 = vsel %vm3418_vm14, %v6453_v33, 0.0 }
 0x405   : > { %v4006_v12 = vsel %vm3418_vm14, %v3952_v31, 0.0  ;;  %4655 = vxpose.xlu0.b32.cont [8/16] (narrow) %v4654_v47, 8  ;;  %v4662_v47 = vpack.i.bf16 %v6442_v18, %v6335_v25 }
 0x406   : > { %v3908_v7 = vadd.f32 %v3907_v42, %v3906_v22  ;;  %v4007_v20 = vadd.f32 %v4006_v12, %v4005_v14  ;;  %v4016_v50 = vsel %vm3418_vm14, %v3957_v61, 0.0  ;;  %v4664_v12 = vpack.i.bf16 %v6453_v33, %v6352_v40 }
 0x408   : > { %v4009_v37 = vadd.f32 %v4008_v53, %v4007_v20  ;;  %v3910_v21 = vadd.f32 %v3909_v23, %v3908_v7 }
 0x40a   : > { %v4011_v13 = vadd.f32 %v4010_v28, %v4009_v37  ;;  %v3912_v45 = vadd.f32 %v3911_v30, %v3910_v21 }
 0x40b   : > { %v3852_v11 = vpop.f32.mrf.mxu3 }
 0x40c   : > { %v4013_v58 = vadd.f32 %v4012_v48, %v4011_v13  ;;  %v3914_v34 = vadd.f32 %v3913_v41, %v3912_v45  ;;  %v3958_v5 = vmul.f32 %v3852_v11, %v3852_v11  ;;  %v3917_v44 = vsel %vm3418_vm14, %v3852_v11, 0.0 }
 0x40d   : > { %4657 = vxpose.xlu0.b32.cont [9/16] (narrow) %v4656_v56, 8  ;;  %v4666_v7 = vpack.i.bf16 %v3852_v11, %v6376_v27 }
 0x40e   : > { %v4015_v52 = vadd.f32 %v4014_v6, %v4013_v58  ;;  %v3916_v9 = vadd.f32 %v3915_v16, %v3914_v34  ;;  %v4018_v0 = vsel %vm3418_vm14, %v3958_v5, 0.0 }
 0x410   : > { %v4017_v57 = vadd.f32 %v4016_v50, %v4015_v52  ;;  %v3918_v17 = vadd.f32 %v3917_v44, %v3916_v9 }
 0x412   : > { %v4019_v10 = vadd.f32 %v4018_v0, %v4017_v57 }
 0x413   : > { %v3855_v59 = vpop.f32.mrf.mxu3 }
 0x414   : > { %v3959_v38 = vmul.f32 %v3855_v59, %v3855_v59  ;;  %v3919_v4 = vsel %vm3418_vm14, %v3855_v59, 0.0  ;;  %v4668_v20 = vpack.i.bf16 %v3855_v59, %v6391_v1 }
 0x415   : > { %4659 = vxpose.xlu0.b32.cont [10/16] (narrow) %v4658_v15, 8  ;;  %v3920_v8 = vadd.f32 %v3919_v4, %v3918_v17 }
 0x416   : > { %v4020_v32 = vsel %vm3418_vm14, %v3959_v38, 0.0 }
 0x417   : > { %v4021_v3 = vadd.f32 %v4020_v32, %v4019_v10 }
 0x41b   : > { %v3857_v39 = vpop.f32.mrf.mxu3 }
 0x41c   : > { %v3921_v55 = vsel %vm3418_vm14, %v3857_v39, 0.0  ;;  %v3960_v35 = vmul.f32 %v3857_v39, %v3857_v39  ;;  %v4670_v53 = vpack.i.bf16 %v3857_v39, %v6408_v29 }
 0x41d   : > { %v3922_v46 = vadd.f32 %v3921_v55, %v3920_v8  ;;  %4661 = vxpose.xlu0.b32.cont [11/16] (narrow) %v4660_v62, 8 }
 0x41e   : > { %v4022_v19 = vsel %vm3418_vm14, %v3960_v35, 0.0 }
 0x41f   : > { %v3923_v26 = vrot.slane %v3922_v46, 4  ;;  %v4023_v54 = vadd.f32 %v4022_v19, %v4021_v3 }
 0x421   : > { %v3924_v51 = vadd.f32 %v3923_v26, %v3922_v46  ;;  %v4024_v60 = vrot.slane %v4023_v54, 4 }
 0x423   : > { %v3925_v63 = vrot.slane %v3924_v51, 2  ;;  %v4025_v36 = vadd.f32 %v4024_v60, %v4023_v54 }
 0x425   : > { %v3926_v24 = vadd.f32 %v3925_v63, %v3924_v51  ;;  %v4026_v31 = vrot.slane %v4025_v36, 2  ;;  %4663 = vxpose.xlu0.b32.cont [12/16] (narrow) %v4662_v47, 8 }
 0x427   : > { %v3927_v14 = vrot.slane %v3926_v24, 1  ;;  %v4027_v22 = vadd.f32 %v4026_v31, %v4025_v36 }
 0x429   : > { %v4028_v42 = vrot.slane %v4027_v22, 1  ;;  %v3928_v25 = vadd.f32 %v3927_v14, %v3926_v24 }
 0x42b   : > { %v4029_v18 = vadd.f32 %v4028_v42, %v4027_v22 }
 0x42d   : > { %v4031_v43 = vsel %vm4030_vm4, %v3928_v25, %v4029_v18  ;;  %4665 = vxpose.xlu0.b32.cont [13/16] (narrow) %v4664_v12, 8 }
 0x42e   : > { %4033 = vst.msk [vmem:[%s235_s27] sm:$0x3] %vm4032_vm9, %v4031_v43 }
 0x435   : > { %4667 = vxpose.xlu0.b32.cont [14/16] (narrow) %v4666_v7, 8 }
 0x43d   : > { %4669 = vxpose.xlu0.b32.cont [15/16] (narrow) %v4668_v20, 8 }
 0x445   : > { %4671 = vxpose.xlu0.b32.end [16/16] (narrow) %v4670_v53, 8 }
 0x471   : > { %v4672_v23 = vpop.trf.xlu0 }
 0x472   : > { %v4676_v37 = vunpack.i.h.bf16 %v4672_v23  ;;  %v4673_v21 = vunpack.i.l.bf16 %v4672_v23 }
 0x474   : > { %v4098_v40 = vpack.c.bf16 %v4676_v37, %v4673_v21 }
 0x476   : > { %4099 = vst [vmem:[%s231_s30] sm:$0xff] %v4098_v40 }
 0x477 PF: > { %s16_s18 = sadd.s32 1, %s4705_s18  }
 0x478   : > { %p13_p4 = scmp.ge.s32.totalorder %s16_s18, 4  }
 0x47a   :  { %15 = sbr.rel (!%p13_p4) target bundleno = 1 (0x1), region = 80 }

// kernel: decoder_block_forward.5
= control target key start
LH: loop header
LB: loop body
LE: loop exit
PB: predicated region body
PF: predicated region fallthrough
CT: control target
= control target key end

     0   :  { %s5157_s15 = smov 0   ;;  %s7584_s0 = inlined_call_operand.vmem [shape: bf16[2,16,16,4], index: 0, kind: input, shape index: {}]   ;;  %s7585_s1 = inlined_call_operand.vmem [shape: bf16[2,16,16,4], index: 1, kind: input, shape index: {}]   ;;  %s7586_s2 = inlined_call_operand.vmem [shape: bf16[72,8], index: 2, kind: input, shape index: {}]   ;;  %s7587_s3 = inlined_call_operand.vmem [shape: bf16[2,8,256], index: 3, kind: output, shape index: {0}]   ;;  %s7588_s4 = inlined_call_operand.vmem [shape: f32[2,2,8], index: 4, kind: output, shape index: {1}]  }
   0x1 LB: > { %s4672_s16 = sadd.s32 4294967295, %s5120_s15   ;;  %p4676_p0 = scmp.ge.s32.totalorder %s5120_s15, 1  ;;  %s5120_s15 = sphi %s5157_s15, %s15_s15  }
   0x2   : > { %p175_p1 = scmp.lt.s32.totalorder %s5120_s15, 3 }
   0x4   : > { %p176_p2 = pnand %p4676_p0, %p175_p1 }
   0x6   : > { %179 = sbr.rel (%p176_p2) target bundleno = 909 (0x38d), region = 32 }
   0xb   : > { %p210_p3 = scmp.lt.s32.totalorder %s4672_s16, 1  ;;  %vm318_vm0 = vsmask.f32 256  ;;  %vm319_vm1 = vsmask.f32 4368  ;;  %s5122_s21 = smov 4  }
   0xc   : > { %vm5184_vm2 = vmor %vm318_vm0, %vm319_vm1  ;;  %vm233_vm3 = vcmask 57344   ;;  %vm650_vm4 = vcmask 24576   ;;  %vm230_vm6 = vcmask 60416   ;;  %vm642_vm7 = vcmask 27648   ;;  %s5124_s25 = smov 8   ;;  %s5125_s26 = smov 16  }
   0xd   : > { %s7635_s16 = smov (!%p210_p3, %s4672_s16), 1  ;;  %vm5302_vm5 = vmand %vm650_vm4, %vm318_vm0  ;;  %vm643_vm8 = vsmask.f32 7938  ;;  %vm1215_vm9 = vcmask 57376   ;;  %vm1208_vm12 = vcmask 60448   ;;  %vm1824_vm1 = vcmask 1042432  }
   0xe   : > { %s4958_s17 = sshll.u32 %s7635_s16, 7  ;;  %vm5358_vm10 = vmand %vm642_vm7, %vm643_vm8  ;;  %vm1373_vm14 = vsmask.f32 3328  ;;  %vm1374_vm15 = vsmask.f32 7440  ;;  %s5126_s27 = smov 24  }
   0xf   : > { %s5173_s20 = scalar_lea.vmem %s7585_s1, %s4958_s17  ;;  %s5251_s24 = scalar_lea.vmem %s7584_s0, %s4958_s17  ;;  %vm5370_vm11 = vmand %vm1215_vm9, %vm318_vm0  ;;  %vm4241_vm9 = vcmask 1043456  }
  0x10   : > { %v761_v0 = vld [vmem:[%s5173_s20 + $0x4] sm:$0xf]  ;;  %v760_v1 = vld [vmem:[%s5173_s20] sm:$0xf]  ;;  %v762_v2 = vld [vmem:[%s5173_s20 + $0x8] sm:$0xf] }
  0x11   : > { %v801_v3 = vshrl.u32 %v761_v0, 16  ;;  %v793_v4 = vshrl.u32 %v760_v1, 16  ;;  %v796_v5 = vshll.u32 %v760_v1, 16  ;;  %v810_v8 = vshrl.u32 %v762_v2, 16  ;;  %v763_v9 = vld [vmem:[%s5173_s20 + $0xc] sm:$0xf]  ;;  %vm5456_vm13 = vmand %vm1208_vm12, %vm643_vm8 }
  0x12   : > { %v804_v10 = vshll.u32 %v761_v0, 16  ;;  %v764_v11 = vld [vmem:[%s5173_s20 + $0x10] sm:$0xf]  ;;  %v818_v12 = vshrl.u32 %v763_v9, 16  ;;  %v765_v15 = vld [vmem:[%s5173_s20 + $0x14] sm:$0xf]  ;;  %vm5563_vm0 = vmor %vm1373_vm14, %vm1374_vm15 }
  0x13   : > { %v803_v6 = vrot.slane %v801_v3, 7  ;;  %v795_v7 = vrot.slane %v793_v4, 7  ;;  %v812_v16 = vrot.slane %v810_v8, 7  ;;  %v813_v17 = vshll.u32 %v762_v2, 16  ;;  %v766_v33 = vld [vmem:[%s5173_s20 + $0x18] sm:$0xf] }
  0x14   : > { %v827_v18 = vshrl.u32 %v764_v11, 16  ;;  %v820_v19 = vrot.slane %v818_v12, 7  ;;  %v835_v22 = vshrl.u32 %v765_v15, 16  ;;  %v821_v23 = vshll.u32 %v763_v9, 16  ;;  %v767_v34 = vld [vmem:[%s5173_s20 + $0x1c] sm:$0xf] }
  0x15   : > { %v808_v13 = vrot.slane %v803_v6, 4  ;;  %v798_v14 = vor.u32 %v796_v5, %v795_v7  ;;  %v806_v20 = vor.u32 %v804_v10, %v803_v6  ;;  %v799_v21 = vrot.slane %v795_v7, 4  ;;  %v768_v46 = vld [vmem:[%s5173_s20 + $0x20] sm:$0xf]  ;;  %v769_v47 = vld [vmem:[%s5173_s20 + $0x24] sm:$0xf] }
  0x16   : > { %v825_v25 = vrot.slane %v820_v19, 4  ;;  %v815_v26 = vor.u32 %v813_v17, %v812_v16  ;;  %v829_v27 = vrot.slane %v827_v18, 7  ;;  %v838_v28 = vshll.u32 %v765_v15, 16  ;;  %v770_v59 = vld [vmem:[%s5173_s20 + $0x28] sm:$0xf]  ;;  %s5127_s28 = smov 32  }
  0x17   : > { %1068 = vrot.lane.b32.xlu1 %v808_v13, %s5122_s21  ;;  %1064 = vrot.lane.b32.xlu0 %v798_v14, %s5122_s21  ;;  %v807_v29 = vsel %vm5184_vm2, %v799_v21, %v806_v20  ;;  %v837_v30 = vrot.slane %v835_v22, 7  ;;  %v823_v31 = vor.u32 %v821_v23, %v820_v19  ;;  %v816_v32 = vrot.slane %v812_v16, 4  ;;  %v771_v60 = vld [vmem:[%s5173_s20 + $0x2c] sm:$0xf]  ;;  %v772_v8 = vld [vmem:[%s5173_s20 + $0x30] sm:$0xf] }
  0x18   : > { %1074 = vrot.lane.b32.xlu2 %v825_v25, %s5122_s21  ;;  %v833_v35 = vrot.slane %v829_v27, 4  ;;  %v830_v36 = vshll.u32 %v764_v11, 16  ;;  %v844_v38 = vshrl.u32 %v766_v33, 16  ;;  %v852_v39 = vshrl.u32 %v767_v34, 16  ;;  %v773_v9 = vld [vmem:[%s5173_s20 + $0x34] sm:$0xf] }
  0x19   : > { %v840_v37 = vor.u32 %v838_v28, %v837_v30  ;;  %v824_v40 = vsel %vm5184_vm2, %v816_v32, %v823_v31  ;;  %v855_v45 = vshll.u32 %v767_v34, 16  ;;  %v847_v48 = vshll.u32 %v766_v33, 16  ;;  %v774_v21 = vld [vmem:[%s5173_s20 + $0x38] sm:$0xf]  ;;  %v775_v22 = vld [vmem:[%s5173_s20 + $0x3c] sm:$0xf] }
  0x1a   : > { %v832_v41 = vor.u32 %v830_v36, %v829_v27  ;;  %v846_v43 = vrot.slane %v844_v38, 7  ;;  %v854_v44 = vrot.slane %v852_v39, 7  ;;  %v842_v49 = vrot.slane %v837_v30, 4  ;;  %v777_v36 = vld [vmem:[%s5173_s20 + $0x44] sm:$0xf]  ;;  %s5128_s29 = smov 40  }
  0x1b   : > { %v841_v42 = vsel %vm5184_vm2, %v833_v35, %v840_v37  ;;  %v861_v52 = vshrl.u32 %v768_v46, 16  ;;  %v869_v53 = vshrl.u32 %v769_v47, 16  ;;  %v872_v58 = vshll.u32 %v769_v47, 16  ;;  %v776_v35 = vld [vmem:[%s5173_s20 + $0x40] sm:$0xf]  ;;  %s5129_s30 = smov 48  }
  0x1c   : > { %v850_v50 = vrot.slane %v846_v43, 4  ;;  %v857_v51 = vor.u32 %v855_v45, %v854_v44  ;;  %v849_v54 = vor.u32 %v847_v48, %v846_v43  ;;  %v864_v61 = vshll.u32 %v768_v46, 16  ;;  %v778_v48 = vld [vmem:[%s5173_s20 + $0x48] sm:$0xf]  ;;  %s5130_s5 = smov 56   ;;  %s5131_s6 = smov 64  }
  0x1d   : > { %v863_v56 = vrot.slane %v861_v52, 7  ;;  %v871_v57 = vrot.slane %v869_v53, 7  ;;  %v859_v62 = vrot.slane %v854_v44, 4  ;;  %v878_v1 = vshrl.u32 %v770_v59, 16  ;;  %s4683_s19 = sshll.u32 %s7635_s16, 1  ;;  %s4960_s23 = sshll.u32 %s7635_s16, 3 }
  0x1e   : > { %v858_v55 = vsel %vm5184_vm2, %v850_v50, %v857_v51  ;;  %v886_v2 = vshrl.u32 %v771_v60, 16  ;;  %v889_v7 = vshll.u32 %v771_v60, 16  ;;  %v881_v10 = vshll.u32 %v770_v59, 16  ;;  %s228_s22 = scalar_lea.vmem %s7588_s4, %s4683_s19 }
  0x1f   : > { %1070 = vrot.lane.b32.xlu1 %v815_v26, %s5122_s21  ;;  %1066 = vrot.lane.b32.xlu0 %v807_v29, %s5122_s21  ;;  %v867_v63 = vrot.slane %v863_v56, 4  ;;  %v874_v0 = vor.u32 %v872_v58, %v871_v57  ;;  %v866_v3 = vor.u32 %v864_v61, %v863_v56  ;;  %v880_v5 = vrot.slane %v878_v1, 7  ;;  %v780_v61 = vld [vmem:[%s5173_s20 + $0x50] sm:$0xf] }
  0x20   : > { %1072 = vrot.lane.b32.xlu2 %v824_v40, %s5122_s21  ;;  %v888_v6 = vrot.slane %v886_v2, 7  ;;  %v876_v11 = vrot.slane %v871_v57, 4  ;;  %v895_v14 = vshrl.u32 %v772_v8, 16  ;;  %v903_v15 = vshrl.u32 %v773_v9, 16 }
  0x21   : > { %v875_v4 = vsel %vm5184_vm2, %v867_v63, %v874_v0  ;;  %v884_v12 = vrot.slane %v880_v5, 4  ;;  %v883_v16 = vor.u32 %v881_v10, %v880_v5  ;;  %v906_v20 = vshll.u32 %v773_v9, 16 }
  0x22   : > { %v891_v13 = vor.u32 %v889_v7, %v888_v6  ;;  %v897_v18 = vrot.slane %v895_v14, 7  ;;  %v905_v19 = vrot.slane %v903_v15, 7  ;;  %v898_v23 = vshll.u32 %v772_v8, 16  ;;  %v5259_v7 = vld [vmem:[%s5251_s24 + $0x4] sm:$0xf] }
  0x23   : > { %v893_v25 = vrot.slane %v888_v6, 4  ;;  %v912_v28 = vshrl.u32 %v774_v21, 16  ;;  %v920_v29 = vshrl.u32 %v775_v22, 16  ;;  %v923_v34 = vshll.u32 %v775_v22, 16  ;;  %v5270_v14 = vld [vmem:[%s5251_s24 + $0xc] sm:$0xf] }
  0x24   : > { %v892_v17 = vsel %vm5184_vm2, %v884_v12, %v891_v13  ;;  %v901_v26 = vrot.slane %v897_v18, 4  ;;  %v908_v27 = vor.u32 %v906_v20, %v905_v19  ;;  %v900_v30 = vor.u32 %v898_v23, %v897_v18  ;;  %v782_v12 = vld [vmem:[%s5173_s20 + $0x58] sm:$0xf]  ;;  %v783_v13 = vld [vmem:[%s5173_s20 + $0x5c] sm:$0xf] }
  0x25   : > { %v914_v32 = vrot.slane %v912_v28, 7  ;;  %v922_v33 = vrot.slane %v920_v29, 7  ;;  %v915_v37 = vshll.u32 %v774_v21, 16  ;;  %v910_v38 = vrot.slane %v905_v19, 4  ;;  %v5283_v23 = vld [vmem:[%s5173_s20 + $0x60] sm:$0xf] }
  0x26   : > { %v909_v31 = vsel %vm5184_vm2, %v901_v26, %v908_v27  ;;  %v940_v47 = vshll.u32 %v777_v36, 16  ;;  %v932_v50 = vshll.u32 %v776_v35, 16  ;;  %v949_v63 = vshll.u32 %v778_v48, 16  ;;  %v785_v29 = vld [vmem:[%s5173_s20 + $0x64] sm:$0xf] }
  0x27   : > { %1078 = vrot.lane.b32.xlu1 %v841_v42, %s5122_s21  ;;  %1076 = vrot.lane.b32.xlu0 %v832_v41, %s5122_s21  ;;  %v918_v39 = vrot.slane %v914_v32, 4  ;;  %v925_v40 = vor.u32 %v923_v34, %v922_v33  ;;  %v929_v41 = vshrl.u32 %v776_v35, 16  ;;  %v937_v42 = vshrl.u32 %v777_v36, 16 }
  0x28   : > { %1080 = vrot.lane.b32.xlu2 %v842_v49, %s5122_s21  ;;  %v917_v43 = vor.u32 %v915_v37, %v914_v32  ;;  %v779_v49 = vld [vmem:[%s5173_s20 + $0x4c] sm:$0xf]  ;;  %v927_v51 = vrot.slane %v922_v33, 4  ;;  %v5123_v5 = vmov 0   ;;  %v330_v15 = vshrl.u32 %v5259_v7, 16 }
  0x29   : > { %v926_v44 = vsel %vm5184_vm2, %v918_v39, %v925_v40  ;;  %v931_v45 = vrot.slane %v929_v41, 7  ;;  %v939_v46 = vrot.slane %v937_v42, 7  ;;  %v957_v60 = vshll.u32 %v779_v49, 16  ;;  %240 = vst.msk [vmem:[#allocation2 + $0x20] sm:$0x1] %vm233_vm3, %v5123_v5 }
  0x2a   : > { %234 = vst.msk [vmem:[#allocation2 + $0x8] sm:$0x1] %vm233_vm3, %v5123_v5  ;;  %v347_v18 = vshrl.u32 %v5270_v14, 16  ;;  %v980_v21 = vshrl.u32 %v782_v12, 16  ;;  %v988_v22 = vshrl.u32 %v783_v13, 16  ;;  %v5291_v27 = vrot.slane %v330_v15, 7 }
  0x2b   : > { %v935_v52 = vrot.slane %v931_v45, 4  ;;  %v942_v53 = vor.u32 %v940_v47, %v939_v46  ;;  %v934_v56 = vor.u32 %v932_v50, %v931_v45  ;;  %v944_v0 = vrot.slane %v939_v46, 4  ;;  %237 = vst.msk [vmem:[#allocation2 + $0x14] sm:$0x1] %vm233_vm3, %v5123_v5 }
  0x2c   : > { %243 = vst.msk [vmem:[#allocation2 + $0x2c] sm:$0x1] %vm233_vm3, %v5123_v5  ;;  %v982_v32 = vrot.slane %v980_v21, 7  ;;  %v990_v33 = vrot.slane %v988_v22, 7  ;;  %v991_v34 = vshll.u32 %v783_v13, 16  ;;  %v983_v36 = vshll.u32 %v782_v12, 16 }
  0x2d   : > { %v943_v57 = vsel %vm5184_vm2, %v935_v52, %v942_v53  ;;  %246 = vst.msk [vmem:[#allocation2 + $0x38] sm:$0x1] %vm233_vm3, %v5123_v5  ;;  %v1005_v39 = vshrl.u32 %v785_v29, 16  ;;  %v337_v41 = vrot.slane %v5291_v27, 4  ;;  %v786_v53 = vld [vmem:[%s5173_s20 + $0x68] sm:$0xf] }
  0x2e   : > { %249 = vst.msk [vmem:[#allocation2 + $0x44] sm:$0x1] %vm233_vm3, %v5123_v5  ;;  %v993_v45 = vor.u32 %v991_v34, %v990_v33  ;;  %v985_v46 = vor.u32 %v983_v36, %v982_v32  ;;  %v789_v12 = vld [vmem:[%s5173_s20 + $0x74] sm:$0xf]  ;;  %vm4040_vm8 = vcmask 326656   ;;  %vm4504_vm14 = vcmask 1040384  }
  0x2f   : > { %1084 = vrot.lane.b32.xlu1 %v858_v55, %s5122_s21  ;;  %1082 = vrot.lane.b32.xlu0 %v849_v54, %s5122_s21  ;;  %v946_v54 = vshrl.u32 %v778_v48, 16  ;;  %v954_v55 = vshrl.u32 %v779_v49, 16  ;;  %252 = vst.msk [vmem:[#allocation2 + $0x50] sm:$0x1] %vm233_vm3, %v5123_v5  ;;  %v5327_v50 = vrot.slane %v1005_v39, 7  ;;  %v1039_v22 = vshrl.u32 %v789_v12, 16 }
  0x30   : > { %1086 = vrot.lane.b32.xlu2 %v859_v62, %s5122_s21  ;;  %v781_v62 = vld [vmem:[%s5173_s20 + $0x54] sm:$0xf]  ;;  %255 = vst.msk [vmem:[#allocation2 + $0x5c] sm:$0x1] %vm233_vm3, %v5123_v5  ;;  %v659_v26 = vld [vmem:[#allocation2 + $0x20] sm:$0x1] }
  0x31   : > { %v948_v58 = vrot.slane %v946_v54, 7  ;;  %v956_v59 = vrot.slane %v954_v55, 7  ;;  %258 = vst.msk [vmem:[#allocation2 + $0x68] sm:$0x1] %vm233_vm3, %v5123_v5  ;;  %v787_v54 = vld [vmem:[%s5173_s20 + $0x6c] sm:$0xf] }
  0x32   : > { %261 = vst.msk [vmem:[#allocation2 + $0x74] sm:$0x1] %vm233_vm3, %v5123_v5  ;;  %v652_v42 = vld [vmem:[#allocation2 + $0x14] sm:$0x1]  ;;  %vm4506_vm15 = vcmask 58368  }
  0x33   : > { %v952_v1 = vrot.slane %v948_v58, 4  ;;  %v959_v2 = vor.u32 %v957_v60, %v956_v59  ;;  %v951_v6 = vor.u32 %v949_v63, %v948_v58  ;;  %264 = vst.msk [vmem:[#allocation2 + $0x80] sm:$0x1] %vm233_vm3, %v5123_v5  ;;  %v653_v47 = vsel %vm5302_vm5, %v337_v41, %v652_v42  ;;  %v5424_v41 = vld [vmem:[%s5251_s24 + $0x10] sm:$0xf] }
  0x34   : > { %267 = vst.msk [vmem:[#allocation2 + $0x8c] sm:$0x1] %vm233_vm3, %v5123_v5  ;;  %v1014_v58 = vshrl.u32 %v786_v53, 16  ;;  %v995_v60 = vrot.slane %v990_v33, 4  ;;  %v1025_v63 = vshll.u32 %v787_v54, 16 }
  0x35   : > { %v960_v8 = vsel %vm5184_vm2, %v952_v1, %v959_v2  ;;  %270 = vst.msk [vmem:[#allocation2 + $0x98] sm:$0x1] %vm233_vm3, %v5123_v5 }
  0x36   : > { %273 = vst.msk [vmem:[#allocation2 + $0xa4] sm:$0x1] %vm233_vm3, %v5123_v5  ;;  %v1016_v2 = vrot.slane %v1014_v58, 7 }
  0x37   : > { %1090 = vrot.lane.b32.xlu1 %v875_v4, %s5122_s21  ;;  %1088 = vrot.lane.b32.xlu0 %v866_v3, %s5122_s21  ;;  %v963_v3 = vshrl.u32 %v780_v61, 16  ;;  %v971_v4 = vshrl.u32 %v781_v62, 16  ;;  %276 = vst.msk [vmem:[#allocation2 + $0xb0] sm:$0x1] %vm233_vm3, %v5123_v5 }
  0x38   : > { %1092 = vrot.lane.b32.xlu2 %v876_v11, %s5122_s21  ;;  %v974_v11 = vshll.u32 %v781_v62, 16  ;;  %279 = vst.msk [vmem:[#allocation2 + $0xbc] sm:$0x1] %vm233_vm3, %v5123_v5 }
  0x39   : > { %v965_v9 = vrot.slane %v963_v3, 7  ;;  %v973_v10 = vrot.slane %v971_v4, 7  ;;  %282 = vst.msk [vmem:[#allocation2 + $0xc8] sm:$0x1] %vm233_vm3, %v5123_v5 }
  0x3a   : > { %285 = vst.msk [vmem:[#allocation2 + $0xd4] sm:$0x1] %vm233_vm3, %v5123_v5  ;;  %vm1825_vm3 = vcmask 1046532  }
  0x3b   : > { %v969_v19 = vrot.slane %v965_v9, 4  ;;  %v976_v20 = vor.u32 %v974_v11, %v973_v10  ;;  %v978_v40 = vrot.slane %v973_v10, 4  ;;  %654 = vst [vmem:[#allocation2 + $0x14] sm:$0x1] %v653_v47  ;;  %vm6028_vm4 = vmor %vm1824_vm1, %vm1825_vm3 }
  0x3c   : > { %235 = vst.msk [vmem:[#allocation2 + $0xc] sm:$0xf] %vm230_vm6, %v5123_v5 }
  0x3d   : > { %231 = vst.msk [vmem:[#allocation2] sm:$0xf] %vm230_vm6, %v5123_v5 }
  0x3e   : > { %232 = vst.msk [vmem:[#allocation2 + $0x4] sm:$0xf] %vm230_vm6, %v5123_v5 }
  0x3f   : > { %1096 = vrot.lane.b32.xlu1 %v892_v17, %s5122_s21  ;;  %1094 = vrot.lane.b32.xlu0 %v883_v16, %s5122_s21  ;;  %v966_v16 = vshll.u32 %v780_v61, 16  ;;  %v961_v17 = vrot.slane %v956_v59, 4  ;;  %v1022_v59 = vshrl.u32 %v787_v54, 16  ;;  %236 = vst.msk [vmem:[#allocation2 + $0x10] sm:$0xf] %vm230_vm6, %v5123_v5 }
  0x40   : > { %1098 = vrot.lane.b32.xlu2 %v893_v25, %s5122_s21  ;;  %v5285_v25 = vrot.slane %v347_v18, 7  ;;  %238 = vst.msk [vmem:[#allocation2 + $0x18] sm:$0xf] %vm230_vm6, %v5123_v5 }
  0x41   : > { %v968_v28 = vor.u32 %v966_v16, %v965_v9  ;;  %v1024_v3 = vrot.slane %v1022_v59, 7  ;;  %239 = vst.msk [vmem:[#allocation2 + $0x1c] sm:$0xf] %vm230_vm6, %v5123_v5  ;;  %v788_v9 = vld [vmem:[%s5173_s20 + $0x70] sm:$0xf] }
  0x42   : > { %241 = vst.msk [vmem:[#allocation2 + $0x24] sm:$0xf] %vm230_vm6, %v5123_v5  ;;  %v1031_v21 = vshrl.u32 %v788_v9, 16  ;;  %v1034_v33 = vshll.u32 %v788_v9, 16 }
  0x43   : > { %v645_v13 = vld [vmem:[#allocation2 + $0xc] sm:$0xf]  ;;  %242 = vst.msk [vmem:[#allocation2 + $0x28] sm:$0xf] %vm230_vm6, %v5123_v5  ;;  %v1027_v18 = vor.u32 %v1025_v63, %v1024_v3  ;;  %v1029_v34 = vrot.slane %v1024_v3, 4  ;;  %v359_v3 = vshll.u32 %v5424_v41, 16 }
  0x44   : > { %244 = vst.msk [vmem:[#allocation2 + $0x30] sm:$0xf] %vm230_vm6, %v5123_v5 }
  0x45   : > { %245 = vst.msk [vmem:[#allocation2 + $0x34] sm:$0xf] %vm230_vm6, %v5123_v5 }
  0x46   : > { %247 = vst.msk [vmem:[#allocation2 + $0x3c] sm:$0xf] %vm230_vm6, %v5123_v5 }
  0x47   : > { %1102 = vrot.lane.b32.xlu1 %v909_v31, %s5122_s21  ;;  %1100 = vrot.lane.b32.xlu0 %v900_v30, %s5122_s21  ;;  %v354_v30 = vrot.slane %v5285_v25, 4  ;;  %v977_v31 = vsel %vm5184_vm2, %v969_v19, %v976_v20  ;;  %v1017_v19 = vshll.u32 %v786_v53, 16  ;;  %v1012_v20 = vrot.slane %v5327_v50, 4  ;;  %248 = vst.msk [vmem:[#allocation2 + $0x40] sm:$0xf] %vm230_vm6, %v5123_v5 }
  0x48   : > { %1104 = vrot.lane.b32.xlu2 %v910_v38, %s5122_s21  ;;  %v997_v38 = vshrl.u32 %v5283_v23, 16  ;;  %250 = vst.msk [vmem:[#allocation2 + $0x48] sm:$0xf] %vm230_vm6, %v5123_v5 }
  0x49   : > { %v660_v37 = vsel %vm5302_vm5, %v354_v30, %v659_v26  ;;  %v5398_v30 = vrot.slane %v1039_v22, 7  ;;  %251 = vst.msk [vmem:[#allocation2 + $0x4c] sm:$0xf] %vm230_vm6, %v5123_v5 }
  0x4a   : > { %661 = vst [vmem:[#allocation2 + $0x20] sm:$0x1] %v660_v37  ;;  %v999_v49 = vrot.slane %v997_v38, 7 }
  0x4b   : > { %253 = vst.msk [vmem:[#allocation2 + $0x54] sm:$0xf] %vm230_vm6, %v5123_v5  ;;  %v1046_v59 = vrot.slane %v5398_v30, 4 }
  0x4c   : > { %v1003_v61 = vrot.slane %v999_v49, 4  ;;  %254 = vst.msk [vmem:[#allocation2 + $0x58] sm:$0xf] %vm230_vm6, %v5123_v5 }
  0x4d   : > { %256 = vst.msk [vmem:[#allocation2 + $0x60] sm:$0xf] %vm230_vm6, %v5123_v5 }
  0x4e   : > { %257 = vst.msk [vmem:[#allocation2 + $0x64] sm:$0xf] %vm230_vm6, %v5123_v5 }
  0x4f   : > { %1108 = vrot.lane.b32.xlu1 %v926_v44, %s5122_s21  ;;  %1106 = vrot.lane.b32.xlu0 %v917_v43, %s5122_s21  ;;  %v286_v43 = vld [vmem:[%s5251_s24] sm:$0xf]  ;;  %v986_v44 = vrot.slane %v982_v32, 4  ;;  %259 = vst.msk [vmem:[#allocation2 + $0x6c] sm:$0xf] %vm230_vm6, %v5123_v5 }
  0x50   : > { %1110 = vrot.lane.b32.xlu2 %v927_v51, %s5122_s21  ;;  %v322_v48 = vshrl.u32 %v286_v43, 16  ;;  %v1008_v51 = vshll.u32 %v785_v29, 16  ;;  %v1033_v29 = vrot.slane %v1031_v21, 7  ;;  %260 = vst.msk [vmem:[#allocation2 + $0x70] sm:$0xf] %vm230_vm6, %v5123_v5 }
  0x51   : > { %v994_v52 = vsel %vm5184_vm2, %v986_v44, %v993_v45  ;;  %v1224_v4 = vld [vmem:[#allocation2 + $0x20] sm:$0x1]  ;;  %v350_v44 = vshll.u32 %v5270_v14, 16  ;;  %262 = vst.msk [vmem:[#allocation2 + $0x78] sm:$0xf] %vm230_vm6, %v5123_v5 }
  0x52   : > { %v5340_v55 = vrot.slane %v322_v48, 7  ;;  %v1010_v62 = vor.u32 %v1008_v51, %v5327_v50  ;;  %v1037_v36 = vrot.slane %v1033_v29, 4  ;;  %v1036_v42 = vor.u32 %v1034_v33, %v1033_v29  ;;  %v1217_v50 = vld [vmem:[#allocation2 + $0x14] sm:$0x1]  ;;  %263 = vst.msk [vmem:[#allocation2 + $0x7c] sm:$0xf] %vm230_vm6, %v5123_v5 }
  0x53   : > { %v356_v48 = vshrl.u32 %v5424_v41, 16  ;;  %v790_v14 = vld [vmem:[%s5173_s20 + $0x78] sm:$0xf]  ;;  %v791_v51 = vld [vmem:[%s5173_s20 + $0x7c] sm:$0xf] }
  0x54   : > { %265 = vst.msk [vmem:[#allocation2 + $0x84] sm:$0xf] %vm230_vm6, %v5123_v5  ;;  %v1048_v53 = vshrl.u32 %v790_v14, 16  ;;  %v1056_v54 = vshrl.u32 %v791_v51, 16  ;;  %v5509_v33 = vld [vmem:[%s5251_s24 + $0x24] sm:$0xf] }
  0x55   : > { %266 = vst.msk [vmem:[#allocation2 + $0x88] sm:$0xf] %vm230_vm6, %v5123_v5 }
  0x56   : > { %268 = vst.msk [vmem:[#allocation2 + $0x90] sm:$0xf] %vm230_vm6, %v5123_v5 }
  0x57   : > { %1114 = vrot.lane.b32.xlu1 %v943_v57, %s5122_s21  ;;  %1112 = vrot.lane.b32.xlu0 %v934_v56, %s5122_s21  ;;  %v325_v56 = vshll.u32 %v286_v43, 16  ;;  %v1000_v57 = vshll.u32 %v5283_v23, 16  ;;  %v5389_v23 = vld [vmem:[%s5251_s24 + $0x8] sm:$0xf]  ;;  %269 = vst.msk [vmem:[#allocation2 + $0x94] sm:$0xf] %vm230_vm6, %v5123_v5 }
  0x58   : > { %1116 = vrot.lane.b32.xlu2 %v944_v0, %s5122_s21  ;;  %v339_v32 = vshrl.u32 %v5389_v23, 16  ;;  %v342_v43 = vshll.u32 %v5389_v23, 16  ;;  %271 = vst.msk [vmem:[#allocation2 + $0x9c] sm:$0xf] %vm230_vm6, %v5123_v5  ;;  %v5496_v23 = vld [vmem:[#allocation2 + $0x18] sm:$0xf] }
  0x59   : > { %v327_v0 = vor.u32 %v325_v56, %v5340_v55  ;;  %v1002_v1 = vor.u32 %v1000_v57, %v999_v49  ;;  %v5441_v49 = vld [vmem:[%s5251_s24 + $0x18] sm:$0xf]  ;;  %272 = vst.msk [vmem:[#allocation2 + $0xa0] sm:$0xf] %vm230_vm6, %v5123_v5 }
  0x5a   : > { %v5416_v39 = vrot.slane %v339_v32, 7  ;;  %v373_v63 = vshrl.u32 %v5441_v49, 16  ;;  %v376_v29 = vshll.u32 %v5441_v49, 16  ;;  %274 = vst.msk [vmem:[#allocation2 + $0xa8] sm:$0xf] %vm230_vm6, %v5123_v5  ;;  %v352_v32 = vor.u32 %v350_v44, %v5285_v25 }
  0x5b   : > { %v646_v16 = vsel %vm5358_vm10, %v327_v0, %v645_v13  ;;  %275 = vst.msk [vmem:[#allocation2 + $0xac] sm:$0xf] %vm230_vm6, %v5123_v5  ;;  %v666_v25 = vld [vmem:[#allocation2 + $0x2c] sm:$0x1] }
  0x5c   : > { %647 = vst [vmem:[#allocation2 + $0xc] sm:$0xf] %v646_v16  ;;  %v345_v47 = vrot.slane %v5416_v39, 4  ;;  %v5486_v16 = vrot.slane %v356_v48, 7  ;;  %v5492_v22 = vrot.slane %v373_v63, 7 }
  0x5d   : > { %277 = vst.msk [vmem:[#allocation2 + $0xb4] sm:$0xf] %vm230_vm6, %v5123_v5 }
  0x5e   : > { %278 = vst.msk [vmem:[#allocation2 + $0xb8] sm:$0xf] %vm230_vm6, %v5123_v5 }
  0x5f   : > { %1120 = vrot.lane.b32.xlu1 %v960_v8, %s5122_s21  ;;  %1118 = vrot.lane.b32.xlu0 %v951_v6, %s5122_s21  ;;  %v1011_v8 = vsel %vm5184_vm2, %v1003_v61, %v1010_v62  ;;  %v5467_v61 = vrot.slane %v1056_v54, 7  ;;  %v1059_v62 = vshll.u32 %v791_v51, 16  ;;  %280 = vst.msk [vmem:[#allocation2 + $0xc0] sm:$0xf] %vm230_vm6, %v5123_v5  ;;  %v353_v51 = vsel %vm5184_vm2, %v345_v47, %v352_v32  ;;  %v5533_v54 = vld [vmem:[#allocation2 + $0x24] sm:$0xf] }
  0x60   : > { %1122 = vrot.lane.b32.xlu2 %v961_v17, %s5122_s21  ;;  %v1020_v17 = vrot.slane %v1016_v2, 4  ;;  %281 = vst.msk [vmem:[#allocation2 + $0xc4] sm:$0xf] %vm230_vm6, %v5123_v5  ;;  %v398_v47 = vshrl.u32 %v5509_v33, 16  ;;  %v5585_v32 = vld [vmem:[%s5251_s24 + $0x2c] sm:$0xf] }
  0x61   : > { %283 = vst.msk [vmem:[#allocation2 + $0xcc] sm:$0xf] %vm230_vm6, %v5123_v5 }
  0x62   : > { %v1028_v26 = vsel %vm5184_vm2, %v1020_v17, %v1027_v18  ;;  %v1325_v18 = vld [vmem:[#allocation2] sm:$0xf]  ;;  %284 = vst.msk [vmem:[#allocation2 + $0xd0] sm:$0xf] %vm230_vm6, %v5123_v5  ;;  %vm3974_vm6 = vcmask 195584  }
  0x63   : > { %v1210_v57 = vld [vmem:[#allocation2 + $0xc] sm:$0xf]  ;;  %v1380_v41 = vshll.u32 %v1325_v18, 16  ;;  %658 = vst.msk [vmem:[#allocation2 + $0x1c] sm:$0xf] %vm642_vm7, %v353_v51 }
  0x67   : > { %1126 = vrot.lane.b32.xlu1 %v977_v31, %s5122_s21  ;;  %1124 = vrot.lane.b32.xlu0 %v968_v28, %s5122_s21  ;;  %v1019_v28 = vor.u32 %v1017_v19, %v1016_v2  ;;  %v1042_v31 = vshll.u32 %v789_v12, 16  ;;  %v333_v2 = vshll.u32 %v5259_v7, 16  ;;  %v328_v7 = vrot.slane %v5340_v55, 4 }
  0x68   : > { %1128 = vrot.lane.b32.xlu2 %v978_v40, %s5122_s21  ;;  %v5419_v40 = vld [vmem:[%s5251_s24 + $0x14] sm:$0xf] }
  0x69   : > { %v1044_v37 = vor.u32 %v1042_v31, %v5398_v30  ;;  %v364_v45 = vshrl.u32 %v5419_v40, 16  ;;  %v1377_v30 = vshrl.u32 %v1325_v18, 16  ;;  %v5505_v31 = vor.u32 %v342_v43, %v5416_v39  ;;  %v673_v18 = vld [vmem:[#allocation2 + $0x38] sm:$0x1] }
  0x6a   : > { %v335_v48 = vor.u32 %v333_v2, %v5291_v27  ;;  %v5539_v39 = vor.u32 %v359_v3, %v5486_v16 }
  0x6b   : > { %v5462_v58 = vrot.slane %v364_v45, 7 }
  0x6c   : > { %v336_v3 = vsel %vm5184_vm2, %v328_v7, %v335_v48 }
  0x6d   : > { %v371_v19 = vrot.slane %v5462_v58, 4  ;;  %649 = vst.msk [vmem:[#allocation2 + $0x10] sm:$0xf] %vm642_vm7, %v336_v3 }
  0x6f   : > { %1132 = vrot.lane.b32.xlu1 %v994_v52, %s5122_s21  ;;  %1130 = vrot.lane.b32.xlu0 %v985_v46, %s5122_s21  ;;  %v1045_v46 = vsel %vm5184_vm2, %v1037_v36, %v1044_v37  ;;  %v5450_v52 = vld [vmem:[%s5251_s24 + $0x1c] sm:$0xf]  ;;  %v1357_v36 = vld [vmem:[#allocation2 + $0x8] sm:$0x1]  ;;  %v1063_v37 = vrot.slane %v5467_v61, 4 }
  0x70   : > { %1134 = vrot.lane.b32.xlu2 %v995_v60, %s5122_s21  ;;  %v1050_v60 = vrot.slane %v1048_v53, 7  ;;  %v1396_v44 = vshll.u32 %v1357_v36, 16  ;;  %v656_v53 = vsel %vm5358_vm10, %v5505_v31, %v5496_v23 }
  0x71   : > { %657 = vst [vmem:[#allocation2 + $0x18] sm:$0xf] %v656_v53  ;;  %v680_v53 = vld [vmem:[#allocation2 + $0x44] sm:$0x1] }
  0x72   : > { %v1075_v11 = vpop.permute.xlu2 %1074  ;;  %v1054_v13 = vrot.slane %v1050_v60, 4 }
  0x73   : > { %v1225_v15 = vsel %vm5370_vm11, %v1075_v11, %v1224_v4  ;;  %v381_v4 = vshrl.u32 %v5450_v52, 16 }
  0x74   : > { %1226 = vst [vmem:[#allocation2 + $0x20] sm:$0x1] %v1225_v15  ;;  %v1061_v15 = vor.u32 %v1059_v62, %v5467_v61  ;;  %v1398_v62 = vrot.slane %v1396_v44, 5  ;;  %v415_v44 = vshrl.u32 %v5585_v32, 16 }
  0x76   : > { %v1062_v21 = vsel %vm5184_vm2, %v1054_v13, %v1061_v15 }
  0x77   : > { %1138 = vrot.lane.b32.xlu1 %v1011_v8, %s5122_s21  ;;  %1136 = vrot.lane.b32.xlu0 %v1002_v1, %s5122_s21  ;;  %v1051_v8 = vshll.u32 %v790_v14, 16 }
  0x78   : > { %1140 = vrot.lane.b32.xlu2 %v1012_v20, %s5122_s21  ;;  %v367_v20 = vshll.u32 %v5419_v40, 16  ;;  %v1379_v40 = vrot.slane %v1377_v30, 4 }
  0x79   : > { %v1053_v17 = vor.u32 %v1051_v8, %v1050_v60  ;;  %v5549_v8 = vld [vmem:[%s5251_s24 + $0x20] sm:$0xf] }
  0x7a   : > { %v5414_v38 = vpop.permute.xlu2 %1072  ;;  %v369_v63 = vor.u32 %v367_v20, %v5462_v58  ;;  %v384_v58 = vshll.u32 %v5450_v52, 16  ;;  %v390_v7 = vshrl.u32 %v5549_v8, 16  ;;  %v663_v52 = vsel %vm5358_vm10, %v5539_v39, %v5533_v54 }
  0x7b   : > { %1223 = vst.msk [vmem:[#allocation2 + $0x1c] sm:$0xf] %vm1208_vm12, %v5414_v38 }
  0x7c   : > { %664 = vst [vmem:[#allocation2 + $0x24] sm:$0xf] %v663_v52 }
  0x7f   : > { %1144 = vrot.lane.b32.xlu1 %v1028_v26, %s5122_s21  ;;  %1142 = vrot.lane.b32.xlu0 %v1019_v28, %s5122_s21  ;;  %v362_v26 = vrot.slane %v5486_v16, 4  ;;  %v5499_v28 = vrot.slane %v381_v4, 7 }
  0x80   : > { %1146 = vrot.lane.b32.xlu2 %v1029_v34, %s5122_s21  ;;  %v1326_v34 = vld [vmem:[#allocation2 + $0x4] sm:$0xf] }
  0x81   : > { %v1390_v43 = vshrl.u32 %v1326_v34, 16  ;;  %v388_v27 = vrot.slane %v5499_v28, 4  ;;  %v370_v23 = vsel %vm5184_vm2, %v362_v26, %v369_v63  ;;  %v378_v26 = vor.u32 %v376_v29, %v5492_v22 }
  0x82   : > { %v5481_v12 = vpop.permute.xlu2 %1080  ;;  %665 = vst.msk [vmem:[#allocation2 + $0x28] sm:$0xf] %vm642_vm7, %v370_v23  ;;  %v1330_v39 = vld [vmem:[#allocation2 + $0x1c] sm:$0xf] }
  0x83   : > { %v674_v48 = vsel %vm5302_vm5, %v388_v27, %v673_v18 }
  0x84   : > { %675 = vst [vmem:[#allocation2 + $0x38] sm:$0x1] %v674_v48 }
  0x87   : > { %1150 = vrot.lane.b32.xlu1 %v1045_v46, %s5122_s21  ;;  %1148 = vrot.lane.b32.xlu0 %v1036_v42, %s5122_s21  ;;  %v1386_v42 = vshll.u32 %v1326_v34, 16 }
  0x88   : > { %1152 = vrot.lane.b32.xlu2 %v1046_v59, %s5122_s21  ;;  %v1359_v59 = vld [vmem:[#allocation2 + $0x20] sm:$0x1] }
  0x89   : > { %v1069_v0 = vpop.permute.xlu1 %1068  ;;  %v1065_v1 = vpop.permute.xlu0 %1064  ;;  %v1388_v14 = vrot.slane %v1386_v42, 5  ;;  %v5593_v42 = vld [vmem:[%s5251_s24 + $0x28] sm:$0xf] }
  0x8a   : > { %v1218_v9 = vsel %vm5370_vm11, %v1069_v0, %v1217_v50  ;;  %v1211_v11 = vsel %vm5456_vm13, %v1065_v1, %v1210_v57  ;;  %v1382_v50 = vrot.slane %v1380_v41, 5  ;;  %v1392_v57 = vrot.slane %v1390_v43, 4  ;;  %v5546_v0 = vpop.permute.xlu2 %1086 }
  0x8b   : > { %1219 = vst [vmem:[#allocation2 + $0x14] sm:$0x1] %v1218_v9  ;;  %v667_v9 = vsel %vm5302_vm5, %v371_v19, %v666_v25  ;;  %v5574_v19 = vrot.slane %v398_v47, 7  ;;  %v392_v25 = vrot.slane %v390_v7, 7  ;;  %v401_v43 = vshll.u32 %v5509_v33, 16 }
  0x8c   : > { %1212 = vst [vmem:[#allocation2 + $0xc] sm:$0xf] %v1211_v11  ;;  %v1383_v61 = vor.u32 %v1382_v50, %v1379_v40  ;;  %v1393_v4 = vor.u32 %v1392_v57, %v1388_v14  ;;  %v386_v40 = vor.u32 %v384_v58, %v5499_v28  ;;  %v669_v28 = vld [vmem:[#allocation2 + $0x30] sm:$0xf]  ;;  %v407_v33 = vshrl.u32 %v5593_v42, 16 }
  0x8d   : > { %668 = vst [vmem:[#allocation2 + $0x2c] sm:$0x1] %v667_v9  ;;  %v405_v50 = vrot.slane %v5574_v19, 4  ;;  %v396_v29 = vrot.slane %v392_v25, 4  ;;  %v410_v27 = vshll.u32 %v5593_v42, 16  ;;  %v403_v47 = vor.u32 %v401_v43, %v5574_v19 }
  0x8e   : > { %v1384_v13 = vrot.slane %v1383_v61, 4  ;;  %v5619_v57 = vld [vmem:[%s5251_s24 + $0x34] sm:$0xf]  ;;  %v670_v63 = vsel %vm5358_vm10, %v378_v26, %v669_v28  ;;  %v409_v3 = vrot.slane %v407_v33, 7  ;;  %v418_v9 = vshll.u32 %v5585_v32, 16 }
  0x8f   : > { %1156 = vrot.lane.b32.xlu1 %v1062_v21, %s5122_s21  ;;  %1154 = vrot.lane.b32.xlu0 %v1053_v17, %s5122_s21  ;;  %v1394_v17 = vrot.slane %v1393_v4, 4  ;;  %v1444_v21 = vshll.u32 %v1359_v59, 16  ;;  %v432_v61 = vshrl.u32 %v5619_v57, 16  ;;  %671 = vst [vmem:[#allocation2 + $0x30] sm:$0xf] %v670_v63 }
  0x90   : > { %1158 = vrot.lane.b32.xlu2 %v1063_v37, %s5122_s21  ;;  %v1389_v20 = vsel %vm5563_vm0, %v1384_v13, %v1388_v14  ;;  %v379_v37 = vrot.slane %v5492_v22, 4  ;;  %v393_v22 = vshll.u32 %v5549_v8, 16  ;;  %v676_v8 = vld [vmem:[#allocation2 + $0x3c] sm:$0xf]  ;;  %v5651_v32 = vld [vmem:[%s5251_s24 + $0x30] sm:$0xf] }
  0x91   : > { %v5520_v45 = vpop.permute.xlu1 %1070  ;;  %v1067_v46 = vpop.permute.xlu0 %1066  ;;  %v1399_v30 = vsel %vm5563_vm0, %v1394_v17, %v1398_v62  ;;  %v3220_v31 = vunpack.c.l.b16 %v1389_v20  ;;  %v5604_v51 = vrot.slane %v1444_v21, 5  ;;  %v1220_v62 = vld [vmem:[#allocation2 + $0x18] sm:$0xf]  ;;  %v5634_v58 = vrot.slane %v432_v61, 7  ;;  %v1227_v42 = vld [vmem:[#allocation2 + $0x24] sm:$0xf] }
  0x92   : > { %v1358_v11 = vld [vmem:[#allocation2 + $0x14] sm:$0x1]  ;;  %v3221_v41 = vunpack.c.l.b16 %v1399_v30  ;;  %1214 = vst.msk [vmem:[#allocation2 + $0x10] sm:$0xf] %vm1208_vm12, %v1067_v46  ;;  %v387_v46 = vsel %vm5184_vm2, %v379_v37, %v386_v40  ;;  %v5621_v59 = vpop.permute.xlu2 %1092  ;;  %v1221_v4 = vsel %vm5456_vm13, %v5520_v45, %v1220_v62  ;;  %v395_v7 = vor.u32 %v393_v22, %v392_v25  ;;  %v1238_v48 = vld [vmem:[#allocation2 + $0x38] sm:$0x1] }
  0x93   : > { %v1327_v60 = vld [vmem:[#allocation2 + $0xc] sm:$0xf]  ;;  %v1420_v38 = vshll.u32 %v1358_v11, 16  ;;  %672 = vst.msk [vmem:[#allocation2 + $0x34] sm:$0xf] %vm642_vm7, %v387_v46  ;;  %v681_v45 = vsel %vm5302_vm5, %v405_v50, %v680_v53  ;;  %v404_v20 = vsel %vm5184_vm2, %v396_v29, %v403_v47  ;;  %v412_v25 = vor.u32 %v410_v27, %v409_v3 }
  0x94   : > { %v1401_v1 = vshrl.u32 %v1327_v60, 16  ;;  %v1404_v2 = vshll.u32 %v1327_v60, 16  ;;  %v3252_v14 = vpack.c.b16 %v3221_v41, %v3220_v31  ;;  %v5624_v60 = vrot.slane %v415_v44, 7  ;;  %1222 = vst [vmem:[#allocation2 + $0x18] sm:$0xf] %v1221_v4 }
  0x95   : > { %v5607_v49 = vrot.slane %v1420_v38, 5  ;;  %v1231_v52 = vld [vmem:[#allocation2 + $0x2c] sm:$0x1]  ;;  %v687_v38 = vld [vmem:[#allocation2 + $0x50] sm:$0x1]  ;;  %v413_v31 = vrot.slane %v409_v3, 4  ;;  %v1239_v22 = vsel %vm5370_vm11, %v5546_v0, %v1238_v48 }
  0x96   : > { %v1403_v5 = vrot.slane %v1401_v1, 4  ;;  %v1406_v55 = vrot.slane %v1404_v2, 5  ;;  %v1434_v1 = vshll.u32 %v1330_v39, 16  ;;  %v1438_v2 = vshrl.u32 %v1330_v39, 16  ;;  %v5654_v41 = vld [vmem:[#allocation2 + $0x48] sm:$0xf] }
  0x97   : > { %3268 = vrot.lane.b32.xlu0 %v3252_v14, %s5124_s25  ;;  %v1232_v21 = vsel %vm5370_vm11, %v5481_v12, %v1231_v52  ;;  %v422_v30 = vrot.slane %v5624_v60, 4  ;;  %682 = vst [vmem:[#allocation2 + $0x44] sm:$0x1] %v681_v45  ;;  %v677_v12 = vsel %vm5358_vm10, %v395_v7, %v676_v8  ;;  %v439_v43 = vrot.slane %v5634_v58, 4  ;;  %v694_v46 = vld [vmem:[#allocation2 + $0x5c] sm:$0x1] }
  0x98   : > { %v1407_v16 = vor.u32 %v1406_v55, %v1403_v5  ;;  %v5638_v55 = vrot.slane %v1434_v1, 5  ;;  %v1440_v17 = vrot.slane %v1438_v2, 4  ;;  %1233 = vst [vmem:[#allocation2 + $0x2c] sm:$0x1] %v1232_v21  ;;  %v684_v2 = vsel %vm5358_vm10, %v412_v25, %v5654_v41  ;;  %v1234_v8 = vld [vmem:[#allocation2 + $0x30] sm:$0xf] }
  0x99   : > { %v1079_v34 = vpop.permute.xlu1 %1078  ;;  %v5588_v36 = vpop.permute.xlu0 %1076  ;;  %v1328_v5 = vld [vmem:[#allocation2 + $0x10] sm:$0xf]  ;;  %679 = vst.msk [vmem:[#allocation2 + $0x40] sm:$0xf] %vm642_vm7, %v404_v20 }
  0x9a   : > { %1230 = vst.msk [vmem:[#allocation2 + $0x28] sm:$0xf] %vm1208_vm12, %v1079_v34  ;;  %v5614_v54 = vrot.slane %v1407_v16, 4  ;;  %v1410_v18 = vshll.u32 %v1328_v5, 16  ;;  %v1414_v19 = vshrl.u32 %v1328_v5, 16  ;;  %v1441_v23 = vor.u32 %v1440_v17, %v5638_v55  ;;  %v5672_v39 = vpop.permute.xlu2 %1098 }
  0x9b   : > { %v420_v16 = vor.u32 %v418_v9, %v5624_v60  ;;  %v1228_v44 = vsel %vm5456_vm13, %v5588_v36, %v1227_v42  ;;  %v424_v36 = vshrl.u32 %v5651_v32, 16  ;;  %1240 = vst [vmem:[#allocation2 + $0x38] sm:$0x1] %v1239_v22  ;;  %v1329_v27 = vld [vmem:[#allocation2 + $0x18] sm:$0xf] }
  0x9c   : > { %v1412_v34 = vrot.slane %v1410_v18, 5  ;;  %v1416_v37 = vrot.slane %v1414_v19, 4  ;;  %1229 = vst [vmem:[#allocation2 + $0x24] sm:$0xf] %v1228_v44  ;;  %v1442_v29 = vrot.slane %v1441_v23, 4  ;;  %v1425_v0 = vshrl.u32 %v1329_v27, 16 }
  0x9d   : > { %v421_v60 = vsel %vm5184_vm2, %v413_v31, %v420_v16  ;;  %v1428_v62 = vshll.u32 %v1329_v27, 16  ;;  %678 = vst [vmem:[#allocation2 + $0x3c] sm:$0xf] %v677_v12  ;;  %v695_v23 = vsel %vm5302_vm5, %v439_v43, %v694_v46  ;;  %v426_v25 = vrot.slane %v424_v36, 7  ;;  %v5705_v43 = vld [vmem:[%s5251_s24 + $0x3c] sm:$0xf] }
  0x9e   : > { %v1413_v28 = vsel %vm5563_vm0, %v5614_v54, %v1412_v34  ;;  %v1417_v50 = vor.u32 %v1416_v37, %v1412_v34  ;;  %v688_v54 = vsel %vm5302_vm5, %v422_v30, %v687_v38  ;;  %v1427_v52 = vrot.slane %v1425_v0, 4  ;;  %v1245_v19 = vld [vmem:[#allocation2 + $0x44] sm:$0x1]  ;;  %686 = vst.msk [vmem:[#allocation2 + $0x4c] sm:$0xf] %vm642_vm7, %v421_v60 }
  0x9f   : > { %v3222_v61 = vunpack.c.l.b16 %v1413_v28  ;;  %v1430_v45 = vrot.slane %v1428_v62, 5  ;;  %689 = vst [vmem:[#allocation2 + $0x50] sm:$0x1] %v688_v54  ;;  %v1360_v18 = vld [vmem:[#allocation2 + $0x2c] sm:$0x1]  ;;  %v427_v62 = vshll.u32 %v5651_v32, 16 }
  0xa0   : > { %v1418_v53 = vrot.slane %v1417_v50, 4  ;;  %v1468_v21 = vshll.u32 %v1360_v18, 16  ;;  %685 = vst [vmem:[#allocation2 + $0x48] sm:$0xf] %v684_v2 }
  0xa1   : > { %v1085_v11 = vpop.permute.xlu1 %1084  ;;  %v5636_v13 = vpop.permute.xlu0 %1082  ;;  %v1332_v40 = vld [vmem:[#allocation2 + $0x28] sm:$0xf]  ;;  %v1431_v30 = vor.u32 %v1430_v45, %v1427_v52  ;;  %696 = vst [vmem:[#allocation2 + $0x5c] sm:$0x1] %v695_v23 }
  0xa2   : > { %1237 = vst.msk [vmem:[#allocation2 + $0x34] sm:$0xf] %vm1208_vm12, %v1085_v11  ;;  %v1458_v26 = vshll.u32 %v1332_v40, 16  ;;  %v1462_v14 = vshrl.u32 %v1332_v40, 16  ;;  %v1423_v3 = vsel %vm5563_vm0, %v1418_v53, %v5607_v49  ;;  %v1235_v17 = vsel %vm5456_vm13, %v5636_v13, %v1234_v8  ;;  %v1105_v54 = vpop.permute.xlu2 %1104 }
  0xa3   : > { %v3223_v7 = vunpack.c.l.b16 %v1423_v3  ;;  %1236 = vst [vmem:[#allocation2 + $0x30] sm:$0xf] %v1235_v17  ;;  %v1447_v49 = vsel %vm5563_vm0, %v1442_v29, %v5604_v51  ;;  %v1246_v13 = vsel %vm5370_vm11, %v5621_v59, %v1245_v19  ;;  %v1331_v34 = vld [vmem:[#allocation2 + $0x24] sm:$0xf]  ;;  %v1470_v37 = vrot.slane %v1468_v21, 5 }
  0xa4   : > { %v5669_v33 = vrot.slane %v1458_v26, 5  ;;  %v1464_v47 = vrot.slane %v1462_v14, 4  ;;  %1247 = vst [vmem:[#allocation2 + $0x44] sm:$0x1] %v1246_v13  ;;  %v1432_v40 = vrot.slane %v1431_v30, 4  ;;  %v1449_v16 = vshrl.u32 %v1331_v34, 16 }
  0xa5   : > { %v3253_v38 = vpack.c.b16 %v3223_v7, %v3222_v61  ;;  %v1452_v41 = vshll.u32 %v1331_v34, 16  ;;  %v3225_v42 = vunpack.c.l.b16 %v1447_v49  ;;  %v1241_v12 = vld [vmem:[#allocation2 + $0x3c] sm:$0xf]  ;;  %v1361_v29 = vld [vmem:[#allocation2 + $0x38] sm:$0x1]  ;;  %v449_v17 = vshrl.u32 %v5705_v43, 16 }
  0xa6   : > { %v1465_v9 = vor.u32 %v1464_v47, %v5669_v33  ;;  %v1437_v44 = vsel %vm5563_vm0, %v1432_v40, %v5638_v55  ;;  %v1451_v28 = vrot.slane %v1449_v16, 4  ;;  %v1252_v27 = vld [vmem:[#allocation2 + $0x50] sm:$0x1]  ;;  %v1492_v60 = vshll.u32 %v1361_v29, 16  ;;  %v300_v34 = vld [vmem:[%s5251_s24 + $0x38] sm:$0xf] }
  0xa7   : > { %3270 = vrot.lane.b32.xlu1 %v3253_v38, %s5124_s25  ;;  %v1454_v50 = vrot.slane %v1452_v41, 5  ;;  %v3224_v53 = vunpack.c.l.b16 %v1437_v44  ;;  %v1253_v55 = vsel %vm5370_vm11, %v5672_v39, %v1252_v27  ;;  %v1248_v39 = vld [vmem:[#allocation2 + $0x48] sm:$0xf]  ;;  %v451_v40 = vrot.slane %v449_v17, 7 }
  0xa8   : > { %v1466_v20 = vrot.slane %v1465_v9, 4  ;;  %1254 = vst [vmem:[#allocation2 + $0x50] sm:$0x1] %v1253_v55  ;;  %v1494_v8 = vrot.slane %v1492_v60, 5  ;;  %v429_v9 = vor.u32 %v427_v62, %v426_v25  ;;  %v1259_v19 = vld [vmem:[#allocation2 + $0x5c] sm:$0x1] }
  0xa9   : > { %v1091_v63 = vpop.permute.xlu1 %1090  ;;  %v1089_v1 = vpop.permute.xlu0 %1088  ;;  %v1334_v4 = vld [vmem:[#allocation2 + $0x34] sm:$0xf]  ;;  %v1455_v61 = vor.u32 %v1454_v50, %v1451_v28  ;;  %v1260_v21 = vsel %vm5370_vm11, %v1105_v54, %v1259_v19  ;;  %v701_v38 = vld [vmem:[#allocation2 + $0x68] sm:$0x1]  ;;  %v456_v44 = vrot.slane %v451_v40, 4  ;;  %v441_v50 = vshrl.u32 %v300_v34, 16 }
  0xaa   : > { %1244 = vst.msk [vmem:[#allocation2 + $0x40] sm:$0xf] %vm1208_vm12, %v1091_v63  ;;  %v1482_v11 = vshll.u32 %v1334_v4, 16  ;;  %v1486_v5 = vshrl.u32 %v1334_v4, 16  ;;  %v1471_v59 = vsel %vm5563_vm0, %v1466_v20, %v1470_v37  ;;  %v1242_v48 = vsel %vm5456_vm13, %v1089_v1, %v1241_v12  ;;  %v1333_v0 = vld [vmem:[#allocation2 + $0x30] sm:$0xf] }
  0xab   : > { %1243 = vst [vmem:[#allocation2 + $0x3c] sm:$0xf] %v1242_v48  ;;  %v3227_v36 = vunpack.c.l.b16 %v1471_v59  ;;  %v430_v63 = vrot.slane %v426_v25, 4  ;;  %v3254_v1 = vpack.c.b16 %v3225_v42, %v3224_v53  ;;  %v1473_v2 = vshrl.u32 %v1333_v0, 16  ;;  %v1362_v30 = vld [vmem:[#allocation2 + $0x44] sm:$0x1] }
  0xac   : > { %v5698_v31 = vrot.slane %v1482_v11, 5  ;;  %v1488_v51 = vrot.slane %v1486_v5, 4  ;;  %v1476_v4 = vshll.u32 %v1333_v0, 16  ;;  %v1456_v3 = vrot.slane %v1455_v61, 4  ;;  %v690_v5 = vld [vmem:[#allocation2 + $0x54] sm:$0xf] }
  0xad   : > { %v435_v11 = vshll.u32 %v5619_v57, 16  ;;  %3272 = vrot.lane.b32.xlu2 %v3254_v1, %s5124_s25  ;;  %v1475_v7 = vrot.slane %v1473_v2, 4  ;;  %1261 = vst [vmem:[#allocation2 + $0x5c] sm:$0x1] %v1260_v21  ;;  %v5741_v42 = vld [vmem:[%s5251_s24 + $0x44] sm:$0xf]  ;;  %v702_v54 = vsel %vm5302_vm5, %v456_v44, %v701_v38 }
  0xae   : > { %v1489_v26 = vor.u32 %v1488_v51, %v5698_v31  ;;  %v1478_v52 = vrot.slane %v1476_v4, 5  ;;  %v1461_v18 = vsel %vm5563_vm0, %v1456_v3, %v5669_v33  ;;  %v1516_v28 = vshll.u32 %v1362_v30, 16  ;;  %703 = vst [vmem:[#allocation2 + $0x68] sm:$0x1] %v702_v54  ;;  %v697_v1 = vld [vmem:[#allocation2 + $0x60] sm:$0xf] }
  0xaf   : > { %v437_v49 = vor.u32 %v435_v11, %v5634_v58  ;;  %v3226_v20 = vunpack.c.l.b16 %v1461_v18  ;;  %v691_v58 = vsel %vm5358_vm10, %v429_v9, %v690_v5  ;;  %v444_v27 = vshll.u32 %v300_v34, 16  ;;  %v302_v21 = vld [vmem:[%s5251_s24 + $0x40] sm:$0xf] }
  0xb0   : > { %v1490_v47 = vrot.slane %v1489_v26, 4  ;;  %v1479_v23 = vor.u32 %v1478_v52, %v1475_v7  ;;  %692 = vst [vmem:[#allocation2 + $0x54] sm:$0xf] %v691_v58  ;;  %v443_v61 = vrot.slane %v441_v50, 7  ;;  %v452_v0 = vshll.u32 %v5705_v43, 16 }
  0xb1   : > { %v1097_v14 = vpop.permute.xlu1 %1096  ;;  %v1095_v22 = vpop.permute.xlu0 %1094  ;;  %v5712_v46 = vld [vmem:[#allocation2 + $0x40] sm:$0xf]  ;;  %v438_v33 = vsel %vm5184_vm2, %v430_v63, %v437_v49  ;;  %v3255_v12 = vpack.c.b16 %v3227_v36, %v3226_v20  ;;  %v708_v43 = vld [vmem:[#allocation2 + $0x74] sm:$0x1]  ;;  %v1363_v49 = vld [vmem:[#allocation2 + $0x50] sm:$0x1] }
  0xb2   : > { %1251 = vst.msk [vmem:[#allocation2 + $0x4c] sm:$0xf] %vm1208_vm12, %v1097_v14  ;;  %v1495_v32 = vsel %vm5563_vm0, %v1490_v47, %v1494_v8  ;;  %v1506_v45 = vshll.u32 %v5712_v46, 16  ;;  %v1249_v57 = vsel %vm5456_vm13, %v1095_v22, %v1248_v39  ;;  %v1335_v16 = vld [vmem:[#allocation2 + $0x3c] sm:$0xf]  ;;  %v1480_v59 = vrot.slane %v1479_v23, 4  ;;  %v5750_v22 = vpop.permute.xlu2 %1110 }
  0xb3   : > { %1250 = vst [vmem:[#allocation2 + $0x48] sm:$0xf] %v1249_v57  ;;  %v3229_v13 = vunpack.c.l.b16 %v1495_v32  ;;  %v1497_v26 = vshrl.u32 %v1335_v16, 16  ;;  %v1500_v25 = vshll.u32 %v1335_v16, 16  ;;  %v1510_v48 = vshrl.u32 %v5712_v46, 16  ;;  %3274 = vrot.lane.b32.xlu0 %v3255_v12, %s5124_s25 }
  0xb4   : > { %v1508_v41 = vrot.slane %v1506_v45, 5  ;;  %693 = vst.msk [vmem:[#allocation2 + $0x58] sm:$0xf] %vm642_vm7, %v438_v33  ;;  %v1485_v14 = vsel %vm5563_vm0, %v1480_v59, %v5698_v31  ;;  %v1518_v46 = vrot.slane %v1516_v28, 5  ;;  %v466_v31 = vshrl.u32 %v5741_v42, 16 }
  0xb5   : > { %v1499_v29 = vrot.slane %v1497_v26, 4  ;;  %v1502_v53 = vrot.slane %v1500_v25, 5  ;;  %v3228_v36 = vunpack.c.l.b16 %v1485_v14  ;;  %v1512_v47 = vrot.slane %v1510_v48, 4  ;;  %v1266_v12 = vld [vmem:[#allocation2 + $0x68] sm:$0x1] }
  0xb6   : > { %v446_v9 = vor.u32 %v444_v27, %v443_v61  ;;  %v447_v11 = vrot.slane %v443_v61, 4  ;;  %v454_v5 = vor.u32 %v452_v0, %v451_v40  ;;  %v468_v52 = vrot.slane %v466_v31, 7  ;;  %v704_v14 = vld [vmem:[#allocation2 + $0x6c] sm:$0xf] }
  0xb7   : > { %v1503_v55 = vor.u32 %v1502_v53, %v1499_v29  ;;  %v3256_v62 = vpack.c.b16 %v3229_v13, %v3228_v36  ;;  %v1513_v63 = vor.u32 %v1512_v47, %v1508_v41  ;;  %v1255_v23 = vld [vmem:[#allocation2 + $0x54] sm:$0xf]  ;;  %v1540_v26 = vshll.u32 %v1363_v49, 16 }
  0xb8   : > { %v455_v57 = vsel %vm5184_vm2, %v447_v11, %v454_v5  ;;  %v698_v19 = vsel %vm5358_vm10, %v446_v9, %v697_v1  ;;  %v473_v30 = vrot.slane %v468_v52, 4  ;;  %v458_v25 = vshrl.u32 %v302_v21, 16  ;;  %v715_v11 = vld [vmem:[#allocation2 + $0x80] sm:$0x1]  ;;  %v5796_v5 = vld [vmem:[#allocation2 + $0x5c] sm:$0x1] }
  0xb9   : > { %v1103_v37 = vpop.permute.xlu1 %1102  ;;  %v5736_v51 = vpop.permute.xlu0 %1100  ;;  %v1338_v60 = vld [vmem:[#allocation2 + $0x4c] sm:$0xf]  ;;  %v1504_v3 = vrot.slane %v1503_v55, 4  ;;  %3276 = vrot.lane.b32.xlu1 %v3256_v62, %s5124_s25  ;;  %v1514_v17 = vrot.slane %v1513_v63, 4  ;;  %700 = vst.msk [vmem:[#allocation2 + $0x64] sm:$0xf] %vm642_vm7, %v455_v57  ;;  %v1267_v44 = vsel %vm5370_vm11, %v5750_v22, %v1266_v12 }
  0xba   : > { %1258 = vst.msk [vmem:[#allocation2 + $0x58] sm:$0xf] %vm1208_vm12, %v1103_v37  ;;  %v1337_v2 = vld [vmem:[#allocation2 + $0x48] sm:$0xf]  ;;  %v1530_v4 = vshll.u32 %v1338_v60, 16  ;;  %v1534_v8 = vshrl.u32 %v1338_v60, 16  ;;  %v1256_v33 = vsel %vm5456_vm13, %v5736_v51, %v1255_v23  ;;  %v709_v59 = vsel %vm5302_vm5, %v473_v30, %v708_v43  ;;  %v1117_v51 = vpop.permute.xlu2 %1116 }
  0xbb   : > { %v1521_v32 = vshrl.u32 %v1337_v2, 16  ;;  %v1524_v45 = vshll.u32 %v1337_v2, 16  ;;  %v1509_v18 = vsel %vm5563_vm0, %v1504_v3, %v1508_v41  ;;  %v1519_v13 = vsel %vm5563_vm0, %v1514_v17, %v1518_v46  ;;  %v5770_v37 = vld [vmem:[%s5251_s24 + $0x4c] sm:$0xf]  ;;  %1257 = vst [vmem:[#allocation2 + $0x54] sm:$0xf] %v1256_v33 }
  0xbc   : > { %v1532_v20 = vrot.slane %v1530_v4, 5  ;;  %v3230_v38 = vunpack.c.l.b16 %v1509_v18  ;;  %v3231_v58 = vunpack.c.l.b16 %v1519_v13  ;;  %v1536_v16 = vrot.slane %v1534_v8, 4  ;;  %699 = vst [vmem:[#allocation2 + $0x60] sm:$0xf] %v698_v19  ;;  %v304_v17 = vld [vmem:[%s5251_s24 + $0x48] sm:$0xf] }
  0xbd   : > { %v1523_v34 = vrot.slane %v1521_v32, 4  ;;  %v1526_v40 = vrot.slane %v1524_v45, 5  ;;  %1268 = vst [vmem:[#allocation2 + $0x68] sm:$0x1] %v1267_v44  ;;  %v1542_v29 = vrot.slane %v1540_v26, 5  ;;  %v460_v53 = vrot.slane %v458_v25, 7 }
  0xbe   : > { %v3257_v48 = vpack.c.b16 %v3231_v58, %v3230_v38  ;;  %v1537_v50 = vor.u32 %v1536_v16, %v1532_v20  ;;  %v461_v27 = vshll.u32 %v302_v21, 16  ;;  %v469_v36 = vshll.u32 %v5741_v42, 16  ;;  %710 = vst [vmem:[#allocation2 + $0x74] sm:$0x1] %v709_v59  ;;  %v5801_v32 = vld [vmem:[%s5251_s24 + $0x54] sm:$0xf] }
  0xbf   : > { %v1527_v28 = vor.u32 %v1526_v40, %v1523_v34  ;;  %v483_v46 = vshrl.u32 %v5770_v37, 16  ;;  %v464_v61 = vrot.slane %v460_v53, 4  ;;  %v1564_v23 = vshll.u32 %v5796_v5, 16 }
  0xc0   : > { %3278 = vrot.lane.b32.xlu2 %v3257_v48, %s5124_s25  ;;  %v1538_v47 = vrot.slane %v1537_v50, 4  ;;  %v463_v55 = vor.u32 %v461_v27, %v460_v53  ;;  %v471_v0 = vor.u32 %v469_v36, %v468_v52  ;;  %v475_v16 = vshrl.u32 %v304_v17, 16  ;;  %v306_v50 = vld [vmem:[%s5251_s24 + $0x50] sm:$0xf]  ;;  %v711_v27 = vld [vmem:[#allocation2 + $0x78] sm:$0xf] }
  0xc1   : > { %v1109_v39 = vpop.permute.xlu1 %1108  ;;  %v5757_v7 = vpop.permute.xlu0 %1106  ;;  %v1340_v41 = vld [vmem:[#allocation2 + $0x58] sm:$0xf]  ;;  %v1528_v54 = vrot.slane %v1527_v28, 4  ;;  %v485_v1 = vrot.slane %v483_v46, 7  ;;  %v1566_v40 = vrot.slane %v1564_v23, 5  ;;  %v478_v59 = vshll.u32 %v304_v17, 16 }
  0xc2   : > { %1265 = vst.msk [vmem:[#allocation2 + $0x64] sm:$0xf] %vm1208_vm12, %v1109_v39  ;;  %v1554_v22 = vshll.u32 %v1340_v41, 16  ;;  %v1558_v62 = vshrl.u32 %v1340_v41, 16  ;;  %v1543_v63 = vsel %vm5563_vm0, %v1538_v47, %v1542_v29  ;;  %v472_v3 = vsel %vm5184_vm2, %v464_v61, %v471_v0  ;;  %v1339_v43 = vld [vmem:[#allocation2 + $0x54] sm:$0xf] }
  0xc3   : > { %v1533_v42 = vsel %vm5563_vm0, %v1528_v54, %v1532_v20  ;;  %v3233_v8 = vunpack.c.l.b16 %v1543_v63  ;;  %v705_v9 = vsel %vm5358_vm10, %v463_v55, %v704_v14  ;;  %707 = vst.msk [vmem:[#allocation2 + $0x70] sm:$0xf] %vm642_vm7, %v472_v3  ;;  %v490_v39 = vrot.slane %v485_v1, 4  ;;  %v1262_v45 = vld [vmem:[#allocation2 + $0x60] sm:$0xf] }
  0xc4   : > { %v5790_v2 = vrot.slane %v1554_v22, 5  ;;  %v3232_v4 = vunpack.c.l.b16 %v1533_v42  ;;  %v1560_v52 = vrot.slane %v1558_v62, 4  ;;  %v1545_v57 = vshrl.u32 %v1339_v43, 16  ;;  %706 = vst [vmem:[#allocation2 + $0x6c] sm:$0xf] %v705_v9 }
  0xc5   : > { %v1548_v19 = vshll.u32 %v1339_v43, 16  ;;  %v1263_v49 = vsel %vm5456_vm13, %v5757_v7, %v1262_v45  ;;  %v716_v20 = vsel %vm5302_vm5, %v490_v39, %v715_v11  ;;  %v1273_v38 = vld [vmem:[#allocation2 + $0x74] sm:$0x1]  ;;  %v1123_v7 = vpop.permute.xlu2 %1122  ;;  %v486_v26 = vshll.u32 %v5770_v37, 16  ;;  %v722_v54 = vld [vmem:[#allocation2 + $0x8c] sm:$0x1] }
  0xc6   : > { %v3258_v18 = vpack.c.b16 %v3233_v8, %v3232_v4  ;;  %v1561_v21 = vor.u32 %v1560_v52, %v5790_v2  ;;  %1264 = vst [vmem:[#allocation2 + $0x60] sm:$0xf] %v1263_v49  ;;  %v1547_v30 = vrot.slane %v1545_v57, 4  ;;  %v1274_v33 = vsel %vm5370_vm11, %v1117_v51, %v1273_v38  ;;  %v5825_v22 = vld [vmem:[#allocation2 + $0x68] sm:$0x1] }
  0xc7   : > { %v1550_v34 = vrot.slane %v1548_v19, 5  ;;  %717 = vst [vmem:[#allocation2 + $0x80] sm:$0x1] %v716_v20  ;;  %v500_v25 = vshrl.u32 %v5801_v32, 16  ;;  %v477_v48 = vrot.slane %v475_v16, 7  ;;  %v488_v53 = vor.u32 %v486_v26, %v485_v1 }
  0xc8   : > { %3280 = vrot.lane.b32.xlu0 %v3258_v18, %s5124_s25  ;;  %v1562_v58 = vrot.slane %v1561_v21, 4  ;;  %1275 = vst [vmem:[#allocation2 + $0x74] sm:$0x1] %v1274_v33  ;;  %v1588_v42 = vshll.u32 %v5825_v22, 16  ;;  %v492_v63 = vshrl.u32 %v306_v50, 16 }
  0xc9   : > { %v1115_v60 = vpop.permute.xlu1 %1114  ;;  %v5784_v31 = vpop.permute.xlu0 %1112  ;;  %v5811_v13 = vld [vmem:[#allocation2 + $0x64] sm:$0xf]  ;;  %v1551_v41 = vor.u32 %v1550_v34, %v1547_v30  ;;  %v502_v47 = vrot.slane %v500_v25, 7  ;;  %v480_v37 = vor.u32 %v478_v59, %v477_v48  ;;  %v481_v46 = vrot.slane %v477_v48, 4  ;;  %v5841_v11 = vld [vmem:[%s5251_s24 + $0x5c] sm:$0xf] }
  0xca   : > { %1272 = vst.msk [vmem:[#allocation2 + $0x70] sm:$0xf] %vm1208_vm12, %v1115_v60  ;;  %v1567_v44 = vsel %vm5563_vm0, %v1562_v58, %v1566_v40  ;;  %v1578_v51 = vshll.u32 %v5811_v13, 16  ;;  %v1582_v28 = vshrl.u32 %v5811_v13, 16  ;;  %v1590_v57 = vrot.slane %v1588_v42, 5 }
  0xcb   : > { %v1552_v14 = vrot.slane %v1551_v41, 4  ;;  %v3235_v29 = vunpack.c.l.b16 %v1567_v44  ;;  %v1269_v61 = vld [vmem:[#allocation2 + $0x6c] sm:$0xf]  ;;  %v507_v62 = vrot.slane %v502_v47, 4  ;;  %v489_v8 = vsel %vm5184_vm2, %v481_v46, %v488_v53  ;;  %v718_v49 = vld [vmem:[#allocation2 + $0x84] sm:$0xf] }
  0xcc   : > { %v5827_v60 = vrot.slane %v1578_v51, 5  ;;  %v1584_v55 = vrot.slane %v1582_v28, 4  ;;  %v1270_v1 = vsel %vm5456_vm13, %v5784_v31, %v1269_v61  ;;  %v712_v3 = vsel %vm5358_vm10, %v480_v37, %v711_v27  ;;  %714 = vst.msk [vmem:[#allocation2 + $0x7c] sm:$0xf] %vm642_vm7, %v489_v8  ;;  %v308_v25 = vld [vmem:[%s5251_s24 + $0x58] sm:$0xf] }
  0xcd   : > { %v1557_v0 = vsel %vm5563_vm0, %v1552_v14, %v5790_v2  ;;  %v1341_v9 = vld [vmem:[#allocation2 + $0x60] sm:$0xf]  ;;  %1271 = vst [vmem:[#allocation2 + $0x6c] sm:$0xf] %v1270_v1  ;;  %v723_v39 = vsel %vm5302_vm5, %v507_v62, %v722_v54  ;;  %v494_v19 = vrot.slane %v492_v63, 7  ;;  %v495_v30 = vshll.u32 %v306_v50, 16  ;;  %v5853_v34 = vpop.permute.xlu2 %1128 }
  0xce   : > { %v3234_v4 = vunpack.c.l.b16 %v1557_v0  ;;  %v1280_v2 = vld [vmem:[#allocation2 + $0x80] sm:$0x1]  ;;  %v1569_v43 = vshrl.u32 %v1341_v9, 16  ;;  %v1572_v52 = vshll.u32 %v1341_v9, 16  ;;  %v1585_v31 = vor.u32 %v1584_v55, %v5827_v60  ;;  %713 = vst [vmem:[#allocation2 + $0x78] sm:$0xf] %v712_v3 }
  0xcf   : > { %v1281_v45 = vsel %vm5370_vm11, %v1123_v7, %v1280_v2  ;;  %v498_v33 = vrot.slane %v494_v19, 4  ;;  %v503_v7 = vshll.u32 %v5801_v32, 16  ;;  %v517_v58 = vshrl.u32 %v5841_v11, 16  ;;  %724 = vst [vmem:[#allocation2 + $0x8c] sm:$0x1] %v723_v39 }
  0xd0   : > { %v3259_v18 = vpack.c.b16 %v3235_v29, %v3234_v4  ;;  %1282 = vst [vmem:[#allocation2 + $0x80] sm:$0x1] %v1281_v45  ;;  %v1571_v20 = vrot.slane %v1569_v43, 4  ;;  %v1574_v21 = vrot.slane %v1572_v52, 5  ;;  %v1586_v23 = vrot.slane %v1585_v31, 4 }
  0xd1   : > { %v1121_v12 = vpop.permute.xlu1 %1120  ;;  %v5823_v36 = vpop.permute.xlu0 %1118  ;;  %v5843_v17 = vld [vmem:[#allocation2 + $0x70] sm:$0xf]  ;;  %v497_v59 = vor.u32 %v495_v30, %v494_v19  ;;  %v519_v44 = vrot.slane %v517_v58, 7  ;;  %v5862_v48 = vld [vmem:[#allocation2 + $0x74] sm:$0x1]  ;;  %v509_v46 = vshrl.u32 %v308_v25, 16 }
  0xd2   : > { %3282 = vrot.lane.b32.xlu1 %v3259_v18, %s5124_s25  ;;  %1279 = vst.msk [vmem:[#allocation2 + $0x7c] sm:$0xf] %vm1208_vm12, %v1121_v12  ;;  %v1602_v40 = vshll.u32 %v5843_v17, 16  ;;  %v1575_v16 = vor.u32 %v1574_v21, %v1571_v20  ;;  %v1591_v41 = vsel %vm5563_vm0, %v1586_v23, %v1590_v57  ;;  %v1606_v26 = vshrl.u32 %v5843_v17, 16  ;;  %v729_v14 = vld [vmem:[#allocation2 + $0x98] sm:$0x1] }
  0xd3   : > { %v505_v12 = vor.u32 %v503_v7, %v502_v47  ;;  %v719_v50 = vsel %vm5358_vm10, %v497_v59, %v718_v49  ;;  %v1612_v53 = vshll.u32 %v5862_v48, 16  ;;  %v3237_v27 = vunpack.c.l.b16 %v1591_v41  ;;  %v5877_v42 = vld [vmem:[%s5251_s24 + $0x64] sm:$0xf]  ;;  %v725_v3 = vld [vmem:[#allocation2 + $0x90] sm:$0xf] }
  0xd4   : > { %v5864_v51 = vrot.slane %v1602_v40, 5  ;;  %v1576_v32 = vrot.slane %v1575_v16, 4  ;;  %v1608_v29 = vrot.slane %v1606_v26, 4  ;;  %720 = vst [vmem:[#allocation2 + $0x84] sm:$0xf] %v719_v50  ;;  %v524_v47 = vrot.slane %v519_v44, 4 }
  0xd5   : > { %v506_v54 = vsel %vm5184_vm2, %v498_v33, %v505_v12  ;;  %v1343_v37 = vld [vmem:[#allocation2 + $0x6c] sm:$0xf]  ;;  %v1614_v4 = vrot.slane %v1612_v53, 5  ;;  %v511_v8 = vrot.slane %v509_v46, 7  ;;  %v512_v39 = vshll.u32 %v308_v25, 16  ;;  %v1135_v33 = vpop.permute.xlu2 %1134 }
  0xd6   : > { %v1581_v55 = vsel %vm5563_vm0, %v1576_v32, %v5827_v60  ;;  %721 = vst.msk [vmem:[#allocation2 + $0x88] sm:$0xf] %vm642_vm7, %v506_v54  ;;  %v1593_v61 = vshrl.u32 %v1343_v37, 16  ;;  %v1596_v0 = vshll.u32 %v1343_v37, 16  ;;  %v1609_v62 = vor.u32 %v1608_v29, %v5864_v51  ;;  %v1276_v43 = vld [vmem:[#allocation2 + $0x78] sm:$0xf] }
  0xd7   : > { %v3236_v63 = vunpack.c.l.b16 %v1581_v55  ;;  %v730_v1 = vsel %vm5302_vm5, %v524_v47, %v729_v14  ;;  %v515_v45 = vrot.slane %v511_v8, 4  ;;  %v520_v18 = vshll.u32 %v5841_v11, 16  ;;  %v1287_v49 = vld [vmem:[#allocation2 + $0x8c] sm:$0x1]  ;;  %v310_v58 = vld [vmem:[%s5251_s24 + $0x60] sm:$0xf] }
  0xd8   : > { %731 = vst [vmem:[#allocation2 + $0x98] sm:$0x1] %v730_v1  ;;  %v1595_v9 = vrot.slane %v1593_v61, 4  ;;  %v1598_v60 = vrot.slane %v1596_v0, 5  ;;  %v1610_v2 = vrot.slane %v1609_v62, 4  ;;  %v534_v57 = vshrl.u32 %v5877_v42, 16 }
  0xd9   : > { %v1127_v38 = vpop.permute.xlu1 %1126  ;;  %v1125_v28 = vpop.permute.xlu0 %1124  ;;  %v3260_v52 = vpack.c.b16 %v3237_v27, %v3236_v63  ;;  %v1277_v19 = vsel %vm5456_vm13, %v5823_v36, %v1276_v43  ;;  %v514_v23 = vor.u32 %v512_v39, %v511_v8  ;;  %v5889_v30 = vld [vmem:[#allocation2 + $0x7c] sm:$0xf]  ;;  %v1288_v11 = vsel %vm5370_vm11, %v5853_v34, %v1287_v49  ;;  %v5900_v25 = vld [vmem:[%s5251_s24 + $0x6c] sm:$0xf]  ;;  %v5903_v12 = vld [vmem:[%s5251_s24 + $0x68] sm:$0xf] }
  0xda   : > { %1286 = vst.msk [vmem:[#allocation2 + $0x88] sm:$0xf] %vm1208_vm12, %v1127_v38  ;;  %v1599_v20 = vor.u32 %v1598_v60, %v1595_v9  ;;  %v1615_v21 = vsel %vm5563_vm0, %v1610_v2, %v1614_v4  ;;  %v736_v38 = vld [vmem:[#allocation2 + $0xa4] sm:$0x1]  ;;  %v522_v36 = vor.u32 %v520_v18, %v519_v44  ;;  %v536_v7 = vrot.slane %v534_v57, 7 }
  0xdb   : > { %1278 = vst [vmem:[#allocation2 + $0x78] sm:$0xf] %v1277_v19  ;;  %3284 = vrot.lane.b32.xlu2 %v3260_v52, %s5124_s25  ;;  %v1283_v40 = vld [vmem:[#allocation2 + $0x84] sm:$0xf]  ;;  %v3239_v41 = vunpack.c.l.b16 %v1615_v21  ;;  %v726_v59 = vsel %vm5358_vm10, %v514_v23, %v725_v3  ;;  %v1626_v26 = vshll.u32 %v5889_v30, 16  ;;  %v1630_v14 = vshrl.u32 %v5889_v30, 16 }
  0xdc   : > { %1289 = vst [vmem:[#allocation2 + $0x8c] sm:$0x1] %v1288_v11  ;;  %v1600_v16 = vrot.slane %v1599_v20, 4  ;;  %v1284_v34 = vsel %vm5456_vm13, %v1125_v28, %v1283_v40  ;;  %v523_v44 = vsel %vm5184_vm2, %v515_v45, %v522_v36  ;;  %v541_v32 = vrot.slane %v536_v7, 4  ;;  %v5909_v50 = vld [vmem:[#allocation2 + $0x80] sm:$0x1] }
  0xdd   : > { %727 = vst [vmem:[#allocation2 + $0x90] sm:$0xf] %v726_v59  ;;  %v5915_v27 = vrot.slane %v1626_v26, 5  ;;  %v1636_v54 = vshll.u32 %v5909_v50, 16  ;;  %v526_v28 = vshrl.u32 %v310_v58, 16  ;;  %v1632_v55 = vrot.slane %v1630_v14, 4  ;;  %v1141_v36 = vpop.permute.xlu2 %1140 }
  0xde   : > { %1285 = vst [vmem:[#allocation2 + $0x84] sm:$0xf] %v1284_v34  ;;  %v1605_v29 = vsel %vm5563_vm0, %v1600_v16, %v5864_v51  ;;  %v737_v46 = vsel %vm5302_vm5, %v541_v32, %v736_v38  ;;  %v529_v61 = vshll.u32 %v310_v58, 16  ;;  %v537_v63 = vshll.u32 %v5877_v42, 16  ;;  %v732_v1 = vld [vmem:[#allocation2 + $0x9c] sm:$0xf] }
  0xdf   : > { %v1294_v47 = vld [vmem:[#allocation2 + $0x98] sm:$0x1]  ;;  %v3238_v37 = vunpack.c.l.b16 %v1605_v29  ;;  %728 = vst.msk [vmem:[#allocation2 + $0x94] sm:$0xf] %vm642_vm7, %v523_v44  ;;  %v1638_v51 = vrot.slane %v1636_v54, 5  ;;  %v528_v62 = vrot.slane %v526_v28, 7  ;;  %v1633_v8 = vor.u32 %v1632_v55, %v5915_v27 }
  0xe0   : > { %v1295_v0 = vsel %vm5370_vm11, %v1135_v33, %v1294_v47  ;;  %v551_v3 = vshrl.u32 %v5900_v25, 16  ;;  %v543_v60 = vshrl.u32 %v5903_v12, 16  ;;  %738 = vst [vmem:[#allocation2 + $0xa4] sm:$0x1] %v737_v46  ;;  %v539_v52 = vor.u32 %v537_v63, %v536_v7  ;;  %v743_v19 = vld [vmem:[#allocation2 + $0xb0] sm:$0x1] }
  0xe1   : > { %v1133_v31 = vpop.permute.xlu1 %1132  ;;  %v1131_v53 = vpop.permute.xlu0 %1130  ;;  %1296 = vst [vmem:[#allocation2 + $0x98] sm:$0x1] %v1295_v0  ;;  %v3261_v4 = vpack.c.b16 %v3239_v41, %v3238_v37  ;;  %v5927_v9 = vld [vmem:[#allocation2 + $0x88] sm:$0xf]  ;;  %v531_v39 = vor.u32 %v529_v61, %v528_v62  ;;  %v532_v43 = vrot.slane %v528_v62, 4  ;;  %v1634_v18 = vrot.slane %v1633_v8, 4 }
  0xe2   : > { %1293 = vst.msk [vmem:[#allocation2 + $0x94] sm:$0xf] %vm1208_vm12, %v1133_v31  ;;  %v1345_v2 = vld [vmem:[#allocation2 + $0x78] sm:$0xf]  ;;  %v1650_v31 = vshll.u32 %v5927_v9, 16  ;;  %v553_v49 = vrot.slane %v551_v3, 7 }
  0xe3   : > { %3286 = vrot.lane.b32.xlu0 %v3261_v4, %s5124_s25  ;;  %v1617_v42 = vshrl.u32 %v1345_v2, 16  ;;  %v1620_v45 = vshll.u32 %v1345_v2, 16  ;;  %v540_v21 = vsel %vm5184_vm2, %v532_v43, %v539_v52  ;;  %v5934_v23 = vld [vmem:[#allocation2 + $0x8c] sm:$0x1]  ;;  %v1654_v11 = vshrl.u32 %v5927_v9, 16 }
  0xe4   : > { %v1290_v20 = vld [vmem:[#allocation2 + $0x90] sm:$0xf]  ;;  %v1652_v38 = vrot.slane %v1650_v31, 5  ;;  %735 = vst.msk [vmem:[#allocation2 + $0xa0] sm:$0xf] %vm642_vm7, %v540_v21  ;;  %v733_v40 = vsel %vm5358_vm10, %v531_v39, %v732_v1  ;;  %v1639_v41 = vsel %vm5563_vm0, %v1634_v18, %v1638_v51  ;;  %v558_v59 = vrot.slane %v553_v49, 4 }
  0xe5   : > { %v1291_v33 = vsel %vm5456_vm13, %v1131_v53, %v1290_v20  ;;  %v1619_v7 = vrot.slane %v1617_v42, 4  ;;  %v1622_v58 = vrot.slane %v1620_v45, 5  ;;  %v1347_v16 = vld [vmem:[#allocation2 + $0x84] sm:$0xf]  ;;  %v5945_v44 = vld [vmem:[%s5251_s24 + $0x74] sm:$0xf]  ;;  %v3241_v51 = vunpack.c.l.b16 %v1639_v41 }
  0xe6   : > { %1292 = vst [vmem:[#allocation2 + $0x90] sm:$0xf] %v1291_v33  ;;  %v1641_v26 = vshrl.u32 %v1347_v16, 16  ;;  %v1644_v34 = vshll.u32 %v1347_v16, 16  ;;  %v1656_v14 = vrot.slane %v1654_v11, 4  ;;  %v1660_v29 = vshll.u32 %v5934_v23, 16  ;;  %v1147_v16 = vpop.permute.xlu2 %1146 }
  0xe7   : > { %v1623_v32 = vor.u32 %v1622_v58, %v1619_v7  ;;  %v545_v53 = vrot.slane %v543_v60, 7  ;;  %v739_v54 = vld [vmem:[#allocation2 + $0xa8] sm:$0xf]  ;;  %734 = vst [vmem:[#allocation2 + $0x9c] sm:$0xf] %v733_v40  ;;  %v744_v47 = vsel %vm5302_vm5, %v558_v59, %v743_v19  ;;  %v546_v55 = vshll.u32 %v5903_v12, 16 }
  0xe8   : > { %v1643_v37 = vrot.slane %v1641_v26, 4  ;;  %v1646_v46 = vrot.slane %v1644_v34, 5  ;;  %v1301_v61 = vld [vmem:[#allocation2 + $0xa4] sm:$0x1]  ;;  %745 = vst [vmem:[#allocation2 + $0xb0] sm:$0x1] %v744_v47  ;;  %v1657_v62 = vor.u32 %v1656_v14, %v1652_v38 }
  0xe9   : > { %v1139_v57 = vpop.permute.xlu1 %1138  ;;  %v1137_v28 = vpop.permute.xlu0 %1136  ;;  %v1624_v0 = vrot.slane %v1623_v32, 4  ;;  %v1662_v63 = vrot.slane %v1660_v29, 5  ;;  %v1302_v1 = vsel %vm5370_vm11, %v1141_v36, %v1301_v61  ;;  %v548_v8 = vor.u32 %v546_v55, %v545_v53  ;;  %v5954_v60 = vld [vmem:[#allocation2 + $0x94] sm:$0xf]  ;;  %v750_v36 = vld [vmem:[#allocation2 + $0xbc] sm:$0x1] }
  0xea   : > { %1300 = vst.msk [vmem:[#allocation2 + $0xa0] sm:$0xf] %vm1208_vm12, %v1139_v57  ;;  %v1647_v4 = vor.u32 %v1646_v46, %v1643_v37  ;;  %v549_v3 = vrot.slane %v545_v53, 4  ;;  %v1658_v12 = vrot.slane %v1657_v62, 4  ;;  %v554_v39 = vshll.u32 %v5900_v25, 16 }
  0xeb   : > { %1303 = vst [vmem:[#allocation2 + $0xa4] sm:$0x1] %v1302_v1  ;;  %v1629_v2 = vsel %vm5563_vm0, %v1624_v0, %v5915_v27  ;;  %v568_v43 = vshrl.u32 %v5945_v44, 16  ;;  %v740_v42 = vsel %vm5358_vm10, %v548_v8, %v739_v54  ;;  %v1674_v45 = vshll.u32 %v5954_v60, 16  ;;  %v314_v58 = vld [vmem:[%s5251_s24 + $0x70] sm:$0xf] }
  0xec   : > { %v3240_v52 = vunpack.c.l.b16 %v1629_v2  ;;  %v1648_v31 = vrot.slane %v1647_v4, 4  ;;  %v1663_v18 = vsel %vm5563_vm0, %v1658_v12, %v1662_v63  ;;  %v556_v19 = vor.u32 %v554_v39, %v553_v49  ;;  %741 = vst [vmem:[#allocation2 + $0xa8] sm:$0xf] %v740_v42  ;;  %v5973_v34 = vld [vmem:[%s5251_s24 + $0x7c] sm:$0xf] }
  0xed   : > { %v570_v27 = vrot.slane %v568_v43, 7  ;;  %v1349_v20 = vld [vmem:[#allocation2 + $0x90] sm:$0xf]  ;;  %v1678_v25 = vshrl.u32 %v5954_v60, 16  ;;  %v3243_v33 = vunpack.c.l.b16 %v1663_v18  ;;  %v1676_v29 = vrot.slane %v1674_v45, 5 }
  0xee   : > { %v3262_v21 = vpack.c.b16 %v3241_v51, %v3240_v52  ;;  %v1653_v11 = vsel %vm5563_vm0, %v1648_v31, %v1652_v38  ;;  %v1665_v7 = vshrl.u32 %v1349_v20, 16  ;;  %v1297_v40 = vld [vmem:[#allocation2 + $0x9c] sm:$0xf]  ;;  %v557_v49 = vsel %vm5184_vm2, %v549_v3, %v556_v19  ;;  %v5983_v37 = vld [vmem:[#allocation2 + $0x98] sm:$0x1] }
  0xef   : > { %v3242_v41 = vunpack.c.l.b16 %v1653_v11  ;;  %v575_v59 = vrot.slane %v570_v27, 4  ;;  %v1668_v26 = vshll.u32 %v1349_v20, 16  ;;  %v1298_v32 = vsel %vm5456_vm13, %v1137_v28, %v1297_v40  ;;  %v1308_v38 = vld [vmem:[#allocation2 + $0xb0] sm:$0x1]  ;;  %742 = vst.msk [vmem:[#allocation2 + $0xac] sm:$0xf] %vm642_vm7, %v557_v49  ;;  %v1153_v49 = vpop.permute.xlu2 %1152 }
  0xf0   : > { %3288 = vrot.lane.b32.xlu1 %v3262_v21, %s5124_s25  ;;  %v1667_v14 = vrot.slane %v1665_v7, 4  ;;  %1299 = vst [vmem:[#allocation2 + $0x9c] sm:$0xf] %v1298_v32  ;;  %v1309_v53 = vsel %vm5370_vm11, %v1147_v16, %v1308_v38  ;;  %v1680_v61 = vrot.slane %v1678_v25, 4  ;;  %v1684_v28 = vshll.u32 %v5983_v37, 16 }
  0xf1   : > { %v1145_v57 = vpop.permute.xlu1 %1144  ;;  %v3263_v54 = vpack.c.b16 %v3243_v33, %v3242_v41  ;;  %v751_v47 = vsel %vm5302_vm5, %v575_v59, %v750_v36  ;;  %v1670_v46 = vrot.slane %v1668_v26, 5  ;;  %1310 = vst [vmem:[#allocation2 + $0xb0] sm:$0x1] %v1309_v53  ;;  %v1143_v55 = vpop.permute.xlu0 %1142  ;;  %v560_v0 = vshrl.u32 %v314_v58, 16  ;;  %v746_v1 = vld [vmem:[#allocation2 + $0xb4] sm:$0xf] }
  0xf2   : > { %v563_v51 = vshll.u32 %v314_v58, 16  ;;  %1307 = vst.msk [vmem:[#allocation2 + $0xac] sm:$0xf] %vm1208_vm12, %v1145_v57  ;;  %v571_v63 = vshll.u32 %v5945_v44, 16  ;;  %v585_v4 = vshrl.u32 %v5973_v34, 16  ;;  %v1681_v2 = vor.u32 %v1680_v61, %v1676_v29 }
  0xf3   : > { %3290 = vrot.lane.b32.xlu2 %v3263_v54, %s5124_s25  ;;  %v1671_v62 = vor.u32 %v1670_v46, %v1667_v14  ;;  %v5990_v8 = vld [vmem:[#allocation2 + $0xa0] sm:$0xf]  ;;  %v1304_v3 = vld [vmem:[#allocation2 + $0xa8] sm:$0xf]  ;;  %752 = vst [vmem:[#allocation2 + $0xbc] sm:$0x1] %v751_v47 }
  0xf4   : > { %v1686_v12 = vrot.slane %v1684_v28, 5  ;;  %v562_v39 = vrot.slane %v560_v0, 7  ;;  %v1305_v43 = vsel %vm5456_vm13, %v1143_v55, %v1304_v3  ;;  %v573_v31 = vor.u32 %v571_v63, %v570_v27  ;;  %v757_v42 = vld [vmem:[#allocation2 + $0xc8] sm:$0x1]  ;;  %v5996_v18 = vld [vmem:[#allocation2 + $0xa4] sm:$0x1] }
  0xf5   : > { %v1672_v52 = vrot.slane %v1671_v62, 4  ;;  %v5994_v45 = vrot.slane %v585_v4, 7  ;;  %1306 = vst [vmem:[#allocation2 + $0xa8] sm:$0xf] %v1305_v43  ;;  %v1682_v44 = vrot.slane %v1681_v2, 4  ;;  %v1698_v20 = vshll.u32 %v5990_v8, 16 }
  0xf6   : > { %v565_v57 = vor.u32 %v563_v51, %v562_v39  ;;  %v566_v19 = vrot.slane %v562_v39, 4  ;;  %v1702_v27 = vshrl.u32 %v5990_v8, 16  ;;  %v1708_v33 = vshll.u32 %v5996_v18, 16  ;;  %v1760_v41 = vld [vmem:[#allocation2] sm:$0xe] }
  0xf7   : > { %v1677_v25 = vsel %vm5563_vm0, %v1672_v52, %v1676_v29  ;;  %v592_v11 = vrot.slane %v5994_v45, 4  ;;  %v1687_v36 = vsel %vm5563_vm0, %v1682_v44, %v1686_v12  ;;  %v1351_v16 = vld [vmem:[#allocation2 + $0x9c] sm:$0xf]  ;;  %v1700_v29 = vrot.slane %v1698_v20, 5  ;;  %v5083_v44 = vld [vmem:[#allocation2 + $0x4] sm:$0xf] }
  0xf8   : > { %v3244_v7 = vunpack.c.l.b16 %v1677_v25  ;;  %v574_v58 = vsel %vm5184_vm2, %v566_v19, %v573_v31  ;;  %v747_v40 = vsel %vm5358_vm10, %v565_v57, %v746_v1  ;;  %v3245_v59 = vunpack.c.l.b16 %v1687_v36  ;;  %v6013_v14 = vld [vmem:[#allocation2 + $0xb0] sm:$0x1] }
  0xf9   : > { %v1151_v21 = vpop.permute.xlu1 %1150  ;;  %749 = vst.msk [vmem:[#allocation2 + $0xb8] sm:$0xf] %vm642_vm7, %v574_v58  ;;  %v758_v26 = vsel %vm5302_vm5, %v592_v11, %v757_v42  ;;  %v1689_v32 = vshrl.u32 %v1351_v16, 16  ;;  %v1692_v38 = vshll.u32 %v1351_v16, 16  ;;  %v1704_v53 = vrot.slane %v1702_v27, 4  ;;  %v1149_v19 = vpop.permute.xlu0 %1148 }
  0xfa   : > { %1314 = vst.msk [vmem:[#allocation2 + $0xb8] sm:$0xf] %vm1208_vm12, %v1151_v21  ;;  %v1710_v54 = vrot.slane %v1708_v33, 5  ;;  %v1315_v47 = vld [vmem:[#allocation2 + $0xbc] sm:$0x1]  ;;  %v3264_v46 = vpack.c.b16 %v3245_v59, %v3244_v7  ;;  %v1732_v51 = vshll.u32 %v6013_v14, 16 }
  0xfb   : > { %748 = vst [vmem:[#allocation2 + $0xb4] sm:$0xf] %v747_v40  ;;  %v1691_v55 = vrot.slane %v1689_v32, 4  ;;  %v1694_v61 = vrot.slane %v1692_v38, 5  ;;  %v1316_v28 = vsel %vm5370_vm11, %v1153_v49, %v1315_v47  ;;  %v1705_v35 = vor.u32 %v1704_v53, %v1700_v29  ;;  %v6018_v0 = vld [vmem:[#allocation2 + $0xac] sm:$0xf]  ;;  %v1159_v53 = vpop.permute.xlu2 %1158 }
  0xfc   : > { %759 = vst [vmem:[#allocation2 + $0xc8] sm:$0x1] %v758_v26  ;;  %v4684_v62 = vrot.slane %v1760_v41, 9  ;;  %3292 = vrot.lane.b32.xlu0 %v3264_v46, %s5124_s25  ;;  %v1353_v1 = vld [vmem:[#allocation2 + $0xa8] sm:$0xf]  ;;  %v1722_v4 = vshll.u32 %v6018_v0, 16 }
  0xfd   : > { %1317 = vst [vmem:[#allocation2 + $0xbc] sm:$0x1] %v1316_v28  ;;  %v1695_v63 = vor.u32 %v1694_v61, %v1691_v55  ;;  %v1726_v3 = vshrl.u32 %v6018_v0, 16  ;;  %v1706_v2 = vrot.slane %v1705_v35, 4  ;;  %v1713_v12 = vshrl.u32 %v1353_v1, 16 }
  0xfe   : > { %v1716_v39 = vshll.u32 %v1353_v1, 16  ;;  %v1734_v43 = vrot.slane %v1732_v51, 5  ;;  %v1724_v31 = vrot.slane %v1722_v4, 5  ;;  %v1829_v57 = vrot.slane %v5083_v44, 5  ;;  %v5084_v27 = vld [vmem:[#allocation2 + $0x8] sm:$0x1] }
  0xff   : > { %v1696_v52 = vrot.slane %v1695_v63, 4  ;;  %v1728_v42 = vrot.slane %v1726_v3, 4  ;;  %v1711_v20 = vsel %vm5563_vm0, %v1706_v2, %v1710_v54  ;;  %v1715_v25 = vrot.slane %v1713_v12, 4  ;;  %v1761_v51 = vld [vmem:[#allocation2 + $0xc] sm:$0xe] }
 0x100   : > { %v1718_v21 = vrot.slane %v1716_v39, 5  ;;  %v1832_v33 = vrot.slane %v5084_v27, 5  ;;  %v3247_v7 = vunpack.c.l.b16 %v1711_v20  ;;  %v1830_v40 = vsel %vm6028_vm4, %v4684_v62, %v1829_v57  ;;  %v1763_v39 = vld [vmem:[#allocation2 + $0x24] sm:$0xe] }
 0x101   : > { %v1701_v36 = vsel %vm5563_vm0, %v1696_v52, %v1700_v29  ;;  %v1729_v58 = vor.u32 %v1728_v42, %v1724_v31  ;;  %v6036_v16 = vld [vmem:[#allocation2 + $0xb8] sm:$0xf]  ;;  %v1831_v26 = vrot.slane %v1829_v57, 4  ;;  %v3300_v32 = vunpack.c.l.b16 %v1830_v40  ;;  %v5087_v40 = vld [vmem:[#allocation2 + $0x28] sm:$0xf] }
 0x102   : > { %v1311_v41 = vld [vmem:[#allocation2 + $0xb4] sm:$0xf]  ;;  %v3246_v49 = vunpack.c.l.b16 %v1701_v36  ;;  %v1719_v59 = vor.u32 %v1718_v21, %v1715_v25  ;;  %v1746_v29 = vshll.u32 %v6036_v16, 16  ;;  %v1750_v46 = vshrl.u32 %v6036_v16, 16 }
 0x103   : > { %v1312_v38 = vsel %vm5456_vm13, %v1149_v19, %v1311_v41  ;;  %v1322_v54 = vld [vmem:[#allocation2 + $0xc8] sm:$0x1]  ;;  %v1730_v47 = vrot.slane %v1729_v58, 4  ;;  %v1833_v35 = vsel %vm6028_vm4, %v1831_v26, %v1832_v33  ;;  %v4685_v44 = vrot.slane %v1761_v51, 9  ;;  %v316_v19 = vld [vmem:[%s5251_s24 + $0x78] sm:$0xf] }
 0x104   : > { %1313 = vst [vmem:[#allocation2 + $0xb4] sm:$0xf] %v1312_v38  ;;  %v1323_v55 = vsel %vm5370_vm11, %v1159_v53, %v1322_v54  ;;  %v3265_v61 = vpack.c.b16 %v3247_v7, %v3246_v49  ;;  %v1720_v28 = vrot.slane %v1719_v59, 4  ;;  %v3301_v63 = vunpack.c.l.b16 %v1833_v35  ;;  %v6048_v1 = vld [vmem:[#allocation2 + $0xbc] sm:$0x1] }
 0x105   : > { %1324 = vst [vmem:[#allocation2 + $0xc8] sm:$0x1] %v1323_v55  ;;  %v1735_v62 = vsel %vm5563_vm0, %v1730_v47, %v1734_v43  ;;  %v6050_v4 = vrot.slane %v1746_v29, 5  ;;  %v1752_v3 = vrot.slane %v1750_v46, 4  ;;  %v1756_v12 = vshll.u32 %v6048_v1, 16 }
 0x106   : > { %3294 = vrot.lane.b32.xlu1 %v3265_v61, %s5124_s25  ;;  %v1725_v10 = vsel %vm5563_vm0, %v1720_v28, %v1724_v31  ;;  %v3249_v2 = vunpack.c.l.b16 %v1735_v62  ;;  %v5085_v43 = vld [vmem:[#allocation2 + $0x10] sm:$0xf]  ;;  %v3332_v20 = vpack.c.b16 %v3301_v63, %v3300_v32  ;;  %v5086_v25 = vld [vmem:[#allocation2 + $0x14] sm:$0x1]  ;;  %v4687_v31 = vrot.slane %v1763_v39, 9 }
 0x107   : > { %v3248_v52 = vunpack.c.l.b16 %v1725_v10  ;;  %v1753_v42 = vor.u32 %v1752_v3, %v6050_v4  ;;  %v1836_v57 = vrot.slane %v5085_v43, 5  ;;  %v1839_v21 = vrot.slane %v5086_v25, 5  ;;  %v5088_v32 = vld [vmem:[#allocation2 + $0x2c] sm:$0x1]  ;;  %v1764_v10 = vld [vmem:[#allocation2 + $0x30] sm:$0xe] }
 0x108   : > { %v1758_v58 = vrot.slane %v1756_v12, 5  ;;  %v1850_v41 = vrot.slane %v5087_v40, 5  ;;  %v577_v49 = vshrl.u32 %v316_v19, 16  ;;  %v1853_v38 = vrot.slane %v5088_v32, 5 }
 0x109   : > { %v3266_v27 = vpack.c.b16 %v3249_v2, %v3248_v52  ;;  %v1837_v33 = vsel %vm6028_vm4, %v4685_v44, %v1836_v57  ;;  %v1838_v36 = vrot.slane %v1836_v57, 4  ;;  %v1754_v7 = vrot.slane %v1753_v42, 4  ;;  %v1762_v42 = vld [vmem:[#allocation2 + $0x18] sm:$0xe]  ;;  %v5089_v57 = vld [vmem:[#allocation2 + $0x1c] sm:$0xf] }
 0x10a   : > { %v580_v53 = vshll.u32 %v316_v19, 16  ;;  %v588_v54 = vshll.u32 %v5973_v34, 16  ;;  %v3302_v46 = vunpack.c.l.b16 %v1837_v33  ;;  %v1851_v61 = vsel %vm6028_vm4, %v4687_v31, %v1850_v41  ;;  %v753_v34 = vld [vmem:[#allocation2 + $0xc0] sm:$0xf] }
 0x10b   : > { %3296 = vrot.lane.b32.xlu2 %v3266_v27, %s5124_s25  ;;  %v1355_v59 = vld [vmem:[#allocation2 + $0xb4] sm:$0xf]  ;;  %v1840_v26 = vsel %vm6028_vm4, %v1838_v36, %v1839_v21  ;;  %v1852_v28 = vrot.slane %v1850_v41, 4  ;;  %v579_v35 = vrot.slane %v577_v49, 7  ;;  %v1759_v3 = vsel %vm5563_vm0, %v1754_v7, %v1758_v58  ;;  %v1766_v36 = vld [vmem:[#allocation2 + $0x48] sm:$0xe]  ;;  %v1157_v58 = vpop.permute.xlu1 %1156 }
 0x10c   : > { %v1737_v47 = vshrl.u32 %v1355_v59, 16  ;;  %v1740_v29 = vshll.u32 %v1355_v59, 16  ;;  %v3303_v55 = vunpack.c.l.b16 %v1840_v26  ;;  %v590_v51 = vor.u32 %v588_v54, %v5994_v45  ;;  %v5090_v27 = vld [vmem:[#allocation2 + $0x34] sm:$0xf]  ;;  %v5091_v41 = vld [vmem:[#allocation2 + $0x20] sm:$0x1] }
 0x10d   : > { %v1854_v12 = vsel %vm6028_vm4, %v1852_v28, %v1853_v38  ;;  %v582_v39 = vor.u32 %v580_v53, %v579_v35  ;;  %v583_v52 = vrot.slane %v579_v35, 4  ;;  %v3306_v43 = vunpack.c.l.b16 %v1851_v61  ;;  %v5092_v59 = vld [vmem:[#allocation2 + $0x38] sm:$0x1]  ;;  %v5094_v35 = vld [vmem:[#allocation2 + $0x50] sm:$0x1] }
 0x10e   : > { %3348 = vrot.lane.b32.xlu1 %v3332_v20, %s5125_s26  ;;  %v1739_v62 = vrot.slane %v1737_v47, 4  ;;  %v1742_v63 = vrot.slane %v1740_v29, 5  ;;  %v3333_v2 = vpack.c.b16 %v3303_v55, %v3302_v46  ;;  %v3307_v45 = vunpack.c.l.b16 %v1854_v12  ;;  %v5093_v55 = vld [vmem:[#allocation2 + $0x4c] sm:$0xf] }
 0x10f   : > { %v1843_v19 = vrot.slane %v5089_v57, 5  ;;  %v591_v20 = vsel %vm5184_vm2, %v583_v52, %v590_v51  ;;  %v754_v25 = vsel %vm5358_vm10, %v582_v39, %v753_v34  ;;  %v4688_v21 = vrot.slane %v1764_v10, 9  ;;  %v1765_v10 = vld [vmem:[#allocation2 + $0x3c] sm:$0xe]  ;;  %v5095_v39 = vld [vmem:[#allocation2 + $0x40] sm:$0xf] }
 0x110   : > { %v1743_v44 = vor.u32 %v1742_v63, %v1739_v62  ;;  %v1857_v33 = vrot.slane %v5090_v27, 5  ;;  %v3251_v7 = vunpack.c.l.b16 %v1759_v3  ;;  %756 = vst.msk [vmem:[#allocation2 + $0xc4] sm:$0xf] %vm642_vm7, %v591_v20  ;;  %v4686_v40 = vrot.slane %v1762_v42, 9  ;;  %v1767_v62 = vld [vmem:[#allocation2 + $0x54] sm:$0xe] }
 0x111   : > { %1321 = vst.msk [vmem:[#allocation2 + $0xc4] sm:$0xf] %vm1208_vm12, %v1157_v58  ;;  %v1846_v24 = vrot.slane %v5091_v41, 5  ;;  %v1860_v26 = vrot.slane %v5092_v59, 5  ;;  %v3335_v38 = vpack.c.b16 %v3307_v45, %v3306_v43  ;;  %v1845_v53 = vrot.slane %v1843_v19, 4 }
 0x112   : > { %v1744_v31 = vrot.slane %v1743_v44, 4  ;;  %v1858_v6 = vsel %vm6028_vm4, %v4688_v21, %v1857_v33  ;;  %v1859_v49 = vrot.slane %v1857_v33, 4  ;;  %755 = vst [vmem:[#allocation2 + $0xc0] sm:$0xf] %v754_v25  ;;  %v4690_v54 = vrot.slane %v1766_v36, 9  ;;  %v1155_v36 = vpop.permute.xlu0 %1154 }
 0x113   : > { %3350 = vrot.lane.b32.xlu2 %v3333_v2, %s5125_s26  ;;  %v3308_v46 = vunpack.c.l.b16 %v1858_v6  ;;  %v1871_v61 = vrot.slane %v5093_v55, 5  ;;  %v1874_v51 = vrot.slane %v5094_v35, 5  ;;  %v1847_v2 = vsel %vm6028_vm4, %v1845_v53, %v1846_v24  ;;  %v5096_v45 = vld [vmem:[#allocation2 + $0x58] sm:$0xf]  ;;  %v5097_v21 = vld [vmem:[#allocation2 + $0x44] sm:$0x1] }
 0x114   : > { %v1749_v32 = vsel %vm5563_vm0, %v1744_v31, %v6050_v4  ;;  %v1861_v29 = vsel %vm6028_vm4, %v1859_v49, %v1860_v26  ;;  %v1844_v4 = vsel %vm6028_vm4, %v4686_v40, %v1843_v19  ;;  %v1864_v52 = vrot.slane %v5095_v39, 5  ;;  %v1769_v33 = vld [vmem:[#allocation2 + $0x6c] sm:$0xe]  ;;  %v1768_v53 = vld [vmem:[#allocation2 + $0x60] sm:$0xe] }
 0x115   : > { %v3250_v47 = vunpack.c.l.b16 %v1749_v32  ;;  %v3309_v28 = vunpack.c.l.b16 %v1861_v29  ;;  %v1872_v3 = vsel %vm6028_vm4, %v4690_v54, %v1871_v61  ;;  %v1873_v34 = vrot.slane %v1871_v61, 4  ;;  %v1770_v29 = vld [vmem:[#allocation2 + $0x78] sm:$0xe] }
 0x116   : > { %3354 = vrot.lane.b32.xlu1 %v3335_v38, %s5125_s26  ;;  %v3312_v12 = vunpack.c.l.b16 %v1872_v3  ;;  %v4691_v43 = vrot.slane %v1767_v62, 9  ;;  %v1878_v57 = vrot.slane %v5096_v45, 5  ;;  %v3304_v19 = vunpack.c.l.b16 %v1844_v4 }
 0x117   : > { %v3267_v63 = vpack.c.b16 %v3251_v7, %v3250_v47  ;;  %v3336_v42 = vpack.c.b16 %v3309_v28, %v3308_v46  ;;  %v1875_v44 = vsel %vm6028_vm4, %v1873_v34, %v1874_v51  ;;  %v4689_v25 = vrot.slane %v1765_v10, 9  ;;  %v1772_v28 = vld [vmem:[#allocation2 + $0x90] sm:$0xe] }
 0x118   : > { %v3313_v20 = vunpack.c.l.b16 %v1875_v44  ;;  %v1867_v27 = vrot.slane %v5097_v21, 5  ;;  %v1866_v7 = vrot.slane %v1864_v52, 4  ;;  %v1879_v58 = vsel %vm6028_vm4, %v4691_v43, %v1878_v57  ;;  %v1771_v21 = vld [vmem:[#allocation2 + $0x84] sm:$0xe] }
 0x119   : > { %3298 = vrot.lane.b32.xlu0 %v3267_v63, %s5124_s25  ;;  %v1318_v31 = vld [vmem:[#allocation2 + $0xc0] sm:$0xf]  ;;  %v1880_v40 = vrot.slane %v1878_v57, 4  ;;  %v1881_v41 = vrot.slane %v5796_v5, 5  ;;  %v3305_v6 = vunpack.c.l.b16 %v1847_v2  ;;  %v3314_v26 = vunpack.c.l.b16 %v1879_v58 }
 0x11a   : > { %v1319_v24 = vsel %vm5456_vm13, %v1155_v36, %v1318_v31  ;;  %v3338_v49 = vpack.c.b16 %v3313_v20, %v3312_v12  ;;  %v4693_v32 = vrot.slane %v1769_v33, 9  ;;  %v1892_v38 = vrot.slane %v5843_v17, 5 }
 0x11b   : > { %3356 = vrot.lane.b32.xlu2 %v3336_v42, %s5125_s26  ;;  %1320 = vst [vmem:[#allocation2 + $0xc0] sm:$0xf] %v1319_v24  ;;  %v1882_v59 = vsel %vm6028_vm4, %v1880_v40, %v1881_v41  ;;  %v3334_v54 = vpack.c.b16 %v3305_v6, %v3304_v19  ;;  %v1895_v5 = vrot.slane %v5862_v48, 5  ;;  %v1885_v56 = vrot.slane %v5811_v13, 5 }
 0x11c   : > { %v3315_v47 = vunpack.c.l.b16 %v1882_v59  ;;  %v1865_v46 = vsel %vm6028_vm4, %v4689_v25, %v1864_v52  ;;  %v1868_v55 = vsel %vm6028_vm4, %v1866_v7, %v1867_v27  ;;  %v1893_v61 = vsel %vm6028_vm4, %v4693_v32, %v1892_v38  ;;  %v1775_v7 = vld [vmem:[#allocation2 + $0xb4] sm:$0xe] }
 0x11d   : > { %v1894_v17 = vrot.slane %v1892_v38, 4  ;;  %v3318_v35 = vunpack.c.l.b16 %v1893_v61  ;;  %v4692_v51 = vrot.slane %v1768_v53, 9  ;;  %v1887_v62 = vrot.slane %v1885_v56, 4  ;;  %v6152_v61 = vld [vmem:[#allocation2 + $0x1c] sm:$0xf] }
 0x11e   : > { %3360 = vrot.lane.b32.xlu1 %v3338_v49, %s5125_s26  ;;  %v1888_v63 = vrot.slane %v5825_v22, 5  ;;  %v3339_v13 = vpack.c.b16 %v3315_v47, %v3314_v26  ;;  %v4694_v4 = vrot.slane %v1770_v29, 9  ;;  %v1899_v3 = vrot.slane %v5889_v30, 5  ;;  %v6148_v29 = vpop.permute.xlu2 %3272 }
 0x11f   : > { %v1896_v48 = vsel %vm6028_vm4, %v1894_v17, %v1895_v5  ;;  %v3310_v34 = vunpack.c.l.b16 %v1865_v46  ;;  %v1902_v2 = vrot.slane %v5909_v50, 5  ;;  %v4696_v12 = vrot.slane %v1772_v28, 9  ;;  %v1773_v50 = vld [vmem:[#allocation2 + $0x9c] sm:$0xe]  ;;  %v6154_v17 = vpop.permute.xlu0 %3268 }
 0x120   : > { %v3319_v10 = vunpack.c.l.b16 %v1896_v48  ;;  %v3311_v39 = vunpack.c.l.b16 %v1868_v55  ;;  %v1900_v22 = vsel %vm6028_vm4, %v4694_v4, %v1899_v3  ;;  %v1901_v52 = vrot.slane %v1899_v3, 4 }
 0x121   : > { %3352 = vrot.lane.b32.xlu0 %v3334_v54, %s5125_s26  ;;  %v1913_v42 = vrot.slane %v5954_v60, 5  ;;  %v1886_v43 = vsel %vm6028_vm4, %v4692_v51, %v1885_v56  ;;  %v1889_v30 = vsel %vm6028_vm4, %v1887_v62, %v1888_v63  ;;  %v1916_v45 = vrot.slane %v5983_v37, 5  ;;  %v1941_v56 = vld [vmem:[#allocation2 + $0x18] sm:$0xf]  ;;  %v1774_v51 = vld [vmem:[#allocation2 + $0xa8] sm:$0xe] }
 0x122   : > { %v3341_v44 = vpack.c.b16 %v3319_v10, %v3318_v35  ;;  %v1903_v57 = vsel %vm6028_vm4, %v1901_v52, %v1902_v2  ;;  %v3320_v19 = vunpack.c.l.b16 %v1900_v22  ;;  %v1906_v27 = vrot.slane %v5927_v9, 5  ;;  %v1939_v10 = vld [vmem:[#allocation2 + $0xc] sm:$0xf]  ;;  %v6167_v52 = vld [vmem:[#allocation2 + $0x10] sm:$0xf] }
 0x123   : > { %3362 = vrot.lane.b32.xlu2 %v3339_v13, %s5125_s26  ;;  %v1914_v20 = vsel %vm6028_vm4, %v4696_v12, %v1913_v42  ;;  %v1915_v25 = vrot.slane %v1913_v42, 4  ;;  %v3321_v60 = vunpack.c.l.b16 %v1903_v57  ;;  %v3337_v33 = vpack.c.b16 %v3311_v39, %v3310_v34 }
 0x124   : > { %v4697_v37 = vrot.slane %v1773_v50, 9  ;;  %v1920_v31 = vrot.slane %v5990_v8, 5  ;;  %v3316_v58 = vunpack.c.l.b16 %v1886_v43  ;;  %v3317_v40 = vunpack.c.l.b16 %v1889_v30 }
 0x125   : > { %v1917_v36 = vsel %vm6028_vm4, %v1915_v25, %v1916_v45  ;;  %v3324_v41 = vunpack.c.l.b16 %v1914_v20  ;;  %v3342_v6 = vpack.c.b16 %v3321_v60, %v3320_v19  ;;  %v4695_v49 = vrot.slane %v1771_v21, 9  ;;  %v3271_v45 = vpop.permute.xlu1 %3270 }
 0x126   : > { %3366 = vrot.lane.b32.xlu1 %v3341_v44, %s5125_s26  ;;  %v3325_v24 = vunpack.c.l.b16 %v1917_v36  ;;  %v1922_v59 = vrot.slane %v1920_v31, 4  ;;  %v1923_v26 = vrot.slane %v5996_v18, 5  ;;  %v1908_v9 = vrot.slane %v1906_v27, 4 }
 0x127   : > { %v1909_v32 = vrot.slane %v5934_v23, 5  ;;  %v1921_v38 = vsel %vm6028_vm4, %v4697_v37, %v1920_v31  ;;  %v4699_v53 = vrot.slane %v1775_v7, 9  ;;  %v1934_v54 = vrot.slane %v6036_v16, 5  ;;  %v1943_v31 = vld [vmem:[#allocation2 + $0x24] sm:$0xf] }
 0x128   : > { %v1924_v8 = vsel %vm6028_vm4, %v1922_v59, %v1923_v26  ;;  %v3344_v47 = vpack.c.b16 %v3325_v24, %v3324_v41  ;;  %v1937_v5 = vrot.slane %v6048_v1, 5  ;;  %v3326_v18 = vunpack.c.l.b16 %v1921_v38  ;;  %v4961_v7 = vld [vmem:[#allocation2] sm:$0xff]  ;;  %v3275_v59 = vpop.permute.xlu0 %3274 }
 0x129   : > { %3358 = vrot.lane.b32.xlu0 %v3337_v33, %s5125_s26  ;;  %v3327_v46 = vunpack.c.l.b16 %v1924_v8  ;;  %v1935_v23 = vsel %vm6028_vm4, %v4699_v53, %v1934_v54  ;;  %v1936_v55 = vrot.slane %v1934_v54, 4  ;;  %v3340_v28 = vpack.c.b16 %v3317_v40, %v3316_v58  ;;  %v3279_v33 = vpop.permute.xlu2 %3278  ;;  %v4966_v8 = vld [vmem:[#allocation2 + $0x3c] sm:$0xff] }
 0x12a   : > { %v1907_v16 = vsel %vm6028_vm4, %v4695_v49, %v1906_v27  ;;  %v1910_v1 = vsel %vm6028_vm4, %v1908_v9, %v1909_v32  ;;  %v1927_v62 = vrot.slane %v6018_v0, 5  ;;  %v2012_v63 = vshrl.u32 %v1941_v56, 16  ;;  %v6169_v0 = vld [vmem:[#allocation2 + $0x20] sm:$0x1]  ;;  %v4962_v49 = vld [vmem:[#allocation2 + $0xc] sm:$0xff] }
 0x12b   : > { %3368 = vrot.lane.b32.xlu2 %v3342_v6, %s5125_s26  ;;  %v1938_v35 = vsel %vm6028_vm4, %v1936_v55, %v1937_v5  ;;  %v2015_v13 = vshll.u32 %v1941_v56, 16  ;;  %v3330_v48 = vunpack.c.l.b16 %v1935_v23  ;;  %v2021_v3 = vshll.u32 %v6152_v61, 16  ;;  %v4963_v6 = vld [vmem:[#allocation2 + $0x18] sm:$0xff]  ;;  %v4977_v32 = vld [vmem:[#allocation2 + $0xc] sm:$0xff]  ;;  %v6187_v5 = vld [vmem:[#allocation2 + $0x14] sm:$0x1] }
 0x12c   : > { %v3331_v4 = vunpack.c.l.b16 %v1938_v35  ;;  %v2025_v34 = vshrl.u32 %v6152_v61, 16  ;;  %v3322_v2 = vunpack.c.l.b16 %v1907_v16  ;;  %v3345_v12 = vpack.c.b16 %v3327_v46, %v3326_v18  ;;  %v4964_v55 = vld [vmem:[#allocation2 + $0x24] sm:$0xff] }
 0x12d   : > { %v2014_v39 = vrot.slane %v2012_v63, 4  ;;  %v2017_v22 = vrot.slane %v2015_v13, 5  ;;  %v3323_v42 = vunpack.c.l.b16 %v1910_v1  ;;  %v4698_v44 = vrot.slane %v1774_v51, 9  ;;  %v6201_v16 = vld [vmem:[#allocation2 + $0x28] sm:$0xf]  ;;  %v3277_v35 = vpop.permute.xlu1 %3276 }
 0x12e   : > { %3372 = vrot.lane.b32.xlu1 %v3344_v47, %s5125_s26  ;;  %v6171_v43 = vrot.slane %v2021_v3, 5  ;;  %v2027_v30 = vrot.slane %v2025_v34, 4  ;;  %v1929_v50 = vrot.slane %v1927_v62, 4  ;;  %v1930_v57 = vrot.slane %v6013_v14, 5  ;;  %v1947_v63 = vld [vmem:[#allocation2 + $0x3c] sm:$0xf] }
 0x12f   : > { %v1988_v19 = vshrl.u32 %v1939_v10, 16  ;;  %v1991_v20 = vshll.u32 %v1939_v10, 16  ;;  %v3347_v25 = vpack.c.b16 %v3331_v4, %v3330_v48  ;;  %v2018_v60 = vor.u32 %v2017_v22, %v2014_v39  ;;  %v4979_v48 = vld [vmem:[#allocation2 + $0x24] sm:$0xff]  ;;  %v6214_v10 = vld [vmem:[#allocation2 + $0x40] sm:$0xf] }
 0x130   : > { %v1997_v21 = vshll.u32 %v6167_v52, 16  ;;  %v2001_v27 = vshrl.u32 %v6167_v52, 16  ;;  %v2028_v36 = vor.u32 %v2027_v30, %v6171_v43  ;;  %v2031_v37 = vshll.u32 %v6169_v0, 16  ;;  %v4969_v30 = vld [vmem:[#allocation2 + $0x60] sm:$0xff] }
 0x131   : > { %3364 = vrot.lane.b32.xlu0 %v3340_v28, %s5125_s26  ;;  %vm3892_vm2 = vcmask 64512   ;;  %v3343_v40 = vpack.c.b16 %v3323_v42, %v3322_v2  ;;  %v1990_v41 = vrot.slane %v1988_v19, 4  ;;  %v1993_v24 = vrot.slane %v1991_v20, 5 }
 0x132   : > { %v6180_v58 = vrot.slane %v1997_v21, 5  ;;  %v2003_v14 = vrot.slane %v2001_v27, 4  ;;  %v1928_v26 = vsel %vm6028_vm4, %v4698_v44, %v1927_v62  ;;  %v1931_v9 = vsel %vm6028_vm4, %v1929_v50, %v1930_v57 }
 0x133   : > { %3374 = vrot.lane.b32.xlu2 %v3345_v12, %s5125_s26  ;;  %v2019_v38 = vrot.slane %v2018_v60, 4  ;;  %v2036_v53 = vshrl.u32 %v1943_v31, 16  ;;  %v2029_v54 = vrot.slane %v2028_v36, 4  ;;  %v2033_v47 = vrot.slane %v2031_v37, 5  ;;  %v1945_v60 = vld [vmem:[#allocation2 + $0x30] sm:$0xf] }
 0x134   : > { %v2039_v56 = vshll.u32 %v1943_v31, 16  ;;  %v6191_v18 = vsel %vm3892_vm2, %v4963_v6, %v6148_v29  ;;  %v6194_v46 = vsel %vm3892_vm2, %v4962_v49, %v3271_v45  ;;  %v6198_v23 = vsel %vm3892_vm2, %v4961_v7, %v6154_v17  ;;  %v4965_v17 = vld [vmem:[#allocation2 + $0x30] sm:$0xff]  ;;  %v4967_v31 = vld [vmem:[#allocation2 + $0x48] sm:$0xff] }
 0x135   : > { %v2004_v28 = vor.u32 %v2003_v14, %v6180_v58  ;;  %v6204_v1 = vsel %vm3892_vm2, %v4966_v8, %v3279_v33  ;;  %v3328_v51 = vunpack.c.l.b16 %v1928_v26  ;;  %v3329_v62 = vunpack.c.l.b16 %v1931_v9  ;;  %v3285_v2 = vpop.permute.xlu2 %3284  ;;  %v4980_v7 = vld [vmem:[#allocation2 + $0x30] sm:$0xff] }
 0x136   : > { %3378 = vrot.lane.b32.xlu1 %v3347_v25, %s5125_s26  ;;  %7606 = vst [vmem:[#allocation3_spill] sm:$0xff] %v6204_v1  ;;  %v1994_v29 = vor.u32 %v1993_v24, %v1990_v41  ;;  %v6208_v13 = vsel %vm3892_vm2, %v4964_v55, %v3275_v59  ;;  %v2024_v4 = vsel %vm5563_vm0, %v2019_v38, %v6171_v43  ;;  %v2007_v3 = vshll.u32 %v6187_v5, 16  ;;  %v6239_v6 = vld [vmem:[#allocation2 + $0x34] sm:$0xf]  ;;  %v6243_v59 = vld [vmem:[#allocation2 + $0x2c] sm:$0x1] }
 0x137   : > { %v2038_v34 = vrot.slane %v2036_v53, 4  ;;  %v2034_v12 = vsel %vm5563_vm0, %v2029_v54, %v2033_v47  ;;  %v2041_v39 = vrot.slane %v2039_v56, 5  ;;  %v2045_v22 = vshll.u32 %v6201_v16, 16  ;;  %v1949_v54 = vld [vmem:[#allocation2 + $0x48] sm:$0xf] }
 0x138   : > { %v2049_v42 = vshrl.u32 %v6201_v16, 16  ;;  %v6221_v44 = vsel %vm3892_vm2, %v4965_v17, %v3277_v35  ;;  %v2005_v43 = vrot.slane %v2004_v28, 4  ;;  %v2084_v45 = vshrl.u32 %v1947_v63, 16  ;;  %v4982_v47 = vld [vmem:[#allocation2 + $0x48] sm:$0xff]  ;;  %v1982_v1 = vld [vmem:[#allocation2 + $0x98] sm:$0x1] }
 0x139   : > { %3370 = vrot.lane.b32.xlu0 %v3343_v40, %s5125_s26  ;;  %v2087_v50 = vshll.u32 %v1947_v63, 16  ;;  %v3346_v57 = vpack.c.b16 %v3329_v62, %v3328_v51  ;;  %v1995_v19 = vrot.slane %v1994_v29, 4  ;;  %v2093_v20 = vshll.u32 %v6214_v10, 16  ;;  %v1950_v51 = vld [vmem:[#allocation2 + $0x4c] sm:$0xf] }
 0x13a   : > { %v2097_v25 = vshrl.u32 %v6214_v10, 16  ;;  %v6227_v21 = vsel %vm3892_vm2, %v4969_v30, %v3285_v2  ;;  %v3281_v27 = vpop.permute.xlu0 %3280  ;;  %v6229_v33 = vunpack.c.l.b16 %v2024_v4  ;;  %v6231_v36 = vunpack.c.l.b16 %v2034_v12  ;;  %v4978_v12 = vld [vmem:[#allocation2 + $0x18] sm:$0xff] }
 0x13b   : > { %3444 = vrot.lane.b32.xlu2 %v4977_v32, %s5126_s27  ;;  %7607 = vst [vmem:[#allocation4_spill] sm:$0xff] %v6227_v21  ;;  %v2009_v37 = vrot.slane %v2007_v3, 5  ;;  %v2000_v14 = vsel %vm5563_vm0, %v1995_v19, %v6180_v58  ;;  %v2042_v40 = vor.u32 %v2041_v39, %v2038_v34  ;;  %v6237_v41 = vrot.slane %v2045_v22, 5 }
 0x13c   : > { %v2051_v24 = vrot.slane %v2049_v42, 4  ;;  %v2086_v26 = vrot.slane %v2084_v45, 4  ;;  %v2089_v9 = vrot.slane %v2087_v50, 5  ;;  %v2060_v32 = vshrl.u32 %v1945_v60, 16  ;;  %v6266_v45 = vld [vmem:[#allocation2 + $0x38] sm:$0x1] }
 0x13d   : > { %v2010_v49 = vsel %vm5563_vm0, %v2005_v43, %v2009_v37  ;;  %v6246_v38 = vsel %vm3892_vm2, %v4967_v31, %v3281_v27  ;;  %v6249_v58 = vrot.slane %v2093_v20, 5  ;;  %v2099_v53 = vrot.slane %v2097_v25, 4  ;;  %v4983_v20 = vld [vmem:[#allocation2 + $0x54] sm:$0xff] }
 0x13e   : > { %3448 = vrot.lane.b32.xlu1 %v4979_v48, %s5126_s27  ;;  %v2063_v8 = vshll.u32 %v1945_v60, 16  ;;  %v2055_v55 = vshll.u32 %v6243_v59, 16  ;;  %v2069_v28 = vshll.u32 %v6239_v6, 16  ;;  %v2073_v35 = vshrl.u32 %v6239_v6, 16  ;;  %v6261_v48 = vld [vmem:[#allocation2 + $0x44] sm:$0x1] }
 0x13f   : > { %v6256_v62 = vunpack.c.l.b16 %v2000_v14  ;;  %v6258_v29 = vunpack.c.l.b16 %v2010_v49  ;;  %v2043_v63 = vrot.slane %v2042_v40, 4  ;;  %v2052_v17 = vor.u32 %v2051_v24, %v6237_v41  ;;  %v1976_v60 = vld [vmem:[#allocation2 + $0x50] sm:$0x1]  ;;  %v1954_v49 = vld [vmem:[#allocation2 + $0x64] sm:$0xf] }
 0x140   : > { %v2090_v4 = vor.u32 %v2089_v9, %v2086_v26  ;;  %v2103_v3 = vshll.u32 %v6261_v48, 16  ;;  %v2062_v34 = vrot.slane %v2060_v32, 4  ;;  %v2108_v2 = vshrl.u32 %v1949_v54, 16 }
 0x141   : > { %3376 = vrot.lane.b32.xlu0 %v3346_v57, %s5125_s26  ;;  %v2100_v39 = vor.u32 %v2099_v53, %v6249_v58  ;;  %v2065_v22 = vrot.slane %v2063_v8, 5  ;;  %v2111_v42 = vshll.u32 %v1949_v54, 16  ;;  %v2117_v30 = vshll.u32 %v1950_v51, 16  ;;  %v1953_v8 = vld [vmem:[#allocation2 + $0x60] sm:$0xf]  ;;  %s224_s26 = scalar_lea.vmem %s7587_s3, %s4960_s23 }
 0x142   : > { %v2057_v43 = vrot.slane %v2055_v55, 5  ;;  %v6268_v50 = vrot.slane %v2069_v28, 5  ;;  %v2075_v57 = vrot.slane %v2073_v35, 4  ;;  %v2121_v19 = vshrl.u32 %v1950_v51, 16  ;;  %v1951_v54 = vld [vmem:[#allocation2 + $0x54] sm:$0xf] }
 0x143   : > { %3450 = vrot.lane.b32.xlu2 %v4980_v7, %s5126_s27  ;;  %v2110_v27 = vrot.slane %v2108_v2, 4  ;;  %v2113_v37 = vrot.slane %v2111_v42, 5  ;;  %v6273_v31 = vrot.slane %v2117_v30, 5  ;;  %v2053_v7 = vrot.slane %v2052_v17, 4 }
 0x144   : > { %v2091_v14 = vrot.slane %v2090_v4, 4  ;;  %v2105_v40 = vrot.slane %v2103_v3, 5  ;;  %v2123_v24 = vrot.slane %v2121_v19, 4  ;;  %v2048_v26 = vsel %vm5563_vm0, %v2043_v63, %v6237_v41  ;;  %v1952_v19 = vld [vmem:[#allocation2 + $0x58] sm:$0xf] }
 0x145   : > { %v2101_v9 = vrot.slane %v2100_v39, 4  ;;  %v2066_v32 = vor.u32 %v2065_v22, %v2062_v34  ;;  %v2079_v53 = vshll.u32 %v6266_v45, 16  ;;  %v2076_v55 = vor.u32 %v2075_v57, %v6268_v50  ;;  %v4981_v39 = vld [vmem:[#allocation2 + $0x3c] sm:$0xff] }
 0x146   : > { %3454 = vrot.lane.b32.xlu1 %v4982_v47, %s5126_s27  ;;  %v4985_v47 = vld [vmem:[#allocation2 + $0x6c] sm:$0xff]  ;;  %v2127_v28 = vshll.u32 %v1976_v60, 16  ;;  %v2156_v35 = vshrl.u32 %v1953_v8, 16  ;;  %v2159_v51 = vshll.u32 %v1953_v8, 16  ;;  %v2114_v17 = vor.u32 %v2113_v37, %v2110_v27 }
 0x147   : > { %v2124_v4 = vor.u32 %v2123_v24, %v6273_v31  ;;  %v2165_v3 = vshll.u32 %v1954_v49, 16  ;;  %v2169_v2 = vshrl.u32 %v1954_v49, 16  ;;  %v2058_v41 = vsel %vm5563_vm0, %v2053_v7, %v2057_v43  ;;  %v4986_v43 = vld [vmem:[#allocation2 + $0x78] sm:$0xff] }
 0x148   : > { %v6285_v63 = vunpack.c.l.b16 %v2048_v26  ;;  %v2132_v34 = vshrl.u32 %v1951_v54, 16  ;;  %v2096_v22 = vsel %vm5563_vm0, %v2091_v14, %v6249_v58  ;;  %v2067_v42 = vrot.slane %v2066_v32, 4 }
 0x149   : > { %3446 = vrot.lane.b32.xlu0 %v4978_v12, %s5126_s27  ;;  %v2135_v12 = vshll.u32 %v1951_v54, 16  ;;  %v2158_v30 = vrot.slane %v2156_v35, 4  ;;  %v2161_v57 = vrot.slane %v2159_v51, 5  ;;  %v2077_v60 = vrot.slane %v2076_v55, 4  ;;  %v1955_v55 = vld [vmem:[#allocation2 + $0x6c] sm:$0xf] }
 0x14a   : > { %v2081_v27 = vrot.slane %v2079_v53, 5  ;;  %v2129_v37 = vrot.slane %v2127_v28, 5  ;;  %v2115_v7 = vrot.slane %v2114_v17, 4  ;;  %v2125_v24 = vrot.slane %v2124_v4, 4  ;;  %v1978_v53 = vld [vmem:[#allocation2 + $0x68] sm:$0x1] }
 0x14b   : > { %3456 = vrot.lane.b32.xlu2 %v4983_v20, %s5126_s27  ;;  %v2106_v20 = vsel %vm5563_vm0, %v2101_v9, %v2105_v40  ;;  %v6293_v49 = vrot.slane %v2165_v3, 5  ;;  %v2171_v26 = vrot.slane %v2169_v2, 4  ;;  %v2134_v8 = vrot.slane %v2132_v34, 4  ;;  %v4988_v28 = vld [vmem:[#allocation2 + $0x90] sm:$0xff] }
 0x14c   : > { %v2137_v58 = vrot.slane %v2135_v12, 5  ;;  %v2141_v14 = vshll.u32 %v1952_v19, 16  ;;  %v2145_v32 = vshrl.u32 %v1952_v19, 16  ;;  %v6296_v54 = vunpack.c.l.b16 %v2058_v41  ;;  %v6307_v4 = vld [vmem:[#allocation2 + $0x70] sm:$0xf] }
 0x14d   : > { %v6298_v40 = vunpack.c.l.b16 %v2096_v22  ;;  %v2072_v9 = vsel %vm5563_vm0, %v2067_v42, %v6268_v50  ;;  %v6303_v35 = vunpack.c.l.b16 %v2106_v20  ;;  %v2180_v3 = vshrl.u32 %v1955_v55, 16  ;;  %v4984_v50 = vld [vmem:[#allocation2 + $0x60] sm:$0xff]  ;;  %v1977_v19 = vld [vmem:[#allocation2 + $0x5c] sm:$0x1] }
 0x14e   : > { %3460 = vrot.lane.b32.xlu1 %v4985_v47, %s5126_s27  ;;  %v2162_v47 = vor.u32 %v2161_v57, %v2158_v30  ;;  %v6305_v51 = vrot.slane %v2141_v14, 5  ;;  %v2147_v17 = vrot.slane %v2145_v32, 4  ;;  %v2082_v2 = vsel %vm5563_vm0, %v2077_v60, %v2081_v27 }
 0x14f   : > { %v2172_v41 = vor.u32 %v2171_v26, %v6293_v49  ;;  %v2175_v34 = vshll.u32 %v1978_v53, 16  ;;  %v2183_v12 = vshll.u32 %v1955_v55, 16  ;;  %v2120_v22 = vsel %vm5563_vm0, %v2115_v7, %v6273_v31  ;;  %v4968_v53 = vld [vmem:[#allocation2 + $0x54] sm:$0xff]  ;;  %v4989_v31 = vld [vmem:[#allocation2 + $0x9c] sm:$0xff] }
 0x150   : > { %v2130_v42 = vsel %vm5563_vm0, %v2125_v24, %v2129_v37  ;;  %v2138_v30 = vor.u32 %v2137_v58, %v2134_v8  ;;  %v2163_v57 = vrot.slane %v2162_v47, 4  ;;  %v2182_v20 = vrot.slane %v2180_v3, 4 }
 0x151   : > { %3452 = vrot.lane.b32.xlu0 %v4981_v39, %s5126_s27  ;;  %v6313_v39 = vunpack.c.l.b16 %v2072_v9  ;;  %v2185_v60 = vrot.slane %v2183_v12, 5  ;;  %v2189_v27 = vshll.u32 %v6307_v4, 16  ;;  %v6321_v26 = vunpack.c.l.b16 %v2082_v2  ;;  %v1957_v12 = vld [vmem:[#allocation2 + $0x78] sm:$0xf] }
 0x152   : > { %v2148_v14 = vor.u32 %v2147_v17, %v6305_v51  ;;  %v2151_v32 = vshll.u32 %v1977_v19, 16  ;;  %v2193_v9 = vshrl.u32 %v6307_v4, 16  ;;  %v2173_v37 = vrot.slane %v2172_v41, 4 }
 0x153   : > { %3462 = vrot.lane.b32.xlu2 %v4986_v43, %s5126_s27  ;;  %v3283_v43 = vpop.permute.xlu1 %3282  ;;  %v2177_v7 = vrot.slane %v2175_v34, 5  ;;  %v2186_v24 = vor.u32 %v2185_v60, %v2182_v20  ;;  %v2191_v8 = vrot.slane %v2189_v27, 5  ;;  %v6326_v58 = vunpack.c.l.b16 %v2120_v22  ;;  %v6344_v20 = vld [vmem:[#allocation2 + $0x7c] sm:$0xf]  ;;  %v6346_v60 = vpop.permute.xlu2 %3290 }
 0x154   : > { %v6328_v47 = vunpack.c.l.b16 %v2130_v42  ;;  %v2139_v55 = vrot.slane %v2138_v30, 4  ;;  %v2195_v3 = vrot.slane %v2193_v9, 4  ;;  %v6333_v17 = vsel %vm3892_vm2, %v4968_v53, %v3283_v43  ;;  %7608 = vst [vmem:[#allocation5_spill] sm:$0xff] %v6344_v20 }
 0x155   : > { %v2168_v41 = vsel %vm5563_vm0, %v2163_v57, %v6293_v49  ;;  %v2149_v42 = vrot.slane %v2148_v14, 4  ;;  %v2153_v30 = vrot.slane %v2151_v32, 5  ;;  %7609 = vst [vmem:[#allocation6_spill] sm:$0xff] %v6346_v60  ;;  %v2178_v27 = vsel %vm5563_vm0, %v2173_v37, %v2177_v7  ;;  %v2371_v57 = vld [vmem:[#allocation2 + $0xc] sm:$0xe] }
 0x156   : > { %3466 = vrot.lane.b32.xlu1 %v4988_v28, %s5126_s27  ;;  %v6330_v28 = vld [vmem:[#allocation2 + $0x74] sm:$0x1]  ;;  %v2196_v19 = vor.u32 %v2195_v3, %v2191_v8  ;;  %v2187_v43 = vrot.slane %v2186_v24, 4  ;;  %v2204_v9 = vshrl.u32 %v1957_v12, 16  ;;  %v2207_v49 = vshll.u32 %v1957_v12, 16  ;;  %v4987_v3 = vld [vmem:[#allocation2 + $0x84] sm:$0xff] }
 0x157   : > { %v2199_v34 = vshll.u32 %v6330_v28, 16  ;;  %v6355_v32 = vunpack.c.l.b16 %v2168_v41  ;;  %v2213_v24 = vshll.u32 %v6344_v20, 16  ;;  %v2217_v12 = vshrl.u32 %v6344_v20, 16 }
 0x158   : > { %v2197_v37 = vrot.slane %v2196_v19, 4  ;;  %v6362_v25 = vunpack.c.l.b16 %v2178_v27  ;;  %v2154_v53 = vsel %vm5563_vm0, %v2149_v42, %v2153_v30  ;;  %v4700_v14 = vrot.slane %v2371_v57, 9 }
 0x159   : > { %3458 = vrot.lane.b32.xlu0 %v4984_v50, %s5126_s27  ;;  %v4991_v50 = vld [vmem:[#allocation2 + $0xb4] sm:$0xff]  ;;  %v2201_v7 = vrot.slane %v2199_v34, 5  ;;  %v2437_v41 = vrot.slane %v6167_v52, 5  ;;  %v1960_v34 = vld [vmem:[#allocation2 + $0x88] sm:$0xf]  ;;  %v2206_v19 = vrot.slane %v2204_v9, 4  ;;  %v6373_v42 = vunpack.c.l.b16 %v2154_v53 }
 0x15a   : > { %v2209_v2 = vrot.slane %v2207_v49, 5  ;;  %v2237_v20 = vshll.u32 %v1960_v34, 16  ;;  %v2241_v21 = vshrl.u32 %v1960_v34, 16  ;;  %vm3941_vm5 = vcmask 130048  }
 0x15b   : > { %3468 = vrot.lane.b32.xlu2 %v4989_v31, %s5126_s27  ;;  %v2144_v31 = vsel %vm5563_vm0, %v2139_v55, %v6305_v51  ;;  %v2192_v51 = vsel %vm5563_vm0, %v2187_v43, %v2191_v8  ;;  %v1959_v55 = vld [vmem:[#allocation2 + $0x84] sm:$0xf]  ;;  %v2202_v52 = vsel %vm5563_vm0, %v2197_v37, %v2201_v7  ;;  %v6377_v30 = vrot.slane %v2213_v24, 5  ;;  %v1981_v8 = vld [vmem:[#allocation2 + $0x8c] sm:$0x1] }
 0x15c   : > { %v6368_v22 = vunpack.c.l.b16 %v2144_v31  ;;  %v2228_v56 = vshrl.u32 %v1959_v55, 16  ;;  %v2231_v27 = vshll.u32 %v1959_v55, 16  ;;  %v2219_v57 = vrot.slane %v2217_v12, 4  ;;  %v6389_v37 = vld [vmem:[#allocation2 + $0x18] sm:$0xe] }
 0x15d   : > { %v6379_v9 = vrot.slane %v2237_v20, 5  ;;  %v2243_v49 = vrot.slane %v2241_v21, 4  ;;  %v6383_v55 = vunpack.c.l.b16 %v2192_v51  ;;  %v6387_v53 = vsel %vm6028_vm4, %v4700_v14, %v2437_v41  ;;  %v6398_v24 = vld [vmem:[#allocation2 + $0x80] sm:$0x1]  ;;  %v4990_v14 = vld [vmem:[#allocation2 + $0xa8] sm:$0xff] }
 0x15e   : > { %3472 = vrot.lane.b32.xlu1 %v4991_v50, %s5126_s27  ;;  %v4992_v50 = vld [vmem:[#allocation2 + $0xc0] sm:$0xff]  ;;  %v2230_v43 = vrot.slane %v2228_v56, 4  ;;  %v2233_v31 = vrot.slane %v2231_v27, 5  ;;  %v2439_v34 = vrot.slane %v2437_v41, 4  ;;  %v7611_v56 = vpack.c.b16 %v6231_v36, %v6229_v33  ;;  %7612 = vst [vmem:[#allocation8_spill] sm:$0xff] %v6398_v24  ;;  %v4971_v36 = vld [vmem:[#allocation2 + $0x78] sm:$0xff] }
 0x15f   : > { %v6395_v20 = vunpack.c.l.b16 %v2202_v52  ;;  %v2244_v7 = vor.u32 %v2243_v49, %v6379_v9  ;;  %v2210_v12 = vor.u32 %v2209_v2, %v2206_v19  ;;  %v2220_v27 = vor.u32 %v2219_v57, %v6377_v30  ;;  %v1962_v41 = vld [vmem:[#allocation2 + $0x94] sm:$0xf]  ;;  %v1965_v2 = vld [vmem:[#allocation2 + $0xa8] sm:$0xf] }
 0x160   : > { %v2234_v21 = vor.u32 %v2233_v31, %v2230_v43  ;;  %v2440_v33 = vrot.slane %v6187_v5, 5  ;;  %v2265_v5 = vshrl.u32 %v1962_v41, 16  ;;  %vm4007_vm7 = vcmask 261120  }
 0x161   : > { %3464 = vrot.lane.b32.xlu0 %v4987_v3, %s5126_s27  ;;  %v2245_v19 = vrot.slane %v2244_v7, 4  ;;  %v2211_v31 = vrot.slane %v2210_v12, 4  ;;  %v2221_v7 = vrot.slane %v2220_v27, 4  ;;  %v2300_v27 = vshrl.u32 %v1965_v2, 16 }
 0x162   : > { %v3289_v51 = vpop.permute.xlu1 %3288  ;;  %v2235_v43 = vrot.slane %v2234_v21, 4  ;;  %v6412_v57 = vsel %vm6028_vm4, %v2439_v34, %v2440_v33  ;;  %v2261_v33 = vshll.u32 %v1962_v41, 16  ;;  %v2267_v41 = vrot.slane %v2265_v5, 4 }
 0x163   : > { %3474 = vrot.lane.b32.xlu2 %v4992_v50, %s5126_s27  ;;  %v2247_v50 = vshll.u32 %v1981_v8, 16  ;;  %v2223_v8 = vshll.u32 %v6398_v24, 16  ;;  %v6416_v24 = vsel %vm3892_vm2, %v4971_v36, %v3289_v51  ;;  %vm4073_vm10 = vcmask 392192  }
 0x164   : > { %v2240_v51 = vsel %vm5563_vm0, %v2235_v43, %v6379_v9  ;;  %v2303_v43 = vshll.u32 %v1965_v2, 16  ;;  %vm4106_vm11 = vcmask 457728   ;;  %vm4139_vm12 = vcmask 523264  }
 0x165   : > { %v6381_v3 = vpop.permute.xlu2 %3296  ;;  %v2249_v49 = vrot.slane %v2247_v50, 5  ;;  %v7613_v50 = vpack.c.b16 %v6296_v54, %v6285_v63  ;;  %v2263_v54 = vrot.slane %v2261_v33, 5  ;;  %vm4208_vm13 = vcmask 588800  }
 0x166   : > { %7610 = vst [vmem:[#allocation7_spill] sm:$0xff] %v6381_v3  ;;  %3526 = vrot.lane.b32.xlu1 %v7611_v56, %s5127_s28  ;;  %v1961_v56 = vld [vmem:[#allocation2 + $0x90] sm:$0xf]  ;;  %v1966_v3 = vld [vmem:[#allocation2 + $0xac] sm:$0xf]  ;;  %v2305_v33 = vrot.slane %v2303_v43, 5 }
 0x167   : > { %v2252_v52 = vshrl.u32 %v1961_v56, 16  ;;  %v2255_v34 = vshll.u32 %v1961_v56, 16  ;;  %v2250_v60 = vsel %vm5563_vm0, %v2245_v19, %v2249_v49  ;;  %v2309_v12 = vshll.u32 %v1966_v3, 16  ;;  %v1963_v49 = vld [vmem:[#allocation2 + $0x9c] sm:$0xf] }
 0x168   : > { %v2313_v19 = vshrl.u32 %v1966_v3, 16 }
 0x169   : > { %3470 = vrot.lane.b32.xlu0 %v4990_v14, %s5126_s27  ;;  %v2225_v14 = vrot.slane %v2223_v8, 5  ;;  %v2254_v36 = vrot.slane %v2252_v52, 4  ;;  %v2257_v63 = vrot.slane %v2255_v34, 5  ;;  %v7614_v8 = vpack.c.b16 %v6303_v35, %v6298_v40 }
 0x16a   : > { %v2271_v52 = vshll.u32 %v1982_v1, 16  ;;  %v2216_v34 = vsel %vm5563_vm0, %v2211_v31, %v6377_v30  ;;  %v2268_v35 = vor.u32 %v2267_v41, %v2263_v54  ;;  %v6449_v1 = vunpack.c.l.b16 %v2240_v51  ;;  %v1984_v31 = vld [vmem:[#allocation2 + $0xb0] sm:$0x1] }
 0x16b   : > { %3528 = vrot.lane.b32.xlu2 %v7613_v50, %s5127_s28  ;;  %v2258_v56 = vor.u32 %v2257_v63, %v2254_v36  ;;  %v2302_v50 = vrot.slane %v2300_v27, 4  ;;  %v2226_v40 = vsel %vm5563_vm0, %v2221_v7, %v2225_v14  ;;  %v2311_v2 = vrot.slane %v2309_v12, 5 }
 0x16c   : > { %v2315_v5 = vrot.slane %v2313_v19, 4  ;;  %v2273_v30 = vrot.slane %v2271_v52, 5  ;;  %v2276_v7 = vshrl.u32 %v1963_v49, 16  ;;  %v7616_v14 = vpack.c.b16 %v6328_v47, %v6326_v58  ;;  %v1967_v19 = vld [vmem:[#allocation2 + $0xb4] sm:$0xf] }
 0x16d   : > { %v3351_v21 = vpop.permute.xlu2 %3350  ;;  %v2259_v3 = vrot.slane %v2258_v56, 4  ;;  %v2306_v36 = vor.u32 %v2305_v33, %v2302_v50  ;;  %v2269_v63 = vrot.slane %v2268_v35, 4  ;;  %v2319_v27 = vshll.u32 %v1984_v31, 16 }
 0x16e   : > { %3532 = vrot.lane.b32.xlu1 %v7614_v8, %s5127_s28  ;;  %v6436_v9 = vsel %vm3941_vm5, %v6194_v46, %v3351_v21  ;;  %v6443_v8 = vld [vmem:[#allocation2 + $0xa0] sm:$0xf]  ;;  %v7615_v46 = vpack.c.b16 %v6258_v29, %v6256_v62  ;;  %v6451_v21 = vunpack.c.l.b16 %v2250_v60  ;;  %v2279_v62 = vshll.u32 %v1963_v49, 16 }
 0x16f   : > { %v2285_v29 = vshll.u32 %v6443_v8, 16  ;;  %v6458_v51 = vunpack.c.l.b16 %v2216_v34  ;;  %v2316_v12 = vor.u32 %v2315_v5, %v2311_v2  ;;  %v2278_v41 = vrot.slane %v2276_v7, 4 }
 0x170   : > { %v7617_v60 = vrot.slane %v6152_v61, 5  ;;  %v6464_v56 = vunpack.c.l.b16 %v2226_v40  ;;  %v2264_v58 = vsel %vm5563_vm0, %v2259_v3, %v2263_v54  ;;  %v2307_v47 = vrot.slane %v2306_v36, 4  ;;  %v6478_v40 = vld [vmem:[#allocation2 + $0xa4] sm:$0x1] }
 0x171   : > { %3524 = vrot.lane.b32.xlu0 %v7615_v46, %s5127_s28  ;;  %v2281_v50 = vrot.slane %v2279_v62, 5  ;;  %v7618_v49 = vpack.c.b16 %v6362_v25, %v6355_v32  ;;  %v3518_v35 = vpack.c.b16 %v6451_v21, %v6449_v1  ;;  %7619 = vst [vmem:[#allocation9_spill] sm:$0xff] %v6478_v40  ;;  %v2287_v33 = vrot.slane %v2285_v29, 5  ;;  %v1968_v46 = vld [vmem:[#allocation2 + $0xb8] sm:$0xf] }
 0x172   : > { %v6462_v52 = vrot.slane %v7617_v60, 4  ;;  %v2289_v54 = vshrl.u32 %v6443_v8, 16  ;;  %v2274_v3 = vsel %vm5563_vm0, %v2269_v63, %v2273_v30  ;;  %v2321_v5 = vrot.slane %v2319_v27, 5 }
 0x173   : > { %3534 = vrot.lane.b32.xlu2 %v7616_v14, %s5127_s28  ;;  %v2282_v31 = vor.u32 %v2281_v50, %v2278_v41  ;;  %v2295_v25 = vshll.u32 %v6478_v40, 16  ;;  %v2317_v36 = vrot.slane %v2316_v12, 4  ;;  %v2324_v14 = vshrl.u32 %v1967_v19, 16  ;;  %v1985_v41 = vld [vmem:[#allocation2 + $0xbc] sm:$0x1]  ;;  %v6492_v12 = vpop.permute.xlu0 %3286 }
 0x174   : > { %v2291_v7 = vrot.slane %v2289_v54, 4  ;;  %v7620_v1 = vpack.c.b16 %v6321_v26, %v6313_v39  ;;  %v2312_v21 = vsel %vm5563_vm0, %v2307_v47, %v2311_v2  ;;  %v2327_v30 = vshll.u32 %v1967_v19, 16  ;;  %v1970_v47 = vld [vmem:[#allocation2 + $0xc4] sm:$0xf] }
 0x175   : > { %v3357_v43 = vpop.permute.xlu2 %3356  ;;  %v2283_v62 = vrot.slane %v2282_v31, 4  ;;  %v2333_v63 = vshll.u32 %v1968_v46, 16  ;;  %v3499_v27 = vunpack.c.l.b16 %v2274_v3  ;;  %v2326_v60 = vrot.slane %v2324_v14, 4 }
 0x176   : > { %3538 = vrot.lane.b32.xlu1 %v7618_v49, %s5127_s28  ;;  %v6474_v34 = vsel %vm3941_vm5, %v6221_v44, %v3357_v43  ;;  %v3498_v44 = vunpack.c.l.b16 %v2264_v58  ;;  %v2292_v29 = vor.u32 %v2291_v7, %v2287_v33  ;;  %v2337_v43 = vshrl.u32 %v1968_v46, 16  ;;  %v1969_v58 = vld [vmem:[#allocation2 + $0xc0] sm:$0xf] }
 0x177   : > { %v7621_v50 = vpack.c.b16 %v6395_v20, %v6383_v55  ;;  %v2297_v39 = vrot.slane %v2295_v25, 5  ;;  %v2329_v26 = vrot.slane %v2327_v30, 5  ;;  %v2335_v49 = vrot.slane %v2333_v63, 5 }
 0x178   : > { %v6484_v32 = vpop.permute.xlu1 %3294  ;;  %v2343_v2 = vshll.u32 %v1985_v41, 16  ;;  %v2322_v19 = vsel %vm5563_vm0, %v2317_v36, %v2321_v5  ;;  %v3502_v54 = vunpack.c.l.b16 %v2312_v21  ;;  %v2293_v3 = vrot.slane %v2292_v29, 4  ;;  %v1986_v41 = vld [vmem:[#allocation2 + $0xc8] sm:$0x1] }
 0x179   : > { %3530 = vrot.lane.b32.xlu0 %v7620_v1, %s5127_s28  ;;  %v2339_v31 = vrot.slane %v2337_v43, 4  ;;  %v2288_v7 = vsel %vm5563_vm0, %v2283_v62, %v2287_v33  ;;  %v2330_v14 = vor.u32 %v2329_v26, %v2326_v60  ;;  %v2348_v1 = vshrl.u32 %v1969_v58, 16 }
 0x17a   : > { %v2351_v40 = vshll.u32 %v1969_v58, 16  ;;  %v2345_v25 = vrot.slane %v2343_v2, 5  ;;  %v2357_v30 = vshll.u32 %v1970_v47, 16  ;;  %v2298_v5 = vsel %vm5563_vm0, %v2293_v3, %v2297_v39 }
 0x17b   : > { %3540 = vrot.lane.b32.xlu2 %v7621_v50, %s5127_s28  ;;  %v2340_v20 = vor.u32 %v2339_v31, %v2335_v49  ;;  %v2331_v36 = vrot.slane %v2330_v14, 4  ;;  %v2350_v21 = vrot.slane %v2348_v1, 4  ;;  %v3503_v33 = vunpack.c.l.b16 %v2322_v19  ;;  %v6525_v19 = vpop.permute.xlu0 %3292 }
 0x17c   : > { %v2353_v63 = vrot.slane %v2351_v40, 5  ;;  %v2359_v60 = vrot.slane %v2357_v30, 5  ;;  %v2361_v43 = vshrl.u32 %v1970_v47, 16  ;;  %v3519_v58 = vpack.c.b16 %v3499_v27, %v3498_v44  ;;  %v2373_v27 = vld [vmem:[#allocation2 + $0x24] sm:$0xe] }
 0x17d   : > { %v3363_v46 = vpop.permute.xlu2 %3362  ;;  %v2341_v62 = vrot.slane %v2340_v20, 4  ;;  %v2336_v50 = vsel %vm5563_vm0, %v2331_v36, %v2335_v49  ;;  %v6519_v39 = vunpack.c.l.b16 %v2288_v7  ;;  %v6521_v26 = vunpack.c.l.b16 %v2298_v5  ;;  %v4974_v49 = vld [vmem:[#allocation2 + $0x9c] sm:$0xff]  ;;  %v2548_v20 = vld [vmem:[#allocation2 + $0x18] sm:$0xf] }
 0x17e   : > { %3544 = vrot.lane.b32.xlu1 %v3518_v35, %s5127_s28  ;;  %v6505_v55 = vsel %vm3941_vm5, %v6333_v17, %v3363_v46  ;;  %v7622_v17 = vpack.c.b16 %v6373_v42, %v6368_v22  ;;  %v2354_v40 = vor.u32 %v2353_v63, %v2350_v21  ;;  %v2363_v47 = vrot.slane %v2361_v43, 4  ;;  %v2374_v43 = vld [vmem:[#allocation2 + $0x30] sm:$0xe] }
 0x17f   : > { %v2346_v2 = vsel %vm5563_vm0, %v2341_v62, %v2345_v25  ;;  %v3504_v22 = vunpack.c.l.b16 %v2336_v50  ;;  %v2367_v42 = vshll.u32 %v1986_v41, 16  ;;  %v2447_v44 = vrot.slane %v6169_v0, 5  ;;  %v6558_v41 = vld [vmem:[#allocation2 + $0x20] sm:$0x1] }
 0x180   : > { %v3349_v29 = vpop.permute.xlu1 %3348  ;;  %v3521_v3 = vpack.c.b16 %v3503_v33, %v3502_v54  ;;  %v2355_v31 = vrot.slane %v2354_v40, 4  ;;  %v2364_v46 = vor.u32 %v2363_v47, %v2359_v60  ;;  %v7623_v7 = vrot.slane %v6152_v61, 5 }
 0x181   : > { %3536 = vrot.lane.b32.xlu0 %v7622_v17, %s5127_s28  ;;  %v6515_v35 = vsel %vm3941_vm5, %v6198_v23, %v3349_v29  ;;  %v3505_v23 = vunpack.c.l.b16 %v2346_v2  ;;  %v7624_v14 = vrot.slane %v6389_v37, 9  ;;  %v3517_v25 = vpack.c.b16 %v6464_v56, %v6458_v51  ;;  %v6554_v29 = vld [vmem:[#allocation2 + $0x1c] sm:$0xf] }
 0x182   : > { %v7625_v5 = vunpack.c.l.b16 %v6387_v53  ;;  %v7626_v0 = vunpack.c.l.b16 %v6412_v57  ;;  %v2448_v54 = vsel %vm6028_vm4, %v6462_v52, %v2447_v44  ;;  %v2451_v61 = vrot.slane %v6201_v16, 5 }
 0x183   : > { %3546 = vrot.lane.b32.xlu2 %v3519_v58, %s5127_s28  ;;  %v2445_v1 = vsel %vm6028_vm4, %v7624_v14, %v7623_v7  ;;  %v3934_v37 = vsel %vm3892_vm2, %v4974_v49, %v6484_v32  ;;  %v3520_v53 = vpack.c.b16 %v6521_v26, %v6519_v39  ;;  %v4702_v57 = vrot.slane %v2373_v27, 9 }
 0x184   : > { %v3588_v36 = vpack.c.b16 %v7626_v0, %v7625_v5  ;;  %v3522_v56 = vpack.c.b16 %v3505_v23, %v3504_v22  ;;  %v2369_v21 = vrot.slane %v2367_v42, 5  ;;  %v3558_v63 = vunpack.c.l.b16 %v2445_v1  ;;  %v2375_v5 = vld [vmem:[#allocation2 + $0x3c] sm:$0xe] }
 0x185   : > { %v3369_v30 = vpop.permute.xlu2 %3368  ;;  %v2597_v52 = vshrl.u32 %v2548_v20, 16  ;;  %v2360_v32 = vsel %vm5563_vm0, %v2355_v31, %v2359_v60  ;;  %v2365_v33 = vrot.slane %v2364_v46, 4  ;;  %v3559_v62 = vunpack.c.l.b16 %v2448_v54 }
 0x186   : > { %3550 = vrot.lane.b32.xlu1 %v3521_v3, %s5127_s28  ;;  %v6550_v51 = vsel %vm3941_vm5, %v6416_v24, %v3369_v30  ;;  %v2600_v24 = vshll.u32 %v2548_v20, 16  ;;  %v2453_v58 = vrot.slane %v2451_v61, 4  ;;  %v2454_v50 = vrot.slane %v6243_v59, 5  ;;  %v2980_v3 = vld [vmem:[#allocation2 + $0x18] sm:$0xe] }
 0x187   : > { %v2599_v40 = vrot.slane %v2597_v52, 4  ;;  %v6568_v39 = vsel %vm6028_vm4, %v4702_v57, %v2451_v61  ;;  %v2606_v26 = vshll.u32 %v6554_v29, 16  ;;  %v2610_v2 = vshrl.u32 %v6554_v29, 16 }
 0x188   : > { %v3355_v16 = vpop.permute.xlu1 %3354  ;;  %v2602_v60 = vrot.slane %v2600_v24, 5  ;;  %v6575_v22 = vunpack.c.l.b16 %v2360_v32  ;;  %v4703_v59 = vrot.slane %v2374_v43, 9  ;;  %v2458_v23 = vrot.slane %v6239_v6, 5 }
 0x189   : > { %3542 = vrot.lane.b32.xlu0 %v3517_v25, %s5127_s28  ;;  %v6563_v17 = vsel %vm3941_vm5, %v6208_v13, %v3355_v16  ;;  %v2616_v13 = vshll.u32 %v6558_v41, 16  ;;  %v2370_v42 = vsel %vm5563_vm0, %v2365_v33, %v2369_v21  ;;  %v3589_v44 = vpack.c.b16 %v3559_v62, %v3558_v63  ;;  %v4973_v33 = vld [vmem:[#allocation2 + $0x90] sm:$0xff] }
 0x18a   : > { %v2603_v27 = vor.u32 %v2602_v60, %v2599_v40  ;;  %v2608_v49 = vrot.slane %v2606_v26, 5  ;;  %v2455_v46 = vsel %vm6028_vm4, %v2453_v58, %v2454_v50  ;;  %v3560_v7 = vunpack.c.l.b16 %v6568_v39  ;;  %v4993_v26 = vld [vmem:[#allocation2 + $0x18] sm:$0xff] }
 0x18b   : > { %v6572_v47 = vpop.permute.xlu0 %3298  ;;  %3552 = vrot.lane.b32.xlu2 %v3522_v56, %s5127_s28  ;;  %v2612_v14 = vrot.slane %v2610_v2, 4  ;;  %v2460_v1 = vrot.slane %v2458_v23, 4  ;;  %v2618_v25 = vrot.slane %v2616_v13, 5  ;;  %v2461_v30 = vrot.slane %v6266_v45, 5  ;;  %v2379_v13 = vld [vmem:[#allocation2 + $0x6c] sm:$0xe] }
 0x18c   : > { %v2604_v20 = vrot.slane %v2603_v27, 4  ;;  %v2459_v54 = vsel %vm6028_vm4, %v4703_v59, %v2458_v23  ;;  %v4716_v61 = vrot.slane %v2980_v3, 9  ;;  %v3046_v57 = vrot.slane %v6554_v29, 5  ;;  %v4970_v29 = vld [vmem:[#allocation2 + $0x6c] sm:$0xff]  ;;  %v2556_v59 = vld [vmem:[#allocation2 + $0x48] sm:$0xf] }
 0x18d   : > { %v3375_v31 = vpop.permute.xlu2 %3374  ;;  %v2613_v0 = vor.u32 %v2612_v14, %v2608_v49  ;;  %v3507_v21 = vunpack.c.l.b16 %v2370_v42  ;;  %v3561_v63 = vunpack.c.l.b16 %v2455_v46  ;;  %v4704_v32 = vrot.slane %v2375_v5, 9 }
 0x18e   : > { %3604 = vrot.lane.b32.xlu1 %v3588_v36, %s5128_s29  ;;  %v6586_v6 = vsel %vm3941_vm5, %v3934_v37, %v3375_v31  ;;  %v2462_v36 = vsel %vm6028_vm4, %v2460_v1, %v2461_v30  ;;  %v2465_v37 = vrot.slane %v6214_v10, 5  ;;  %v2609_v52 = vsel %vm5563_vm0, %v2604_v20, %v2608_v49  ;;  %v2550_v30 = vld [vmem:[#allocation2 + $0x24] sm:$0xf] }
 0x18f   : > { %v2614_v16 = vrot.slane %v2613_v0, 4  ;;  %v3562_v62 = vunpack.c.l.b16 %v2459_v54  ;;  %v3563_v24 = vunpack.c.l.b16 %v2462_v36  ;;  %v6604_v43 = vsel %vm6028_vm4, %v4716_v61, %v3046_v57  ;;  %v6651_v54 = vld [vmem:[#allocation2 + $0x50] sm:$0x1] }
 0x190   : > { %v3361_v56 = vpop.permute.xlu1 %3360  ;;  %v3049_v10 = vrot.slane %v6558_v41, 5  ;;  %v3048_v58 = vrot.slane %v3046_v57, 4  ;;  %v2467_v50 = vrot.slane %v2465_v37, 4  ;;  %v2468_v40 = vrot.slane %v6261_v48, 5 }
 0x191   : > { %3548 = vrot.lane.b32.xlu0 %v3520_v53, %s5127_s28  ;;  %v6598_v45 = vsel %vm3941_vm5, %v6246_v38, %v3361_v56  ;;  %v2619_v38 = vsel %vm5563_vm0, %v2614_v16, %v2618_v25  ;;  %v3922_v39 = vsel %vm3892_vm2, %v4970_v29, %v6492_v12  ;;  %v6615_v60 = vsel %vm3892_vm2, %v4973_v33, %v6525_v19  ;;  %v6629_v19 = vld [vmem:[#allocation2 + $0x4c] sm:$0xf]  ;;  %v7627_v29 = vld [vmem:[#allocation3_spill] sm:$0xff] }
 0x192   : > { %v3732_v2 = vunpack.c.l.b16 %v2609_v52  ;;  %v3523_v23 = vpack.c.b16 %v3507_v21, %v6575_v22  ;;  %v6626_v48 = vsel %vm6028_vm4, %v4704_v32, %v2465_v37  ;;  %v2493_v12 = vrot.slane %v6307_v4, 5 }
 0x193   : > { %v3353_v53 = vpop.permute.xlu0 %3352  ;;  %3606 = vrot.lane.b32.xlu2 %v3589_v44, %s5128_s29  ;;  %v6622_v44 = vpack.c.b16 %v3561_v63, %v3560_v7  ;;  %v3733_v27 = vunpack.c.l.b16 %v2619_v38  ;;  %v3591_v22 = vpack.c.b16 %v3563_v24, %v3562_v62  ;;  %v3812_v49 = vunpack.c.l.b16 %v6604_v43  ;;  %v6643_v7 = vld [vmem:[#allocation2 + $0x28] sm:$0xf] }
 0x194   : > { %v6619_v41 = vsel %vm3941_vm5, %v6191_v18, %v3353_v53  ;;  %v6639_v3 = vsel %vm6028_vm4, %v3048_v58, %v3049_v10  ;;  %v2469_v4 = vsel %vm6028_vm4, %v2467_v50, %v2468_v40  ;;  %v4708_v31 = vrot.slane %v2379_v13, 9 }
 0x195   : > { %v3445_v42 = vpop.permute.xlu2 %3444  ;;  %v2693_v46 = vshrl.u32 %v2556_v59, 16  ;;  %v3764_v1 = vpack.c.b16 %v3733_v27, %v3732_v2  ;;  %v2696_v20 = vshll.u32 %v2556_v59, 16  ;;  %v2702_v25 = vshll.u32 %v6629_v19, 16  ;;  %v2984_v59 = vld [vmem:[#allocation2 + $0x48] sm:$0xe] }
 0x196   : > { %3700 = vrot.lane.b32.xlu1 %v4993_v26, %s5129_s30  ;;  %v6634_v18 = vsel %vm3974_vm6, %v6515_v35, %v3445_v42  ;;  %v2496_v35 = vrot.slane %v6330_v28, 5  ;;  %v2495_v0 = vrot.slane %v2493_v12, 4  ;;  %v2706_v57 = vshrl.u32 %v6629_v19, 16  ;;  %v4972_v27 = vld [vmem:[#allocation2 + $0x84] sm:$0xff] }
 0x197   : > { %v2695_v61 = vrot.slane %v2693_v46, 4  ;;  %v3564_v56 = vunpack.c.l.b16 %v6626_v48  ;;  %v2698_v21 = vrot.slane %v2696_v20, 5  ;;  %v2704_v63 = vrot.slane %v2702_v25, 5 }
 0x198   : > { %v3367_v14 = vpop.permute.xlu1 %3366  ;;  %v2712_v28 = vshll.u32 %v6651_v54, 16  ;;  %v2708_v37 = vrot.slane %v2706_v57, 4  ;;  %v2621_v52 = vshrl.u32 %v2550_v30, 16  ;;  %v2624_v16 = vshll.u32 %v2550_v30, 16  ;;  %v7628_v30 = vld [vmem:[#allocation6_spill] sm:$0xff] }
 0x199   : > { %3554 = vrot.lane.b32.xlu0 %v3523_v23, %s5127_s28  ;;  %v6649_v5 = vsel %vm3941_vm5, %v3922_v39, %v3367_v14  ;;  %v2630_v32 = vshll.u32 %v6643_v7, 16  ;;  %v3565_v62 = vunpack.c.l.b16 %v2469_v4  ;;  %v2494_v24 = vsel %vm6028_vm4, %v4708_v31, %v2493_v12 }
 0x19a   : > { %v2699_v10 = vor.u32 %v2698_v21, %v2695_v61  ;;  %v2497_v38 = vsel %vm6028_vm4, %v2495_v0, %v2496_v35  ;;  %v2709_v58 = vor.u32 %v2708_v37, %v2704_v63  ;;  %v2623_v50 = vrot.slane %v2621_v52, 4  ;;  %v2981_v21 = vld [vmem:[#allocation2 + $0x24] sm:$0xe]  ;;  %v4997_v52 = vld [vmem:[#allocation2 + $0x48] sm:$0xff] }
 0x19b   : > { %v3359_v36 = vpop.permute.xlu0 %3358  ;;  %3780 = vrot.lane.b32.xlu2 %v3764_v1, %s5130_s5  ;;  %v2626_v40 = vrot.slane %v2624_v16, 5  ;;  %v6671_v2 = vrot.slane %v2630_v32, 5  ;;  %v2634_v13 = vshrl.u32 %v6643_v7, 16  ;;  %v3813_v23 = vunpack.c.l.b16 %v6639_v3  ;;  %v4976_v1 = vld [vmem:[#allocation2 + $0xb4] sm:$0xff]  ;;  %v7629_v37 = vld [vmem:[#allocation4_spill] sm:$0xff] }
 0x19c   : > { %v6660_v33 = vsel %vm3941_vm5, %v7627_v29, %v3359_v36  ;;  %v2700_v26 = vrot.slane %v2699_v10, 4  ;;  %v2710_v42 = vrot.slane %v2709_v58, 4  ;;  %v2714_v48 = vrot.slane %v2712_v28, 5  ;;  %v2564_v29 = vld [vmem:[#allocation2 + $0x78] sm:$0xf] }
 0x19d   : > { %v3451_v53 = vpop.permute.xlu2 %3450  ;;  %v2627_v12 = vor.u32 %v2626_v40, %v2623_v50  ;;  %v3572_v31 = vunpack.c.l.b16 %v2494_v24  ;;  %v3573_v46 = vunpack.c.l.b16 %v2497_v38  ;;  %v2636_v14 = vrot.slane %v2634_v13, 4 }
 0x19e   : > { %3610 = vrot.lane.b32.xlu1 %v3591_v22, %s5128_s29  ;;  %v6669_v39 = vsel %vm3974_vm6, %v6563_v17, %v3451_v53  ;;  %v2581_v22 = vld [vmem:[#allocation2 + $0x2c] sm:$0x1]  ;;  %v3074_v17 = vrot.slane %v6629_v19, 5  ;;  %v3592_v3 = vpack.c.b16 %v3565_v62, %v3564_v56  ;;  %v4720_v25 = vrot.slane %v2984_v59, 9  ;;  %v6702_v53 = vld [vmem:[#allocation2 + $0x7c] sm:$0xf] }
 0x19f   : > { %v2640_v20 = vshll.u32 %v2581_v22, 16  ;;  %v3928_v0 = vsel %vm3892_vm2, %v4972_v27, %v7628_v30  ;;  %v2705_v61 = vsel %vm5563_vm0, %v2700_v26, %v2704_v63  ;;  %v2628_v57 = vrot.slane %v2627_v12, 4  ;;  %v6722_v27 = vld [vmem:[#allocation2 + $0x80] sm:$0x1]  ;;  %v2376_v30 = vld [vmem:[#allocation2 + $0x48] sm:$0xe] }
 0x1a0   : > { %v3373_v4 = vpop.permute.xlu1 %3372  ;;  %v2637_v19 = vor.u32 %v2636_v14, %v6671_v2  ;;  %v2715_v56 = vsel %vm5563_vm0, %v2710_v42, %v2714_v48  ;;  %v3053_v36 = vrot.slane %v6643_v7, 5  ;;  %v3596_v16 = vpack.c.b16 %v3573_v46, %v3572_v31 }
 0x1a1   : > { %3608 = vrot.lane.b32.xlu0 %v6622_v44, %s5128_s29  ;;  %v6680_v35 = vsel %vm3941_vm5, %v6615_v60, %v3373_v4  ;;  %v3940_v44 = vsel %vm3892_vm2, %v4976_v1, %v6572_v47  ;;  %v3844_v60 = vpack.c.b16 %v3813_v23, %v3812_v49  ;;  %v3076_v32 = vrot.slane %v3074_v17, 4 }
 0x1a2   : > { %v3077_v47 = vrot.slane %v6651_v54, 5  ;;  %v3740_v43 = vunpack.c.l.b16 %v2705_v61  ;;  %v2642_v49 = vrot.slane %v2640_v20, 5  ;;  %v3075_v24 = vsel %vm6028_vm4, %v4720_v25, %v3074_v17  ;;  %v5098_v61 = vld [vmem:[#allocation2 + $0x4c] sm:$0xf] }
 0x1a3   : > { %v3365_v28 = vpop.permute.xlu0 %3364  ;;  %3612 = vrot.lane.b32.xlu2 %v3592_v3, %s5128_s29  ;;  %v4717_v10 = vrot.slane %v2981_v21, 9  ;;  %v3741_v38 = vunpack.c.l.b16 %v2715_v56  ;;  %v2633_v54 = vsel %vm5563_vm0, %v2628_v57, %v6671_v2  ;;  %v2638_v58 = vrot.slane %v2637_v19, 4 }
 0x1a4   : > { %v6697_v63 = vsel %vm3941_vm5, %v7629_v37, %v3365_v28  ;;  %v3055_v50 = vrot.slane %v3053_v36, 4  ;;  %v3056_v40 = vrot.slane %v2581_v22, 5  ;;  %v2789_v26 = vshrl.u32 %v2564_v29, 16 }
 0x1a5   : > { %v3457_v62 = vpop.permute.xlu2 %3456  ;;  %v2792_v13 = vshll.u32 %v2564_v29, 16  ;;  %v3078_v23 = vsel %vm6028_vm4, %v3076_v32, %v3077_v47  ;;  %v3820_v42 = vunpack.c.l.b16 %v3075_v24  ;;  %v2798_v48 = vshll.u32 %v6702_v53, 16  ;;  %v4975_v32 = vld [vmem:[#allocation2 + $0xa8] sm:$0xff]  ;;  %v5099_v24 = vld [vmem:[#allocation2 + $0x50] sm:$0x1] }
 0x1a6   : > { %3708 = vrot.lane.b32.xlu1 %v4997_v52, %s5129_s30  ;;  %v6707_v7 = vsel %vm3974_vm6, %v6598_v45, %v3457_v62  ;;  %v2802_v45 = vshrl.u32 %v6702_v53, 16  ;;  %v3054_v2 = vsel %vm6028_vm4, %v4717_v10, %v3053_v36  ;;  %v2791_v4 = vrot.slane %v2789_v26, 4 }
 0x1a7   : > { %v2794_v31 = vrot.slane %v2792_v13, 5  ;;  %v2643_v46 = vsel %vm5563_vm0, %v2638_v58, %v2642_v49  ;;  %v2800_v22 = vrot.slane %v2798_v48, 5  ;;  %v2808_v17 = vshll.u32 %v6722_v27, 16  ;;  %v7630_v58 = vld [vmem:[#allocation7_spill] sm:$0xff]  ;;  %v2552_v13 = vld [vmem:[#allocation2 + $0x30] sm:$0xf] }
 0x1a8   : > { %v3379_v59 = vpop.permute.xlu1 %3378  ;;  %v2804_v14 = vrot.slane %v2802_v45, 4  ;;  %v3768_v3 = vpack.c.b16 %v3741_v38, %v3740_v43  ;;  %v3057_v20 = vsel %vm6028_vm4, %v3055_v50, %v3056_v40  ;;  %v2472_v57 = vrot.slane %v5098_v61, 5  ;;  %v4994_v43 = vld [vmem:[#allocation2 + $0x24] sm:$0xff]  ;;  %v2558_v61 = vld [vmem:[#allocation2 + $0x54] sm:$0xf] }
 0x1a9   : > { %3860 = vrot.lane.b32.xlu0 %v3844_v60, %s5131_s6  ;;  %v6718_v12 = vsel %vm3941_vm5, %v3940_v44, %v3379_v59  ;;  %v2795_v25 = vor.u32 %v2794_v31, %v2791_v4  ;;  %v6733_v21 = vunpack.c.l.b16 %v2633_v54  ;;  %v3821_v44 = vunpack.c.l.b16 %v3078_v23  ;;  %v2988_v60 = vld [vmem:[#allocation2 + $0x78] sm:$0xe] }
 0x1aa   : > { %v2805_v28 = vor.u32 %v2804_v14, %v2800_v22  ;;  %v6735_v36 = vunpack.c.l.b16 %v2643_v46  ;;  %v3814_v37 = vunpack.c.l.b16 %v3054_v2  ;;  %v4705_v62 = vrot.slane %v2376_v30, 9  ;;  %v5001_v23 = vld [vmem:[#allocation2 + $0x78] sm:$0xff]  ;;  %v6762_v46 = vld [vmem:[#allocation2 + $0x34] sm:$0xf] }
 0x1ab   : > { %v3371_v1 = vpop.permute.xlu0 %3370  ;;  %3620 = vrot.lane.b32.xlu2 %v3596_v16, %s5128_s29  ;;  %v2796_v52 = vrot.slane %v2795_v25, 4  ;;  %v2810_v16 = vrot.slane %v2808_v17, 5  ;;  %v2474_v49 = vrot.slane %v2472_v57, 4  ;;  %v2475_v10 = vrot.slane %v5099_v24, 5  ;;  %v2380_v4 = vld [vmem:[#allocation2 + $0x78] sm:$0xe] }
 0x1ac   : > { %v6731_v19 = vsel %vm3941_vm5, %v3928_v0, %v3371_v1  ;;  %v3815_v0 = vunpack.c.l.b16 %v3057_v20  ;;  %v2806_v29 = vrot.slane %v2805_v28, 4  ;;  %v4724_v38 = vrot.slane %v2988_v60, 9 }
 0x1ad   : > { %v3463_v56 = vpop.permute.xlu2 %3462  ;;  %v3102_v54 = vrot.slane %v6702_v53, 5  ;;  %v3937_v50 = vsel %vm3892_vm2, %v4975_v32, %v7630_v58  ;;  %v3848_v26 = vpack.c.b16 %v3821_v44, %v3820_v42  ;;  %v3765_v59 = vpack.c.b16 %v6735_v36, %v6733_v21 }
 0x1ae   : > { %3788 = vrot.lane.b32.xlu1 %v3768_v3, %s5130_s5  ;;  %v6740_v47 = vsel %vm3974_vm6, %v6649_v5, %v3463_v56  ;;  %v2801_v48 = vsel %vm5563_vm0, %v2796_v52, %v2800_v22  ;;  %v2811_v53 = vsel %vm5563_vm0, %v2806_v29, %v2810_v16  ;;  %v6756_v45 = vpack.c.b16 %v3815_v0, %v3814_v37  ;;  %v7632_v37 = vld [vmem:[#allocation8_spill] sm:$0xff] }
 0x1af   : > { %v2473_v42 = vsel %vm6028_vm4, %v4705_v62, %v2472_v57  ;;  %v3105_v2 = vrot.slane %v6722_v27, 5  ;;  %v2476_v22 = vsel %vm6028_vm4, %v2474_v49, %v2475_v10  ;;  %v6769_v17 = vsel %vm6028_vm4, %v4724_v38, %v3102_v54  ;;  %v6782_v62 = vld [vmem:[#allocation2 + $0x58] sm:$0xf] }
 0x1b0   : > { %v3449_v40 = vpop.permute.xlu1 %3448  ;;  %v2645_v1 = vshrl.u32 %v2552_v13, 16  ;;  %v2648_v3 = vshll.u32 %v2552_v13, 16  ;;  %v3748_v27 = vunpack.c.l.b16 %v2801_v48  ;;  %v3749_v25 = vunpack.c.l.b16 %v2811_v53  ;;  %v6785_v38 = vld [vmem:[#allocation2 + $0x38] sm:$0x1] }
 0x1b1   : > { %3702 = vrot.lane.b32.xlu0 %v4994_v43, %s5129_s30  ;;  %v6748_v5 = vsel %vm3974_vm6, %v6619_v41, %v3449_v40  ;;  %v7631_v41 = vld [vmem:[#allocation5_spill] sm:$0xff]  ;;  %v3104_v30 = vrot.slane %v3102_v54, 4  ;;  %v4709_v21 = vrot.slane %v2380_v4, 9  ;;  %v2654_v60 = vshll.u32 %v6762_v46, 16 }
 0x1b2   : > { %v2500_v31 = vrot.slane %v7631_v41, 5  ;;  %v2647_v44 = vrot.slane %v2645_v1, 4  ;;  %v2650_v28 = vrot.slane %v2648_v3, 5  ;;  %v2503_v52 = vrot.slane %v7632_v37, 5  ;;  %v2982_v41 = vld [vmem:[#allocation2 + $0x30] sm:$0xe] }
 0x1b3   : > { %v3377_v14 = vpop.permute.xlu0 %3376  ;;  %3716 = vrot.lane.b32.xlu2 %v5001_v23, %s5129_s30  ;;  %v2658_v16 = vshrl.u32 %v6762_v46, 16  ;;  %v3566_v32 = vunpack.c.l.b16 %v2473_v42  ;;  %v2656_v29 = vrot.slane %v2654_v60, 5  ;;  %v2717_v43 = vshrl.u32 %v2558_v61, 16  ;;  %v2566_v3 = vld [vmem:[#allocation2 + $0x84] sm:$0xf] }
 0x1b4   : > { %v6772_v20 = vsel %vm3941_vm5, %v3937_v50, %v3377_v14  ;;  %v2502_v36 = vrot.slane %v2500_v31, 4  ;;  %v2651_v0 = vor.u32 %v2650_v28, %v2647_v44  ;;  %v3567_v24 = vunpack.c.l.b16 %v2476_v22 }
 0x1b5   : > { %v3469_v57 = vpop.permute.xlu2 %3468  ;;  %v3828_v10 = vunpack.c.l.b16 %v6769_v17  ;;  %v2660_v54 = vrot.slane %v2658_v16, 4  ;;  %v3772_v50 = vpack.c.b16 %v3749_v25, %v3748_v27  ;;  %v6794_v40 = vsel %vm6028_vm4, %v3104_v30, %v3105_v2  ;;  %v6819_v16 = vld [vmem:[#allocation2 + $0x5c] sm:$0x1] }
 0x1b6   : > { %3868 = vrot.lane.b32.xlu1 %v3848_v26, %s5131_s6  ;;  %v6778_v56 = vsel %vm3974_vm6, %v6680_v35, %v3469_v57  ;;  %v2720_v35 = vshll.u32 %v2558_v61, 16  ;;  %v2664_v26 = vshll.u32 %v6785_v38, 16  ;;  %v2501_v13 = vsel %vm6028_vm4, %v4709_v21, %v2500_v31  ;;  %v6810_v21 = vld [vmem:[#allocation2 + $0x88] sm:$0xf] }
 0x1b7   : > { %v2504_v23 = vsel %vm6028_vm4, %v2502_v36, %v2503_v52  ;;  %v2661_v48 = vor.u32 %v2660_v54, %v2656_v29  ;;  %v2719_v42 = vrot.slane %v2717_v43, 4  ;;  %v2730_v2 = vshrl.u32 %v6782_v62, 16 }
 0x1b8   : > { %v3455_v49 = vpop.permute.xlu1 %3454  ;;  %v2722_v4 = vrot.slane %v2720_v35, 5  ;;  %v3593_v31 = vpack.c.b16 %v3567_v24, %v3566_v32  ;;  %v3829_v22 = vunpack.c.l.b16 %v6794_v40  ;;  %v3060_v1 = vrot.slane %v6762_v46, 5 }
 0x1b9   : > { %3782 = vrot.lane.b32.xlu0 %v3765_v59, %s5130_s5  ;;  %v6790_v58 = vsel %vm3974_vm6, %v6660_v33, %v3455_v49  ;;  %v2726_v59 = vshll.u32 %v6782_v62, 16  ;;  %v2652_v33 = vrot.slane %v2651_v0, 4  ;;  %v3574_v25 = vunpack.c.l.b16 %v2501_v13 }
 0x1ba   : > { %v3575_v30 = vunpack.c.l.b16 %v2504_v23  ;;  %v2662_v61 = vrot.slane %v2661_v48, 4  ;;  %v2666_v57 = vrot.slane %v2664_v26, 5  ;;  %v4718_v28 = vrot.slane %v2982_v41, 9 }
 0x1bb   : > { %v3447_v53 = vpop.permute.xlu0 %3446  ;;  %3796 = vrot.lane.b32.xlu2 %v3772_v50, %s5130_s5  ;;  %v2657_v46 = vsel %vm5563_vm0, %v2652_v33, %v2656_v29  ;;  %v2723_v60 = vor.u32 %v2722_v4, %v2719_v42  ;;  %v2732_v36 = vrot.slane %v2730_v2, 4  ;;  %v2813_v37 = vshrl.u32 %v2566_v3, 16  ;;  %v4995_v29 = vld [vmem:[#allocation2 + $0x30] sm:$0xff]  ;;  %v6842_v42 = vld [vmem:[#allocation2 + $0x8c] sm:$0x1] }
 0x1bc   : > { %v6806_v14 = vsel %vm3974_vm6, %v6436_v9, %v3447_v53  ;;  %v2728_v9 = vrot.slane %v2726_v59, 5  ;;  %v3062_v32 = vrot.slane %v3060_v1, 4  ;;  %v3063_v0 = vrot.slane %v6785_v38, 5 }
 0x1bd   : > { %v3475_v27 = vpop.permute.xlu2 %3474  ;;  %v2816_v43 = vshll.u32 %v2566_v3, 16  ;;  %v2822_v49 = vshll.u32 %v6810_v21, 16  ;;  %v3597_v24 = vpack.c.b16 %v3575_v30, %v3574_v25  ;;  %v2667_v54 = vsel %vm5563_vm0, %v2662_v61, %v2666_v57 }
 0x1be   : > { %3614 = vrot.lane.b32.xlu1 %v3593_v31, %s5128_s29  ;;  %v6815_v44 = vsel %vm3974_vm6, %v6718_v12, %v3475_v27  ;;  %v2736_v35 = vshll.u32 %v6819_v16, 16  ;;  %v3736_v50 = vunpack.c.l.b16 %v2657_v46  ;;  %v3061_v38 = vsel %vm6028_vm4, %v4718_v28, %v3060_v1  ;;  %v2985_v1 = vld [vmem:[#allocation2 + $0x54] sm:$0xe] }
 0x1bf   : > { %v2815_v40 = vrot.slane %v2813_v37, 4  ;;  %v2818_v26 = vrot.slane %v2816_v43, 5  ;;  %v2733_v23 = vor.u32 %v2732_v36, %v2728_v9  ;;  %v2826_v48 = vshrl.u32 %v6810_v21, 16 }
 0x1c0   : > { %v3461_v52 = vpop.permute.xlu1 %3460  ;;  %v3737_v53 = vunpack.c.l.b16 %v2667_v54  ;;  %v3064_v33 = vsel %vm6028_vm4, %v3062_v32, %v3063_v0  ;;  %v2832_v31 = vshll.u32 %v6842_v42, 16  ;;  %v3852_v3 = vpack.c.b16 %v3829_v22, %v3828_v10  ;;  %v2989_v10 = vld [vmem:[#allocation2 + $0x84] sm:$0xe]  ;;  %v2572_v32 = vld [vmem:[#allocation2 + $0xa8] sm:$0xf] }
 0x1c1   : > { %3862 = vrot.lane.b32.xlu0 %v6756_v45, %s5131_s6  ;;  %v6827_v12 = vsel %vm3974_vm6, %v6697_v63, %v3461_v52  ;;  %v2724_v45 = vrot.slane %v2723_v60, 4  ;;  %v2824_v63 = vrot.slane %v2822_v49, 5  ;;  %v2819_v4 = vor.u32 %v2818_v26, %v2815_v40  ;;  %v6873_v40 = vld [vmem:[#allocation2 + $0xac] sm:$0xf] }
 0x1c2   : > { %v2828_v41 = vrot.slane %v2826_v48, 4  ;;  %v2738_v27 = vrot.slane %v2736_v35, 5  ;;  %v3816_v25 = vunpack.c.l.b16 %v3061_v38  ;;  %v2734_v61 = vrot.slane %v2733_v23, 4  ;;  %v5002_v35 = vld [vmem:[#allocation2 + $0x84] sm:$0xff] }
 0x1c3   : > { %v3453_v13 = vpop.permute.xlu0 %3452  ;;  %3704 = vrot.lane.b32.xlu2 %v4995_v29, %s5129_s30  ;;  %v2729_v30 = vsel %vm5563_vm0, %v2724_v45, %v2728_v9  ;;  %v3817_v57 = vunpack.c.l.b16 %v3064_v33  ;;  %v3766_v60 = vpack.c.b16 %v3737_v53, %v3736_v50  ;;  %v2820_v36 = vrot.slane %v2819_v4, 4  ;;  %v4998_v33 = vld [vmem:[#allocation2 + $0x54] sm:$0xff] }
 0x1c4   : > { %v6838_v59 = vsel %vm3974_vm6, %v6474_v34, %v3453_v13  ;;  %v2829_v28 = vor.u32 %v2828_v41, %v2824_v63  ;;  %v4721_v37 = vrot.slane %v2985_v1, 9  ;;  %v3081_v17 = vrot.slane %v6782_v62, 5 }
 0x1c5   : > { %v3529_v2 = vpop.permute.xlu2 %3528  ;;  %v2834_v52 = vrot.slane %v2832_v31, 5  ;;  %v3109_v9 = vrot.slane %v6810_v21, 5  ;;  %v6861_v0 = vunpack.c.l.b16 %v2729_v30  ;;  %v2739_v62 = vsel %vm5563_vm0, %v2734_v61, %v2738_v27  ;;  %v6899_v30 = vld [vmem:[#allocation2 + $0xb0] sm:$0x1] }
 0x1c6   : > { %3622 = vrot.lane.b32.xlu1 %v3597_v24, %s5128_s29  ;;  %v6850_v34 = vsel %vm4007_vm7, %v6748_v5, %v3529_v2  ;;  %v2830_v22 = vrot.slane %v2829_v28, 4  ;;  %v3846_v49 = vpack.c.b16 %v3817_v57, %v3816_v25  ;;  %v3084_v29 = vrot.slane %v6819_v16, 5  ;;  %v2383_v24 = vld [vmem:[#allocation2 + $0x9c] sm:$0xe] }
 0x1c7   : > { %v2885_v54 = vshrl.u32 %v2572_v32, 16  ;;  %v2825_v21 = vsel %vm5563_vm0, %v2820_v36, %v2824_v63  ;;  %v3083_v50 = vrot.slane %v3081_v17, 4  ;;  %v4725_v38 = vrot.slane %v2989_v10, 9 }
 0x1c8   : > { %v3467_v46 = vpop.permute.xlu1 %3466  ;;  %v2835_v13 = vsel %vm5563_vm0, %v2830_v22, %v2834_v52  ;;  %v3082_v16 = vsel %vm6028_vm4, %v4721_v37, %v3081_v17  ;;  %v3111_v45 = vrot.slane %v3109_v9, 4  ;;  %v3112_v23 = vrot.slane %v6842_v42, 5  ;;  %v2377_v37 = vld [vmem:[#allocation2 + $0x54] sm:$0xe]  ;;  %v7633_v22 = vld [vmem:[#allocation9_spill] sm:$0xff] }
 0x1c9   : > { %3876 = vrot.lane.b32.xlu0 %v3852_v3, %s5131_s6  ;;  %v6858_v5 = vsel %vm3974_vm6, %v6731_v19, %v3467_v46  ;;  %v4712_v63 = vrot.slane %v2383_v24, 9  ;;  %v2887_v48 = vrot.slane %v2885_v54, 4  ;;  %v2888_v53 = vshll.u32 %v2572_v32, 16 }
 0x1ca   : > { %v3750_v4 = vunpack.c.l.b16 %v2825_v21  ;;  %v2521_v2 = vrot.slane %v6443_v8, 5  ;;  %v2894_v41 = vshll.u32 %v6873_v40, 16  ;;  %v2898_v31 = vshrl.u32 %v6873_v40, 16 }
 0x1cb   : > { %v3459_v43 = vpop.permute.xlu0 %3458  ;;  %3784 = vrot.lane.b32.xlu2 %v3766_v60, %s5130_s5  ;;  %v3751_v3 = vunpack.c.l.b16 %v2835_v13  ;;  %v3085_v42 = vsel %vm6028_vm4, %v3083_v50, %v3084_v29  ;;  %v2890_v27 = vrot.slane %v2888_v53, 5  ;;  %v3113_v8 = vsel %vm6028_vm4, %v3111_v45, %v3112_v23  ;;  %v2554_v13 = vld [vmem:[#allocation2 + $0x3c] sm:$0xf] }
 0x1cc   : > { %v6869_v19 = vsel %vm3974_vm6, %v6505_v55, %v3459_v43  ;;  %v6901_v61 = vrot.slane %v2894_v41, 5  ;;  %v2900_v57 = vrot.slane %v2898_v31, 4  ;;  %v3743_v28 = vunpack.c.l.b16 %v2739_v62  ;;  %v2381_v41 = vld [vmem:[#allocation2 + $0x84] sm:$0xe]  ;;  %v5103_v31 = vld [vmem:[#allocation2 + $0x88] sm:$0xf] }
 0x1cd   : > { %v3535_v26 = vpop.permute.xlu2 %3534  ;;  %v3822_v46 = vunpack.c.l.b16 %v3082_v16  ;;  %v2891_v60 = vor.u32 %v2890_v27, %v2887_v48  ;;  %v2904_v36 = vshll.u32 %v6899_v30, 16  ;;  %v3823_v10 = vunpack.c.l.b16 %v3085_v42  ;;  %v5101_v16 = vld [vmem:[#allocation2 + $0x8c] sm:$0x1] }
 0x1ce   : > { %3718 = vrot.lane.b32.xlu1 %v5002_v35, %s5129_s30  ;;  %v6883_v55 = vsel %vm4007_vm7, %v6790_v58, %v3535_v26  ;;  %v3110_v58 = vsel %vm6028_vm4, %v4725_v38, %v3109_v9  ;;  %v2524_v52 = vrot.slane %v7633_v22, 5  ;;  %v2901_v9 = vor.u32 %v2900_v57, %v6901_v61 }
 0x1cf   : > { %v3773_v43 = vpack.c.b16 %v3751_v3, %v3750_v4  ;;  %v3830_v62 = vunpack.c.l.b16 %v3110_v58  ;;  %v3831_v29 = vunpack.c.l.b16 %v3113_v8  ;;  %v6913_v54 = vsel %vm6028_vm4, %v4712_v63, %v2521_v2  ;;  %v6926_v3 = vld [vmem:[#allocation2 + $0x40] sm:$0xf] }
 0x1d0   : > { %v3473_v1 = vpop.permute.xlu1 %3472  ;;  %v4706_v35 = vrot.slane %v2377_v37, 9  ;;  %v2892_v38 = vrot.slane %v2891_v60, 4  ;;  %v2906_v26 = vrot.slane %v2904_v36, 5  ;;  %v2510_v45 = vrot.slane %v5101_v16, 5 }
 0x1d1   : > { %3710 = vrot.lane.b32.xlu0 %v4998_v33, %s5129_s30  ;;  %v6895_v25 = vsel %vm3974_vm6, %v6772_v20, %v3473_v1  ;;  %v2523_v20 = vrot.slane %v2521_v2, 4  ;;  %v3769_v23 = vpack.c.b16 %v3743_v28, %v6861_v0  ;;  %v3849_v48 = vpack.c.b16 %v3823_v10, %v3822_v46  ;;  %v5102_v2 = vld [vmem:[#allocation2 + $0x5c] sm:$0x1] }
 0x1d2   : > { %v3853_v33 = vpack.c.b16 %v3831_v29, %v3830_v62  ;;  %v3580_v4 = vunpack.c.l.b16 %v6913_v54  ;;  %v2507_v1 = vrot.slane %v5103_v31, 5  ;;  %v2669_v58 = vshrl.u32 %v2554_v13, 16 }
 0x1d3   : > { %v3465_v17 = vpop.permute.xlu0 %3464  ;;  %3864 = vrot.lane.b32.xlu2 %v3846_v49, %s5131_s6  ;;  %v5100_v49 = vld [vmem:[#allocation2 + $0x58] sm:$0xf]  ;;  %v6923_v63 = vsel %vm6028_vm4, %v2523_v20, %v2524_v52  ;;  %v2672_v27 = vshll.u32 %v2554_v13, 16  ;;  %v2897_v57 = vsel %vm5563_vm0, %v2892_v38, %v6901_v61  ;;  %v4710_v36 = vrot.slane %v2381_v41, 9  ;;  %v5005_v61 = vld [vmem:[#allocation2 + $0xa8] sm:$0xff] }
 0x1d4   : > { %v6909_v32 = vsel %vm3974_vm6, %v6550_v51, %v3465_v17  ;;  %v2479_v21 = vrot.slane %v5100_v49, 5  ;;  %v2902_v51 = vrot.slane %v2901_v9, 4  ;;  %v3581_v8 = vunpack.c.l.b16 %v6923_v63  ;;  %v6960_v13 = vld [vmem:[#allocation2 + $0x64] sm:$0xf] }
 0x1d5   : > { %v3541_v24 = vpop.permute.xlu2 %3540  ;;  %v2671_v37 = vrot.slane %v2669_v58, 4  ;;  %v2674_v17 = vrot.slane %v2672_v27, 5  ;;  %v2678_v10 = vshll.u32 %v6926_v3, 16  ;;  %v3130_v22 = vrot.slane %v6873_v40, 5 }
 0x1d6   : > { %3798 = vrot.lane.b32.xlu1 %v3773_v43, %s5130_s5  ;;  %v6918_v50 = vsel %vm4007_vm7, %v6827_v12, %v3541_v24  ;;  %v2482_v12 = vrot.slane %v5102_v2, 5  ;;  %v2481_v42 = vrot.slane %v2479_v21, 4  ;;  %v2907_v28 = vsel %vm5563_vm0, %v2902_v51, %v2906_v26  ;;  %v2560_v43 = vld [vmem:[#allocation2 + $0x60] sm:$0xf] }
 0x1d7   : > { %v2480_v46 = vsel %vm6028_vm4, %v4706_v35, %v2479_v21  ;;  %v2509_v52 = vrot.slane %v2507_v1, 4  ;;  %v2682_v9 = vshrl.u32 %v6926_v3, 16  ;;  %v3756_v29 = vunpack.c.l.b16 %v2897_v57  ;;  %v2568_v57 = vld [vmem:[#allocation2 + $0x90] sm:$0xf] }
 0x1d8   : > { %v3527_v53 = vpop.permute.xlu1 %3526  ;;  %v3757_v24 = vunpack.c.l.b16 %v2907_v28  ;;  %v2483_v35 = vsel %vm6028_vm4, %v2481_v42, %v2482_v12  ;;  %v6951_v49 = vrot.slane %v2678_v10, 5  ;;  %v3568_v21 = vunpack.c.l.b16 %v2480_v46  ;;  %v6965_v12 = vld [vmem:[#allocation2 + $0x44] sm:$0x1] }
 0x1d9   : > { %3790 = vrot.lane.b32.xlu0 %v3769_v23, %s5130_s5  ;;  %v6931_v0 = vsel %vm4007_vm7, %v6806_v14, %v3527_v53  ;;  %v2992_v14 = vld [vmem:[#allocation2 + $0xa8] sm:$0xe]  ;;  %v2684_v38 = vrot.slane %v2682_v9, 4  ;;  %v2508_v51 = vsel %vm6028_vm4, %v4710_v36, %v2507_v1  ;;  %v2675_v26 = vor.u32 %v2674_v17, %v2671_v37  ;;  %v2983_v17 = vld [vmem:[#allocation2 + $0x3c] sm:$0xe] }
 0x1da   : > { %v4728_v40 = vrot.slane %v2992_v14, 9  ;;  %v2741_v16 = vshrl.u32 %v2560_v43, 16  ;;  %v2744_v23 = vshll.u32 %v2560_v43, 16  ;;  %v3569_v53 = vunpack.c.l.b16 %v2483_v35  ;;  %v6988_v9 = vld [vmem:[#allocation2 + $0x94] sm:$0xf] }
 0x1db   : > { %v3471_v60 = vpop.permute.xlu0 %3470  ;;  %3878 = vrot.lane.b32.xlu2 %v3853_v33, %s5131_s6  ;;  %v3132_v33 = vrot.slane %v3130_v22, 4  ;;  %v3133_v2 = vrot.slane %v6899_v30, 5  ;;  %v3776_v31 = vpack.c.b16 %v3757_v24, %v3756_v29  ;;  %v2685_v1 = vor.u32 %v2684_v38, %v6951_v49 }
 0x1dc   : > { %v6945_v20 = vsel %vm3974_vm6, %v6586_v6, %v3471_v60  ;;  %v2688_v42 = vshll.u32 %v6965_v12, 16  ;;  %v6976_v58 = vsel %vm6028_vm4, %v4728_v40, %v3130_v22  ;;  %v3576_v30 = vunpack.c.l.b16 %v2508_v51 }
 0x1dd   : > { %v3547_v62 = vpop.permute.xlu2 %3546  ;;  %v2754_v27 = vshrl.u32 %v6960_v13, 16  ;;  %v2676_v28 = vrot.slane %v2675_v26, 4  ;;  %v2743_v46 = vrot.slane %v2741_v16, 4  ;;  %v2746_v60 = vrot.slane %v2744_v23, 5  ;;  %v4996_v16 = vld [vmem:[#allocation2 + $0x3c] sm:$0xff] }
 0x1de   : > { %3724 = vrot.lane.b32.xlu1 %v5005_v61, %s5129_s30  ;;  %v6956_v6 = vsel %vm4007_vm7, %v6858_v5, %v3547_v62  ;;  %v2511_v5 = vsel %vm6028_vm4, %v2509_v52, %v2510_v45  ;;  %v2750_v45 = vshll.u32 %v6960_v13, 16  ;;  %v3600_v14 = vpack.c.b16 %v3581_v8, %v3580_v4 }
 0x1df   : > { %v3594_v36 = vpack.c.b16 %v3569_v53, %v3568_v21  ;;  %v3134_v37 = vsel %vm6028_vm4, %v3132_v33, %v3133_v2  ;;  %v3836_v61 = vunpack.c.l.b16 %v6976_v58  ;;  %v2686_v22 = vrot.slane %v2685_v1, 4 }
 0x1e0   : > { %v3533_v63 = vpop.permute.xlu1 %3532  ;;  %v2690_v52 = vrot.slane %v2688_v42, 5  ;;  %v2837_v43 = vshrl.u32 %v2568_v57, 16  ;;  %v2752_v54 = vrot.slane %v2750_v45, 5  ;;  %v2756_v4 = vrot.slane %v2754_v27, 4 }
 0x1e1   : > { %3870 = vrot.lane.b32.xlu0 %v3849_v48, %s5131_s6  ;;  %v6970_v41 = vsel %vm4007_vm7, %v6838_v59, %v3533_v63  ;;  %v3577_v59 = vunpack.c.l.b16 %v2511_v5  ;;  %v3837_v8 = vunpack.c.l.b16 %v3134_v37  ;;  %v2681_v24 = vsel %vm5563_vm0, %v2676_v28, %v6951_v49  ;;  %v7007_v63 = vld [vmem:[#allocation2 + $0x68] sm:$0x1] }
 0x1e2   : > { %v2747_v35 = vor.u32 %v2746_v60, %v2743_v46  ;;  %v4719_v40 = vrot.slane %v2983_v17, 9  ;;  %v3067_v38 = vrot.slane %v6926_v3, 5  ;;  %v2840_v51 = vshll.u32 %v2568_v57, 16 }
 0x1e3   : > { %v6980_v48 = vpop.permute.xlu0 %3524  ;;  %3804 = vrot.lane.b32.xlu2 %v3776_v31, %s5130_s5  ;;  %v3598_v29 = vpack.c.b16 %v3577_v59, %v3576_v30  ;;  %v2846_v26 = vshll.u32 %v6988_v9, 16  ;;  %v2691_v23 = vsel %vm5563_vm0, %v2686_v22, %v2690_v52  ;;  %v2839_v49 = vrot.slane %v2837_v43, 4  ;;  %v7021_v59 = vld [vmem:[#allocation2 + $0x98] sm:$0x1] }
 0x1e4   : > { %v2850_v53 = vshrl.u32 %v6988_v9, 16  ;;  %v2757_v33 = vor.u32 %v2756_v4, %v2752_v54  ;;  %v2760_v3 = vshll.u32 %v7007_v63, 16  ;;  %v2842_v2 = vrot.slane %v2840_v51, 5 }
 0x1e5   : > { %v3553_v10 = vpop.permute.xlu2 %3552  ;;  %v7011_v5 = vrot.slane %v2846_v26, 5  ;;  %v2748_v1 = vrot.slane %v2747_v35, 4  ;;  %v3070_v42 = vrot.slane %v6965_v12, 5  ;;  %v3739_v45 = vunpack.c.l.b16 %v2691_v23  ;;  %v4180_v12 = vld [vmem:[%s7586_s2 + $0x20] sm:$0xf] }
 0x1e6   : > { %3616 = vrot.lane.b32.xlu1 %v3594_v36, %s5128_s29  ;;  %v6993_v62 = vsel %vm4007_vm7, %v6895_v25, %v3553_v10  ;;  %v2852_v58 = vrot.slane %v2850_v53, 4  ;;  %v3068_v27 = vsel %vm6028_vm4, %v4719_v40, %v3067_v38  ;;  %v3069_v57 = vrot.slane %v3067_v38, 4  ;;  %v2574_v26 = vld [vmem:[#allocation2 + $0xb4] sm:$0xf]  ;;  %v7053_v53 = vld [vmem:[#allocation2 + $0xb8] sm:$0xf] }
 0x1e7   : > { %v2843_v46 = vor.u32 %v2842_v2, %v2839_v49  ;;  %v7033_v36 = vrot.slane %v2757_v33, 4  ;;  %v2762_v37 = vrot.slane %v2760_v3, 5  ;;  %v3856_v17 = vpack.c.b16 %v3837_v8, %v3836_v61  ;;  %v5003_v3 = vld [vmem:[#allocation2 + $0x90] sm:$0xff] }
 0x1e8   : > { %v3539_v21 = vpop.permute.xlu1 %3538  ;;  %v2853_v60 = vor.u32 %v2852_v58, %v7011_v5  ;;  %v2753_v10 = vsel %vm5563_vm0, %v2748_v1, %v2752_v54  ;;  %v3818_v22 = vunpack.c.l.b16 %v3068_v27  ;;  %v3071_v4 = vsel %vm6028_vm4, %v3069_v57, %v3070_v42  ;;  %v2990_v54 = vld [vmem:[#allocation2 + $0x90] sm:$0xe]  ;;  %v5012_v42 = vld [vmem:[%s7586_s2 + $0x18] sm:$0xff] }
 0x1e9   : > { %3628 = vrot.lane.b32.xlu0 %v3600_v14, %s5128_s29  ;;  %v7003_v25 = vsel %vm4007_vm7, %v6869_v19, %v3539_v21  ;;  %v3738_v19 = vunpack.c.l.b16 %v2681_v24  ;;  %v2856_v14 = vshll.u32 %v7021_v59, 16  ;;  %v2986_v24 = vld [vmem:[#allocation2 + $0x60] sm:$0xe]  ;;  %v4198_v35 = vunpack.c.l.b16 %v4180_v12 }
 0x1ea   : > { %v2844_v61 = vrot.slane %v2843_v46, 4  ;;  %v2854_v8 = vrot.slane %v2853_v60, 4  ;;  %v2763_v40 = vsel %vm5563_vm0, %v7033_v36, %v2762_v37  ;;  %v7048_v38 = vunpack.c.l.b16 %v2753_v10 }
 0x1eb   : > { %v3531_v31 = vpop.permute.xlu0 %3530  ;;  %3706 = vrot.lane.b32.xlu2 %v4996_v16, %s5129_s30  ;;  %v3767_v43 = vpack.c.b16 %v3739_v45, %v3738_v19  ;;  %v2858_v21 = vrot.slane %v2856_v14, 5  ;;  %v3116_v51 = vrot.slane %v6988_v9, 5  ;;  %v3819_v23 = vunpack.c.l.b16 %v3071_v4 }
 0x1ec   : > { %v7017_v30 = vsel %vm4007_vm7, %v6669_v39, %v3531_v31  ;;  %v3091_v49 = vrot.slane %v7007_v63, 5  ;;  %v4726_v31 = vrot.slane %v2990_v54, 9  ;;  %v2849_v1 = vsel %vm5563_vm0, %v2844_v61, %v7011_v5  ;;  %v7097_v54 = vld [vmem:[#allocation2 + $0x68] sm:$0x1] }
 0x1ed   : > { %v3607_v28 = vpop.permute.xlu2 %3606  ;;  %v2859_v63 = vsel %vm5563_vm0, %v2854_v8, %v2858_v21  ;;  %v2912_v58 = vshll.u32 %v2574_v26, 16  ;;  %v3118_v45 = vrot.slane %v3116_v51, 4  ;;  %v3119_v27 = vrot.slane %v7021_v59, 5 }
 0x1ee   : > { %3624 = vrot.lane.b32.xlu1 %v3598_v29, %s5128_s29  ;;  %v7031_v39 = vsel %vm4040_vm8, %v6931_v0, %v3607_v28  ;;  %v3088_v29 = vrot.slane %v6960_v13, 5  ;;  %v4203_v13 = vpack.c.b16 %v4198_v35, %v4198_v35  ;;  %v2918_v57 = vshll.u32 %v7053_v53, 16  ;;  %v4999_v28 = vld [vmem:[#allocation2 + $0x60] sm:$0xff]  ;;  %v5011_v35 = vld [vmem:[%s7586_s2 + $0x10] sm:$0xff] }
 0x1ef   : > { %v2922_v5 = vshrl.u32 %v7053_v53, 16  ;;  %v3847_v46 = vpack.c.b16 %v3819_v23, %v3818_v22  ;;  %v2914_v12 = vrot.slane %v2912_v58, 5  ;;  %v3752_v37 = vunpack.c.l.b16 %v2849_v1 }
 0x1f0   : > { %v3545_v52 = vpop.permute.xlu1 %3544  ;;  %v3090_v2 = vrot.slane %v3088_v29, 4  ;;  %v4243_v9 = vsel %vm4241_vm9, %v4203_v13, 0  ;;  %v7077_v10 = vrot.slane %v2918_v57, 5  ;;  %v3745_v22 = vunpack.c.l.b16 %v2763_v40 }
 0x1f1   : > { %3884 = vrot.lane.b32.xlu0 %v3856_v17, %s5131_s6  ;;  %v7043_v0 = vsel %vm4007_vm7, %v6909_v32, %v3545_v52  ;;  %v4722_v32 = vrot.slane %v2986_v24, 9  ;;  %4248 = vmatpush.bf16.msra.mxu0 %v4243_v9  ;;  %v3753_v17 = vunpack.c.l.b16 %v2859_v63  ;;  %v2924_v59 = vrot.slane %v2922_v5, 4  ;;  %v2562_v52 = vld [vmem:[#allocation2 + $0x6c] sm:$0xf] }
 0x1f2   : > { %5013 = vmatpush.bf16.msra.mxu1 %v4243_v9  ;;  %5014 = vmatpush.bf16.msra.mxu2 %v4243_v9  ;;  %v3092_v4 = vsel %vm6028_vm4, %v3090_v2, %v3091_v49  ;;  %v3117_v24 = vsel %vm6028_vm4, %v4726_v31, %v3116_v51  ;;  %v3120_v61 = vsel %vm6028_vm4, %v3118_v45, %v3119_v27  ;;  %v2489_v40 = vrot.slane %v7097_v54, 5  ;;  %v2378_v49 = vld [vmem:[#allocation2 + $0x60] sm:$0xe] }
 0x1f3   : > { %v3537_v16 = vpop.permute.xlu0 %3536  ;;  %3786 = vrot.lane.b32.xlu2 %v3767_v43, %s5130_s5  ;;  %v7075_v60 = vsel %vm6028_vm4, %v4722_v32, %v3088_v29  ;;  %5015 = vmatpush.bf16.msra.mxu3 %v4243_v9  ;;  %v7088_v29 = vld [vmem:[#allocation2 + $0xbc] sm:$0x1]  ;;  %v2765_v13 = vshrl.u32 %v2562_v52, 16  ;;  %v2384_v32 = vld [vmem:[#allocation2 + $0xa8] sm:$0xe]  ;;  %v3825_v9 = vunpack.c.l.b16 %v3092_v4  ;;  %v3832_v1 = vunpack.c.l.b16 %v3117_v24 }
 0x1f4   : > { %v7057_v33 = vsel %vm4007_vm7, %v6707_v7, %v3537_v16  ;;  %v2909_v7 = vshrl.u32 %v2574_v26, 16  ;;  %v2928_v21 = vshll.u32 %v7088_v29, 16  ;;  %v3774_v16 = vpack.c.b16 %v3753_v17, %v3752_v37 }
 0x1f5   : > { %v7059_v19 = vpop.permute.xlu2 %3780  ;;  %4249 = vmatpush.bf16.msra.mxu0 %v5012_v42  ;;  %v3824_v23 = vunpack.c.l.b16 %v7075_v60  ;;  %v3833_v63 = vunpack.c.l.b16 %v3120_v61  ;;  %v3770_v45 = vpack.c.b16 %v3745_v22, %v7048_v38  ;;  %v2767_v60 = vrot.slane %v2765_v13, 4  ;;  %v2570_v13 = vld [vmem:[#allocation2 + $0x9c] sm:$0xf] }
 0x1f6   : > { %3720 = vrot.lane.b32.xlu1 %v5003_v3, %s5129_s30  ;;  %v2911_v14 = vrot.slane %v2909_v7, 4  ;;  %5016 = vmatpush.bf16.msra.mxu1 %v5012_v42  ;;  %v5105_v3 = vld [vmem:[#allocation2 + $0x64] sm:$0xf]  ;;  %v5106_v7 = vld [vmem:[#allocation2 + $0xac] sm:$0xf]  ;;  %v2930_v5 = vrot.slane %v2928_v21, 5 }
 0x1f7   : > { %5017 = vmatpush.bf16.msra.mxu2 %v5012_v42  ;;  %5018 = vmatpush.bf16.msra.mxu3 %v5012_v42  ;;  %v2486_v2 = vrot.slane %v5105_v3, 5  ;;  %v2528_v58 = vrot.slane %v5106_v7, 5  ;;  %v7111_v42 = vld [vmem:[#allocation2 + $0x70] sm:$0xf]  ;;  %v3850_v22 = vpack.c.b16 %v3825_v9, %v3824_v23  ;;  %v3854_v4 = vpack.c.b16 %v3833_v63, %v3832_v1  ;;  %v7138_v9 = vld [vmem:[#allocation2 + $0xa0] sm:$0xf] }
 0x1f8   : > { %v3551_v36 = vpop.permute.xlu1 %3550  ;;  %v2915_v8 = vor.u32 %v2914_v12, %v2911_v14  ;;  %v2768_v14 = vshll.u32 %v2562_v52, 16  ;;  %v5107_v12 = vld [vmem:[#allocation2 + $0xb0] sm:$0x1]  ;;  %v2778_v38 = vshrl.u32 %v7111_v42, 16  ;;  %v5009_v52 = vld [vmem:[%s7586_s2] sm:$0xff]  ;;  %v5006_v63 = vld [vmem:[#allocation2 + $0xb4] sm:$0xff] }
 0x1f9   : > { %3712 = vrot.lane.b32.xlu0 %v4999_v28, %s5129_s30  ;;  %v7082_v43 = vsel %vm4007_vm7, %v6945_v20, %v3551_v36  ;;  %v2925_v20 = vor.u32 %v2924_v59, %v7077_v10  ;;  %4250 = vmatpush.bf16.msra.mxu0 %v5011_v35  ;;  %v4713_v28 = vrot.slane %v2384_v32, 9  ;;  %v2531_v36 = vrot.slane %v5107_v12, 5 }
 0x1fa   : > { %v2916_v27 = vrot.slane %v2915_v8, 4  ;;  %5019 = vmatpush.bf16.msra.mxu1 %v5011_v35  ;;  %v2488_v17 = vrot.slane %v2486_v2, 4  ;;  %v2774_v59 = vshll.u32 %v7111_v42, 16  ;;  %v2530_v24 = vrot.slane %v2528_v58, 4 }
 0x1fb   : > { %v3543_v51 = vpop.permute.xlu0 %3542  ;;  %3866 = vrot.lane.b32.xlu2 %v3847_v46, %s5131_s6  ;;  %v2926_v57 = vrot.slane %v2925_v20, 4  ;;  %v4707_v46 = vrot.slane %v2378_v49, 9  ;;  %5020 = vmatpush.bf16.msra.mxu2 %v5011_v35  ;;  %v2770_v61 = vrot.slane %v2768_v14, 5  ;;  %v7128_v20 = vld [vmem:[#allocation2 + $0x74] sm:$0x1]  ;;  %v2529_v23 = vsel %vm6028_vm4, %v4713_v28, %v2528_v58 }
 0x1fc   : > { %v7103_v26 = vsel %vm4007_vm7, %v6740_v47, %v3543_v51  ;;  %v5010_v47 = vld [vmem:[%s7586_s2 + $0x8] sm:$0xff]  ;;  %5021 = vmatpush.bf16.msra.mxu3 %v5011_v35  ;;  %v2921_v35 = vsel %vm5563_vm0, %v2916_v27, %v7077_v10  ;;  %v7130_v21 = vrot.slane %v2774_v59, 5  ;;  %v2780_v51 = vrot.slane %v2778_v38, 4  ;;  %v2993_v10 = vld [vmem:[#allocation2 + $0xb4] sm:$0xe] }
 0x1fd   : > { %v7106_v31 = vpop.permute.xlu2 %3612  ;;  %4251 = vmatpush.bf16.msra.mxu0 %v5010_v47  ;;  %v2931_v8 = vsel %vm5563_vm0, %v2926_v57, %v2930_v5  ;;  %v2487_v32 = vsel %vm6028_vm4, %v4707_v46, %v2486_v2  ;;  %v3137_v49 = vrot.slane %v7053_v53, 5  ;;  %v2771_v3 = vor.u32 %v2770_v61, %v2767_v60 }
 0x1fe   : > { %3800 = vrot.lane.b32.xlu1 %v3774_v16, %s5130_s5  ;;  %5022 = vmatpush.bf16.msra.mxu1 %v5010_v47  ;;  %v2490_v7 = vsel %vm6028_vm4, %v2488_v17, %v2489_v40  ;;  %v2781_v58 = vor.u32 %v2780_v51, %v7130_v21  ;;  %v2784_v2 = vshll.u32 %v7128_v20, 16  ;;  %v3759_v27 = vunpack.c.l.b16 %v2931_v8 }
 0x1ff   : > { %5023 = vmatpush.bf16.msra.mxu2 %v5010_v47  ;;  %v2861_v57 = vshrl.u32 %v2570_v13, 16  ;;  %v2864_v5 = vshll.u32 %v2570_v13, 16  ;;  %v4729_v54 = vrot.slane %v2993_v10, 9  ;;  %v3140_v40 = vrot.slane %v7088_v29, 5 }
 0x200   : > { %v7115_v37 = vpop.permute.xlu1 %3604  ;;  %5024 = vmatpush.bf16.msra.mxu3 %v5010_v47  ;;  %v2870_v28 = vshll.u32 %v7138_v9, 16  ;;  %v3570_v46 = vunpack.c.l.b16 %v2487_v32  ;;  %v3571_v47 = vunpack.c.l.b16 %v2490_v7  ;;  %v3139_v60 = vrot.slane %v3137_v49, 4  ;;  %v7177_v32 = vld [vmem:[#allocation2 + $0xa4] sm:$0x1] }
 0x201   : > { %3792 = vrot.lane.b32.xlu0 %v3770_v45, %s5130_s5  ;;  %v3758_v45 = vunpack.c.l.b16 %v2921_v35  ;;  %4252 = vmatpush.bf16.msra.mxu0 %v5009_v52  ;;  %v2772_v14 = vrot.slane %v2771_v3, 4  ;;  %v2782_v17 = vrot.slane %v2781_v58, 4  ;;  %v2786_v59 = vrot.slane %v2784_v2, 5 }
 0x202   : > { %5025 = vmatpush.bf16.msra.mxu1 %v5009_v52  ;;  %v2863_v38 = vrot.slane %v2861_v57, 4  ;;  %v7160_v61 = vrot.slane %v2870_v28, 5  ;;  %v2874_v35 = vshrl.u32 %v7138_v9, 16  ;;  %v3595_v51 = vpack.c.b16 %v3571_v47, %v3570_v46  ;;  %v5108_v57 = vld [vmem:[#allocation2 + $0x94] sm:$0xf] }
 0x203   : > { %v3549_v16 = vpop.permute.xlu0 %3548  ;;  %3880 = vrot.lane.b32.xlu2 %v3854_v4, %s5131_s6  ;;  %5026 = vmatpush.bf16.msra.mxu2 %v5009_v52  ;;  %v2866_v4 = vrot.slane %v2864_v5, 5  ;;  %v3138_v13 = vsel %vm6028_vm4, %v4729_v54, %v3137_v49  ;;  %v2880_v49 = vshll.u32 %v7177_v32, 16  ;;  %v2514_v5 = vrot.slane %v5108_v57, 5 }
 0x204   : > { %v7142_v1 = vsel %vm4007_vm7, %v6778_v56, %v3549_v16  ;;  %v2532_v56 = vsel %vm6028_vm4, %v2530_v24, %v2531_v36  ;;  %5027 = vmatpush.bf16.msra.mxu3 %v5009_v52  ;;  %v3777_v36 = vpack.c.b16 %v3759_v27, %v3758_v45  ;;  %v3582_v24 = vunpack.c.l.b16 %v2529_v23  ;;  %v2382_v27 = vld [vmem:[#allocation2 + $0x90] sm:$0xe] }
 0x205   : > { %v7150_v53 = vpop.permute.xlu2 %3620  ;;  %v3583_v29 = vunpack.c.l.b16 %v2532_v56  ;;  %v3141_v16 = vsel %vm6028_vm4, %v3139_v60, %v3140_v40  ;;  %v2787_v23 = vsel %vm5563_vm0, %v2782_v17, %v2786_v59  ;;  %v2867_v10 = vor.u32 %v2866_v4, %v2863_v38  ;;  %v5109_v56 = vld [vmem:[#allocation2 + $0x98] sm:$0x1]  ;;  %v5000_v60 = vld [vmem:[#allocation2 + $0x6c] sm:$0xff]  ;;  %v2576_v59 = vld [vmem:[#allocation2 + $0xc0] sm:$0xf] }
 0x206   : > { %3726 = vrot.lane.b32.xlu1 %v5006_v63, %s5129_s30  ;;  %v2876_v3 = vrot.slane %v2874_v35, 4  ;;  %v3838_v7 = vunpack.c.l.b16 %v3138_v13  ;;  %v3839_v58 = vunpack.c.l.b16 %v3141_v16  ;;  %v3747_v45 = vunpack.c.l.b16 %v2787_v23 }
 0x207   : > { %v3601_v2 = vpack.c.b16 %v3583_v29, %v3582_v24  ;;  %v2517_v54 = vrot.slane %v5109_v56, 5  ;;  %v4009_v40 = vsel %vm4007_vm7, %v6634_v18, %v6980_v48  ;;  %v2868_v46 = vrot.slane %v2867_v10, 4  ;;  %v2991_v24 = vld [vmem:[#allocation2 + $0x9c] sm:$0xe]  ;;  %v7195_v48 = vld [vmem:[#allocation2 + $0xc4] sm:$0xf] }
 0x208   : > { %v7157_v12 = vpop.permute.xlu1 %3700  ;;  %v2882_v17 = vrot.slane %v2880_v49, 5  ;;  %v4042_v38 = vsel %vm4040_vm8, %v4009_v40, %v7115_v37  ;;  %v3857_v4 = vpack.c.b16 %v3839_v58, %v3838_v7  ;;  %v3123_v18 = vrot.slane %v7138_v9, 5 }
 0x209   : > { %3872 = vrot.lane.b32.xlu0 %v3850_v22, %s5131_s6  ;;  %v2777_v22 = vsel %vm5563_vm0, %v2772_v14, %v7130_v21  ;;  %v2877_v21 = vor.u32 %v2876_v3, %v7160_v61  ;;  %v2516_v35 = vrot.slane %v2514_v5, 4  ;;  %v3095_v37 = vrot.slane %v7111_v42, 5 }
 0x20a   : > { %v2936_v13 = vshll.u32 %v2576_v59, 16  ;;  %v4727_v23 = vrot.slane %v2991_v24, 9  ;;  %v2942_v10 = vshll.u32 %v7195_v48, 16  ;;  %v2946_v3 = vshrl.u32 %v7195_v48, 16 }
 0x20b   : > { %v3555_v8 = vpop.permute.xlu0 %3554  ;;  %3806 = vrot.lane.b32.xlu2 %v3777_v36, %s5130_s5  ;;  %v2878_v14 = vrot.slane %v2877_v21, 4  ;;  %v4711_v36 = vrot.slane %v2382_v27, 9  ;;  %v3125_v49 = vrot.slane %v3123_v18, 4  ;;  %v3126_v42 = vrot.slane %v7177_v32, 5  ;;  %v7216_v21 = vld [vmem:[#allocation2 + $0xc8] sm:$0x1] }
 0x20c   : > { %v7173_v52 = vsel %vm4007_vm7, %v6815_v44, %v3555_v8  ;;  %v3746_v44 = vunpack.c.l.b16 %v2777_v22  ;;  %v2873_v8 = vsel %vm5563_vm0, %v2868_v46, %v7160_v61  ;;  %v2987_v22 = vld [vmem:[#allocation2 + $0x6c] sm:$0xe]  ;;  %v2518_v58 = vsel %vm6028_vm4, %v2516_v35, %v2517_v54  ;;  %v5004_v32 = vld [vmem:[#allocation2 + $0x9c] sm:$0xff] }
 0x20d   : > { %v7179_v63 = vpop.permute.xlu2 %3716  ;;  %v2883_v9 = vsel %vm5563_vm0, %v2878_v14, %v2882_v17  ;;  %v2515_v61 = vsel %vm6028_vm4, %v4711_v36, %v2514_v5  ;;  %v4075_v27 = vsel %vm4073_vm10, %v4042_v38, %v7157_v12  ;;  %v3754_v56 = vunpack.c.l.b16 %v2873_v8 }
 0x20e   : > { %3618 = vrot.lane.b32.xlu1 %v3595_v51, %s5128_s29  ;;  %v2933_v51 = vshrl.u32 %v2576_v59, 16  ;;  %v3755_v5 = vunpack.c.l.b16 %v2883_v9  ;;  %v4723_v40 = vrot.slane %v2987_v22, 9  ;;  %v3098_v54 = vrot.slane %v7128_v20, 5  ;;  %v2385_v9 = vld [vmem:[#allocation2 + $0xb4] sm:$0xe] }
 0x20f   : > { %v3124_v46 = vsel %vm6028_vm4, %v4727_v23, %v3123_v18  ;;  %v2952_v17 = vshll.u32 %v7216_v21, 16  ;;  %v4108_v38 = vsel %vm4106_vm11, %v4075_v27, %v7059_v19  ;;  %v3579_v36 = vunpack.c.l.b16 %v2518_v58  ;;  %v5111_v22 = vld [vmem:[#allocation2 + $0xc4] sm:$0xf] }
 0x210   : > { %v3611_v28 = vpop.permute.xlu1 %3610  ;;  %v2935_v7 = vrot.slane %v2933_v51, 4  ;;  %v3775_v24 = vpack.c.b16 %v3755_v5, %v3754_v56  ;;  %v3096_v18 = vsel %vm6028_vm4, %v4723_v40, %v3095_v37  ;;  %v3834_v19 = vunpack.c.l.b16 %v3124_v46  ;;  %v5113_v5 = vld [vmem:[#allocation2 + $0xc8] sm:$0x1] }
 0x211   : > { %3630 = vrot.lane.b32.xlu0 %v3601_v2, %s5128_s29  ;;  %v7190_v47 = vsel %vm4040_vm8, %v7017_v30, %v3611_v28  ;;  %v3771_v30 = vpack.c.b16 %v3747_v45, %v3746_v44  ;;  %v2938_v2 = vrot.slane %v2936_v13, 5  ;;  %v7218_v44 = vrot.slane %v2942_v10, 5 }
 0x212   : > { %v2948_v45 = vrot.slane %v2946_v3, 4  ;;  %v3097_v28 = vrot.slane %v3095_v37, 4  ;;  %v2542_v23 = vrot.slane %v5111_v22, 5  ;;  %v2386_v37 = vld [vmem:[#allocation2 + $0xc0] sm:$0xe]  ;;  %v4714_v27 = vrot.slane %v2385_v9, 9 }
 0x213   : > { %v7197_v29 = vpop.permute.xlu0 %3608  ;;  %3714 = vrot.lane.b32.xlu2 %v5000_v60, %s5129_s30  ;;  %v3127_v60 = vsel %vm6028_vm4, %v3125_v49, %v3126_v42  ;;  %v2939_v14 = vor.u32 %v2938_v2, %v2935_v7  ;;  %v5112_v49 = vld [vmem:[#allocation2 + $0xbc] sm:$0x1]  ;;  %v3826_v2 = vunpack.c.l.b16 %v3096_v18  ;;  %v2545_v40 = vrot.slane %v5113_v5, 5 }
 0x214   : > { %v2949_v12 = vor.u32 %v2948_v45, %v7218_v44  ;;  %v3099_v51 = vsel %vm6028_vm4, %v3097_v28, %v3098_v54  ;;  %v3835_v13 = vunpack.c.l.b16 %v3127_v60  ;;  %v2538_v42 = vrot.slane %v5112_v49, 5 }
 0x215   : > { %v7204_v16 = vpop.permute.xlu2 %3796  ;;  %v2940_v10 = vrot.slane %v2939_v14, 4  ;;  %v3827_v45 = vunpack.c.l.b16 %v3099_v51  ;;  %v4715_v28 = vrot.slane %v2386_v37, 9  ;;  %v2544_v54 = vrot.slane %v2542_v23, 4  ;;  %v2579_v14 = vld [vmem:[#allocation2 + $0xd0] sm:$0xf] }
 0x216   : > { %3794 = vrot.lane.b32.xlu1 %v3771_v30, %s5130_s5  ;;  %v5110_v30 = vld [vmem:[#allocation2 + $0xb8] sm:$0xf]  ;;  %v2950_v3 = vrot.slane %v2949_v12, 4  ;;  %v2970_v22 = vshrl.u32 %v2579_v14, 16 }
 0x217   : > { %v2535_v35 = vrot.slane %v5110_v30, 5  ;;  %v2945_v46 = vsel %vm5563_vm0, %v2940_v10, %v7218_v44 }
 0x218   : > { %v7222_v57 = vpop.permute.xlu1 %3708  ;;  %v3760_v30 = vunpack.c.l.b16 %v2945_v46 }
 0x219   : > { %3886 = vrot.lane.b32.xlu0 %v3857_v4, %s5131_s6  ;;  %v3578_v4 = vunpack.c.l.b16 %v2515_v61  ;;  %v2954_v61 = vrot.slane %v2952_v17, 5  ;;  %v2537_v56 = vrot.slane %v2535_v35, 4  ;;  %v2578_v17 = vld [vmem:[#allocation2 + $0xcc] sm:$0xf] }
 0x21a   : > { %v2960_v9 = vshll.u32 %v2578_v17, 16 }
 0x21b   : > { %v3861_v59 = vpop.permute.xlu0 %3860  ;;  %3722 = vrot.lane.b32.xlu2 %v5004_v32, %s5129_s30  ;;  %v3599_v7 = vpack.c.b16 %v3579_v36, %v3578_v4  ;;  %v3855_v32 = vpack.c.b16 %v3835_v13, %v3834_v19  ;;  %v2955_v60 = vsel %vm5563_vm0, %v2950_v3, %v2954_v61  ;;  %v3851_v4 = vpack.c.b16 %v3827_v45, %v3826_v2  ;;  %v5007_v36 = vld [vmem:[#allocation2 + $0xc0] sm:$0xff] }
 0x21c   : > { %v4141_v20 = vsel %vm4139_vm12, %v4108_v38, %v3861_v59  ;;  %v3151_v59 = vrot.slane %v2579_v14, 5  ;;  %v4050_v38 = vsel %vm4040_vm8, %v6970_v41, %v7106_v31  ;;  %v2539_v44 = vsel %vm6028_vm4, %v2537_v56, %v2538_v42  ;;  %v2595_v41 = vld [vmem:[#allocation2 + $0xd4] sm:$0x1]  ;;  %v2994_v56 = vld [vmem:[#allocation2 + $0xc0] sm:$0xe] }
 0x21d   : > { %4940 = vmatmul.msk.bf16.vlgmr.msra.gmra.mxu0 %vm4208_vm13, %v4141_v20  ;;  %v7239_v8 = vpop.permute.xlu2 %3704  ;;  %v2536_v20 = vsel %vm6028_vm4, %v4714_v27, %v2535_v35  ;;  %v3761_v51 = vunpack.c.l.b16 %v2955_v60  ;;  %v2543_v19 = vsel %vm6028_vm4, %v4715_v28, %v2542_v23  ;;  %v2546_v13 = vsel %vm6028_vm4, %v2544_v54, %v2545_v40 }
 0x21e   : > { %3802 = vrot.lane.b32.xlu1 %v3775_v24, %s5130_s5  ;;  %v2995_v24 = vld [vmem:[#allocation2 + $0xcc] sm:$0xe]  ;;  %v2957_v31 = vshrl.u32 %v2578_v17, 16  ;;  %v2966_v35 = vshll.u32 %v2579_v14, 16  ;;  %v4083_v10 = vsel %vm4073_vm10, %v4050_v38, %v7222_v57  ;;  %v3153_v61 = vrot.slane %v3151_v59, 4 }
 0x21f   : > { %v4731_v3 = vrot.slane %v2995_v24, 9  ;;  %v3154_v37 = vrot.slane %v2595_v41, 5  ;;  %v3586_v23 = vunpack.c.l.b16 %v2543_v19  ;;  %v3144_v2 = vrot.slane %v7195_v48, 5  ;;  %v5008_v19 = vld [vmem:[#allocation2 + $0xcc] sm:$0xff] }
 0x220   : > { %v3789_v58 = vpop.permute.xlu1 %3788  ;;  %v3778_v27 = vpack.c.b16 %v3761_v51, %v3760_v30  ;;  %v2959_v5 = vrot.slane %v2957_v31, 4  ;;  %v2962_v57 = vrot.slane %v2960_v9, 5  ;;  %v2968_v40 = vrot.slane %v2966_v35, 5 }
 0x221   : > { %3626 = vrot.lane.b32.xlu0 %v3599_v7, %s5128_s29  ;;  %v4116_v49 = vsel %vm4106_vm11, %v4083_v10, %v3789_v58  ;;  %v3587_v7 = vunpack.c.l.b16 %v2546_v13  ;;  %v3584_v54 = vunpack.c.l.b16 %v2536_v20  ;;  %v3585_v58 = vunpack.c.l.b16 %v2539_v44 }
 0x222   : > { %v3152_v48 = vsel %vm6028_vm4, %v4731_v3, %v3151_v59  ;;  %v3155_v46 = vsel %vm6028_vm4, %v3153_v61, %v3154_v37  ;;  %v4730_v14 = vrot.slane %v2994_v56, 9  ;;  %v3146_v17 = vrot.slane %v3144_v2, 4 }
 0x223   : > { %v7250_v12 = vpop.permute.xlu0 %3702  ;;  %3882 = vrot.lane.b32.xlu2 %v3855_v32, %s5131_s6  ;;  %v2972_v32 = vrot.slane %v2970_v22, 4  ;;  %v3603_v60 = vpack.c.b16 %v3587_v7, %v3586_v23  ;;  %v3147_v38 = vrot.slane %v7216_v21, 5  ;;  %v2963_v24 = vor.u32 %v2962_v57, %v2959_v5 }
 0x224   : > { %v3842_v44 = vunpack.c.l.b16 %v3152_v48  ;;  %v3843_v30 = vunpack.c.l.b16 %v3155_v46  ;;  %v3602_v51 = vpack.c.b16 %v3585_v58, %v3584_v54  ;;  %v3145_v59 = vsel %vm6028_vm4, %v4730_v14, %v3144_v2 }
 0x225   : > { %v7260_v18 = vpop.permute.xlu2 %3784  ;;  %v2973_v20 = vor.u32 %v2972_v32, %v2968_v40  ;;  %v3148_v31 = vsel %vm6028_vm4, %v3146_v17, %v3147_v38  ;;  %v2964_v9 = vrot.slane %v2963_v24, 4  ;;  %v3840_v61 = vunpack.c.l.b16 %v3145_v59 }
 0x226   : > { %3728 = vrot.lane.b32.xlu1 %v5007_v36, %s5129_s30  ;;  %v2976_v36 = vshll.u32 %v2595_v41, 16  ;;  %v4077_v41 = vsel %vm4073_vm10, %v7031_v39, %v7250_v12  ;;  %v3859_v22 = vpack.c.b16 %v3843_v30, %v3842_v44  ;;  %v3841_v37 = vunpack.c.l.b16 %v3148_v31 }
 0x227   : > { %v2974_v35 = vrot.slane %v2973_v20, 4  ;;  %v4058_v7 = vsel %vm4040_vm8, %v6918_v50, %v7150_v53  ;;  %v4046_v50 = vsel %vm4040_vm8, %v6850_v34, %v7197_v29 }
 0x228   : > { %v3869_v42 = vpop.permute.xlu1 %3868  ;;  %v2978_v21 = vrot.slane %v2976_v36, 5  ;;  %v3858_v12 = vpack.c.b16 %v3841_v37, %v3840_v61  ;;  %v4079_v53 = vsel %vm4073_vm10, %v4046_v50, %v7239_v8 }
 0x229   : > { %3874 = vrot.lane.b32.xlu0 %v3851_v4, %s5131_s6  ;;  %v4149_v45 = vsel %vm4139_vm12, %v4116_v49, %v3869_v42  ;;  %v2969_v42 = vsel %vm5563_vm0, %v2964_v9, %v2968_v40 }
 0x22a   : > { %4944 = vmatmul.msk.bf16.vlgmr.msra.gmra.mxu1 %vm4208_vm13, %v4149_v45  ;;  %v2979_v39 = vsel %vm5563_vm0, %v2974_v35, %v2978_v21  ;;  %v3762_v2 = vunpack.c.l.b16 %v2969_v42 }
 0x22b   : > { %v3783_v28 = vpop.permute.xlu0 %3782  ;;  %3808 = vrot.lane.b32.xlu2 %v3778_v27, %s5130_s5  ;;  %v3763_v45 = vunpack.c.l.b16 %v2979_v39  ;;  %v4091_v27 = vsel %vm4073_vm10, %v4058_v7, %v7179_v63  ;;  %v4112_v63 = vsel %vm4106_vm11, %v4079_v53, %v7260_v18 }
 0x22c   : > { %v4110_v10 = vsel %vm4106_vm11, %v4077_v41, %v3783_v28  ;;  %v4124_v56 = vsel %vm4106_vm11, %v4091_v27, %v7204_v16 }
 0x22d   : > { %v3865_v4 = vpop.permute.xlu2 %3864  ;;  %v3779_v57 = vpack.c.b16 %v3763_v45, %v3762_v2 }
 0x22e   : > { %3634 = vrot.lane.b32.xlu1 %v3603_v60, %s5128_s29  ;;  %v4145_v28 = vsel %vm4139_vm12, %v4112_v63, %v3865_v4 }
 0x230   : > { %v3615_v13 = vpop.permute.xlu1 %3614 }
 0x231   : > { %3632 = vrot.lane.b32.xlu0 %v3602_v51, %s5128_s29  ;;  %v4052_v14 = vsel %vm4040_vm8, %v6883_v55, %v3615_v13 }
 0x233   : > { %v3863_v3 = vpop.permute.xlu0 %3862  ;;  %3730 = vrot.lane.b32.xlu2 %v5008_v19, %s5129_s30 }
 0x234   : > { %v4143_v11 = vsel %vm4139_vm12, %v4110_v10, %v3863_v3 }
 0x235   : > { %4941 = vmatmul.msk.bf16.gmra.mxu0 %vm4208_vm13, %v4143_v11  ;;  %v3879_v49 = vpop.permute.xlu2 %3878 }
 0x236   : > { %3890 = vrot.lane.b32.xlu1 %v3859_v22, %s5131_s6 }
 0x238   : > { %v3623_v23 = vpop.permute.xlu1 %3622 }
 0x239   : > { %3888 = vrot.lane.b32.xlu0 %v3858_v12, %s5131_s6  ;;  %v4060_v58 = vsel %vm4040_vm8, %v7103_v26, %v3623_v23 }
 0x23b   : > { %v3877_v15 = vpop.permute.xlu0 %3876 }
 0x23c   : > { %v4157_v5 = vsel %vm4139_vm12, %v4124_v56, %v3877_v15 }
 0x23d   : > { %4948 = vmatmul.msk.bf16.vlgmr.msra.gmra.mxu2 %vm4208_vm13, %v4157_v5  ;;  %v3805_v40 = vpop.permute.xlu2 %3804 }
 0x240   : > { %v3719_v32 = vpop.permute.xlu1 %3718 }
 0x241   : > { %3810 = vrot.lane.b32.xlu0 %v3779_v57, %s5130_s5  ;;  %v4093_v48 = vsel %vm4073_vm10, %v4060_v58, %v3719_v32 }
 0x243   : > { %v3711_v16 = vpop.permute.xlu0 %3710 }
 0x244   : > { %v4085_v17 = vsel %vm4073_vm10, %v4052_v14, %v3711_v16 }
 0x245   : > { %4942 = vmatmul.msk.bf16.gmra.mxu0 %vm4208_vm13, %v4145_v28  ;;  %v3707_v54 = vpop.permute.xlu2 %3706 }
 0x246   : > { %v4081_v4 = vsel %vm4073_vm10, %v7190_v47, %v3707_v54 }
 0x248   : > { %v3799_v34 = vpop.permute.xlu1 %3798 }
 0x249   : > { %v4126_v29 = vsel %vm4106_vm11, %v4093_v48, %v3799_v34 }
 0x24a   : > { %v4159_v46 = vsel %vm4139_vm12, %v4126_v29, %v3879_v49 }
 0x24b   : > { %v3791_v8 = vpop.permute.xlu0 %3790 }
 0x24c   : > { %v4118_v38 = vsel %vm4106_vm11, %v4085_v17, %v3791_v8 }
 0x24d   : > { %4949 = vmatmul.msk.bf16.gmra.mxu2 %vm4208_vm13, %v4159_v46  ;;  %v3787_v18 = vpop.permute.xlu2 %3786 }
 0x24e   : > { %v4114_v24 = vsel %vm4106_vm11, %v4081_v4, %v3787_v18 }
 0x250   : > { %v3725_v60 = vpop.permute.xlu1 %3724 }
 0x253   : > { %v3871_v26 = vpop.permute.xlu0 %3870 }
 0x254   : > { %v4151_v36 = vsel %vm4139_vm12, %v4118_v38, %v3871_v26 }
 0x255   : > { %4945 = vmatmul.msk.bf16.gmra.mxu1 %vm4208_vm13, %v4151_v36  ;;  %v3867_v20 = vpop.permute.xlu2 %3866 }
 0x256   : > { %v4147_v44 = vsel %vm4139_vm12, %v4114_v24, %v3867_v20 }
 0x257   : > { %4943 = vmatmul.msk.bf16.gmra.mxu0 %vm4208_vm13, %v4147_v44 }
 0x258   : > { %v3617_v55 = vpop.permute.xlu1 %3616 }
 0x259   : > { %v4054_v49 = vsel %vm4040_vm8, %v7057_v33, %v3617_v55 }
 0x25b   : > { %v3629_v30 = vpop.permute.xlu0 %3628 }
 0x25c   : > { %v4066_v51 = vsel %vm4040_vm8, %v7142_v1, %v3629_v30 }
 0x25d   : > { %v4099_v19 = vsel %vm4073_vm10, %v4066_v51, %v3725_v60  ;;  %v3881_v9 = vpop.permute.xlu2 %3880 }
 0x25e   : > { %v4132_v59 = vsel %vm4106_vm11, %v4099_v19, %v3805_v40 }
 0x260   : > { %v3625_v13 = vpop.permute.xlu1 %3624 }
 0x261   : > { %v4062_v35 = vsel %vm4040_vm8, %v7043_v0, %v3625_v13 }
 0x263   : > { %v3885_v47 = vpop.permute.xlu0 %3884 }
 0x264   : > { %v4165_v31 = vsel %vm4139_vm12, %v4132_v59, %v3885_v47 }
 0x265   : > { %4952 = vmatmul.msk.bf16.vlgmr.msra.gmra.mxu3 %vm4208_vm13, %v4165_v31  ;;  %v3807_v37 = vpop.permute.xlu2 %3806 }
 0x268   : > { %v3721_v21 = vpop.permute.xlu1 %3720 }
 0x269   : > { %v4095_v22 = vsel %vm4073_vm10, %v4062_v35, %v3721_v21 }
 0x26b   : > { %v3713_v41 = vpop.permute.xlu0 %3712 }
 0x26c   : > { %v4087_v42 = vsel %vm4073_vm10, %v4054_v49, %v3713_v41 }
 0x26d   : > { %v3715_v7 = vpop.permute.xlu2 %3714 }
 0x270   : > { %v3801_v10 = vpop.permute.xlu1 %3800 }
 0x271   : > { %v4128_v1 = vsel %vm4106_vm11, %v4095_v22, %v3801_v10 }
 0x272   : > { %v4161_v3 = vsel %vm4139_vm12, %v4128_v1, %v3881_v9 }
 0x273   : > { %v3793_v61 = vpop.permute.xlu0 %3792  ;;  %4950 = vmatmul.msk.bf16.gmra.mxu2 %vm4208_vm13, %v4161_v3 }
 0x274   : > { %v4120_v39 = vsel %vm4106_vm11, %v4087_v42, %v3793_v61 }
 0x275   : > { %v3723_v5 = vpop.permute.xlu2 %3722 }
 0x278   : > { %v3727_v11 = vpop.permute.xlu1 %3726 }
 0x27b   : > { %v3873_v0 = vpop.permute.xlu0 %3872 }
 0x27c   : > { %v4153_v12 = vsel %vm4139_vm12, %v4120_v39, %v3873_v0 }
 0x27d   : > { %4946 = vmatmul.msk.bf16.gmra.mxu1 %vm4208_vm13, %v4153_v12  ;;  %v3883_v63 = vpop.permute.xlu2 %3882 }
 0x280   : > { %v3619_v23 = vpop.permute.xlu1 %3618 }
 0x281   : > { %v4056_v16 = vsel %vm4040_vm8, %v7003_v25, %v3619_v23 }
 0x282   : > { %v4089_v54 = vsel %vm4073_vm10, %v4056_v16, %v3715_v7 }
 0x283   : > { %v3631_v2 = vpop.permute.xlu0 %3630 }
 0x284   : > { %v4068_v45 = vsel %vm4040_vm8, %v7082_v43, %v3631_v2 }
 0x285   : > { %v4101_v27 = vsel %vm4073_vm10, %v4068_v45, %v3727_v11  ;;  %v3809_v20 = vpop.permute.xlu2 %3808 }
 0x286   : > { %v4134_v33 = vsel %vm4106_vm11, %v4101_v27, %v3807_v37 }
 0x288   : > { %v3795_v15 = vpop.permute.xlu1 %3794 }
 0x289   : > { %v4122_v48 = vsel %vm4106_vm11, %v4089_v54, %v3795_v15 }
 0x28b   : > { %v3887_v56 = vpop.permute.xlu0 %3886 }
 0x28c   : > { %v4167_v57 = vsel %vm4139_vm12, %v4134_v33, %v3887_v56 }
 0x28d   : > { %4953 = vmatmul.msk.bf16.gmra.mxu3 %vm4208_vm13, %v4167_v57  ;;  %v3731_v59 = vpop.permute.xlu2 %3730 }
 0x290   : > { %v3803_v53 = vpop.permute.xlu1 %3802 }
 0x293   : > { %v3627_v40 = vpop.permute.xlu0 %3626 }
 0x294   : > { %v4064_v32 = vsel %vm4040_vm8, %v6956_v6, %v3627_v40 }
 0x295   : > { %v4097_v50 = vsel %vm4073_vm10, %v4064_v32, %v3723_v5 }
 0x296   : > { %v4130_v43 = vsel %vm4106_vm11, %v4097_v50, %v3803_v53 }
 0x297   : > { %v4163_v28 = vsel %vm4139_vm12, %v4130_v43, %v3883_v63 }
 0x298   : > { %4951 = vmatmul.msk.bf16.gmra.mxu2 %vm4208_vm13, %v4163_v28  ;;  %v3729_v36 = vpop.permute.xlu1 %3728 }
 0x29a   : > { %v4254_v58 = vpop.f32.mrf.mxu0 }
 0x29b   : > { %v3875_v34 = vpop.permute.xlu0 %3874  ;;  %v4403_v29 = vmul.f32 %v4254_v58, %v4254_v58  ;;  %v4334_v8 = vsel %vm3892_vm2, %v4254_v58, 0.0 }
 0x29c   : > { %v4155_v6 = vsel %vm4139_vm12, %v4122_v48, %v3875_v34 }
 0x29d   : > { %4947 = vmatmul.msk.bf16.gmra.mxu1 %vm4208_vm13, %v4155_v6  ;;  %v4435_v17 = vsel %vm3892_vm2, %v4403_v29, 0.0 }
 0x2a0   : > { %v3635_v51 = vpop.permute.xlu1 %3634 }
 0x2a2   : > { %v4256_v46 = vpop.f32.mrf.mxu0 }
 0x2a3   : > { %v4335_v25 = vsel %vm3892_vm2, %v4256_v46, 0.0  ;;  %v4404_v18 = vmul.f32 %v4256_v46, %v4256_v46  ;;  %v3633_v60 = vpop.permute.xlu0 %3632 }
 0x2a4   : > { %v4336_v14 = vadd.f32 %v4335_v25, %v4334_v8  ;;  %v4070_v26 = vsel %vm4040_vm8, %v6993_v62, %v3633_v60  ;;  %v4072_v62 = vsel %vm4040_vm8, %v7173_v52, %v3635_v51 }
 0x2a5   : > { %v4436_v38 = vsel %vm3892_vm2, %v4404_v18, 0.0  ;;  %v4103_v24 = vsel %vm4073_vm10, %v4070_v26, %v3729_v36  ;;  %v4105_v21 = vsel %vm4073_vm10, %v4072_v62, %v3731_v59 }
 0x2a6   : > { %v4437_v4 = vadd.f32 %v4436_v38, %v4435_v17  ;;  %v4136_v55 = vsel %vm4106_vm11, %v4103_v24, %v3809_v20 }
 0x2a7   : > { %v7400_v42 = vpop.f32.mrf.mxu1 }
 0x2a8   : > { %v3891_v9 = vpop.permute.xlu1 %3890 }
 0x2ab   : > { %v3889_v44 = vpop.permute.xlu0 %3888 }
 0x2ac   : > { %v4169_v30 = vsel %vm4139_vm12, %v4136_v55, %v3889_v44  ;;  %v4411_v44 = vmul.f32 %v7400_v42, %v7400_v42 }
 0x2ad   : > { %4954 = vmatmul.msk.bf16.gmra.mxu3 %vm4208_vm13, %v4169_v30  ;;  %v4349_v30 = vsel %vm3892_vm2, %v7400_v42, 0.0 }
 0x2af   : > { %v7402_v0 = vpop.f32.mrf.mxu1 }
 0x2b0   : > { %v4351_v59 = vsel %vm3892_vm2, %v7402_v0, 0.0 }
 0x2b2   : > { %v4259_v19 = vpop.f32.mrf.mxu0 }
 0x2b3   : > { %v4337_v13 = vsel %vm3892_vm2, %v4259_v19, 0.0  ;;  %v3811_v31 = vpop.permute.xlu0 %3810  ;;  %v4405_v27 = vmul.f32 %v4259_v19, %v4259_v19 }
 0x2b4   : > { %v4338_v47 = vadd.f32 %v4337_v13, %v4336_v14  ;;  %v4138_v41 = vsel %vm4106_vm11, %v4105_v21, %v3811_v31  ;;  %v4412_v13 = vmul.f32 %v7402_v0, %v7402_v0 }
 0x2b5   : > { %v4171_v35 = vsel %vm4139_vm12, %v4138_v41, %v3891_v9  ;;  %v4438_v57 = vsel %vm3892_vm2, %v4405_v27, 0.0 }
 0x2b6   : > { %v4439_v43 = vadd.f32 %v4438_v57, %v4437_v4  ;;  %v4452_v21 = vsel %vm3892_vm2, %v4412_v13, 0.0 }
 0x2ba   : > { %v4261_v37 = vpop.f32.mrf.mxu0 }
 0x2bb   : > { %v4406_v15 = vmul.f32 %v4261_v37, %v4261_v37  ;;  %v4339_v40 = vsel %vm3892_vm2, %v4261_v37, 0.0 }
 0x2bc   : > { %v4340_v16 = vadd.f32 %v4339_v40, %v4338_v47 }
 0x2bd   : > { %4955 = vmatmul.msk.bf16.gmra.mxu3 %vm4208_vm13, %v4171_v35  ;;  %v4440_v50 = vsel %vm3892_vm2, %v4406_v15, 0.0 }
 0x2be   : > { %v4441_v34 = vadd.f32 %v4440_v50, %v4439_v43 }
 0x2c0   : > { %v7388_v22 = vpop.f32.mrf.mxu2 }
 0x2c1   : > { %v5046_v10 = vpack.i.bf16 %v7388_v22, %v4254_v58 }
 0x2c2   : > { %v4264_v39 = vpop.f32.mrf.mxu0 }
 0x2c3   : > { %5047 = vxpose.xlu2.b32.start [1/16] (narrow) %v5046_v10, 8  ;;  %v4407_v32 = vmul.f32 %v4264_v39, %v4264_v39  ;;  %v4341_v53 = vsel %vm3892_vm2, %v4264_v39, 0.0 }
 0x2c4   : > { %v4342_v6 = vadd.f32 %v4341_v53, %v4340_v16 }
 0x2c5   : > { %v4442_v54 = vsel %vm3892_vm2, %v4407_v32, 0.0 }
 0x2c6   : > { %v4443_v25 = vadd.f32 %v4442_v54, %v4441_v34 }
 0x2c8   : > { %v7391_v1 = vpop.f32.mrf.mxu2 }
 0x2c9   : > { %v5048_v52 = vpack.i.bf16 %v7391_v1, %v4256_v46 }
 0x2ca   : > { %v4266_v12 = vpop.f32.mrf.mxu0 }
 0x2cb   : > { %5049 = vxpose.xlu2.b32.cont [2/16] (narrow) %v5048_v52, 8  ;;  %v4408_v63 = vmul.f32 %v4266_v12, %v4266_v12  ;;  %v4343_v58 = vsel %vm3892_vm2, %v4266_v12, 0.0 }
 0x2cc   : > { %v4344_v18 = vadd.f32 %v4343_v58, %v4342_v6 }
 0x2cd   : > { %v4444_v29 = vsel %vm3892_vm2, %v4408_v63, 0.0 }
 0x2ce   : > { %v4445_v38 = vadd.f32 %v4444_v29, %v4443_v25  ;;  %v4419_v25 = vmul.f32 %v7388_v22, %v7388_v22 }
 0x2d0   : > { %v7394_v3 = vpop.f32.mrf.mxu2 }
 0x2d1   : > { %v5050_v61 = vpack.i.bf16 %v7394_v3, %v4259_v19  ;;  %v4450_v19 = vsel %vm3892_vm2, %v4411_v44, 0.0  ;;  %v4421_v13 = vmul.f32 %v7394_v3, %v7394_v3 }
 0x2d2   : > { %v7404_v23 = vpop.f32.mrf.mxu1 }
 0x2d3   : > { %5051 = vxpose.xlu2.b32.cont [3/16] (narrow) %v5050_v61, 8  ;;  %v4413_v41 = vmul.f32 %v7404_v23, %v7404_v23  ;;  %v4353_v10 = vsel %vm3892_vm2, %v7404_v23, 0.0 }
 0x2d4   : > { %v7409_v45 = vpop.f32.mrf.mxu0 }
 0x2d5   : > { %v4409_v48 = vmul.f32 %v7409_v45, %v7409_v45  ;;  %v4345_v46 = vsel %vm3892_vm2, %v7409_v45, 0.0  ;;  %v4454_v61 = vsel %vm3892_vm2, %v4413_v41, 0.0 }
 0x2d6   : > { %v4346_v26 = vadd.f32 %v4345_v46, %v4344_v18 }
 0x2d7   : > { %v4446_v14 = vsel %vm3892_vm2, %v4409_v48, 0.0 }
 0x2d8   : > { %v7397_v11 = vpop.f32.mrf.mxu2  ;;  %v4447_v36 = vadd.f32 %v4446_v14, %v4445_v38 }
 0x2d9   : > { %v5052_v49 = vpack.i.bf16 %v7397_v11, %v4261_v37 }
 0x2da   : > { %v7414_v5 = vpop.f32.mrf.mxu1 }
 0x2db   : > { %5053 = vxpose.xlu2.b32.cont [4/16] (narrow) %v5052_v49, 8  ;;  %v4414_v37 = vmul.f32 %v7414_v5, %v7414_v5 }
 0x2dc   : > { %v7420_v28 = vpop.f32.mrf.mxu0 }
 0x2dd   : > { %v4410_v8 = vmul.f32 %v7420_v28, %v7420_v28  ;;  %v4347_v17 = vsel %vm3892_vm2, %v7420_v28, 0.0  ;;  %v4456_v32 = vsel %vm3892_vm2, %v4414_v37, 0.0 }
 0x2de   : > { %v4348_v24 = vadd.f32 %v4347_v17, %v4346_v26 }
 0x2df   : > { %v4448_v4 = vsel %vm3892_vm2, %v4410_v8, 0.0 }
 0x2e0   : > { %v4449_v55 = vadd.f32 %v4448_v4, %v4447_v36  ;;  %v4350_v51 = vadd.f32 %v4349_v30, %v4348_v24  ;;  %v4365_v36 = vsel %vm3892_vm2, %v7388_v22, 0.0  ;;  %v4420_v24 = vmul.f32 %v7391_v1, %v7391_v1 }
 0x2e2   : > { %v4451_v47 = vadd.f32 %v4450_v19, %v4449_v55  ;;  %v4352_v31 = vadd.f32 %v4351_v59, %v4350_v51  ;;  %v4466_v51 = vsel %vm3892_vm2, %v4419_v25, 0.0  ;;  %v4367_v19 = vsel %vm3892_vm2, %v7391_v1, 0.0 }
 0x2e3   : > { %v4468_v59 = vsel %vm3892_vm2, %v4420_v24, 0.0  ;;  %v4371_v1 = vsel %vm3892_vm2, %v7397_v11, 0.0 }
 0x2e4   : > { %v4453_v9 = vadd.f32 %v4452_v21, %v4451_v47  ;;  %v4354_v52 = vadd.f32 %v4353_v10, %v4352_v31  ;;  %v4369_v31 = vsel %vm3892_vm2, %v7394_v3, 0.0  ;;  %v4422_v21 = vmul.f32 %v7397_v11, %v7397_v11 }
 0x2e5   : > { %v4470_v10 = vsel %vm3892_vm2, %v4421_v13, 0.0 }
 0x2e6   : > { %v4472_v3 = vsel %vm3892_vm2, %v4422_v21, 0.0 }
 0x2e8   : > { %v7437_v20 = vpop.f32.mrf.mxu3 }
 0x2f0   : > { %v7453_v35 = vpop.f32.mrf.mxu3 }
 0x2f6   : > { %v7406_v7 = vpop.f32.mrf.mxu2 }
 0x2f7   : > { %v5054_v2 = vpack.i.bf16 %v7406_v7, %v4264_v39  ;;  %v4455_v39 = vadd.f32 %v4454_v61, %v4453_v9  ;;  %v5062_v61 = vpack.i.bf16 %v7437_v20, %v7400_v42 }
 0x2f9   : > { %5055 = vxpose.xlu2.b32.cont [5/16] (narrow) %v5054_v2, 8  ;;  %v4355_v2 = vsel %vm3892_vm2, %v7414_v5, 0.0  ;;  %v4457_v16 = vadd.f32 %v4456_v32, %v4455_v39  ;;  %v4373_v39 = vsel %vm3892_vm2, %v7406_v7, 0.0 }
 0x2fa   : > { %v7431_v60 = vpop.f32.mrf.mxu1  ;;  %v4356_v57 = vadd.f32 %v4355_v2, %v4354_v52  ;;  %v4423_v52 = vmul.f32 %v7406_v7, %v7406_v7 }
 0x2fb   : > { %v4415_v49 = vmul.f32 %v7431_v60, %v7431_v60  ;;  %v4357_v27 = vsel %vm3892_vm2, %v7431_v60, 0.0 }
 0x2fc   : > { %v4358_v43 = vadd.f32 %v4357_v27, %v4356_v57  ;;  %v4474_v11 = vsel %vm3892_vm2, %v4423_v52, 0.0 }
 0x2fd   : > { %v4458_v50 = vsel %vm3892_vm2, %v4415_v49, 0.0 }
 0x2fe   : > { %v7411_v56 = vpop.f32.mrf.mxu2  ;;  %v4459_v48 = vadd.f32 %v4458_v50, %v4457_v16 }
 0x2ff   : > { %v5056_v33 = vpack.i.bf16 %v7411_v56, %v4266_v12  ;;  %v4424_v2 = vmul.f32 %v7411_v56, %v7411_v56  ;;  %v4375_v57 = vsel %vm3892_vm2, %v7411_v56, 0.0  ;;  %v5064_v56 = vpack.i.bf16 %v7453_v35, %v7402_v0 }
 0x301   : > { %5057 = vxpose.xlu2.b32.cont [6/16] (narrow) %v5056_v33, 8 }
 0x302   : > { %v7446_v62 = vpop.f32.mrf.mxu1 }
 0x303   : > { %v4416_v15 = vmul.f32 %v7446_v62, %v7446_v62  ;;  %v4359_v53 = vsel %vm3892_vm2, %v7446_v62, 0.0 }
 0x304   : > { %v4360_v34 = vadd.f32 %v4359_v53, %v4358_v43  ;;  %v4476_v53 = vsel %vm3892_vm2, %v4424_v2, 0.0 }
 0x305   : > { %v4460_v58 = vsel %vm3892_vm2, %v4416_v15, 0.0 }
 0x306   : > { %v4461_v29 = vadd.f32 %v4460_v58, %v4459_v48  ;;  %v4427_v58 = vmul.f32 %v7437_v20, %v7437_v20 }
 0x310   : > { %v7477_v54 = vpop.f32.mrf.mxu3 }
 0x311   : > { %v4429_v0 = vmul.f32 %v7477_v54, %v7477_v54 }
 0x31a   : > { %v7462_v12 = vpop.f32.mrf.mxu1 }
 0x31b   : > { %v4309_v33 = vpop.f32.mrf.mxu2  ;;  %v4417_v63 = vmul.f32 %v7462_v12, %v7462_v12 }
 0x31c   : > { %v5058_v40 = vpack.i.bf16 %v4309_v33, %v7409_v45  ;;  %v4361_v45 = vsel %vm3892_vm2, %v7462_v12, 0.0  ;;  %v4377_v7 = vsel %vm3892_vm2, %v4309_v33, 0.0 }
 0x31d   : > { %v4462_v6 = vsel %vm3892_vm2, %v4417_v63, 0.0  ;;  %v4362_v46 = vadd.f32 %v4361_v45, %v4360_v34 }
 0x31e   : > { %5059 = vxpose.xlu2.b32.cont [7/16] (narrow) %v5058_v40, 8  ;;  %v4463_v38 = vadd.f32 %v4462_v6, %v4461_v29  ;;  %v4425_v40 = vmul.f32 %v4309_v33, %v4309_v33  ;;  %v4381_v29 = vsel %vm3892_vm2, %v7437_v20, 0.0  ;;  %v4428_v33 = vmul.f32 %v7453_v35, %v7453_v35 }
 0x320   : > { %v4478_v45 = vsel %vm3892_vm2, %v4425_v40, 0.0  ;;  %v4484_v20 = vsel %vm3892_vm2, %v4428_v33, 0.0 }
 0x322   : > { %v7483_v8 = vpop.f32.mrf.mxu1 }
 0x323   : > { %v4363_v18 = vsel %vm3892_vm2, %v7483_v8, 0.0  ;;  %v4418_v14 = vmul.f32 %v7483_v8, %v7483_v8  ;;  %v4311_v17 = vpop.f32.mrf.mxu2 }
 0x324   : > { %v4364_v26 = vadd.f32 %v4363_v18, %v4362_v46  ;;  %v5060_v4 = vpack.i.bf16 %v4311_v17, %v7420_v28  ;;  %v7502_v28 = vpop.f32.mrf.mxu3  ;;  %v4426_v63 = vmul.f32 %v4311_v17, %v4311_v17  ;;  %v4379_v48 = vsel %vm3892_vm2, %v4311_v17, 0.0 }
 0x325   : > { %v4464_v44 = vsel %vm3892_vm2, %v4418_v14, 0.0  ;;  %v4482_v14 = vsel %vm3892_vm2, %v4427_v58, 0.0  ;;  %v4383_v17 = vsel %vm3892_vm2, %v7453_v35, 0.0  ;;  %v4430_v24 = vmul.f32 %v7502_v28, %v7502_v28 }
 0x326   : > { %v4366_v55 = vadd.f32 %v4365_v36, %v4364_v26  ;;  %v4465_v30 = vadd.f32 %v4464_v44, %v4463_v38  ;;  %5061 = vxpose.xlu2.b32.cont [8/16] (narrow) %v5060_v4, 8  ;;  %v4480_v46 = vsel %vm3892_vm2, %v4426_v63, 0.0  ;;  %v4385_v36 = vsel %vm3892_vm2, %v7477_v54, 0.0 }
 0x327   : > { %v4387_v35 = vsel %vm3892_vm2, %v7502_v28, 0.0  ;;  %v5068_v52 = vpack.i.bf16 %v7502_v28, %v7414_v5 }
 0x328   : > { %v4368_v47 = vadd.f32 %v4367_v19, %v4366_v55  ;;  %v4467_v22 = vadd.f32 %v4466_v51, %v4465_v30  ;;  %v4486_v30 = vsel %vm3892_vm2, %v4429_v0, 0.0  ;;  %v5066_v51 = vpack.i.bf16 %v7477_v54, %v7404_v23 }
 0x32a   : > { %v4370_v41 = vadd.f32 %v4369_v31, %v4368_v47  ;;  %v4469_v9 = vadd.f32 %v4468_v59, %v4467_v22  ;;  %v4488_v47 = vsel %vm3892_vm2, %v4430_v24, 0.0 }
 0x32c   : > { %v4471_v37 = vadd.f32 %v4470_v10, %v4469_v9  ;;  %v4372_v49 = vadd.f32 %v4371_v1, %v4370_v41 }
 0x32e   : > { %v4374_v27 = vadd.f32 %v4373_v39, %v4372_v49  ;;  %v4473_v15 = vadd.f32 %v4472_v3, %v4471_v37  ;;  %5063 = vxpose.xlu2.b32.cont [9/16] (narrow) %v5062_v61, 8 }
 0x330   : > { %v4376_v42 = vadd.f32 %v4375_v57, %v4374_v27  ;;  %v4475_v32 = vadd.f32 %v4474_v11, %v4473_v15  ;;  %v7524_v50 = vpop.f32.mrf.mxu3 }
 0x331   : > { %v4431_v22 = vmul.f32 %v7524_v50, %v7524_v50  ;;  %v4389_v31 = vsel %vm3892_vm2, %v7524_v50, 0.0  ;;  %v5070_v5 = vpack.i.bf16 %v7524_v50, %v7431_v60 }
 0x332   : > { %v4378_v43 = vadd.f32 %v4377_v7, %v4376_v42  ;;  %v4477_v16 = vadd.f32 %v4476_v53, %v4475_v32 }
 0x333   : > { %v4490_v9 = vsel %vm3892_vm2, %v4431_v22, 0.0 }
 0x334   : > { %v4479_v34 = vadd.f32 %v4478_v45, %v4477_v16  ;;  %v4380_v6 = vadd.f32 %v4379_v48, %v4378_v43 }
 0x336   : > { %v4382_v25 = vadd.f32 %v4381_v29, %v4380_v6  ;;  %v4481_v18 = vadd.f32 %v4480_v46, %v4479_v34  ;;  %5065 = vxpose.xlu2.b32.cont [10/16] (narrow) %v5064_v56, 8 }
 0x338   : > { %v4384_v38 = vadd.f32 %v4383_v17, %v4382_v25  ;;  %v4483_v26 = vadd.f32 %v4482_v14, %v4481_v18  ;;  %v4326_v4 = vpop.f32.mrf.mxu3 }
 0x339   : > { %v4432_v10 = vmul.f32 %v4326_v4, %v4326_v4  ;;  %v4391_v23 = vsel %vm3892_vm2, %v4326_v4, 0.0  ;;  %v5072_v45 = vpack.i.bf16 %v4326_v4, %v7446_v62 }
 0x33a   : > { %v4485_v44 = vadd.f32 %v4484_v20, %v4483_v26  ;;  %v4386_v55 = vadd.f32 %v4385_v36, %v4384_v38 }
 0x33b   : > { %v4492_v37 = vsel %vm3892_vm2, %v4432_v10, 0.0 }
 0x33c   : > { %v4388_v19 = vadd.f32 %v4387_v35, %v4386_v55  ;;  %v4487_v13 = vadd.f32 %v4486_v30, %v4485_v44 }
 0x33e   : > { %v4489_v59 = vadd.f32 %v4488_v47, %v4487_v13  ;;  %5067 = vxpose.xlu2.b32.cont [11/16] (narrow) %v5066_v51, 8  ;;  %v4390_v21 = vadd.f32 %v4389_v31, %v4388_v19 }
 0x340   : > { %v4329_v41 = vpop.f32.mrf.mxu3  ;;  %v4491_v1 = vadd.f32 %v4490_v9, %v4489_v59  ;;  %v4392_v61 = vadd.f32 %v4391_v23, %v4390_v21 }
 0x341   : > { %v4433_v54 = vmul.f32 %v4329_v41, %v4329_v41  ;;  %v4393_v49 = vsel %vm3892_vm2, %v4329_v41, 0.0  ;;  %v5074_v29 = vpack.i.bf16 %v4329_v41, %v7462_v12 }
 0x342   : > { %v4493_v3 = vadd.f32 %v4492_v37, %v4491_v1  ;;  %v4394_v2 = vadd.f32 %v4393_v49, %v4392_v61 }
 0x343   : > { %v4494_v39 = vsel %vm3892_vm2, %v4433_v54, 0.0 }
 0x344   : > { %v4495_v57 = vadd.f32 %v4494_v39, %v4493_v3 }
 0x346   : > { %5069 = vxpose.xlu2.b32.cont [12/16] (narrow) %v5068_v52, 8 }
 0x348   : > { %v4331_v27 = vpop.f32.mrf.mxu3 }
 0x349   : > { %v4395_v15 = vsel %vm3892_vm2, %v4331_v27, 0.0  ;;  %v4434_v11 = vmul.f32 %v4331_v27, %v4331_v27  ;;  %v5076_v62 = vpack.i.bf16 %v4331_v27, %v7483_v8 }
 0x34a   : > { %v4396_v40 = vadd.f32 %v4395_v15, %v4394_v2 }
 0x34b   : > { %v4496_v42 = vsel %vm3892_vm2, %v4434_v11, 0.0 }
 0x34c   : > { %v4397_v28 = vrot.slane %v4396_v40, 4  ;;  %v4497_v32 = vadd.f32 %v4496_v42, %v4495_v57 }
 0x34e   : > { %v4398_v53 = vadd.f32 %v4397_v28, %v4396_v40  ;;  %v4498_v7 = vrot.slane %v4497_v32, 4  ;;  %5071 = vxpose.xlu2.b32.cont [13/16] (narrow) %v5070_v5, 8 }
 0x350   : > { %v4399_v63 = vrot.slane %v4398_v53, 2  ;;  %v4499_v43 = vadd.f32 %v4498_v7, %v4497_v32 }
 0x352   : > { %v4400_v16 = vadd.f32 %v4399_v63, %v4398_v53  ;;  %v4500_v58 = vrot.slane %v4499_v43, 2 }
 0x354   : > { %v4401_v48 = vrot.slane %v4400_v16, 1  ;;  %v4501_v56 = vadd.f32 %v4500_v58, %v4499_v43 }
 0x356   : > { %v4502_v34 = vrot.slane %v4501_v56, 1  ;;  %5073 = vxpose.xlu2.b32.cont [14/16] (narrow) %v5072_v45, 8  ;;  %v4402_v60 = vadd.f32 %v4401_v48, %v4400_v16 }
 0x358   : > { %v4503_v50 = vadd.f32 %v4502_v34, %v4501_v56 }
 0x35a   : > { %v4505_v6 = vsel %vm4504_vm14, %v4402_v60, %v4503_v50 }
 0x35b   : > { %4507 = vst.msk [vmem:[%s228_s22] sm:$0x3] %vm4506_vm15, %v4505_v6 }
 0x35e   : > { %5075 = vxpose.xlu2.b32.cont [15/16] (narrow) %v5074_v29, 8 }
 0x366   : > { %5077 = vxpose.xlu2.b32.end [16/16] (narrow) %v5076_v62, 8 }
 0x387   : > { %v5078_v33 = vpop.trf.xlu2 }
 0x388   : > { %v5082_v46 = vunpack.i.h.bf16 %v5078_v33  ;;  %v5079_v25 = vunpack.i.l.bf16 %v5078_v33 }
 0x38a   : > { %v4572_v18 = vpack.c.bf16 %v5082_v46, %v5079_v25 }
 0x38c   : > { %4573 = vst [vmem:[%s224_s26] sm:$0xff] %v4572_v18 }
 0x38d PF: > { %s15_s15 = sadd.s32 1, %s5120_s15  }
 0x38e   : > { %p12_p4 = scmp.ge.s32.totalorder %s15_s15, 4  }
 0x390   :  { %14 = sbr.rel (!%p12_p4) target bundleno = 1 (0x1), region = 79 }

</bundles_post_ra>
